<compile_context>
chip_gen: v6e
topology: v6e:2x2x1
jax: 0.10.0
libtpu: 0.0.40
codegen_flags: <defaults>
</compile_context>

<pallas_src>
import jax
import jax.numpy as jnp
from jax.experimental import pallas as pl
from jax.experimental.pallas import tpu as pltpu

NEG_SLOPE = 0.01
BN_EPS = 1e-5

# autoencoder layer widths: 773 -> 600 -> 400 -> 200 -> 100 -> 200 -> 400 -> 600 -> 773
DIMS = [773, 600, 400, 200, 100, 200, 400, 600, 773]
PDIMS = [((d + 127) // 128) * 128 for d in DIMS]  # 896,640,512,256,128,256,512,640,896
N_LAYERS = len(DIMS) - 1
GB_OFFS = [sum(PDIMS[1:i + 1]) for i in range(N_LAYERS)]  # 128-aligned column offsets
GB_TOTAL = sum(PDIMS[1:])                                  # 3840


def _ae_kernel(x_ref, gb_ref, *rest):
    """Whole autoencoder in one kernel.

    rest = (w0_hbm..w7_hbm, out_ref, latent_ref, wbuf0..wbuf7, dma_sem)
    """
    w_hbm = rest[:N_LAYERS]
    out_ref = rest[N_LAYERS]
    latent_ref = rest[N_LAYERS + 1]
    wbufs = rest[N_LAYERS + 2: 2 * N_LAYERS + 2]
    sem = rest[2 * N_LAYERS + 2]

    # Queue every weight DMA (HBM -> dedicated VMEM buffer) up front; each
    # layer waits only for its own weight so compute overlaps later transfers.
    copies = []
    for i in range(N_LAYERS):
        cp = pltpu.make_async_copy(w_hbm[i], wbufs[i], sem.at[i])
        cp.start()
        copies.append(cp)

    gb = gb_ref[...]          # (2, GB_TOTAL) f32: row 0 = gamma, row 1 = beta
    h = x_ref[...]            # (B, 896) bf16
    for i in range(N_LAYERS):
        d_out = PDIMS[i + 1]
        off = GB_OFFS[i]
        copies[i].wait()
        # Linear (bias omitted: exactly cancelled by train-mode BN mean-subtract).
        z = jnp.dot(h, wbufs[i][...], preferred_element_type=jnp.float32)
        # BatchNorm1d (training mode, biased batch var) folded to scale/shift.
        mean = jnp.mean(z, axis=0, keepdims=True)
        var = jnp.mean(z * z, axis=0, keepdims=True) - mean * mean
        scale = gb[0:1, off:off + d_out] * jax.lax.rsqrt(var + BN_EPS)
        shift = gb[1:2, off:off + d_out] - mean * scale
        y = z * scale + shift
        # LeakyReLU(0.01) in f32.
        y = jnp.where(y >= 0.0, y, NEG_SLOPE * y)
        if i == 3:                      # end of encoder -> latent output
            latent_ref[...] = y
        if i == N_LAYERS - 1:
            out_ref[...] = y
        else:
            h = y.astype(jnp.bfloat16)  # bf16 activations between layers


def _fused_ae(xp, gb, weights):
    """Single grid-less pallas_call; weights stay in HBM and are DMA'd manually."""
    batch = xp.shape[0]

    in_specs = [
        pl.BlockSpec((batch, PDIMS[0]), lambda: (0, 0)),   # x (bf16)
        pl.BlockSpec((2, GB_TOTAL), lambda: (0, 0)),        # packed gamma/beta (f32)
    ] + [pl.BlockSpec(memory_space=pl.ANY) for _ in range(N_LAYERS)]  # weights in HBM

    out_shape = (
        jax.ShapeDtypeStruct((batch, PDIMS[-1]), jnp.float32),  # decoder output
        jax.ShapeDtypeStruct((batch, PDIMS[4]), jnp.float32),   # latent
    )
    out_specs = (
        pl.BlockSpec((batch, PDIMS[-1]), lambda: (0, 0)),
        pl.BlockSpec((batch, PDIMS[4]), lambda: (0, 0)),
    )

    scratch_shapes = (
        [pltpu.VMEM((PDIMS[i], PDIMS[i + 1]), jnp.bfloat16) for i in range(N_LAYERS)]
        + [pltpu.SemaphoreType.DMA((N_LAYERS,))]
    )

    return pl.pallas_call(
        _ae_kernel,
        out_shape=out_shape,
        in_specs=in_specs,
        out_specs=out_specs,
        scratch_shapes=scratch_shapes,
        compiler_params=pltpu.CompilerParams(vmem_limit_bytes=12 << 20),
    )(xp, gb, *weights)


def init_params(key):
    """PyTorch-default-style init at the TRUE layer dims (Linear: U(-k, k); BN: 1/0)."""
    params = []
    for i in range(N_LAYERS):
        d_in, d_out = DIMS[i], DIMS[i + 1]
        key, kw, kb = jax.random.split(key, 3)
        bound = 1.0 / jnp.sqrt(float(d_in))
        w = jax.random.uniform(kw, (d_in, d_out), jnp.float32, -bound, bound)
        b = jax.random.uniform(kb, (1, d_out), jnp.float32, -bound, bound)
        gamma = jnp.ones((1, d_out), jnp.float32)
        beta = jnp.zeros((1, d_out), jnp.float32)
        params.append((w, b, gamma, beta))
    return params


def pack_params(params):
    """Zero-pad every dim to a multiple of 128, cast weights to bf16, drop the
    Linear bias (exactly cancelled by training-mode BatchNorm), and coalesce
    all gamma/beta rows into one (2, GB_TOTAL) f32 array (single DMA).

    Weight pad rows/cols are 0 so padded feature columns stay exactly zero
    through the whole network (scale_pad is finite, shift_pad = 0).
    """
    weights = []
    gb = jnp.zeros((2, GB_TOTAL), jnp.float32)
    gb = gb.at[0, :].set(1.0)  # gamma pad = 1 (padded columns stay 0 regardless)
    for i, (w, _b, g, bt) in enumerate(params):
        d_in, d_out = DIMS[i], DIMS[i + 1]
        p_in, p_out = PDIMS[i], PDIMS[i + 1]
        wp = jnp.zeros((p_in, p_out), jnp.bfloat16)
        wp = wp.at[:d_in, :d_out].set(w.astype(jnp.bfloat16))
        weights.append(wp)
        off = GB_OFFS[i]
        gb = gb.at[0, off:off + d_out].set(g[0])
        gb = gb.at[1, off:off + d_out].set(bt[0])
    return weights, gb


@jax.jit
def ae_forward(x, weights, gb):
    # x.view(-1, 773), padded to 896 lanes and cast to bf16 (halves input DMA).
    x = x.reshape(-1, 773).astype(jnp.bfloat16)
    batch = x.shape[0]
    xp = jnp.zeros((batch, PDIMS[0]), jnp.bfloat16).at[:, :773].set(x)

    out_p, latent_p = _fused_ae(xp, gb, weights)

    # Slice the padding off outside the kernel.
    return out_p[:, :773], latent_p[:, :100]


if __name__ == "__main__":
    key = jax.random.PRNGKey(0)
    kx, kp = jax.random.split(key)
    batch = 8
    x = jax.random.normal(kx, (batch, 773), jnp.float32)
    params = init_params(kp)
    weights, gb = pack_params(params)

    out, latent = ae_forward(x, weights, gb)
    jax.block_until_ready((out, latent))

    assert out.shape == (batch, 773), out.shape
    assert latent.shape == (batch, 100), latent.shape
    assert bool(jnp.all(jnp.isfinite(out))) and bool(jnp.all(jnp.isfinite(latent)))
    print("KERNEL_OK")
</pallas_src>

<mosaic_0001>
module attributes {stable_mosaic.version = 11 : i64} {
  func.func @_ae_kernel(%arg0: memref<8x896xbf16, #tpu.memory_space<vmem>>, %arg1: memref<2x3840xf32, #tpu.memory_space<vmem>>, %arg2: memref<896x640xbf16, #tpu.memory_space<any>>, %arg3: memref<640x512xbf16, #tpu.memory_space<any>>, %arg4: memref<512x256xbf16, #tpu.memory_space<any>>, %arg5: memref<256x128xbf16, #tpu.memory_space<any>>, %arg6: memref<128x256xbf16, #tpu.memory_space<any>>, %arg7: memref<256x512xbf16, #tpu.memory_space<any>>, %arg8: memref<512x640xbf16, #tpu.memory_space<any>>, %arg9: memref<640x896xbf16, #tpu.memory_space<any>>, %arg10: memref<8x896xf32, #tpu.memory_space<vmem>>, %arg11: memref<8x128xf32, #tpu.memory_space<vmem>>, %arg12: memref<896x640xbf16, #tpu.memory_space<vmem>>, %arg13: memref<640x512xbf16, #tpu.memory_space<vmem>>, %arg14: memref<512x256xbf16, #tpu.memory_space<vmem>>, %arg15: memref<256x128xbf16, #tpu.memory_space<vmem>>, %arg16: memref<128x256xbf16, #tpu.memory_space<vmem>>, %arg17: memref<256x512xbf16, #tpu.memory_space<vmem>>, %arg18: memref<512x640xbf16, #tpu.memory_space<vmem>>, %arg19: memref<640x896xbf16, #tpu.memory_space<vmem>>, %arg20: memref<8x!tpu.dma_semaphore, #tpu.memory_space<semaphore_mem>>) attributes {dimension_semantics = [], scalar_prefetch = 0 : i64, scratch_operands = 9 : i64, tpu.core_type = #tpu.core_type<tc>} {
    %c0_i32 = arith.constant 0 : i32
    %0 = tpu.memref_slice %arg20[%c0_i32] : memref<8x!tpu.dma_semaphore, #tpu.memory_space<semaphore_mem>> -> memref<1x!tpu.dma_semaphore, #tpu.memory_space<semaphore_mem>>
    %1 = tpu.memref_squeeze %0 : memref<1x!tpu.dma_semaphore, #tpu.memory_space<semaphore_mem>> -> memref<!tpu.dma_semaphore, #tpu.memory_space<semaphore_mem>>
    tpu.enqueue_dma source(%arg2 : memref<896x640xbf16, #tpu.memory_space<any>>) target(%arg12 : memref<896x640xbf16, #tpu.memory_space<vmem>>) target_semaphore(%1 : memref<!tpu.dma_semaphore, #tpu.memory_space<semaphore_mem>>)
    %c1_i32 = arith.constant 1 : i32
    %2 = tpu.memref_slice %arg20[%c1_i32] : memref<8x!tpu.dma_semaphore, #tpu.memory_space<semaphore_mem>> -> memref<1x!tpu.dma_semaphore, #tpu.memory_space<semaphore_mem>>
    %3 = tpu.memref_squeeze %2 : memref<1x!tpu.dma_semaphore, #tpu.memory_space<semaphore_mem>> -> memref<!tpu.dma_semaphore, #tpu.memory_space<semaphore_mem>>
    tpu.enqueue_dma source(%arg3 : memref<640x512xbf16, #tpu.memory_space<any>>) target(%arg13 : memref<640x512xbf16, #tpu.memory_space<vmem>>) target_semaphore(%3 : memref<!tpu.dma_semaphore, #tpu.memory_space<semaphore_mem>>)
    %c2_i32 = arith.constant 2 : i32
    %4 = tpu.memref_slice %arg20[%c2_i32] : memref<8x!tpu.dma_semaphore, #tpu.memory_space<semaphore_mem>> -> memref<1x!tpu.dma_semaphore, #tpu.memory_space<semaphore_mem>>
    %5 = tpu.memref_squeeze %4 : memref<1x!tpu.dma_semaphore, #tpu.memory_space<semaphore_mem>> -> memref<!tpu.dma_semaphore, #tpu.memory_space<semaphore_mem>>
    tpu.enqueue_dma source(%arg4 : memref<512x256xbf16, #tpu.memory_space<any>>) target(%arg14 : memref<512x256xbf16, #tpu.memory_space<vmem>>) target_semaphore(%5 : memref<!tpu.dma_semaphore, #tpu.memory_space<semaphore_mem>>)
    %c3_i32 = arith.constant 3 : i32
    %6 = tpu.memref_slice %arg20[%c3_i32] : memref<8x!tpu.dma_semaphore, #tpu.memory_space<semaphore_mem>> -> memref<1x!tpu.dma_semaphore, #tpu.memory_space<semaphore_mem>>
    %7 = tpu.memref_squeeze %6 : memref<1x!tpu.dma_semaphore, #tpu.memory_space<semaphore_mem>> -> memref<!tpu.dma_semaphore, #tpu.memory_space<semaphore_mem>>
    tpu.enqueue_dma source(%arg5 : memref<256x128xbf16, #tpu.memory_space<any>>) target(%arg15 : memref<256x128xbf16, #tpu.memory_space<vmem>>) target_semaphore(%7 : memref<!tpu.dma_semaphore, #tpu.memory_space<semaphore_mem>>)
    %c4_i32 = arith.constant 4 : i32
    %8 = tpu.memref_slice %arg20[%c4_i32] : memref<8x!tpu.dma_semaphore, #tpu.memory_space<semaphore_mem>> -> memref<1x!tpu.dma_semaphore, #tpu.memory_space<semaphore_mem>>
    %9 = tpu.memref_squeeze %8 : memref<1x!tpu.dma_semaphore, #tpu.memory_space<semaphore_mem>> -> memref<!tpu.dma_semaphore, #tpu.memory_space<semaphore_mem>>
    tpu.enqueue_dma source(%arg6 : memref<128x256xbf16, #tpu.memory_space<any>>) target(%arg16 : memref<128x256xbf16, #tpu.memory_space<vmem>>) target_semaphore(%9 : memref<!tpu.dma_semaphore, #tpu.memory_space<semaphore_mem>>)
    %c5_i32 = arith.constant 5 : i32
    %10 = tpu.memref_slice %arg20[%c5_i32] : memref<8x!tpu.dma_semaphore, #tpu.memory_space<semaphore_mem>> -> memref<1x!tpu.dma_semaphore, #tpu.memory_space<semaphore_mem>>
    %11 = tpu.memref_squeeze %10 : memref<1x!tpu.dma_semaphore, #tpu.memory_space<semaphore_mem>> -> memref<!tpu.dma_semaphore, #tpu.memory_space<semaphore_mem>>
    tpu.enqueue_dma source(%arg7 : memref<256x512xbf16, #tpu.memory_space<any>>) target(%arg17 : memref<256x512xbf16, #tpu.memory_space<vmem>>) target_semaphore(%11 : memref<!tpu.dma_semaphore, #tpu.memory_space<semaphore_mem>>)
    %c6_i32 = arith.constant 6 : i32
    %12 = tpu.memref_slice %arg20[%c6_i32] : memref<8x!tpu.dma_semaphore, #tpu.memory_space<semaphore_mem>> -> memref<1x!tpu.dma_semaphore, #tpu.memory_space<semaphore_mem>>
    %13 = tpu.memref_squeeze %12 : memref<1x!tpu.dma_semaphore, #tpu.memory_space<semaphore_mem>> -> memref<!tpu.dma_semaphore, #tpu.memory_space<semaphore_mem>>
    tpu.enqueue_dma source(%arg8 : memref<512x640xbf16, #tpu.memory_space<any>>) target(%arg18 : memref<512x640xbf16, #tpu.memory_space<vmem>>) target_semaphore(%13 : memref<!tpu.dma_semaphore, #tpu.memory_space<semaphore_mem>>)
    %c7_i32 = arith.constant 7 : i32
    %14 = tpu.memref_slice %arg20[%c7_i32] : memref<8x!tpu.dma_semaphore, #tpu.memory_space<semaphore_mem>> -> memref<1x!tpu.dma_semaphore, #tpu.memory_space<semaphore_mem>>
    %15 = tpu.memref_squeeze %14 : memref<1x!tpu.dma_semaphore, #tpu.memory_space<semaphore_mem>> -> memref<!tpu.dma_semaphore, #tpu.memory_space<semaphore_mem>>
    tpu.enqueue_dma source(%arg9 : memref<640x896xbf16, #tpu.memory_space<any>>) target(%arg19 : memref<640x896xbf16, #tpu.memory_space<vmem>>) target_semaphore(%15 : memref<!tpu.dma_semaphore, #tpu.memory_space<semaphore_mem>>)
    %c0 = arith.constant 0 : index
    %c0_0 = arith.constant 0 : index
    %16 = vector.load %arg1[%c0, %c0_0] : memref<2x3840xf32, #tpu.memory_space<vmem>>, vector<2x3840xf32>
    %c0_1 = arith.constant 0 : index
    %c0_2 = arith.constant 0 : index
    %17 = vector.load %arg0[%c0_1, %c0_2] : memref<8x896xbf16, #tpu.memory_space<vmem>>, vector<8x896xbf16>
    %c0_i32_3 = arith.constant 0 : i32
    %18 = tpu.memref_slice %arg20[%c0_i32_3] : memref<8x!tpu.dma_semaphore, #tpu.memory_space<semaphore_mem>> -> memref<1x!tpu.dma_semaphore, #tpu.memory_space<semaphore_mem>>
    %19 = tpu.memref_squeeze %18 : memref<1x!tpu.dma_semaphore, #tpu.memory_space<semaphore_mem>> -> memref<!tpu.dma_semaphore, #tpu.memory_space<semaphore_mem>>
    tpu.wait_dma2 semaphore(%19 : memref<!tpu.dma_semaphore, #tpu.memory_space<semaphore_mem>>) src(%arg2 : memref<896x640xbf16, #tpu.memory_space<any>>) dst(%arg12 : memref<896x640xbf16, #tpu.memory_space<vmem>>)
    %c0_4 = arith.constant 0 : index
    %c0_5 = arith.constant 0 : index
    %20 = vector.load %arg12[%c0_4, %c0_5] : memref<896x640xbf16, #tpu.memory_space<vmem>>, vector<896x640xbf16>
    %cst = arith.constant dense<0.000000e+00> : vector<8x640xf32>
    %21 = tpu.matmul %17, %20, %cst {dimension_numbers = #tpu.dot_dimension_numbers<[1], [0], [0], [1], [0, 0, 1, 1], [], []>} : vector<8x896xbf16>, vector<896x640xbf16>, vector<8x640xf32> -> vector<8x640xf32>
    %cst_6 = arith.constant dense<0.000000e+00> : vector<640xf32>
    %22 = vector.multi_reduction <add>, %21, %cst_6 [0] : vector<8x640xf32> to vector<640xf32>
    %23 = vector.shape_cast %22 : vector<640xf32> to vector<1x640xf32>
    %cst_7 = arith.constant 8.000000e+00 : f32
    %24 = vector.broadcast %cst_7 : f32 to vector<1x640xf32>
    %25 = arith.divf %23, %24 : vector<1x640xf32>
    %26 = arith.mulf %21, %21 : vector<8x640xf32>
    %cst_8 = arith.constant dense<0.000000e+00> : vector<640xf32>
    %27 = vector.multi_reduction <add>, %26, %cst_8 [0] : vector<8x640xf32> to vector<640xf32>
    %28 = vector.shape_cast %27 : vector<640xf32> to vector<1x640xf32>
    %cst_9 = arith.constant 8.000000e+00 : f32
    %29 = vector.broadcast %cst_9 : f32 to vector<1x640xf32>
    %30 = arith.divf %28, %29 : vector<1x640xf32>
    %31 = arith.mulf %25, %25 : vector<1x640xf32>
    %32 = arith.subf %30, %31 : vector<1x640xf32>
    %33 = vector.extract_strided_slice %16 {offsets = [0, 0], sizes = [1, 640], strides = [1, 1]} : vector<2x3840xf32> to vector<1x640xf32>
    %cst_10 = arith.constant 9.99999974E-6 : f32
    %34 = vector.broadcast %cst_10 : f32 to vector<1x640xf32>
    %35 = arith.addf %32, %34 : vector<1x640xf32>
    %36 = math.rsqrt %35 : vector<1x640xf32>
    %37 = arith.mulf %33, %36 : vector<1x640xf32>
    %38 = vector.extract_strided_slice %16 {offsets = [1, 0], sizes = [1, 640], strides = [1, 1]} : vector<2x3840xf32> to vector<1x640xf32>
    %39 = arith.mulf %25, %37 : vector<1x640xf32>
    %40 = arith.subf %38, %39 : vector<1x640xf32>
    %41 = vector.broadcast %37 : vector<1x640xf32> to vector<8x640xf32>
    %42 = arith.mulf %21, %41 : vector<8x640xf32>
    %43 = vector.broadcast %40 : vector<1x640xf32> to vector<8x640xf32>
    %44 = arith.addf %42, %43 : vector<8x640xf32>
    %cst_11 = arith.constant 0.000000e+00 : f32
    %45 = vector.broadcast %cst_11 : f32 to vector<8x640xf32>
    %46 = arith.cmpf oge, %44, %45 : vector<8x640xf32>
    %cst_12 = arith.constant 0.00999999977 : f32
    %47 = vector.broadcast %cst_12 : f32 to vector<8x640xf32>
    %48 = arith.mulf %47, %44 : vector<8x640xf32>
    %49 = arith.select %46, %44, %48 : vector<8x640xi1>, vector<8x640xf32>
    %50 = arith.truncf %49 : vector<8x640xf32> to vector<8x640xbf16>
    %c1_i32_13 = arith.constant 1 : i32
    %51 = tpu.memref_slice %arg20[%c1_i32_13] : memref<8x!tpu.dma_semaphore, #tpu.memory_space<semaphore_mem>> -> memref<1x!tpu.dma_semaphore, #tpu.memory_space<semaphore_mem>>
    %52 = tpu.memref_squeeze %51 : memref<1x!tpu.dma_semaphore, #tpu.memory_space<semaphore_mem>> -> memref<!tpu.dma_semaphore, #tpu.memory_space<semaphore_mem>>
    tpu.wait_dma2 semaphore(%52 : memref<!tpu.dma_semaphore, #tpu.memory_space<semaphore_mem>>) src(%arg3 : memref<640x512xbf16, #tpu.memory_space<any>>) dst(%arg13 : memref<640x512xbf16, #tpu.memory_space<vmem>>)
    %c0_14 = arith.constant 0 : index
    %c0_15 = arith.constant 0 : index
    %53 = vector.load %arg13[%c0_14, %c0_15] : memref<640x512xbf16, #tpu.memory_space<vmem>>, vector<640x512xbf16>
    %cst_16 = arith.constant dense<0.000000e+00> : vector<8x512xf32>
    %54 = tpu.matmul %50, %53, %cst_16 {dimension_numbers = #tpu.dot_dimension_numbers<[1], [0], [0], [1], [0, 0, 1, 1], [], []>} : vector<8x640xbf16>, vector<640x512xbf16>, vector<8x512xf32> -> vector<8x512xf32>
    %cst_17 = arith.constant dense<0.000000e+00> : vector<512xf32>
    %55 = vector.multi_reduction <add>, %54, %cst_17 [0] : vector<8x512xf32> to vector<512xf32>
    %56 = vector.shape_cast %55 : vector<512xf32> to vector<1x512xf32>
    %cst_18 = arith.constant 8.000000e+00 : f32
    %57 = vector.broadcast %cst_18 : f32 to vector<1x512xf32>
    %58 = arith.divf %56, %57 : vector<1x512xf32>
    %59 = arith.mulf %54, %54 : vector<8x512xf32>
    %cst_19 = arith.constant dense<0.000000e+00> : vector<512xf32>
    %60 = vector.multi_reduction <add>, %59, %cst_19 [0] : vector<8x512xf32> to vector<512xf32>
    %61 = vector.shape_cast %60 : vector<512xf32> to vector<1x512xf32>
    %cst_20 = arith.constant 8.000000e+00 : f32
    %62 = vector.broadcast %cst_20 : f32 to vector<1x512xf32>
    %63 = arith.divf %61, %62 : vector<1x512xf32>
    %64 = arith.mulf %58, %58 : vector<1x512xf32>
    %65 = arith.subf %63, %64 : vector<1x512xf32>
    %66 = vector.extract_strided_slice %16 {offsets = [0, 640], sizes = [1, 512], strides = [1, 1]} : vector<2x3840xf32> to vector<1x512xf32>
    %cst_21 = arith.constant 9.99999974E-6 : f32
    %67 = vector.broadcast %cst_21 : f32 to vector<1x512xf32>
    %68 = arith.addf %65, %67 : vector<1x512xf32>
    %69 = math.rsqrt %68 : vector<1x512xf32>
    %70 = arith.mulf %66, %69 : vector<1x512xf32>
    %71 = vector.extract_strided_slice %16 {offsets = [1, 640], sizes = [1, 512], strides = [1, 1]} : vector<2x3840xf32> to vector<1x512xf32>
    %72 = arith.mulf %58, %70 : vector<1x512xf32>
    %73 = arith.subf %71, %72 : vector<1x512xf32>
    %74 = vector.broadcast %70 : vector<1x512xf32> to vector<8x512xf32>
    %75 = arith.mulf %54, %74 : vector<8x512xf32>
    %76 = vector.broadcast %73 : vector<1x512xf32> to vector<8x512xf32>
    %77 = arith.addf %75, %76 : vector<8x512xf32>
    %cst_22 = arith.constant 0.000000e+00 : f32
    %78 = vector.broadcast %cst_22 : f32 to vector<8x512xf32>
    %79 = arith.cmpf oge, %77, %78 : vector<8x512xf32>
    %cst_23 = arith.constant 0.00999999977 : f32
    %80 = vector.broadcast %cst_23 : f32 to vector<8x512xf32>
    %81 = arith.mulf %80, %77 : vector<8x512xf32>
    %82 = arith.select %79, %77, %81 : vector<8x512xi1>, vector<8x512xf32>
    %83 = arith.truncf %82 : vector<8x512xf32> to vector<8x512xbf16>
    %c2_i32_24 = arith.constant 2 : i32
    %84 = tpu.memref_slice %arg20[%c2_i32_24] : memref<8x!tpu.dma_semaphore, #tpu.memory_space<semaphore_mem>> -> memref<1x!tpu.dma_semaphore, #tpu.memory_space<semaphore_mem>>
    %85 = tpu.memref_squeeze %84 : memref<1x!tpu.dma_semaphore, #tpu.memory_space<semaphore_mem>> -> memref<!tpu.dma_semaphore, #tpu.memory_space<semaphore_mem>>
    tpu.wait_dma2 semaphore(%85 : memref<!tpu.dma_semaphore, #tpu.memory_space<semaphore_mem>>) src(%arg4 : memref<512x256xbf16, #tpu.memory_space<any>>) dst(%arg14 : memref<512x256xbf16, #tpu.memory_space<vmem>>)
    %c0_25 = arith.constant 0 : index
    %c0_26 = arith.constant 0 : index
    %86 = vector.load %arg14[%c0_25, %c0_26] : memref<512x256xbf16, #tpu.memory_space<vmem>>, vector<512x256xbf16>
    %cst_27 = arith.constant dense<0.000000e+00> : vector<8x256xf32>
    %87 = tpu.matmul %83, %86, %cst_27 {dimension_numbers = #tpu.dot_dimension_numbers<[1], [0], [0], [1], [0, 0, 1, 1], [], []>} : vector<8x512xbf16>, vector<512x256xbf16>, vector<8x256xf32> -> vector<8x256xf32>
    %cst_28 = arith.constant dense<0.000000e+00> : vector<256xf32>
    %88 = vector.multi_reduction <add>, %87, %cst_28 [0] : vector<8x256xf32> to vector<256xf32>
    %89 = vector.shape_cast %88 : vector<256xf32> to vector<1x256xf32>
    %cst_29 = arith.constant 8.000000e+00 : f32
    %90 = vector.broadcast %cst_29 : f32 to vector<1x256xf32>
    %91 = arith.divf %89, %90 : vector<1x256xf32>
    %92 = arith.mulf %87, %87 : vector<8x256xf32>
    %cst_30 = arith.constant dense<0.000000e+00> : vector<256xf32>
    %93 = vector.multi_reduction <add>, %92, %cst_30 [0] : vector<8x256xf32> to vector<256xf32>
    %94 = vector.shape_cast %93 : vector<256xf32> to vector<1x256xf32>
    %cst_31 = arith.constant 8.000000e+00 : f32
    %95 = vector.broadcast %cst_31 : f32 to vector<1x256xf32>
    %96 = arith.divf %94, %95 : vector<1x256xf32>
    %97 = arith.mulf %91, %91 : vector<1x256xf32>
    %98 = arith.subf %96, %97 : vector<1x256xf32>
    %99 = vector.extract_strided_slice %16 {offsets = [0, 1152], sizes = [1, 256], strides = [1, 1]} : vector<2x3840xf32> to vector<1x256xf32>
    %cst_32 = arith.constant 9.99999974E-6 : f32
    %100 = vector.broadcast %cst_32 : f32 to vector<1x256xf32>
    %101 = arith.addf %98, %100 : vector<1x256xf32>
    %102 = math.rsqrt %101 : vector<1x256xf32>
    %103 = arith.mulf %99, %102 : vector<1x256xf32>
    %104 = vector.extract_strided_slice %16 {offsets = [1, 1152], sizes = [1, 256], strides = [1, 1]} : vector<2x3840xf32> to vector<1x256xf32>
    %105 = arith.mulf %91, %103 : vector<1x256xf32>
    %106 = arith.subf %104, %105 : vector<1x256xf32>
    %107 = vector.broadcast %103 : vector<1x256xf32> to vector<8x256xf32>
    %108 = arith.mulf %87, %107 : vector<8x256xf32>
    %109 = vector.broadcast %106 : vector<1x256xf32> to vector<8x256xf32>
    %110 = arith.addf %108, %109 : vector<8x256xf32>
    %cst_33 = arith.constant 0.000000e+00 : f32
    %111 = vector.broadcast %cst_33 : f32 to vector<8x256xf32>
    %112 = arith.cmpf oge, %110, %111 : vector<8x256xf32>
    %cst_34 = arith.constant 0.00999999977 : f32
    %113 = vector.broadcast %cst_34 : f32 to vector<8x256xf32>
    %114 = arith.mulf %113, %110 : vector<8x256xf32>
    %115 = arith.select %112, %110, %114 : vector<8x256xi1>, vector<8x256xf32>
    %116 = arith.truncf %115 : vector<8x256xf32> to vector<8x256xbf16>
    %c3_i32_35 = arith.constant 3 : i32
    %117 = tpu.memref_slice %arg20[%c3_i32_35] : memref<8x!tpu.dma_semaphore, #tpu.memory_space<semaphore_mem>> -> memref<1x!tpu.dma_semaphore, #tpu.memory_space<semaphore_mem>>
    %118 = tpu.memref_squeeze %117 : memref<1x!tpu.dma_semaphore, #tpu.memory_space<semaphore_mem>> -> memref<!tpu.dma_semaphore, #tpu.memory_space<semaphore_mem>>
    tpu.wait_dma2 semaphore(%118 : memref<!tpu.dma_semaphore, #tpu.memory_space<semaphore_mem>>) src(%arg5 : memref<256x128xbf16, #tpu.memory_space<any>>) dst(%arg15 : memref<256x128xbf16, #tpu.memory_space<vmem>>)
    %c0_36 = arith.constant 0 : index
    %c0_37 = arith.constant 0 : index
    %119 = vector.load %arg15[%c0_36, %c0_37] : memref<256x128xbf16, #tpu.memory_space<vmem>>, vector<256x128xbf16>
    %cst_38 = arith.constant dense<0.000000e+00> : vector<8x128xf32>
    %120 = tpu.matmul %116, %119, %cst_38 {dimension_numbers = #tpu.dot_dimension_numbers<[1], [0], [0], [1], [0, 0, 1, 1], [], []>} : vector<8x256xbf16>, vector<256x128xbf16>, vector<8x128xf32> -> vector<8x128xf32>
    %cst_39 = arith.constant dense<0.000000e+00> : vector<128xf32>
    %121 = vector.multi_reduction <add>, %120, %cst_39 [0] : vector<8x128xf32> to vector<128xf32>
    %122 = vector.shape_cast %121 : vector<128xf32> to vector<1x128xf32>
    %cst_40 = arith.constant 8.000000e+00 : f32
    %123 = vector.broadcast %cst_40 : f32 to vector<1x128xf32>
    %124 = arith.divf %122, %123 : vector<1x128xf32>
    %125 = arith.mulf %120, %120 : vector<8x128xf32>
    %cst_41 = arith.constant dense<0.000000e+00> : vector<128xf32>
    %126 = vector.multi_reduction <add>, %125, %cst_41 [0] : vector<8x128xf32> to vector<128xf32>
    %127 = vector.shape_cast %126 : vector<128xf32> to vector<1x128xf32>
    %cst_42 = arith.constant 8.000000e+00 : f32
    %128 = vector.broadcast %cst_42 : f32 to vector<1x128xf32>
    %129 = arith.divf %127, %128 : vector<1x128xf32>
    %130 = arith.mulf %124, %124 : vector<1x128xf32>
    %131 = arith.subf %129, %130 : vector<1x128xf32>
    %132 = vector.extract_strided_slice %16 {offsets = [0, 1408], sizes = [1, 128], strides = [1, 1]} : vector<2x3840xf32> to vector<1x128xf32>
    %cst_43 = arith.constant 9.99999974E-6 : f32
    %133 = vector.broadcast %cst_43 : f32 to vector<1x128xf32>
    %134 = arith.addf %131, %133 : vector<1x128xf32>
    %135 = math.rsqrt %134 : vector<1x128xf32>
    %136 = arith.mulf %132, %135 : vector<1x128xf32>
    %137 = vector.extract_strided_slice %16 {offsets = [1, 1408], sizes = [1, 128], strides = [1, 1]} : vector<2x3840xf32> to vector<1x128xf32>
    %138 = arith.mulf %124, %136 : vector<1x128xf32>
    %139 = arith.subf %137, %138 : vector<1x128xf32>
    %140 = vector.broadcast %136 : vector<1x128xf32> to vector<8x128xf32>
    %141 = arith.mulf %120, %140 : vector<8x128xf32>
    %142 = vector.broadcast %139 : vector<1x128xf32> to vector<8x128xf32>
    %143 = arith.addf %141, %142 : vector<8x128xf32>
    %cst_44 = arith.constant 0.000000e+00 : f32
    %144 = vector.broadcast %cst_44 : f32 to vector<8x128xf32>
    %145 = arith.cmpf oge, %143, %144 : vector<8x128xf32>
    %cst_45 = arith.constant 0.00999999977 : f32
    %146 = vector.broadcast %cst_45 : f32 to vector<8x128xf32>
    %147 = arith.mulf %146, %143 : vector<8x128xf32>
    %148 = arith.select %145, %143, %147 : vector<8x128xi1>, vector<8x128xf32>
    %c0_46 = arith.constant 0 : index
    %c0_47 = arith.constant 0 : index
    %149 = vector.load %arg11[%c0_46, %c0_47] : memref<8x128xf32, #tpu.memory_space<vmem>>, vector<8x128xf32>
    tpu.vector_store %arg11[%c0_46, %c0_47], %148 {strides = array<i32>} : memref<8x128xf32, #tpu.memory_space<vmem>>, vector<8x128xf32>,
    %150 = arith.truncf %148 : vector<8x128xf32> to vector<8x128xbf16>
    %c4_i32_48 = arith.constant 4 : i32
    %151 = tpu.memref_slice %arg20[%c4_i32_48] : memref<8x!tpu.dma_semaphore, #tpu.memory_space<semaphore_mem>> -> memref<1x!tpu.dma_semaphore, #tpu.memory_space<semaphore_mem>>
    %152 = tpu.memref_squeeze %151 : memref<1x!tpu.dma_semaphore, #tpu.memory_space<semaphore_mem>> -> memref<!tpu.dma_semaphore, #tpu.memory_space<semaphore_mem>>
    tpu.wait_dma2 semaphore(%152 : memref<!tpu.dma_semaphore, #tpu.memory_space<semaphore_mem>>) src(%arg6 : memref<128x256xbf16, #tpu.memory_space<any>>) dst(%arg16 : memref<128x256xbf16, #tpu.memory_space<vmem>>)
    %c0_49 = arith.constant 0 : index
    %c0_50 = arith.constant 0 : index
    %153 = vector.load %arg16[%c0_49, %c0_50] : memref<128x256xbf16, #tpu.memory_space<vmem>>, vector<128x256xbf16>
    %cst_51 = arith.constant dense<0.000000e+00> : vector<8x256xf32>
    %154 = tpu.matmul %150, %153, %cst_51 {dimension_numbers = #tpu.dot_dimension_numbers<[1], [0], [0], [1], [0, 0, 1, 1], [], []>} : vector<8x128xbf16>, vector<128x256xbf16>, vector<8x256xf32> -> vector<8x256xf32>
    %cst_52 = arith.constant dense<0.000000e+00> : vector<256xf32>
    %155 = vector.multi_reduction <add>, %154, %cst_52 [0] : vector<8x256xf32> to vector<256xf32>
    %156 = vector.shape_cast %155 : vector<256xf32> to vector<1x256xf32>
    %cst_53 = arith.constant 8.000000e+00 : f32
    %157 = vector.broadcast %cst_53 : f32 to vector<1x256xf32>
    %158 = arith.divf %156, %157 : vector<1x256xf32>
    %159 = arith.mulf %154, %154 : vector<8x256xf32>
    %cst_54 = arith.constant dense<0.000000e+00> : vector<256xf32>
    %160 = vector.multi_reduction <add>, %159, %cst_54 [0] : vector<8x256xf32> to vector<256xf32>
    %161 = vector.shape_cast %160 : vector<256xf32> to vector<1x256xf32>
    %cst_55 = arith.constant 8.000000e+00 : f32
    %162 = vector.broadcast %cst_55 : f32 to vector<1x256xf32>
    %163 = arith.divf %161, %162 : vector<1x256xf32>
    %164 = arith.mulf %158, %158 : vector<1x256xf32>
    %165 = arith.subf %163, %164 : vector<1x256xf32>
    %166 = vector.extract_strided_slice %16 {offsets = [0, 1536], sizes = [1, 256], strides = [1, 1]} : vector<2x3840xf32> to vector<1x256xf32>
    %cst_56 = arith.constant 9.99999974E-6 : f32
    %167 = vector.broadcast %cst_56 : f32 to vector<1x256xf32>
    %168 = arith.addf %165, %167 : vector<1x256xf32>
    %169 = math.rsqrt %168 : vector<1x256xf32>
    %170 = arith.mulf %166, %169 : vector<1x256xf32>
    %171 = vector.extract_strided_slice %16 {offsets = [1, 1536], sizes = [1, 256], strides = [1, 1]} : vector<2x3840xf32> to vector<1x256xf32>
    %172 = arith.mulf %158, %170 : vector<1x256xf32>
    %173 = arith.subf %171, %172 : vector<1x256xf32>
    %174 = vector.broadcast %170 : vector<1x256xf32> to vector<8x256xf32>
    %175 = arith.mulf %154, %174 : vector<8x256xf32>
    %176 = vector.broadcast %173 : vector<1x256xf32> to vector<8x256xf32>
    %177 = arith.addf %175, %176 : vector<8x256xf32>
    %cst_57 = arith.constant 0.000000e+00 : f32
    %178 = vector.broadcast %cst_57 : f32 to vector<8x256xf32>
    %179 = arith.cmpf oge, %177, %178 : vector<8x256xf32>
    %cst_58 = arith.constant 0.00999999977 : f32
    %180 = vector.broadcast %cst_58 : f32 to vector<8x256xf32>
    %181 = arith.mulf %180, %177 : vector<8x256xf32>
    %182 = arith.select %179, %177, %181 : vector<8x256xi1>, vector<8x256xf32>
    %183 = arith.truncf %182 : vector<8x256xf32> to vector<8x256xbf16>
    %c5_i32_59 = arith.constant 5 : i32
    %184 = tpu.memref_slice %arg20[%c5_i32_59] : memref<8x!tpu.dma_semaphore, #tpu.memory_space<semaphore_mem>> -> memref<1x!tpu.dma_semaphore, #tpu.memory_space<semaphore_mem>>
    %185 = tpu.memref_squeeze %184 : memref<1x!tpu.dma_semaphore, #tpu.memory_space<semaphore_mem>> -> memref<!tpu.dma_semaphore, #tpu.memory_space<semaphore_mem>>
    tpu.wait_dma2 semaphore(%185 : memref<!tpu.dma_semaphore, #tpu.memory_space<semaphore_mem>>) src(%arg7 : memref<256x512xbf16, #tpu.memory_space<any>>) dst(%arg17 : memref<256x512xbf16, #tpu.memory_space<vmem>>)
    %c0_60 = arith.constant 0 : index
    %c0_61 = arith.constant 0 : index
    %186 = vector.load %arg17[%c0_60, %c0_61] : memref<256x512xbf16, #tpu.memory_space<vmem>>, vector<256x512xbf16>
    %cst_62 = arith.constant dense<0.000000e+00> : vector<8x512xf32>
    %187 = tpu.matmul %183, %186, %cst_62 {dimension_numbers = #tpu.dot_dimension_numbers<[1], [0], [0], [1], [0, 0, 1, 1], [], []>} : vector<8x256xbf16>, vector<256x512xbf16>, vector<8x512xf32> -> vector<8x512xf32>
    %cst_63 = arith.constant dense<0.000000e+00> : vector<512xf32>
    %188 = vector.multi_reduction <add>, %187, %cst_63 [0] : vector<8x512xf32> to vector<512xf32>
    %189 = vector.shape_cast %188 : vector<512xf32> to vector<1x512xf32>
    %cst_64 = arith.constant 8.000000e+00 : f32
    %190 = vector.broadcast %cst_64 : f32 to vector<1x512xf32>
    %191 = arith.divf %189, %190 : vector<1x512xf32>
    %192 = arith.mulf %187, %187 : vector<8x512xf32>
    %cst_65 = arith.constant dense<0.000000e+00> : vector<512xf32>
    %193 = vector.multi_reduction <add>, %192, %cst_65 [0] : vector<8x512xf32> to vector<512xf32>
    %194 = vector.shape_cast %193 : vector<512xf32> to vector<1x512xf32>
    %cst_66 = arith.constant 8.000000e+00 : f32
    %195 = vector.broadcast %cst_66 : f32 to vector<1x512xf32>
    %196 = arith.divf %194, %195 : vector<1x512xf32>
    %197 = arith.mulf %191, %191 : vector<1x512xf32>
    %198 = arith.subf %196, %197 : vector<1x512xf32>
    %199 = vector.extract_strided_slice %16 {offsets = [0, 1792], sizes = [1, 512], strides = [1, 1]} : vector<2x3840xf32> to vector<1x512xf32>
    %cst_67 = arith.constant 9.99999974E-6 : f32
    %200 = vector.broadcast %cst_67 : f32 to vector<1x512xf32>
    %201 = arith.addf %198, %200 : vector<1x512xf32>
    %202 = math.rsqrt %201 : vector<1x512xf32>
    %203 = arith.mulf %199, %202 : vector<1x512xf32>
    %204 = vector.extract_strided_slice %16 {offsets = [1, 1792], sizes = [1, 512], strides = [1, 1]} : vector<2x3840xf32> to vector<1x512xf32>
    %205 = arith.mulf %191, %203 : vector<1x512xf32>
    %206 = arith.subf %204, %205 : vector<1x512xf32>
    %207 = vector.broadcast %203 : vector<1x512xf32> to vector<8x512xf32>
    %208 = arith.mulf %187, %207 : vector<8x512xf32>
    %209 = vector.broadcast %206 : vector<1x512xf32> to vector<8x512xf32>
    %210 = arith.addf %208, %209 : vector<8x512xf32>
    %cst_68 = arith.constant 0.000000e+00 : f32
    %211 = vector.broadcast %cst_68 : f32 to vector<8x512xf32>
    %212 = arith.cmpf oge, %210, %211 : vector<8x512xf32>
    %cst_69 = arith.constant 0.00999999977 : f32
    %213 = vector.broadcast %cst_69 : f32 to vector<8x512xf32>
    %214 = arith.mulf %213, %210 : vector<8x512xf32>
    %215 = arith.select %212, %210, %214 : vector<8x512xi1>, vector<8x512xf32>
    %216 = arith.truncf %215 : vector<8x512xf32> to vector<8x512xbf16>
    %c6_i32_70 = arith.constant 6 : i32
    %217 = tpu.memref_slice %arg20[%c6_i32_70] : memref<8x!tpu.dma_semaphore, #tpu.memory_space<semaphore_mem>> -> memref<1x!tpu.dma_semaphore, #tpu.memory_space<semaphore_mem>>
    %218 = tpu.memref_squeeze %217 : memref<1x!tpu.dma_semaphore, #tpu.memory_space<semaphore_mem>> -> memref<!tpu.dma_semaphore, #tpu.memory_space<semaphore_mem>>
    tpu.wait_dma2 semaphore(%218 : memref<!tpu.dma_semaphore, #tpu.memory_space<semaphore_mem>>) src(%arg8 : memref<512x640xbf16, #tpu.memory_space<any>>) dst(%arg18 : memref<512x640xbf16, #tpu.memory_space<vmem>>)
    %c0_71 = arith.constant 0 : index
    %c0_72 = arith.constant 0 : index
    %219 = vector.load %arg18[%c0_71, %c0_72] : memref<512x640xbf16, #tpu.memory_space<vmem>>, vector<512x640xbf16>
    %cst_73 = arith.constant dense<0.000000e+00> : vector<8x640xf32>
    %220 = tpu.matmul %216, %219, %cst_73 {dimension_numbers = #tpu.dot_dimension_numbers<[1], [0], [0], [1], [0, 0, 1, 1], [], []>} : vector<8x512xbf16>, vector<512x640xbf16>, vector<8x640xf32> -> vector<8x640xf32>
    %cst_74 = arith.constant dense<0.000000e+00> : vector<640xf32>
    %221 = vector.multi_reduction <add>, %220, %cst_74 [0] : vector<8x640xf32> to vector<640xf32>
    %222 = vector.shape_cast %221 : vector<640xf32> to vector<1x640xf32>
    %cst_75 = arith.constant 8.000000e+00 : f32
    %223 = vector.broadcast %cst_75 : f32 to vector<1x640xf32>
    %224 = arith.divf %222, %223 : vector<1x640xf32>
    %225 = arith.mulf %220, %220 : vector<8x640xf32>
    %cst_76 = arith.constant dense<0.000000e+00> : vector<640xf32>
    %226 = vector.multi_reduction <add>, %225, %cst_76 [0] : vector<8x640xf32> to vector<640xf32>
    %227 = vector.shape_cast %226 : vector<640xf32> to vector<1x640xf32>
    %cst_77 = arith.constant 8.000000e+00 : f32
    %228 = vector.broadcast %cst_77 : f32 to vector<1x640xf32>
    %229 = arith.divf %227, %228 : vector<1x640xf32>
    %230 = arith.mulf %224, %224 : vector<1x640xf32>
    %231 = arith.subf %229, %230 : vector<1x640xf32>
    %232 = vector.extract_strided_slice %16 {offsets = [0, 2304], sizes = [1, 640], strides = [1, 1]} : vector<2x3840xf32> to vector<1x640xf32>
    %cst_78 = arith.constant 9.99999974E-6 : f32
    %233 = vector.broadcast %cst_78 : f32 to vector<1x640xf32>
    %234 = arith.addf %231, %233 : vector<1x640xf32>
    %235 = math.rsqrt %234 : vector<1x640xf32>
    %236 = arith.mulf %232, %235 : vector<1x640xf32>
    %237 = vector.extract_strided_slice %16 {offsets = [1, 2304], sizes = [1, 640], strides = [1, 1]} : vector<2x3840xf32> to vector<1x640xf32>
    %238 = arith.mulf %224, %236 : vector<1x640xf32>
    %239 = arith.subf %237, %238 : vector<1x640xf32>
    %240 = vector.broadcast %236 : vector<1x640xf32> to vector<8x640xf32>
    %241 = arith.mulf %220, %240 : vector<8x640xf32>
    %242 = vector.broadcast %239 : vector<1x640xf32> to vector<8x640xf32>
    %243 = arith.addf %241, %242 : vector<8x640xf32>
    %cst_79 = arith.constant 0.000000e+00 : f32
    %244 = vector.broadcast %cst_79 : f32 to vector<8x640xf32>
    %245 = arith.cmpf oge, %243, %244 : vector<8x640xf32>
    %cst_80 = arith.constant 0.00999999977 : f32
    %246 = vector.broadcast %cst_80 : f32 to vector<8x640xf32>
    %247 = arith.mulf %246, %243 : vector<8x640xf32>
    %248 = arith.select %245, %243, %247 : vector<8x640xi1>, vector<8x640xf32>
    %249 = arith.truncf %248 : vector<8x640xf32> to vector<8x640xbf16>
    %c7_i32_81 = arith.constant 7 : i32
    %250 = tpu.memref_slice %arg20[%c7_i32_81] : memref<8x!tpu.dma_semaphore, #tpu.memory_space<semaphore_mem>> -> memref<1x!tpu.dma_semaphore, #tpu.memory_space<semaphore_mem>>
    %251 = tpu.memref_squeeze %250 : memref<1x!tpu.dma_semaphore, #tpu.memory_space<semaphore_mem>> -> memref<!tpu.dma_semaphore, #tpu.memory_space<semaphore_mem>>
    tpu.wait_dma2 semaphore(%251 : memref<!tpu.dma_semaphore, #tpu.memory_space<semaphore_mem>>) src(%arg9 : memref<640x896xbf16, #tpu.memory_space<any>>) dst(%arg19 : memref<640x896xbf16, #tpu.memory_space<vmem>>)
    %c0_82 = arith.constant 0 : index
    %c0_83 = arith.constant 0 : index
    %252 = vector.load %arg19[%c0_82, %c0_83] : memref<640x896xbf16, #tpu.memory_space<vmem>>, vector<640x896xbf16>
    %cst_84 = arith.constant dense<0.000000e+00> : vector<8x896xf32>
    %253 = tpu.matmul %249, %252, %cst_84 {dimension_numbers = #tpu.dot_dimension_numbers<[1], [0], [0], [1], [0, 0, 1, 1], [], []>} : vector<8x640xbf16>, vector<640x896xbf16>, vector<8x896xf32> -> vector<8x896xf32>
    %cst_85 = arith.constant dense<0.000000e+00> : vector<896xf32>
    %254 = vector.multi_reduction <add>, %253, %cst_85 [0] : vector<8x896xf32> to vector<896xf32>
    %255 = vector.shape_cast %254 : vector<896xf32> to vector<1x896xf32>
    %cst_86 = arith.constant 8.000000e+00 : f32
    %256 = vector.broadcast %cst_86 : f32 to vector<1x896xf32>
    %257 = arith.divf %255, %256 : vector<1x896xf32>
    %258 = arith.mulf %253, %253 : vector<8x896xf32>
    %cst_87 = arith.constant dense<0.000000e+00> : vector<896xf32>
    %259 = vector.multi_reduction <add>, %258, %cst_87 [0] : vector<8x896xf32> to vector<896xf32>
    %260 = vector.shape_cast %259 : vector<896xf32> to vector<1x896xf32>
    %cst_88 = arith.constant 8.000000e+00 : f32
    %261 = vector.broadcast %cst_88 : f32 to vector<1x896xf32>
    %262 = arith.divf %260, %261 : vector<1x896xf32>
    %263 = arith.mulf %257, %257 : vector<1x896xf32>
    %264 = arith.subf %262, %263 : vector<1x896xf32>
    %265 = vector.extract_strided_slice %16 {offsets = [0, 2944], sizes = [1, 896], strides = [1, 1]} : vector<2x3840xf32> to vector<1x896xf32>
    %cst_89 = arith.constant 9.99999974E-6 : f32
    %266 = vector.broadcast %cst_89 : f32 to vector<1x896xf32>
    %267 = arith.addf %264, %266 : vector<1x896xf32>
    %268 = math.rsqrt %267 : vector<1x896xf32>
    %269 = arith.mulf %265, %268 : vector<1x896xf32>
    %270 = vector.extract_strided_slice %16 {offsets = [1, 2944], sizes = [1, 896], strides = [1, 1]} : vector<2x3840xf32> to vector<1x896xf32>
    %271 = arith.mulf %257, %269 : vector<1x896xf32>
    %272 = arith.subf %270, %271 : vector<1x896xf32>
    %273 = vector.broadcast %269 : vector<1x896xf32> to vector<8x896xf32>
    %274 = arith.mulf %253, %273 : vector<8x896xf32>
    %275 = vector.broadcast %272 : vector<1x896xf32> to vector<8x896xf32>
    %276 = arith.addf %274, %275 : vector<8x896xf32>
    %cst_90 = arith.constant 0.000000e+00 : f32
    %277 = vector.broadcast %cst_90 : f32 to vector<8x896xf32>
    %278 = arith.cmpf oge, %276, %277 : vector<8x896xf32>
    %cst_91 = arith.constant 0.00999999977 : f32
    %279 = vector.broadcast %cst_91 : f32 to vector<8x896xf32>
    %280 = arith.mulf %279, %276 : vector<8x896xf32>
    %281 = arith.select %278, %276, %280 : vector<8x896xi1>, vector<8x896xf32>
    %c0_92 = arith.constant 0 : index
    %c0_93 = arith.constant 0 : index
    %282 = vector.load %arg10[%c0_92, %c0_93] : memref<8x896xf32, #tpu.memory_space<vmem>>, vector<8x896xf32>
    tpu.vector_store %arg10[%c0_92, %c0_93], %281 {strides = array<i32>} : memref<8x896xf32, #tpu.memory_space<vmem>>, vector<8x896xf32>,
    return
  }
}

</mosaic_0001>

<bundles_post_ra>
// kernel: ae_forward.1
= control target key start
LH: loop header
LB: loop body
LE: loop exit
PB: predicated region body
PF: predicated region fallthrough
CT: control target
= control target key end

     0   :  { %17 = vsyncpa [#allocation12], 0  ;;  %s14108_s0 = inlined_call_operand.vmem [shape: bf16[8,896], index: 0, kind: input, shape index: {}]   ;;  %s14109_s1 = inlined_call_operand.hbm [shape: f32[2,3840], index: 1, kind: input, shape index: {}]   ;;  %s14110_s2 = inlined_call_operand.hbm [shape: bf16[896,640], index: 2, kind: input, shape index: {}]   ;;  %s14111_s3 = inlined_call_operand.hbm [shape: bf16[640,512], index: 3, kind: input, shape index: {}]   ;;  %s14112_s4 = inlined_call_operand.hbm [shape: bf16[512,256], index: 4, kind: input, shape index: {}]   ;;  %s14113_s5 = inlined_call_operand.hbm [shape: bf16[256,128], index: 5, kind: input, shape index: {}]   ;;  %s14114_s6 = inlined_call_operand.hbm [shape: bf16[128,256], index: 6, kind: input, shape index: {}]   ;;  %s14115_s7 = inlined_call_operand.hbm [shape: bf16[256,512], index: 7, kind: input, shape index: {}]   ;;  %s14116_s8 = inlined_call_operand.hbm [shape: bf16[512,640], index: 8, kind: input, shape index: {}]   ;;  %s14117_s9 = inlined_call_operand.hbm [shape: bf16[640,896], index: 9, kind: input, shape index: {}]   ;;  %s14118_s10 = inlined_call_operand.hbm [shape: f32[8,896], index: 10, kind: output, shape index: {0}]   ;;  %s14119_s11 = inlined_call_operand.hbm [shape: f32[8,128], index: 11, kind: output, shape index: {1}]  }
   0x1   :  { %18 = vsyncpa [#allocation13], 0 }
   0x2   :  { %19 = vsyncpa [#allocation16], 0  ;;  %s13361_s17 = smov [#allocation11]  }
   0x3   :  { %s28_s18 = sshll.u32 %s13361_s17, 4  ;;  %s29_s18 = int_to_ptr.vmem [resolvable:$true] %s28_s18 }
   0x4   :  { %s13127_s19 = scalar_lea.vmem %s29_s18, 960  ;;  %p13132_p1 = scmp.lt.s32.totalorder %s29_s18, %s29_s18 }
   0x5   :  { %p13128_p0 = scmp.ne.s32.totalorder %s29_s18, %s13127_s19  ;;  %p13133_p2 = scmp.lt.s32.totalorder %s13127_s19, %s13127_s19 }
   0x7   :  { %p13134_p3 = por %p13133_p2, %p13132_p1 }
   0x9   :  { %p13135_p4 = pnand %p13134_p3, %p13128_p0 }
   0xb   :  { %13138 = shalt.err (!%p13135_p4)
}
   0xc   :  { %31 = dma.hbm_to_vmem [thread:$0]  %s14109_s1, 960, %s29_s18, [#allocation12]  }
   0xd   :  { %13339 = dma.done.wait [#allocation12], 960  }
   0xe   :  { %13340 = vsyncadd [#allocation12], 4294966336  ;;  %s13362_s22 = smov [#allocation2]   ;;  %s13363_s24 = smov [#allocation3]  }
   0xf   :  { %s43_s23 = sshll.u32 %s13362_s22, 4  ;;  %s55_s25 = sshll.u32 %s13363_s24, 4  ;;  %s44_s23 = int_to_ptr.vmem [resolvable:$true] %s43_s23  ;;  %s56_s25 = int_to_ptr.vmem [resolvable:$true] %s55_s25 }
  0x10   :  { %s13147_s26 = scalar_lea.vmem %s44_s23, 35840  ;;  %p13152_p6 = scmp.lt.s32.totalorder %s44_s23, %s44_s23 }
  0x11   :  { %p13148_p5 = scmp.ne.s32.totalorder %s44_s23, %s13147_s26  ;;  %p13153_p7 = scmp.lt.s32.totalorder %s13147_s26, %s13147_s26 }
  0x13   :  { %p13154_p8 = por %p13153_p7, %p13152_p6 }
  0x15   :  { %p13155_p9 = pnand %p13154_p8, %p13148_p5 }
  0x17   :  { %13158 = shalt.err (!%p13155_p9)  }
  0x18   :  { %46 = dma.hbm_to_vmem [thread:$0]  %s14110_s2, 35840, %s44_s23, [#allocation10] }
  0x19   :  { %s13167_s1 = scalar_lea.vmem %s56_s25, 20480  ;;  %p13172_p11 = scmp.lt.s32.totalorder %s56_s25, %s56_s25 }
  0x1a   :  { %p13168_p10 = scmp.ne.s32.totalorder %s56_s25, %s13167_s1  ;;  %p13173_p12 = scmp.lt.s32.totalorder %s13167_s1, %s13167_s1 }
  0x1c   :  { %p13174_p13 = por %p13173_p12, %p13172_p11 }
  0x1e   :  { %p13175_p0 = pnand %p13174_p13, %p13168_p10 }
  0x20   :  { %13178 = shalt.err (!%p13175_p0)  }
  0x21   :  { %58 = dma.hbm_to_vmem [thread:$0]  %s14111_s3, 20480, %s56_s25, [#allocation10 + $0x1]  ;;  %v13445_v0 = vld [vmem:[#allocation11] sm:$0xff]  ;;  %v13447_v1 = vld [vmem:[#allocation11 + $0x8] sm:$0xff]  ;;  %v13449_v2 = vld [vmem:[#allocation11 + $0x10] sm:$0xff] }
  0x22   :  { %s13364_s12 = smov [#allocation4]   ;;  %s13365_s14 = smov [#allocation5]   ;;  %v13451_v3 = vld [vmem:[#allocation11 + $0x18] sm:$0xff]  ;;  %v13453_v4 = vld [vmem:[#allocation11 + $0x20] sm:$0xff]  ;;  %v13455_v5 = vld [vmem:[#allocation11 + $0x28] sm:$0xff] }
  0x23   :  { %s67_s13 = sshll.u32 %s13364_s12, 4  ;;  %s79_s15 = sshll.u32 %s13365_s14, 4  ;;  %s68_s13 = int_to_ptr.vmem [resolvable:$true] %s67_s13  ;;  %s80_s15 = int_to_ptr.vmem [resolvable:$true] %s79_s15 }
  0x24   :  { %s13187_s2 = scalar_lea.vmem %s68_s13, 8192  ;;  %p13192_p2 = scmp.lt.s32.totalorder %s68_s13, %s68_s13 }
  0x25   :  { %p13188_p1 = scmp.ne.s32.totalorder %s68_s13, %s13187_s2  ;;  %p13193_p3 = scmp.lt.s32.totalorder %s13187_s2, %s13187_s2 }
  0x27   :  { %p13194_p4 = por %p13193_p3, %p13192_p2 }
  0x29   :  { %p13195_p5 = pnand %p13194_p4, %p13188_p1 }
  0x2b   :  { %13198 = shalt.err (!%p13195_p5)  }
  0x2c   :  { %70 = dma.hbm_to_vmem [thread:$0]  %s14112_s4, 8192, %s68_s13, [#allocation10 + $0x2]  ;;  %v13460_v6 = vld [vmem:[#allocation11 + $0x30] sm:$0xff]  ;;  %v13462_v7 = vld [vmem:[#allocation11 + $0x38] sm:$0xf]  ;;  %v13467_v8 = vld [vmem:[%s14108_s0] sm:$0xff] }
  0x2d   :  { %s13207_s19 = scalar_lea.vmem %s80_s15, 2048  ;;  %p13212_p7 = scmp.lt.s32.totalorder %s80_s15, %s80_s15 }
  0x2e   :  { %p13208_p6 = scmp.ne.s32.totalorder %s80_s15, %s13207_s19  ;;  %p13213_p8 = scmp.lt.s32.totalorder %s13207_s19, %s13207_s19 }
  0x30   :  { %p13214_p9 = por %p13213_p8, %p13212_p7 }
  0x32   :  { %p13215_p10 = pnand %p13214_p9, %p13208_p6 }
  0x34   :  { %13218 = shalt.err (!%p13215_p10)  }
  0x35   :  { %82 = dma.hbm_to_vmem [thread:$0]  %s14113_s5, 2048, %s80_s15, [#allocation10 + $0x3]  ;;  %v13475_v9 = vld [vmem:[%s14108_s0 + $0x8] sm:$0xff]  ;;  %v13480_v10 = vld [vmem:[%s14108_s0 + $0x10] sm:$0xff]  ;;  %v13485_v11 = vld [vmem:[%s14108_s0 + $0x18] sm:$0xf] }
  0x36   :  { %s13366_s27 = smov [#allocation6]   ;;  %s13367_s1 = smov [#allocation7]  }
  0x37   :  { %s91_s28 = sshll.u32 %s13366_s27, 4  ;;  %s103_s29 = sshll.u32 %s13367_s1, 4  ;;  %s92_s28 = int_to_ptr.vmem [resolvable:$true] %s91_s28  ;;  %s104_s29 = int_to_ptr.vmem [resolvable:$true] %s103_s29 }
  0x38   :  { %s13227_s5 = scalar_lea.vmem %s92_s28, 2048  ;;  %p13232_p12 = scmp.lt.s32.totalorder %s92_s28, %s92_s28 }
  0x39   :  { %p13228_p11 = scmp.ne.s32.totalorder %s92_s28, %s13227_s5  ;;  %p13233_p13 = scmp.lt.s32.totalorder %s13227_s5, %s13227_s5 }
  0x3b   :  { %p13234_p0 = por %p13233_p13, %p13232_p12 }
  0x3d   :  { %p13235_p1 = pnand %p13234_p0, %p13228_p11 }
  0x3f   :  { %13238 = shalt.err (!%p13235_p1)  }
  0x40   :  { %94 = dma.hbm_to_vmem [thread:$0]  %s14114_s6, 2048, %s92_s28, [#allocation10 + $0x4] }
  0x41   :  { %s13247_s13 = scalar_lea.vmem %s104_s29, 8192  ;;  %p13252_p3 = scmp.lt.s32.totalorder %s104_s29, %s104_s29 }
  0x42   :  { %p13248_p2 = scmp.ne.s32.totalorder %s104_s29, %s13247_s13  ;;  %p13253_p4 = scmp.lt.s32.totalorder %s13247_s13, %s13247_s13 }
  0x44   :  { %p13254_p5 = por %p13253_p4, %p13252_p3 }
  0x46   :  { %p13255_p6 = pnand %p13254_p5, %p13248_p2 }
  0x48   :  { %13258 = shalt.err (!%p13255_p6)  }
  0x49   :  { %106 = dma.hbm_to_vmem [thread:$0]  %s14115_s7, 8192, %s104_s29, [#allocation10 + $0x5] }
  0x4a   :  { %s13368_s15 = smov [#allocation8]   ;;  %s13369_s3 = smov [#allocation9]  }
  0x4b   :  { %s115_s2 = sshll.u32 %s13368_s15, 4  ;;  %s127_s16 = sshll.u32 %s13369_s3, 4  ;;  %s116_s2 = int_to_ptr.vmem [resolvable:$true] %s115_s2  ;;  %s128_s16 = int_to_ptr.vmem [resolvable:$true] %s127_s16 }
  0x4c   :  { %s13267_s17 = scalar_lea.vmem %s116_s2, 20480  ;;  %p13272_p8 = scmp.lt.s32.totalorder %s116_s2, %s116_s2 }
  0x4d   :  { %p13268_p7 = scmp.ne.s32.totalorder %s116_s2, %s13267_s17  ;;  %p13273_p9 = scmp.lt.s32.totalorder %s13267_s17, %s13267_s17 }
  0x4f   :  { %p13274_p10 = por %p13273_p9, %p13272_p8 }
  0x51   :  { %p13275_p11 = pnand %p13274_p10, %p13268_p7 }
  0x53   :  { %13278 = shalt.err (!%p13275_p11)  }
  0x54   :  { %118 = dma.hbm_to_vmem [thread:$0]  %s14116_s8, 20480, %s116_s2, [#allocation10 + $0x6] }
  0x55   :  { %s13287_s19 = scalar_lea.vmem %s128_s16, 35840  ;;  %p13292_p13 = scmp.lt.s32.totalorder %s128_s16, %s128_s16 }
  0x56   :  { %p13288_p12 = scmp.ne.s32.totalorder %s128_s16, %s13287_s19  ;;  %p13293_p0 = scmp.lt.s32.totalorder %s13287_s19, %s13287_s19 }
  0x58   :  { %p13294_p1 = por %p13293_p0, %p13292_p13 }
  0x5a   :  { %p13295_p2 = pnand %p13294_p1, %p13288_p12 }
  0x5c   :  { %13298 = shalt.err (!%p13295_p2)  }
  0x5d   :  { %130 = dma.hbm_to_vmem [thread:$0]  %s14117_s9, 35840, %s128_s16, [#allocation10 + $0x7] }
  0x5e   :  { %13341 = dma.done.wait [#allocation10], 35840 }
  0x5f   :  { %13342 = vsyncadd [#allocation10], 4294931456  ;;  %v13501_v12 = vcombine.high %v13467_v8, %v13467_v8  ;;  %v13505_v13 = vcombine.high %v13475_v9, %v13475_v9  ;;  %v11571_v14 = vld [vmem:[#allocation2 + $0x11c] ss:$20 sps:$4 sm:$0xff]   ;;  %v11575_v16 = vld [vmem:[#allocation2 + $0x118] ss:$20 sps:$4 sm:$0xff]  }
  0x60   :  { %v11573_v15 = vld [vmem:[#allocation2 + $0x39c] ss:$20 sps:$4 sm:$0xff]   ;;  %1964 = vmatprep.subr.bf16.mxu0 %v11571_v14  ;;  %v11576_v17 = vld [vmem:[#allocation2 + $0x398] ss:$20 sps:$4 sm:$0xff]   ;;  %v11577_v18 = vld [vmem:[#allocation2 + $0xf4] ss:$20 sps:$4 sm:$0xff]  }
  0x61   :  { %1996 = vmatprep.mubr.bf16.mxu0 %v13501_v12  ;;  %2037 = vmatprep.mubr.bf16.mxu1 %v13505_v13  ;;  %v11579_v19 = vld [vmem:[#allocation2 + $0x374] ss:$20 sps:$4 sm:$0xff]   ;;  %v11581_v20 = vld [vmem:[#allocation2 + $0xf0] ss:$20 sps:$4 sm:$0xff]   ;;  %v11583_v22 = vld [vmem:[#allocation2 + $0xcc] ss:$20 sps:$4 sm:$0xff]  }
  0x62   :  { %2005 = vmatprep.subr.bf16.mxu1 %v11573_v15  ;;  %1965 = vmatpush1.bf16.msra.mxu0 %v11575_v16  ;;  %v11582_v21 = vld [vmem:[#allocation2 + $0x370] ss:$20 sps:$4 sm:$0xff]   ;;  %v11585_v23 = vld [vmem:[#allocation2 + $0x34c] ss:$20 sps:$4 sm:$0xff]   ;;  %v11587_v24 = vld [vmem:[#allocation2 + $0xc8] ss:$20 sps:$4 sm:$0xff]  }
  0x63   :  { %2006 = vmatpush1.bf16.msra.mxu1 %v11576_v17  ;;  %1966 = vmatprep.subr.bf16.mxu0 %v11577_v18  ;;  %v11588_v25 = vld [vmem:[#allocation2 + $0x348] ss:$20 sps:$4 sm:$0xff]   ;;  %v11589_v26 = vld [vmem:[#allocation2 + $0xa4] ss:$20 sps:$4 sm:$0xff]   ;;  %v11593_v28 = vld [vmem:[#allocation2 + $0xa0] ss:$20 sps:$4 sm:$0xff]  }
  0x64   :  { %2007 = vmatprep.subr.bf16.mxu1 %v11579_v19  ;;  %v11591_v27 = vld [vmem:[#allocation2 + $0x324] ss:$20 sps:$4 sm:$0xff]   ;;  %v11594_v29 = vld [vmem:[#allocation2 + $0x320] ss:$20 sps:$4 sm:$0xff]   ;;  %v11595_v30 = vld [vmem:[#allocation2 + $0x7c] ss:$20 sps:$4 sm:$0xff]  }
  0x65   :  { %v11597_v31 = vld [vmem:[#allocation2 + $0x2fc] ss:$20 sps:$4 sm:$0xff]   ;;  %v11599_v32 = vld [vmem:[#allocation2 + $0x78] ss:$20 sps:$4 sm:$0xff]   ;;  %v11601_v34 = vld [vmem:[#allocation2 + $0x54] ss:$20 sps:$4 sm:$0xff]  }
  0x66   :  { %1967 = vmatpush1.bf16.msra.mxu0 %v11581_v20  ;;  %v11600_v33 = vld [vmem:[#allocation2 + $0x2f8] ss:$20 sps:$4 sm:$0xff]   ;;  %v11603_v35 = vld [vmem:[#allocation2 + $0x2d4] ss:$20 sps:$4 sm:$0xff]   ;;  %v11605_v36 = vld [vmem:[#allocation2 + $0x50] ss:$20 sps:$4 sm:$0xff]  }
  0x67   :  { %2008 = vmatpush1.bf16.msra.mxu1 %v11582_v21  ;;  %1968 = vmatprep.subr.bf16.mxu0 %v11583_v22  ;;  %v11606_v37 = vld [vmem:[#allocation2 + $0x2d0] ss:$20 sps:$4 sm:$0xff]   ;;  %v11607_v38 = vld [vmem:[#allocation2 + $0x2c] ss:$20 sps:$4 sm:$0xff]   ;;  %v11611_v40 = vld [vmem:[#allocation2 + $0x28] ss:$20 sps:$4 sm:$0xff]  }
  0x68   :  { %2009 = vmatprep.subr.bf16.mxu1 %v11585_v23  ;;  %v11609_v39 = vld [vmem:[#allocation2 + $0x2ac] ss:$20 sps:$4 sm:$0xff]   ;;  %v11612_v41 = vld [vmem:[#allocation2 + $0x2a8] ss:$20 sps:$4 sm:$0xff]   ;;  %v11613_v42 = vld [vmem:[#allocation2 + $0x4] ss:$20 sps:$4 sm:$0xff]  }
  0x69   :  { %v11615_v43 = vld [vmem:[#allocation2 + $0x284] ss:$20 sps:$4 sm:$0xff]   ;;  %v11617_v44 = vld [vmem:[#allocation2] ss:$20 sps:$4 sm:$0xff]   ;;  %v11619_v46 = vld [vmem:[#allocation2 + $0x25c] ss:$20 sps:$4 sm:$0xff]  }
  0x6a   :  { %1969 = vmatpush1.bf16.msra.mxu0 %v11587_v24  ;;  %v11618_v45 = vld [vmem:[#allocation2 + $0x280] ss:$20 sps:$4 sm:$0xff]   ;;  %v11621_v47 = vld [vmem:[#allocation2 + $0x4dc] ss:$20 sps:$4 sm:$0xff]   ;;  %v11623_v48 = vld [vmem:[#allocation2 + $0x258] ss:$20 sps:$4 sm:$0xff]  }
  0x6b   :  { %2010 = vmatpush1.bf16.msra.mxu1 %v11588_v25  ;;  %1970 = vmatprep.subr.bf16.mxu0 %v11589_v26  ;;  %v11624_v49 = vld [vmem:[#allocation2 + $0x4d8] ss:$20 sps:$4 sm:$0xff]   ;;  %v11625_v50 = vld [vmem:[#allocation2 + $0x234] ss:$20 sps:$4 sm:$0xff]   ;;  %v11629_v52 = vld [vmem:[#allocation2 + $0x230] ss:$20 sps:$4 sm:$0xff]  }
  0x6c   :  { %2011 = vmatprep.subr.bf16.mxu1 %v11591_v27  ;;  %v11627_v51 = vld [vmem:[#allocation2 + $0x4b4] ss:$20 sps:$4 sm:$0xff]   ;;  %v11630_v53 = vld [vmem:[#allocation2 + $0x4b0] ss:$20 sps:$4 sm:$0xff]   ;;  %v11631_v54 = vld [vmem:[#allocation2 + $0x20c] ss:$20 sps:$4 sm:$0xff]  }
  0x6d   :  { %v11633_v55 = vld [vmem:[#allocation2 + $0x48c] ss:$20 sps:$4 sm:$0xff]   ;;  %v11635_v56 = vld [vmem:[#allocation2 + $0x208] ss:$20 sps:$4 sm:$0xff]   ;;  %v11637_v58 = vld [vmem:[#allocation2 + $0x1e4] ss:$20 sps:$4 sm:$0xff]  }
  0x6e   :  { %1971 = vmatpush1.bf16.msra.mxu0 %v11593_v28  ;;  %v11636_v57 = vld [vmem:[#allocation2 + $0x488] ss:$20 sps:$4 sm:$0xff]   ;;  %v11639_v59 = vld [vmem:[#allocation2 + $0x464] ss:$20 sps:$4 sm:$0xff]   ;;  %v11641_v60 = vld [vmem:[#allocation2 + $0x1e0] ss:$20 sps:$4 sm:$0xff]  }
  0x6f   :  { %2012 = vmatpush1.bf16.msra.mxu1 %v11594_v29  ;;  %1972 = vmatprep.subr.bf16.mxu0 %v11595_v30  ;;  %v11642_v61 = vld [vmem:[#allocation2 + $0x460] ss:$20 sps:$4 sm:$0xff]   ;;  %v11643_v62 = vld [vmem:[#allocation2 + $0x1bc] ss:$20 sps:$4 sm:$0xff]   ;;  %v11647_v14 = vld [vmem:[#allocation2 + $0x1b8] ss:$20 sps:$4 sm:$0xff]   ;;  %v13511_v30 = vcombine.low %v13467_v8, %v13467_v8 }
  0x70   :  { %2013 = vmatprep.subr.bf16.mxu1 %v11597_v31  ;;  %v11645_v63 = vld [vmem:[#allocation2 + $0x43c] ss:$20 sps:$4 sm:$0xff]   ;;  %v11648_v15 = vld [vmem:[#allocation2 + $0x438] ss:$20 sps:$4 sm:$0xff]   ;;  %v11649_v16 = vld [vmem:[#allocation2 + $0x194] ss:$20 sps:$4 sm:$0xff]   ;;  %v13515_v31 = vcombine.low %v13475_v9, %v13475_v9 }
  0x71   :  { %v11651_v17 = vld [vmem:[#allocation2 + $0x414] ss:$20 sps:$4 sm:$0xff]   ;;  %v11653_v18 = vld [vmem:[#allocation2 + $0x190] ss:$20 sps:$4 sm:$0xff]   ;;  %v11655_v20 = vld [vmem:[#allocation2 + $0x16c] ss:$20 sps:$4 sm:$0xff]  }
  0x72   :  { %1973 = vmatpush1.bf16.msra.mxu0 %v11599_v32  ;;  %v11654_v19 = vld [vmem:[#allocation2 + $0x410] ss:$20 sps:$4 sm:$0xff]   ;;  %v11657_v21 = vld [vmem:[#allocation2 + $0x3ec] ss:$20 sps:$4 sm:$0xff]   ;;  %v11659_v22 = vld [vmem:[#allocation2 + $0x168] ss:$20 sps:$4 sm:$0xff]  }
  0x73   :  { %2014 = vmatpush1.bf16.msra.mxu1 %v11600_v33  ;;  %1974 = vmatprep.subr.bf16.mxu0 %v11601_v34  ;;  %v11660_v23 = vld [vmem:[#allocation2 + $0x3e8] ss:$20 sps:$4 sm:$0xff]   ;;  %v11661_v24 = vld [vmem:[#allocation2 + $0x144] ss:$20 sps:$4 sm:$0xff]   ;;  %v11665_v26 = vld [vmem:[#allocation2 + $0x140] ss:$20 sps:$4 sm:$0xff]  }
  0x74   :  { %2015 = vmatprep.subr.bf16.mxu1 %v11603_v35  ;;  %v11663_v25 = vld [vmem:[#allocation2 + $0x3c4] ss:$20 sps:$4 sm:$0xff]   ;;  %v11666_v27 = vld [vmem:[#allocation2 + $0x3c0] ss:$20 sps:$4 sm:$0xff]   ;;  %v11669_v28 = vld [vmem:[#allocation2 + $0x61c] ss:$20 sps:$4 sm:$0xff]  }
  0x75   :  { %v11672_v29 = vld [vmem:[#allocation2 + $0x89c] ss:$20 sps:$4 sm:$0xff]   ;;  %v11667_v32 = vld [vmem:[#allocation2 + $0x618] ss:$20 sps:$4 sm:$0xff]   ;;  %v11675_v34 = vld [vmem:[#allocation2 + $0x5f4] ss:$20 sps:$4 sm:$0xff]  }
  0x76   :  { %1975 = vmatpush1.bf16.msra.mxu0 %v11605_v36  ;;  %v11670_v33 = vld [vmem:[#allocation2 + $0x898] ss:$20 sps:$4 sm:$0xff]   ;;  %v11678_v35 = vld [vmem:[#allocation2 + $0x874] ss:$20 sps:$4 sm:$0xff]   ;;  %v13519_v36 = vcombine.high %v13480_v10, %v13480_v10  ;;  %v11673_v8 = vld [vmem:[#allocation2 + $0x5f0] ss:$20 sps:$4 sm:$0xff]  }
  0x77   :  { %2016 = vmatpush1.bf16.msra.mxu1 %v11606_v37  ;;  %1976 = vmatprep.subr.bf16.mxu0 %v11607_v38  ;;  %v11676_v37 = vld [vmem:[#allocation2 + $0x870] ss:$20 sps:$4 sm:$0xff]   ;;  %v11681_v9 = vld [vmem:[#allocation2 + $0x5cc] ss:$20 sps:$4 sm:$0xff]   ;;  %vm13372_vm0 = vmmov 0  }
  0x78   :  { %2017 = vmatprep.subr.bf16.mxu1 %v11609_v39  ;;  %v11684_v38 = vld [vmem:[#allocation2 + $0x84c] ss:$20 sps:$4 sm:$0xff]   ;;  %v13370_v39 = vmov 0  }
  0x7a   :  { %1977 = vmatpush1.bf16.msra.mxu0 %v11611_v40  ;;  %v11679_v40 = vld [vmem:[#allocation2 + $0x5c8] ss:$20 sps:$4 sm:$0xff]  }
  0x7b   :  { %2018 = vmatpush1.bf16.msra.mxu1 %v11612_v41  ;;  %1978 = vmatprep.subr.bf16.mxu0 %v11613_v42  ;;  %v11682_v41 = vld [vmem:[#allocation2 + $0x848] ss:$20 sps:$4 sm:$0xff]   ;;  %v11687_v42 = vld [vmem:[#allocation2 + $0x5a4] ss:$20 sps:$4 sm:$0xff]  }
  0x7c   :  { %2019 = vmatprep.subr.bf16.mxu1 %v11615_v43  ;;  %v11690_v43 = vld [vmem:[#allocation2 + $0x824] ss:$20 sps:$4 sm:$0xff]  }
  0x7e   :  { %1979 = vmatpush1.bf16.msra.mxu0 %v11617_v44  ;;  %v11685_v44 = vld [vmem:[#allocation2 + $0x5a0] ss:$20 sps:$4 sm:$0xff]  }
  0x7f   :  { %2020 = vmatpush1.bf16.msra.mxu1 %v11618_v45  ;;  %1980 = vmatprep.subr.bf16.mxu0 %v11619_v46  ;;  %v11688_v45 = vld [vmem:[#allocation2 + $0x820] ss:$20 sps:$4 sm:$0xff]   ;;  %v11693_v46 = vld [vmem:[#allocation2 + $0x57c] ss:$20 sps:$4 sm:$0xff]  }
  0x80   :  { %2021 = vmatprep.subr.bf16.mxu1 %v11621_v47  ;;  %v11696_v47 = vld [vmem:[#allocation2 + $0x7fc] ss:$20 sps:$4 sm:$0xff]  }
  0x82   :  { %1981 = vmatpush2.bf16.msra.mxu0 %v11623_v48  ;;  %v11691_v48 = vld [vmem:[#allocation2 + $0x578] ss:$20 sps:$4 sm:$0xff]  }
  0x83   :  { %2022 = vmatpush2.bf16.msra.mxu1 %v11624_v49  ;;  %1982 = vmatprep.subr.bf16.mxu0 %v11625_v50  ;;  %v11694_v49 = vld [vmem:[#allocation2 + $0x7f8] ss:$20 sps:$4 sm:$0xff]   ;;  %v11699_v50 = vld [vmem:[#allocation2 + $0x554] ss:$20 sps:$4 sm:$0xff]  }
  0x84   :  { %2023 = vmatprep.subr.bf16.mxu1 %v11627_v51  ;;  %v11702_v51 = vld [vmem:[#allocation2 + $0x7d4] ss:$20 sps:$4 sm:$0xff]  }
  0x86   :  { %1983 = vmatpush2.bf16.msra.mxu0 %v11629_v52  ;;  %v11697_v52 = vld [vmem:[#allocation2 + $0x550] ss:$20 sps:$4 sm:$0xff]  }
  0x87   :  { %2024 = vmatpush2.bf16.msra.mxu1 %v11630_v53  ;;  %1984 = vmatprep.subr.bf16.mxu0 %v11631_v54  ;;  %v11700_v53 = vld [vmem:[#allocation2 + $0x7d0] ss:$20 sps:$4 sm:$0xff]   ;;  %v11705_v54 = vld [vmem:[#allocation2 + $0x52c] ss:$20 sps:$4 sm:$0xff]  }
  0x88   :  { %2025 = vmatprep.subr.bf16.mxu1 %v11633_v55  ;;  %v11708_v55 = vld [vmem:[#allocation2 + $0x7ac] ss:$20 sps:$4 sm:$0xff]  }
  0x8a   :  { %1985 = vmatpush2.bf16.msra.mxu0 %v11635_v56  ;;  %v11703_v56 = vld [vmem:[#allocation2 + $0x528] ss:$20 sps:$4 sm:$0xff]  }
  0x8b   :  { %2026 = vmatpush2.bf16.msra.mxu1 %v11636_v57  ;;  %1986 = vmatprep.subr.bf16.mxu0 %v11637_v58  ;;  %v11706_v57 = vld [vmem:[#allocation2 + $0x7a8] ss:$20 sps:$4 sm:$0xff]   ;;  %v11711_v58 = vld [vmem:[#allocation2 + $0x504] ss:$20 sps:$4 sm:$0xff]  }
  0x8c   :  { %2027 = vmatprep.subr.bf16.mxu1 %v11639_v59  ;;  %v11714_v59 = vld [vmem:[#allocation2 + $0x784] ss:$20 sps:$4 sm:$0xff]  }
  0x8e   :  { %1987 = vmatpush2.bf16.msra.mxu0 %v11641_v60  ;;  %v11709_v60 = vld [vmem:[#allocation2 + $0x500] ss:$20 sps:$4 sm:$0xff]  }
  0x8f   :  { %2028 = vmatpush2.bf16.msra.mxu1 %v11642_v61  ;;  %1988 = vmatprep.subr.bf16.mxu0 %v11643_v62  ;;  %v11712_v61 = vld [vmem:[#allocation2 + $0x780] ss:$20 sps:$4 sm:$0xff]   ;;  %v11717_v62 = vld [vmem:[#allocation2 + $0x75c] ss:$20 sps:$4 sm:$0xff]  }
  0x90   :  { %2029 = vmatprep.subr.bf16.mxu1 %v11645_v63  ;;  %v11720_v63 = vld [vmem:[#allocation2 + $0x124] ss:$20 sps:$4 sm:$0xff]  }
  0x92   :  { %1989 = vmatpush2.bf16.msra.mxu0 %v11647_v14  ;;  %v11715_v14 = vld [vmem:[#allocation2 + $0x758] ss:$20 sps:$4 sm:$0xff]  }
  0x93   :  { %2030 = vmatpush2.bf16.msra.mxu1 %v11648_v15  ;;  %1990 = vmatprep.subr.bf16.mxu0 %v11649_v16  ;;  %v11718_v15 = vld [vmem:[#allocation2 + $0x120] ss:$20 sps:$4 sm:$0xff]   ;;  %v13527_v16 = vcombine.low %v13485_v11, %v13485_v11  ;;  %v11727_v11 = vld [vmem:[#allocation2 + $0x708] ss:$20 sps:$4 sm:$0xff]  }
  0x94   :  { %2031 = vmatprep.subr.bf16.mxu1 %v11651_v17  ;;  %v11723_v17 = vld [vmem:[#allocation2 + $0x734] ss:$20 sps:$4 sm:$0xff]  }
  0x96   :  { %1991 = vmatpush2.bf16.msra.mxu0 %v11653_v18  ;;  %v11726_v18 = vld [vmem:[#allocation2 + $0xfc] ss:$20 sps:$4 sm:$0xff]  }
  0x97   :  { %2032 = vmatpush2.bf16.msra.mxu1 %v11654_v19  ;;  %1992 = vmatprep.subr.bf16.mxu0 %v11655_v20  ;;  %v11721_v19 = vld [vmem:[#allocation2 + $0x730] ss:$20 sps:$4 sm:$0xff]   ;;  %v11724_v20 = vld [vmem:[#allocation2 + $0xf8] ss:$20 sps:$4 sm:$0xff]  }
  0x98   :  { %2033 = vmatprep.subr.bf16.mxu1 %v11657_v21  ;;  %v11729_v21 = vld [vmem:[#allocation2 + $0x70c] ss:$20 sps:$4 sm:$0xff]  }
  0x9a   :  { %1993 = vmatpush2.bf16.msra.mxu0 %v11659_v22  ;;  %v11732_v22 = vld [vmem:[#allocation2 + $0xd4] ss:$20 sps:$4 sm:$0xff]  }
  0x9b   :  { %2034 = vmatpush2.bf16.msra.mxu1 %v11660_v23  ;;  %1994 = vmatprep.subr.bf16.mxu0 %v11661_v24  ;;  %v11730_v23 = vld [vmem:[#allocation2 + $0xd0] ss:$20 sps:$4 sm:$0xff]  }
  0x9c   :  { %2035 = vmatprep.subr.bf16.mxu1 %v11663_v25  ;;  %v11735_v24 = vld [vmem:[#allocation2 + $0x6e4] ss:$20 sps:$4 sm:$0xff]   ;;  %v11738_v25 = vld [vmem:[#allocation2 + $0xac] ss:$20 sps:$4 sm:$0xff]  }
  0x9e   :  { %1995 = vmatpush2.bf16.msra.mxu0 %v11665_v26  ;;  %v11733_v26 = vld [vmem:[#allocation2 + $0x6e0] ss:$20 sps:$4 sm:$0xff]  }
  0x9f   :  { %2036 = vmatpush2.bf16.msra.mxu1 %v11666_v27  ;;  %2046 = vmatprep.subr.bf16.mxu0 %v11669_v28  ;;  %v11736_v27 = vld [vmem:[#allocation2 + $0xa8] ss:$20 sps:$4 sm:$0xff]  }
  0xa0   :  { %2087 = vmatprep.subr.bf16.mxu1 %v11672_v29  ;;  %v11741_v28 = vld [vmem:[#allocation2 + $0x6bc] ss:$20 sps:$4 sm:$0xff]   ;;  %v11744_v29 = vld [vmem:[#allocation2 + $0x84] ss:$20 sps:$4 sm:$0xff]  }
  0xa1   :  { %1997 = vmatmul.mubr.bf16.vlgmr.msra.gmra.mxu0 %v13511_v30 }
  0xa2   :  { %2038 = vmatmul.mubr.bf16.vlgmr.msra.gmra.mxu1 %v13515_v31  ;;  %2047 = vmatpush1.bf16.msra.mxu0 %v11667_v32  ;;  %v11739_v32 = vld [vmem:[#allocation2 + $0x6b8] ss:$20 sps:$4 sm:$0xff]  }
  0xa3   :  { %2088 = vmatpush1.bf16.msra.mxu1 %v11670_v33  ;;  %2048 = vmatprep.subr.bf16.mxu0 %v11675_v34  ;;  %v11742_v33 = vld [vmem:[#allocation2 + $0x80] ss:$20 sps:$4 sm:$0xff]  }
  0xa4   :  { %2089 = vmatprep.subr.bf16.mxu1 %v11678_v35  ;;  %2119 = vmatprep.mubr.bf16.mxu1 %v13370_v39  ;;  %v11747_v34 = vld [vmem:[#allocation2 + $0x694] ss:$20 sps:$4 sm:$0xff]   ;;  %v11750_v35 = vld [vmem:[#allocation2 + $0x5c] ss:$20 sps:$4 sm:$0xff]  }
  0xa5   :  { %2078 = vmatprep.mubr.bf16.mxu0 %v13519_v36 }
  0xa6   :  { %2049 = vmatpush1.bf16.msra.mxu0 %v11673_v8  ;;  %v11745_v8 = vld [vmem:[#allocation2 + $0x690] ss:$20 sps:$4 sm:$0xff]  }
  0xa7   :  { %2090 = vmatpush1.bf16.msra.mxu1 %v11676_v37  ;;  %2050 = vmatprep.subr.bf16.mxu0 %v11681_v9  ;;  %v11748_v37 = vld [vmem:[#allocation2 + $0x58] ss:$20 sps:$4 sm:$0xff]  }
  0xa8   :  { %2091 = vmatprep.subr.bf16.mxu1 %v11684_v38  ;;  %v11753_v9 = vld [vmem:[#allocation2 + $0x66c] ss:$20 sps:$4 sm:$0xff]   ;;  %v11756_v38 = vld [vmem:[#allocation2 + $0x34] ss:$20 sps:$4 sm:$0xff]  }
  0xaa   :  { %2051 = vmatpush1.bf16.msra.mxu0 %v11679_v40  ;;  %v11751_v40 = vld [vmem:[#allocation2 + $0x668] ss:$20 sps:$4 sm:$0xff]  }
  0xab   :  { %2092 = vmatpush1.bf16.msra.mxu1 %v11682_v41  ;;  %2052 = vmatprep.subr.bf16.mxu0 %v11687_v42  ;;  %v11754_v41 = vld [vmem:[#allocation2 + $0x30] ss:$20 sps:$4 sm:$0xff]  }
  0xac   :  { %2093 = vmatprep.subr.bf16.mxu1 %v11690_v43  ;;  %v11759_v42 = vld [vmem:[#allocation2 + $0x644] ss:$20 sps:$4 sm:$0xff]   ;;  %v11762_v43 = vld [vmem:[#allocation2 + $0xc] ss:$20 sps:$4 sm:$0xff]  }
  0xae   :  { %2053 = vmatpush1.bf16.msra.mxu0 %v11685_v44  ;;  %v11757_v44 = vld [vmem:[#allocation2 + $0x640] ss:$20 sps:$4 sm:$0xff]  }
  0xaf   :  { %2094 = vmatpush1.bf16.msra.mxu1 %v11688_v45  ;;  %2054 = vmatprep.subr.bf16.mxu0 %v11693_v46  ;;  %v11760_v45 = vld [vmem:[#allocation2 + $0x8] ss:$20 sps:$4 sm:$0xff]   ;;  %v11765_v46 = vld [vmem:[#allocation2 + $0x264] ss:$20 sps:$4 sm:$0xff]  }
  0xb0   :  { %2095 = vmatprep.subr.bf16.mxu1 %v11696_v47  ;;  %v11768_v47 = vld [vmem:[#allocation2 + $0x3a4] ss:$20 sps:$4 sm:$0xff]  }
  0xb2   :  { %2055 = vmatpush1.bf16.msra.mxu0 %v11691_v48  ;;  %v13533_v48 = vcombine.low %v13480_v10, %v13480_v10  ;;  %v11775_v10 = vld [vmem:[#allocation2 + $0x210] ss:$20 sps:$4 sm:$0xff]  }
  0xb3   :  { %2096 = vmatpush1.bf16.msra.mxu1 %v11694_v49  ;;  %2056 = vmatprep.subr.bf16.mxu0 %v11699_v50  ;;  %v11763_v49 = vld [vmem:[#allocation2 + $0x260] ss:$20 sps:$4 sm:$0xff]  }
  0xb4   :  { %2097 = vmatprep.subr.bf16.mxu1 %v11702_v51  ;;  %v11766_v50 = vld [vmem:[#allocation2 + $0x3a0] ss:$20 sps:$4 sm:$0xff]   ;;  %v11771_v51 = vld [vmem:[#allocation2 + $0x23c] ss:$20 sps:$4 sm:$0xff]  }
  0xb6   :  { %2057 = vmatpush1.bf16.msra.mxu0 %v11697_v52  ;;  %v11774_v52 = vld [vmem:[#allocation2 + $0x37c] ss:$20 sps:$4 sm:$0xff]  }
  0xb7   :  { %2098 = vmatpush1.bf16.msra.mxu1 %v11700_v53  ;;  %2058 = vmatprep.subr.bf16.mxu0 %v11705_v54  ;;  %v11769_v53 = vld [vmem:[#allocation2 + $0x238] ss:$20 sps:$4 sm:$0xff]  }
  0xb8   :  { %2099 = vmatprep.subr.bf16.mxu1 %v11708_v55  ;;  %v11772_v54 = vld [vmem:[#allocation2 + $0x378] ss:$20 sps:$4 sm:$0xff]   ;;  %v11777_v55 = vld [vmem:[#allocation2 + $0x214] ss:$20 sps:$4 sm:$0xff]  }
  0xba   :  { %2059 = vmatpush1.bf16.msra.mxu0 %v11703_v56  ;;  %v11780_v56 = vld [vmem:[#allocation2 + $0x354] ss:$20 sps:$4 sm:$0xff]  }
  0xbb   :  { %2100 = vmatpush1.bf16.msra.mxu1 %v11706_v57  ;;  %2060 = vmatprep.subr.bf16.mxu0 %v11711_v58  ;;  %v11778_v57 = vld [vmem:[#allocation2 + $0x350] ss:$20 sps:$4 sm:$0xff]   ;;  %v11783_v58 = vld [vmem:[#allocation2 + $0x1ec] ss:$20 sps:$4 sm:$0xff]  }
  0xbc   :  { %2101 = vmatprep.subr.bf16.mxu1 %v11714_v59  ;;  %v11786_v59 = vld [vmem:[#allocation2 + $0x32c] ss:$20 sps:$4 sm:$0xff]  }
  0xbe   :  { %2061 = vmatpush1.bf16.msra.mxu0 %v11709_v60  ;;  %v11781_v60 = vld [vmem:[#allocation2 + $0x1e8] ss:$20 sps:$4 sm:$0xff]  }
  0xbf   :  { %2102 = vmatpush1.bf16.msra.mxu1 %v11712_v61  ;;  %2062 = vmatprep.subr.bf16.mxu0 %v11717_v62  ;;  %v11784_v61 = vld [vmem:[#allocation2 + $0x328] ss:$20 sps:$4 sm:$0xff]   ;;  %v11789_v62 = vld [vmem:[#allocation2 + $0x1c4] ss:$20 sps:$4 sm:$0xff]  }
  0xc0   :  { %2128 = vmatprep.subr.bf16.mxu1 %v11720_v63  ;;  %v11792_v63 = vld [vmem:[#allocation2 + $0x304] ss:$20 sps:$4 sm:$0xff]  }
  0xc2   :  { %2120 = vmatmul.mubr.bf16.vlgmr.msra.gmra.mxu1 %v13527_v16  ;;  %2063 = vmatpush2.bf16.msra.mxu0 %v11715_v14  ;;  %v11787_v14 = vld [vmem:[#allocation2 + $0x1c0] ss:$20 sps:$4 sm:$0xff]  }
  0xc3   :  { %2129 = vmatpush1.bf16.msra.mxu1 %v11718_v15  ;;  %2064 = vmatprep.subr.bf16.mxu0 %v11723_v17  ;;  %v11790_v15 = vld [vmem:[#allocation2 + $0x300] ss:$20 sps:$4 sm:$0xff]   ;;  %v11795_v17 = vld [vmem:[#allocation2 + $0x19c] ss:$20 sps:$4 sm:$0xff]  }
  0xc4   :  { %2130 = vmatprep.subr.bf16.mxu1 %v11726_v18  ;;  %2160 = vmatprep.mubr.bf16.mxu1 %v13501_v12  ;;  %v11798_v18 = vld [vmem:[#allocation2 + $0x2dc] ss:$20 sps:$4 sm:$0xff]  }
  0xc6   :  { %2065 = vmatpush2.bf16.msra.mxu0 %v11721_v19  ;;  %v11793_v19 = vld [vmem:[#allocation2 + $0x198] ss:$20 sps:$4 sm:$0xff]  }
  0xc7   :  { %2131 = vmatpush1.bf16.msra.mxu1 %v11724_v20  ;;  %2066 = vmatprep.subr.bf16.mxu0 %v11729_v21  ;;  %v11796_v20 = vld [vmem:[#allocation2 + $0x2d8] ss:$20 sps:$4 sm:$0xff]   ;;  %v11801_v21 = vld [vmem:[#allocation2 + $0x174] ss:$20 sps:$4 sm:$0xff]  }
  0xc8   :  { %2132 = vmatprep.subr.bf16.mxu1 %v11732_v22  ;;  %v11804_v22 = vld [vmem:[#allocation2 + $0x2b4] ss:$20 sps:$4 sm:$0xff]  }
  0xca   :  { %2067 = vmatpush2.bf16.msra.mxu0 %v11727_v11  ;;  %v11799_v11 = vld [vmem:[#allocation2 + $0x170] ss:$20 sps:$4 sm:$0xff]  }
  0xcb   :  { %2133 = vmatpush1.bf16.msra.mxu1 %v11730_v23  ;;  %2068 = vmatprep.subr.bf16.mxu0 %v11735_v24  ;;  %v11802_v23 = vld [vmem:[#allocation2 + $0x2b0] ss:$20 sps:$4 sm:$0xff]   ;;  %v11807_v24 = vld [vmem:[#allocation2 + $0x14c] ss:$20 sps:$4 sm:$0xff]  }
  0xcc   :  { %2134 = vmatprep.subr.bf16.mxu1 %v11738_v25  ;;  %v11810_v25 = vld [vmem:[#allocation2 + $0x28c] ss:$20 sps:$4 sm:$0xff]  }
  0xce   :  { %2069 = vmatpush2.bf16.msra.mxu0 %v11733_v26  ;;  %v11805_v26 = vld [vmem:[#allocation2 + $0x148] ss:$20 sps:$4 sm:$0xff]  }
  0xcf   :  { %2135 = vmatpush1.bf16.msra.mxu1 %v11736_v27  ;;  %2070 = vmatprep.subr.bf16.mxu0 %v11741_v28  ;;  %v11808_v27 = vld [vmem:[#allocation2 + $0x288] ss:$20 sps:$4 sm:$0xff]   ;;  %v11813_v28 = vld [vmem:[#allocation2 + $0x4e4] ss:$20 sps:$4 sm:$0xff]  }
  0xd0   :  { %2136 = vmatprep.subr.bf16.mxu1 %v11744_v29  ;;  %v11816_v29 = vld [vmem:[#allocation2 + $0x624] ss:$20 sps:$4 sm:$0xff]  }
  0xd2   :  { %2071 = vmatpush2.bf16.msra.mxu0 %v11739_v32  ;;  %v11811_v32 = vld [vmem:[#allocation2 + $0x4e0] ss:$20 sps:$4 sm:$0xff]  }
  0xd3   :  { %2137 = vmatpush1.bf16.msra.mxu1 %v11742_v33  ;;  %2072 = vmatprep.subr.bf16.mxu0 %v11747_v34  ;;  %v11814_v33 = vld [vmem:[#allocation2 + $0x620] ss:$20 sps:$4 sm:$0xff]   ;;  %v11819_v34 = vld [vmem:[#allocation2 + $0x4bc] ss:$20 sps:$4 sm:$0xff]  }
  0xd4   :  { %2138 = vmatprep.subr.bf16.mxu1 %v11750_v35  ;;  %v11822_v35 = vld [vmem:[#allocation2 + $0x5fc] ss:$20 sps:$4 sm:$0xff]  }
  0xd6   :  { %2073 = vmatpush2.bf16.msra.mxu0 %v11745_v8  ;;  %v11817_v8 = vld [vmem:[#allocation2 + $0x4b8] ss:$20 sps:$4 sm:$0xff]  }
  0xd7   :  { %2139 = vmatpush1.bf16.msra.mxu1 %v11748_v37  ;;  %2074 = vmatprep.subr.bf16.mxu0 %v11753_v9  ;;  %v11820_v37 = vld [vmem:[#allocation2 + $0x5f8] ss:$20 sps:$4 sm:$0xff]   ;;  %v11825_v9 = vld [vmem:[#allocation2 + $0x494] ss:$20 sps:$4 sm:$0xff]  }
  0xd8   :  { %2140 = vmatprep.subr.bf16.mxu1 %v11756_v38  ;;  %v11828_v38 = vld [vmem:[#allocation2 + $0x5d4] ss:$20 sps:$4 sm:$0xff]  }
  0xda   :  { %2075 = vmatpush2.bf16.msra.mxu0 %v11751_v40  ;;  %v11823_v40 = vld [vmem:[#allocation2 + $0x490] ss:$20 sps:$4 sm:$0xff]  }
  0xdb   :  { %2141 = vmatpush1.bf16.msra.mxu1 %v11754_v41  ;;  %2076 = vmatprep.subr.bf16.mxu0 %v11759_v42  ;;  %v11826_v41 = vld [vmem:[#allocation2 + $0x5d0] ss:$20 sps:$4 sm:$0xff]   ;;  %v11831_v42 = vld [vmem:[#allocation2 + $0x46c] ss:$20 sps:$4 sm:$0xff]  }
  0xdc   :  { %2142 = vmatprep.subr.bf16.mxu1 %v11762_v43  ;;  %v11834_v43 = vld [vmem:[#allocation2 + $0x5ac] ss:$20 sps:$4 sm:$0xff]  }
  0xde   :  { %2077 = vmatpush2.bf16.msra.mxu0 %v11757_v44  ;;  %v11829_v44 = vld [vmem:[#allocation2 + $0x468] ss:$20 sps:$4 sm:$0xff]  }
  0xdf   :  { %2143 = vmatpush1.bf16.msra.mxu1 %v11760_v45  ;;  %2169 = vmatprep.subr.bf16.mxu0 %v11768_v47  ;;  %v11832_v45 = vld [vmem:[#allocation2 + $0x5a8] ss:$20 sps:$4 sm:$0xff]   ;;  %v11840_v47 = vld [vmem:[#allocation2 + $0x584] ss:$20 sps:$4 sm:$0xff]  }
  0xe0   :  { %2144 = vmatprep.subr.bf16.mxu1 %v11765_v46  ;;  %v11837_v46 = vld [vmem:[#allocation2 + $0x444] ss:$20 sps:$4 sm:$0xff]  }
  0xe1   :  { %2079 = vmatmul.mubr.bf16.vlgmr.msra.gmra.mxu0 %v13533_v48 }
  0xe2   :  { %2170 = vmatpush1.bf16.msra.mxu0 %v11766_v50  ;;  %2201 = vmatprep.mubr.bf16.mxu0 %v13505_v13  ;;  %v11838_v50 = vld [vmem:[#allocation2 + $0x580] ss:$20 sps:$4 sm:$0xff]  }
  0xe3   :  { %2145 = vmatpush2.bf16.msra.mxu1 %v11763_v49  ;;  %2171 = vmatprep.subr.bf16.mxu0 %v11774_v52  ;;  %v11835_v49 = vld [vmem:[#allocation2 + $0x440] ss:$20 sps:$4 sm:$0xff]   ;;  %v11846_v52 = vld [vmem:[#allocation2 + $0x55c] ss:$20 sps:$4 sm:$0xff]  }
  0xe4   :  { %2146 = vmatprep.subr.bf16.mxu1 %v11771_v51  ;;  %v11843_v51 = vld [vmem:[#allocation2 + $0x41c] ss:$20 sps:$4 sm:$0xff]  }
  0xe6   :  { %2172 = vmatpush1.bf16.msra.mxu0 %v11772_v54  ;;  %v11844_v54 = vld [vmem:[#allocation2 + $0x558] ss:$20 sps:$4 sm:$0xff]  }
  0xe7   :  { %2147 = vmatpush2.bf16.msra.mxu1 %v11769_v53  ;;  %2173 = vmatprep.subr.bf16.mxu0 %v11780_v56  ;;  %v11841_v53 = vld [vmem:[#allocation2 + $0x418] ss:$20 sps:$4 sm:$0xff]   ;;  %v11852_v56 = vld [vmem:[#allocation2 + $0x534] ss:$20 sps:$4 sm:$0xff]  }
  0xe8   :  { %2148 = vmatprep.subr.bf16.mxu1 %v11777_v55  ;;  %v11849_v55 = vld [vmem:[#allocation2 + $0x3f4] ss:$20 sps:$4 sm:$0xff]  }
  0xea   :  { %2174 = vmatpush1.bf16.msra.mxu0 %v11778_v57  ;;  %v11850_v57 = vld [vmem:[#allocation2 + $0x530] ss:$20 sps:$4 sm:$0xff]  }
  0xeb   :  { %2149 = vmatpush2.bf16.msra.mxu1 %v11775_v10  ;;  %2175 = vmatprep.subr.bf16.mxu0 %v11786_v59  ;;  %v11847_v10 = vld [vmem:[#allocation2 + $0x3f0] ss:$20 sps:$4 sm:$0xff]   ;;  %v11858_v59 = vld [vmem:[#allocation2 + $0x50c] ss:$20 sps:$4 sm:$0xff]  }
  0xec   :  { %2150 = vmatprep.subr.bf16.mxu1 %v11783_v58  ;;  %v11855_v58 = vld [vmem:[#allocation2 + $0x3cc] ss:$20 sps:$4 sm:$0xff]  }
  0xee   :  { %2176 = vmatpush1.bf16.msra.mxu0 %v11784_v61  ;;  %v11856_v61 = vld [vmem:[#allocation2 + $0x508] ss:$20 sps:$4 sm:$0xff]  }
  0xef   :  { %2151 = vmatpush2.bf16.msra.mxu1 %v11781_v60  ;;  %2177 = vmatprep.subr.bf16.mxu0 %v11792_v63  ;;  %v11853_v60 = vld [vmem:[#allocation2 + $0x3c8] ss:$20 sps:$4 sm:$0xff]   ;;  %v11864_v63 = vld [vmem:[#allocation2 + $0x8a4] ss:$20 sps:$4 sm:$0xff]  }
  0xf0   :  { %2152 = vmatprep.subr.bf16.mxu1 %v11789_v62  ;;  %v11861_v62 = vld [vmem:[#allocation2 + $0x764] ss:$20 sps:$4 sm:$0xff]  }
  0xf2   :  { %2178 = vmatpush1.bf16.msra.mxu0 %v11790_v15  ;;  %v11862_v15 = vld [vmem:[#allocation2 + $0x8a0] ss:$20 sps:$4 sm:$0xff]  }
  0xf3   :  { %2153 = vmatpush2.bf16.msra.mxu1 %v11787_v14  ;;  %2179 = vmatprep.subr.bf16.mxu0 %v11798_v18  ;;  %v11859_v14 = vld [vmem:[#allocation2 + $0x760] ss:$20 sps:$4 sm:$0xff]   ;;  %v11870_v18 = vld [vmem:[#allocation2 + $0x87c] ss:$20 sps:$4 sm:$0xff]  }
  0xf4   :  { %2154 = vmatprep.subr.bf16.mxu1 %v11795_v17  ;;  %v11867_v17 = vld [vmem:[#allocation2 + $0x73c] ss:$20 sps:$4 sm:$0xff]  }
  0xf6   :  { %2180 = vmatpush1.bf16.msra.mxu0 %v11796_v20  ;;  %v11868_v20 = vld [vmem:[#allocation2 + $0x878] ss:$20 sps:$4 sm:$0xff]  }
  0xf7   :  { %2155 = vmatpush2.bf16.msra.mxu1 %v11793_v19  ;;  %2181 = vmatprep.subr.bf16.mxu0 %v11804_v22  ;;  %v11865_v19 = vld [vmem:[#allocation2 + $0x738] ss:$20 sps:$4 sm:$0xff]   ;;  %v11876_v22 = vld [vmem:[#allocation2 + $0x854] ss:$20 sps:$4 sm:$0xff]  }
  0xf8   :  { %2156 = vmatprep.subr.bf16.mxu1 %v11801_v21  ;;  %v11873_v21 = vld [vmem:[#allocation2 + $0x714] ss:$20 sps:$4 sm:$0xff]  }
  0xfa   :  { %2182 = vmatpush1.bf16.msra.mxu0 %v11802_v23  ;;  %v11874_v23 = vld [vmem:[#allocation2 + $0x850] ss:$20 sps:$4 sm:$0xff]  }
  0xfb   :  { %2157 = vmatpush2.bf16.msra.mxu1 %v11799_v11  ;;  %2183 = vmatprep.subr.bf16.mxu0 %v11810_v25  ;;  %v11871_v11 = vld [vmem:[#allocation2 + $0x710] ss:$20 sps:$4 sm:$0xff]   ;;  %v11882_v25 = vld [vmem:[#allocation2 + $0x82c] ss:$20 sps:$4 sm:$0xff]  }
  0xfc   :  { %2158 = vmatprep.subr.bf16.mxu1 %v11807_v24  ;;  %v11879_v24 = vld [vmem:[#allocation2 + $0x6ec] ss:$20 sps:$4 sm:$0xff]  }
  0xfe   :  { %2184 = vmatpush1.bf16.msra.mxu0 %v11808_v27  ;;  %v11880_v27 = vld [vmem:[#allocation2 + $0x828] ss:$20 sps:$4 sm:$0xff]  }
  0xff   :  { %2159 = vmatpush2.bf16.msra.mxu1 %v11805_v26  ;;  %2185 = vmatprep.subr.bf16.mxu0 %v11813_v28  ;;  %v11877_v26 = vld [vmem:[#allocation2 + $0x6e8] ss:$20 sps:$4 sm:$0xff]   ;;  %v11885_v28 = vld [vmem:[#allocation2 + $0x6c4] ss:$20 sps:$4 sm:$0xff]  }
 0x100   :  { %2210 = vmatprep.subr.bf16.mxu1 %v11816_v29  ;;  %v11888_v29 = vld [vmem:[#allocation2 + $0x804] ss:$20 sps:$4 sm:$0xff]  }
 0x102   :  { %2161 = vmatmul.mubr.bf16.vlgmr.msra.gmra.mxu1 %v13511_v30  ;;  %2186 = vmatpush2.bf16.msra.mxu0 %v11811_v32  ;;  %v11883_v32 = vld [vmem:[#allocation2 + $0x6c0] ss:$20 sps:$4 sm:$0xff]  }
 0x103   :  { %2211 = vmatpush1.bf16.msra.mxu1 %v11814_v33  ;;  %2187 = vmatprep.subr.bf16.mxu0 %v11819_v34  ;;  %v11886_v33 = vld [vmem:[#allocation2 + $0x800] ss:$20 sps:$4 sm:$0xff]   ;;  %v11891_v34 = vld [vmem:[#allocation2 + $0x69c] ss:$20 sps:$4 sm:$0xff]  }
 0x104   :  { %2212 = vmatprep.subr.bf16.mxu1 %v11822_v35  ;;  %2242 = vmatprep.mubr.bf16.mxu1 %v13519_v36  ;;  %v11894_v35 = vld [vmem:[#allocation2 + $0x7dc] ss:$20 sps:$4 sm:$0xff]  }
 0x106   :  { %2188 = vmatpush2.bf16.msra.mxu0 %v11817_v8  ;;  %v11889_v8 = vld [vmem:[#allocation2 + $0x698] ss:$20 sps:$4 sm:$0xff]  }
 0x107   :  { %2213 = vmatpush1.bf16.msra.mxu1 %v11820_v37  ;;  %2189 = vmatprep.subr.bf16.mxu0 %v11825_v9  ;;  %v11892_v37 = vld [vmem:[#allocation2 + $0x7d8] ss:$20 sps:$4 sm:$0xff]   ;;  %v11897_v9 = vld [vmem:[#allocation2 + $0x674] ss:$20 sps:$4 sm:$0xff]  }
 0x108   :  { %2214 = vmatprep.subr.bf16.mxu1 %v11828_v38  ;;  %v11900_v38 = vld [vmem:[#allocation2 + $0x7b4] ss:$20 sps:$4 sm:$0xff]  }
 0x10a   :  { %2190 = vmatpush2.bf16.msra.mxu0 %v11823_v40  ;;  %v11895_v40 = vld [vmem:[#allocation2 + $0x670] ss:$20 sps:$4 sm:$0xff]  }
 0x10b   :  { %2215 = vmatpush1.bf16.msra.mxu1 %v11826_v41  ;;  %2191 = vmatprep.subr.bf16.mxu0 %v11831_v42  ;;  %v11898_v41 = vld [vmem:[#allocation2 + $0x7b0] ss:$20 sps:$4 sm:$0xff]   ;;  %v11903_v42 = vld [vmem:[#allocation2 + $0x64c] ss:$20 sps:$4 sm:$0xff]  }
 0x10c   :  { %2216 = vmatprep.subr.bf16.mxu1 %v11834_v43  ;;  %v11906_v43 = vld [vmem:[#allocation2 + $0x78c] ss:$20 sps:$4 sm:$0xff]  }
 0x10e   :  { %2192 = vmatpush2.bf16.msra.mxu0 %v11829_v44  ;;  %v11901_v44 = vld [vmem:[#allocation2 + $0x648] ss:$20 sps:$4 sm:$0xff]  }
 0x10f   :  { %2217 = vmatpush1.bf16.msra.mxu1 %v11832_v45  ;;  %2193 = vmatprep.subr.bf16.mxu0 %v11837_v46  ;;  %v11904_v45 = vld [vmem:[#allocation2 + $0x788] ss:$20 sps:$4 sm:$0xff]  }
 0x110   :  { %2218 = vmatprep.subr.bf16.mxu1 %v11840_v47  ;;  %v11907_v46 = vld [vmem:[#allocation2 + $0x268] ss:$20 sps:$4 sm:$0xff]  }
 0x111   :  { %v11908_v47 = vld [vmem:[#allocation2 + $0x4e8] ss:$20 sps:$4 sm:$0xff]  }
 0x112   :  { %2194 = vmatpush2.bf16.msra.mxu0 %v11835_v49  ;;  %v11909_v49 = vld [vmem:[#allocation2 + $0x128] ss:$20 sps:$4 sm:$0xff]  }
 0x113   :  { %2219 = vmatpush1.bf16.msra.mxu1 %v11838_v50  ;;  %2195 = vmatprep.subr.bf16.mxu0 %v11843_v51  ;;  %v11910_v50 = vld [vmem:[#allocation2 + $0x3a8] ss:$20 sps:$4 sm:$0xff]   ;;  %v11911_v51 = vld [vmem:[#allocation2 + $0x240] ss:$20 sps:$4 sm:$0xff]  }
 0x114   :  { %2220 = vmatprep.subr.bf16.mxu1 %v11846_v52  ;;  %v11912_v52 = vld [vmem:[#allocation2 + $0x4c0] ss:$20 sps:$4 sm:$0xff]  }
 0x116   :  { %2196 = vmatpush2.bf16.msra.mxu0 %v11841_v53  ;;  %v11913_v53 = vld [vmem:[#allocation2 + $0x100] ss:$20 sps:$4 sm:$0xff]  }
 0x117   :  { %2221 = vmatpush1.bf16.msra.mxu1 %v11844_v54  ;;  %2197 = vmatprep.subr.bf16.mxu0 %v11849_v55  ;;  %v11914_v54 = vld [vmem:[#allocation2 + $0x380] ss:$20 sps:$4 sm:$0xff]   ;;  %v11915_v55 = vld [vmem:[#allocation2 + $0x218] ss:$20 sps:$4 sm:$0xff]  }
 0x118   :  { %2222 = vmatprep.subr.bf16.mxu1 %v11852_v56  ;;  %v11916_v56 = vld [vmem:[#allocation2 + $0x498] ss:$20 sps:$4 sm:$0xff]  }
 0x11a   :  { %2198 = vmatpush2.bf16.msra.mxu0 %v11847_v10  ;;  %v11917_v10 = vld [vmem:[#allocation2 + $0xd8] ss:$20 sps:$4 sm:$0xff]  }
 0x11b   :  { %2223 = vmatpush1.bf16.msra.mxu1 %v11850_v57  ;;  %2199 = vmatprep.subr.bf16.mxu0 %v11855_v58  ;;  %v11918_v57 = vld [vmem:[#allocation2 + $0x358] ss:$20 sps:$4 sm:$0xff]   ;;  %v11919_v58 = vld [vmem:[#allocation2 + $0x1f0] ss:$20 sps:$4 sm:$0xff]  }
 0x11c   :  { %2224 = vmatprep.subr.bf16.mxu1 %v11858_v59  ;;  %v11920_v59 = vld [vmem:[#allocation2 + $0x470] ss:$20 sps:$4 sm:$0xff]  }
 0x11e   :  { %2200 = vmatpush2.bf16.msra.mxu0 %v11853_v60  ;;  %v11921_v60 = vld [vmem:[#allocation2 + $0xb0] ss:$20 sps:$4 sm:$0xff]  }
 0x11f   :  { %2225 = vmatpush1.bf16.msra.mxu1 %v11856_v61  ;;  %2251 = vmatprep.subr.bf16.mxu0 %v11864_v63  ;;  %v11922_v61 = vld [vmem:[#allocation2 + $0x330] ss:$20 sps:$4 sm:$0xff]   ;;  %v11924_v63 = vld [vmem:[#allocation2 + $0x448] ss:$20 sps:$4 sm:$0xff]  }
 0x120   :  { %2226 = vmatprep.subr.bf16.mxu1 %v11861_v62  ;;  %v11923_v62 = vld [vmem:[#allocation2 + $0x1c8] ss:$20 sps:$4 sm:$0xff]  }
 0x121   :  { %2202 = vmatmul.mubr.bf16.vlgmr.msra.gmra.mxu0 %v13515_v31 }
 0x122   :  { %2252 = vmatpush1.bf16.msra.mxu0 %v11862_v15  ;;  %2283 = vmatprep.mubr.bf16.mxu0 %v13370_v39  ;;  %v11928_v15 = vld [vmem:[#allocation2 + $0x420] ss:$20 sps:$4 sm:$0xff]  }
 0x123   :  { %2227 = vmatpush2.bf16.msra.mxu1 %v11859_v14  ;;  %2253 = vmatprep.subr.bf16.mxu0 %v11870_v18  ;;  %v11927_v14 = vld [vmem:[#allocation2 + $0x1a0] ss:$20 sps:$4 sm:$0xff]  }
 0x124   :  { %2228 = vmatprep.subr.bf16.mxu1 %v11867_v17  ;;  %v11929_v17 = vld [vmem:[#allocation2 + $0x60] ss:$20 sps:$4 sm:$0xff]  }
 0x125   :  { %v11930_v18 = vld [vmem:[#allocation2 + $0x2e0] ss:$20 sps:$4 sm:$0xff]  }
 0x126   :  { %2254 = vmatpush1.bf16.msra.mxu0 %v11868_v20  ;;  %v11932_v20 = vld [vmem:[#allocation2 + $0x3f8] ss:$20 sps:$4 sm:$0xff]  }
 0x127   :  { %2229 = vmatpush2.bf16.msra.mxu1 %v11865_v19  ;;  %2255 = vmatprep.subr.bf16.mxu0 %v11876_v22  ;;  %v11931_v19 = vld [vmem:[#allocation2 + $0x178] ss:$20 sps:$4 sm:$0xff]  }
 0x128   :  { %2230 = vmatprep.subr.bf16.mxu1 %v11873_v21  ;;  %v11933_v21 = vld [vmem:[#allocation2 + $0x38] ss:$20 sps:$4 sm:$0xff]  }
 0x129   :  { %v11934_v22 = vld [vmem:[#allocation2 + $0x2b8] ss:$20 sps:$4 sm:$0xff]  }
 0x12a   :  { %2256 = vmatpush1.bf16.msra.mxu0 %v11874_v23  ;;  %v11936_v23 = vld [vmem:[#allocation2 + $0x3d0] ss:$20 sps:$4 sm:$0xff]  }
 0x12b   :  { %2231 = vmatpush2.bf16.msra.mxu1 %v11871_v11  ;;  %2257 = vmatprep.subr.bf16.mxu0 %v11882_v25  ;;  %v11935_v11 = vld [vmem:[#allocation2 + $0x150] ss:$20 sps:$4 sm:$0xff]  }
 0x12c   :  { %2232 = vmatprep.subr.bf16.mxu1 %v11879_v24  ;;  %v11937_v24 = vld [vmem:[#allocation2 + $0x10] ss:$20 sps:$4 sm:$0xff]  }
 0x12d   :  { %v11938_v25 = vld [vmem:[#allocation2 + $0x290] ss:$20 sps:$4 sm:$0xff]  }
 0x12e   :  { %2258 = vmatpush1.bf16.msra.mxu0 %v11880_v27  ;;  %v11940_v27 = vld [vmem:[#allocation2 + $0x628] ss:$20 sps:$4 sm:$0xff]  }
 0x12f   :  { %2233 = vmatpush2.bf16.msra.mxu1 %v11877_v26  ;;  %2259 = vmatprep.subr.bf16.mxu0 %v11888_v29  ;;  %v11939_v26 = vld [vmem:[#allocation2 + $0x768] ss:$20 sps:$4 sm:$0xff]   ;;  %v13371_v29 = vmov 0.0  }
 0x130   :  { %2234 = vmatprep.subr.bf16.mxu1 %v11885_v28  ;;  %v11941_v28 = vld [vmem:[#allocation2 + $0x8a8] ss:$20 sps:$4 sm:$0xff]  }
 0x132   :  { %2260 = vmatpush1.bf16.msra.mxu0 %v11886_v33 }
 0x133   :  { %2235 = vmatpush2.bf16.msra.mxu1 %v11883_v32  ;;  %2261 = vmatprep.subr.bf16.mxu0 %v11894_v35  ;;  %v11942_v32 = vld [vmem:[#allocation2 + $0x740] ss:$20 sps:$4 sm:$0xff]  }
 0x134   :  { %2236 = vmatprep.subr.bf16.mxu1 %v11891_v34 }
 0x136   :  { %2262 = vmatpush1.bf16.msra.mxu0 %v11892_v37  ;;  %v11944_v37 = vld [vmem:[#allocation2 + $0x880] ss:$20 sps:$4 sm:$0xff]  }
 0x137   :  { %2237 = vmatpush2.bf16.msra.mxu1 %v11889_v8  ;;  %2263 = vmatprep.subr.bf16.mxu0 %v11900_v38  ;;  %v11943_v8 = vld [vmem:[#allocation2 + $0x600] ss:$20 sps:$4 sm:$0xff]  }
 0x138   :  { %2238 = vmatprep.subr.bf16.mxu1 %v11897_v9 }
 0x13a   :  { %2264 = vmatpush1.bf16.msra.mxu0 %v11898_v41 }
 0x13b   :  { %2239 = vmatpush2.bf16.msra.mxu1 %v11895_v40  ;;  %2265 = vmatprep.subr.bf16.mxu0 %v11906_v43  ;;  %v11945_v40 = vld [vmem:[#allocation2 + $0x718] ss:$20 sps:$4 sm:$0xff]  }
 0x13c   :  { %2240 = vmatprep.subr.bf16.mxu1 %v11903_v42  ;;  %v11946_v42 = vld [vmem:[#allocation2 + $0x5d8] ss:$20 sps:$4 sm:$0xff]  }
 0x13d   :  { %v11947_v43 = vld [vmem:[#allocation2 + $0x858] ss:$20 sps:$4 sm:$0xff]  }
 0x13e   :  { %2266 = vmatpush1.bf16.msra.mxu0 %v11904_v45 }
 0x13f   :  { %2241 = vmatpush2.bf16.msra.mxu1 %v11901_v44  ;;  %11322 = vmatprep.subr.bf16.mxu0 %v11907_v46  ;;  %v11948_v46 = vld [vmem:[#allocation2 + $0x6f0] ss:$20 sps:$4 sm:$0xff]  }
 0x140   :  { %11344 = vmatprep.subr.bf16.mxu1 %v11908_v47  ;;  %v11949_v47 = vld [vmem:[#allocation2 + $0x5b0] ss:$20 sps:$4 sm:$0xff]  }
 0x141   :  { %2284 = vmatmul.mubr.bf16.vlgmr.msra.gmra.mxu0 %v13527_v16 }
 0x142   :  { %2243 = vmatmul.mubr.bf16.vlgmr.msra.gmra.mxu1 %v13533_v48  ;;  %11323 = vmatpush3.bf16.msra.mxu0 %v11909_v49  ;;  %v11951_v49 = vld [vmem:[#allocation2 + $0x6c8] ss:$20 sps:$4 sm:$0xff]  }
 0x143   :  { %11345 = vmatpush3.bf16.msra.mxu1 %v11910_v50  ;;  %11324 = vmatprep.subr.bf16.mxu0 %v11911_v51  ;;  %v11952_v50 = vld [vmem:[#allocation2 + $0x588] ss:$20 sps:$4 sm:$0xff]  }
 0x144   :  { %11346 = vmatprep.subr.bf16.mxu1 %v11912_v52  ;;  %2324 = vmatprep.mubr.bf16.mxu0 %v13501_v12  ;;  %v11925_v12 = vld [vmem:[#allocation2 + $0x88] ss:$20 sps:$4 sm:$0xff]   ;;  %v11954_v52 = vld [vmem:[#allocation2 + $0x6a0] ss:$20 sps:$4 sm:$0xff]  }
 0x145   :  { %2364 = vmatprep.mubr.bf16.mxu1 %v13505_v13  ;;  %v11926_v13 = vld [vmem:[#allocation2 + $0x308] ss:$20 sps:$4 sm:$0xff]  }
 0x146   :  { %11325 = vmatpush3.bf16.msra.mxu0 %v11913_v53  ;;  %v11953_v51 = vld [vmem:[#allocation2 + $0x808] ss:$20 sps:$4 sm:$0xff]   ;;  %v11955_v53 = vld [vmem:[#allocation2 + $0x560] ss:$20 sps:$4 sm:$0xff]  }
 0x147   :  { %11347 = vmatpush3.bf16.msra.mxu1 %v11914_v54  ;;  %11326 = vmatprep.subr.bf16.mxu0 %v11915_v55  ;;  %v11956_v54 = vld [vmem:[#allocation2 + $0x7e0] ss:$20 sps:$4 sm:$0xff]   ;;  %v11957_v55 = vld [vmem:[#allocation2 + $0x678] ss:$20 sps:$4 sm:$0xff]  }
 0x148   :  { %11348 = vmatprep.subr.bf16.mxu1 %v11916_v56  ;;  %v11958_v56 = vld [vmem:[#allocation2 + $0x538] ss:$20 sps:$4 sm:$0xff]  }
 0x14a   :  { %11327 = vmatpush3.bf16.msra.mxu0 %v11917_v10  ;;  %v11959_v10 = vld [vmem:[#allocation2 + $0x7b8] ss:$20 sps:$4 sm:$0xff]  }
 0x14b   :  { %11349 = vmatpush3.bf16.msra.mxu1 %v11918_v57  ;;  %11328 = vmatprep.subr.bf16.mxu0 %v11919_v58  ;;  %v11960_v57 = vld [vmem:[#allocation2 + $0x650] ss:$20 sps:$4 sm:$0xff]  }
 0x14c   :  { %11350 = vmatprep.subr.bf16.mxu1 %v11920_v59  ;;  %v11961_v58 = vld [vmem:[#allocation2 + $0x510] ss:$20 sps:$4 sm:$0xff]  }
 0x14d   :  { %v11962_v59 = vld [vmem:[#allocation2 + $0x790] ss:$20 sps:$4 sm:$0xff]  }
 0x14e   :  { %11329 = vmatpush3.bf16.msra.mxu0 %v11921_v60 }
 0x14f   :  { %11351 = vmatpush3.bf16.msra.mxu1 %v11922_v61  ;;  %11330 = vmatprep.subr.bf16.mxu0 %v11923_v62 }
 0x150   :  { %11352 = vmatprep.subr.bf16.mxu1 %v11924_v63 }
 0x152   :  { %11331 = vmatpush3.bf16.msra.mxu0 %v11925_v12 }
 0x153   :  { %11353 = vmatpush3.bf16.msra.mxu1 %v11926_v13  ;;  %11332 = vmatprep.subr.bf16.mxu0 %v11927_v14 }
 0x154   :  { %11354 = vmatprep.subr.bf16.mxu1 %v11928_v15 }
 0x156   :  { %11333 = vmatpush3.bf16.msra.mxu0 %v11929_v17 }
 0x157   :  { %11355 = vmatpush3.bf16.msra.mxu1 %v11930_v18  ;;  %11334 = vmatprep.subr.bf16.mxu0 %v11931_v19 }
 0x158   :  { %11356 = vmatprep.subr.bf16.mxu1 %v11932_v20 }
 0x15a   :  { %11335 = vmatpush3.bf16.msra.mxu0 %v11933_v21 }
 0x15b   :  { %11357 = vmatpush3.bf16.msra.mxu1 %v11934_v22  ;;  %11336 = vmatprep.subr.bf16.mxu0 %v11935_v11 }
 0x15c   :  { %11358 = vmatprep.subr.bf16.mxu1 %v11936_v23 }
 0x15e   :  { %11337 = vmatpush3.bf16.msra.mxu0 %v11937_v24 }
 0x15f   :  { %11359 = vmatpush3.bf16.msra.mxu1 %v11938_v25  ;;  %11366 = vmatprep.subr.bf16.mxu0 %v11939_v26 }
 0x160   :  { %11516 = vmatprep.subr.bf16.mxu1 %v13371_v29 }
 0x161   :  { %v1998_v33 = vpop.f32.mrf.mxu0  ;;  %2325 = vmatmul.mubr.bf16.vlgmr.msra.gmra.mxu0 %v13511_v30 }
 0x162   :  { %v2039_v34 = vpop.f32.mrf.mxu1  ;;  %2365 = vmatmul.mubr.bf16.vlgmr.msra.gmra.mxu1 %v13515_v31  ;;  %11367 = vmatpush3.bf16.msra.mxu0 %v11940_v27 }
 0x163   :  { %v13548_v35 = vadd.f32 %v2039_v34, %v1998_v33  ;;  %11517 = vmatpush3.bf16.msra.mxu1 %v11941_v28  ;;  %v2000_v9 = vpop.f32.mrf.mxu0  ;;  %11368 = vmatprep.subr.bf16.mxu0 %v11942_v32 }
 0x164   :  { %v2041_v38 = vpop.f32.mrf.mxu1  ;;  %11518 = vmatprep.subr.bf16.mxu1 %v13371_v29  ;;  %2404 = vmatprep.mubr.bf16.mxu0 %v13519_v36  ;;  %v11950_v36 = vld [vmem:[#allocation2 + $0x830] ss:$20 sps:$4 sm:$0xff]  }
 0x165   :  { %v2042_v41 = vadd.f32 %v2041_v38, %v2000_v9  ;;  %11532 = vmatprep.mubr.msk.bf16.mxu1 %vm13372_vm0, %v13371_v29  ;;  %v2002_v30 = vpop.f32.mrf.mxu0 }
 0x166   :  { %v2043_v31 = vpop.f32.mrf.mxu1  ;;  %11369 = vmatpush3.bf16.msra.mxu0 %v11943_v8 }
 0x167   :  { %11519 = vmatpush3.bf16.msra.mxu1 %v11944_v37  ;;  %v2003_v44 = vpop.f32.mrf.mxu0  ;;  %11370 = vmatprep.subr.bf16.mxu0 %v11945_v40 }
 0x168   :  { %v2044_v45 = vpop.f32.mrf.mxu1  ;;  %11520 = vmatprep.subr.bf16.mxu1 %v13371_v29 }
 0x16a   :  { %11371 = vmatpush3.bf16.msra.mxu0 %v11946_v42 }
 0x16b   :  { %11521 = vmatpush3.bf16.msra.mxu1 %v11947_v43  ;;  %11372 = vmatprep.subr.bf16.mxu0 %v11948_v46 }
 0x16c   :  { %11522 = vmatprep.subr.bf16.mxu1 %v13371_v29 }
 0x16e   :  { %11373 = vmatpush3.bf16.msra.mxu0 %v11949_v47 }
 0x16f   :  { %11523 = vmatpush3.bf16.msra.mxu1 %v11950_v36  ;;  %11374 = vmatprep.subr.bf16.mxu0 %v11951_v49 }
 0x170   :  { %11524 = vmatprep.subr.bf16.mxu1 %v13371_v29 }
 0x172   :  { %11375 = vmatpush3.bf16.msra.mxu0 %v11952_v50 }
 0x173   :  { %11525 = vmatpush3.bf16.msra.mxu1 %v11953_v51  ;;  %11376 = vmatprep.subr.bf16.mxu0 %v11954_v52 }
 0x174   :  { %11526 = vmatprep.subr.bf16.mxu1 %v13371_v29 }
 0x176   :  { %11377 = vmatpush3.bf16.msra.mxu0 %v11955_v53 }
 0x177   :  { %11527 = vmatpush3.bf16.msra.mxu1 %v11956_v54  ;;  %11378 = vmatprep.subr.bf16.mxu0 %v11957_v55 }
 0x178   :  { %11528 = vmatprep.subr.bf16.mxu1 %v13371_v29 }
 0x17a   :  { %11379 = vmatpush3.bf16.msra.mxu0 %v11958_v56 }
 0x17b   :  { %11529 = vmatpush3.bf16.msra.mxu1 %v11959_v10  ;;  %11380 = vmatprep.subr.bf16.mxu0 %v11960_v57 }
 0x17c   :  { %11530 = vmatprep.subr.bf16.mxu1 %v13371_v29 }
 0x17e   :  { %11381 = vmatpush3.bf16.msra.mxu0 %v11961_v58 }
 0x17f   :  { %11531 = vmatpush3.bf16.msra.mxu1 %v11962_v59 }
 0x181   :  { %2405 = vmatmul.mubr.bf16.vlgmr.msra.gmra.mxu0 %v13533_v48 }
 0x182   :  { %11533 = vmatmul.mubr.bf16.vlgmr.msra.gmra.mxu1 %v13527_v16  ;;  %v2121_v60 = vpop.f32.mrf.mxu1 }
 0x184   :  { %v2123_v61 = vpop.f32.mrf.mxu1 }
 0x186   :  { %v2125_v62 = vpop.f32.mrf.mxu1 }
 0x188   :  { %v2126_v63 = vpop.f32.mrf.mxu1 }
 0x1a1   :  { %v2080_v12 = vpop.f32.mrf.mxu0 }
 0x1a2   :  { %v2081_v13 = vadd.f32 %v2080_v12, %v13548_v35 }
 0x1a3   :  { %v2082_v14 = vpop.f32.mrf.mxu0 }
 0x1a4   :  { %v13563_v15 = vadd.f32 %v2121_v60, %v2081_v13  ;;  %v2083_v17 = vadd.f32 %v2082_v14, %v2042_v41 }
 0x1a5   :  { %v2084_v18 = vpop.f32.mrf.mxu0 }
 0x1a6   :  { %v2452_v19 = vrot.slane %v13563_v15, 4  ;;  %v2488_v20 = vmul.f32 %v13563_v15, %v13563_v15  ;;  %v13568_v48 = vadd.f32 %v2123_v61, %v2083_v17 }
 0x1a7   :  { %v2085_v16 = vpop.f32.mrf.mxu0 }
 0x1a8   :  { %v2453_v21 = vadd.f32 %v2452_v19, %v13563_v15  ;;  %v2493_v22 = vrot.slane %v2488_v20, 4  ;;  %v2458_v11 = vrot.slane %v13568_v48, 4  ;;  %v2489_v23 = vmul.f32 %v13568_v48, %v13568_v48 }
 0x1aa   :  { %v2454_v24 = vrot.slane %v2453_v21, 2  ;;  %v2494_v25 = vadd.f32 %v2493_v22, %v2488_v20  ;;  %v2459_v26 = vadd.f32 %v2458_v11, %v13568_v48  ;;  %v2499_v27 = vrot.slane %v2489_v23, 4 }
 0x1ac   :  { %v2455_v28 = vadd.f32 %v2454_v24, %v2453_v21  ;;  %v2495_v32 = vrot.slane %v2494_v25, 2  ;;  %v2460_v33 = vrot.slane %v2459_v26, 2  ;;  %v2500_v34 = vadd.f32 %v2499_v27, %v2489_v23 }
 0x1ae   :  { %v2456_v35 = vrot.slane %v2455_v28, 1  ;;  %v2496_v8 = vadd.f32 %v2495_v32, %v2494_v25  ;;  %v2461_v37 = vadd.f32 %v2460_v33, %v2459_v26  ;;  %v2501_v9 = vrot.slane %v2500_v34, 2 }
 0x1b0   :  { %v2457_v38 = vadd.f32 %v2456_v35, %v2455_v28  ;;  %v2497_v40 = vrot.slane %v2496_v8, 1  ;;  %v2462_v41 = vrot.slane %v2461_v37, 1  ;;  %v2502_v30 = vadd.f32 %v2501_v9, %v2500_v34 }
 0x1b2   :  { %v13575_v31 = vmul.f32 0.125, %v2457_v38  ;;  %v2498_v42 = vadd.f32 %v2497_v40, %v2496_v8  ;;  %v2463_v43 = vadd.f32 %v2462_v41, %v2461_v37  ;;  %v2503_v44 = vrot.slane %v2502_v30, 1 }
 0x1b4   :  { %v2523_v45 = vmul.f32 0.125, %v2498_v42  ;;  %v2528_v46 = vmul.f32 %v13575_v31, %v13575_v31  ;;  %v13579_v47 = vmul.f32 0.125, %v2463_v43  ;;  %v2504_v36 = vadd.f32 %v2503_v44, %v2502_v30 }
 0x1b6   :  { %v2533_v49 = vsub.f32 %v2523_v45, %v2528_v46  ;;  %v2524_v50 = vmul.f32 0.125, %v2504_v36  ;;  %v2529_v51 = vmul.f32 %v13579_v47, %v13579_v47 }
 0x1b8   :  { %v2538_v52 = vadd.f32 1e-05, %v2533_v49  ;;  %v2534_v53 = vsub.f32 %v2524_v50, %v2529_v51 }
 0x1ba   :  { %v2539_v54 = vadd.f32 1e-05, %v2534_v53  ;;  %11963 = vrsqrt.f32 %v2538_v52 }
 0x1bc   :  { %11965 = vrsqrt.f32 %v2539_v54 }
 0x1c2   :  { %v2162_v55 = vpop.f32.mrf.mxu1 }
 0x1c4   :  { %v2164_v56 = vpop.f32.mrf.mxu1 }
 0x1c6   :  { %v2166_v10 = vpop.f32.mrf.mxu1 }
 0x1c7   :  { %v13583_v58 = vpop.eup %11963 }
 0x1c8   :  { %v2167_v57 = vpop.f32.mrf.mxu1 }
 0x1c9   :  { %v13585_v59 = vpop.eup %11965 }
 0x1ca   :  { %v2553_v60 = vcombine.low %v13583_v58, %v13585_v59 }
 0x1e1   :  { %v2203_v61 = vpop.f32.mrf.mxu0 }
 0x1e2   :  { %v2204_v62 = vadd.f32 %v2203_v61, %v2162_v55 }
 0x1e3   :  { %v2205_v63 = vpop.f32.mrf.mxu0 }
 0x1e4   :  { %v2206_v12 = vadd.f32 %v2205_v63, %v2164_v56 }
 0x1e5   :  { %v2207_v13 = vpop.f32.mrf.mxu0 }
 0x1e7   :  { %v2208_v14 = vpop.f32.mrf.mxu0 }
 0x201   :  { %v2285_v18 = vpop.f32.mrf.mxu0 }
 0x202   :  { %v2244_v17 = vpop.f32.mrf.mxu1 }
 0x203   :  { %v2245_v19 = vadd.f32 %v2244_v17, %v2204_v62  ;;  %v2287_v16 = vpop.f32.mrf.mxu0 }
 0x204   :  { %v2246_v20 = vpop.f32.mrf.mxu1 }
 0x205   :  { %v13589_v21 = vadd.f32 %v2285_v18, %v2245_v19  ;;  %v2247_v22 = vadd.f32 %v2246_v20, %v2206_v12  ;;  %v2289_v11 = vpop.f32.mrf.mxu0  ;;  %v13373_v18 = vmov 1983009808   ;;  %v2558_v20 = vlaneseq }
 0x206   :  { %v2248_v23 = vpop.f32.mrf.mxu1  ;;  %v2556_v19 = vunpack.c.l.s4 %v13373_v18 }
 0x207   :  { %v2464_v24 = vrot.slane %v13589_v21, 4  ;;  %v2490_v25 = vmul.f32 %v13589_v21, %v13589_v21  ;;  %v13594_v26 = vadd.f32 %v2287_v16, %v2247_v22  ;;  %v2290_v27 = vpop.f32.mrf.mxu0 }
 0x208   :  { %v2249_v28 = vpop.f32.mrf.mxu1 }
 0x209   :  { %v2465_v32 = vadd.f32 %v2464_v24, %v13589_v21  ;;  %v2505_v33 = vrot.slane %v2490_v25, 4  ;;  %v2470_v34 = vrot.slane %v13594_v26, 4  ;;  %v2491_v35 = vmul.f32 %v13594_v26, %v13594_v26 }
 0x20a   :  { %v2557_v24 = vunpack.c.0.s8 %v2556_v19 }
 0x20b   :  { %v2466_v8 = vrot.slane %v2465_v32, 2  ;;  %v2506_v37 = vadd.f32 %v2505_v33, %v2490_v25  ;;  %v2471_v9 = vadd.f32 %v2470_v34, %v13594_v26  ;;  %v2511_v38 = vrot.slane %v2491_v35, 4 }
 0x20c   :  { %v2559_v25 = vshrl.u32 %v2558_v20, 7 }
 0x20d   :  { %v2467_v40 = vadd.f32 %v2466_v8, %v2465_v32  ;;  %v2507_v41 = vrot.slane %v2506_v37, 2  ;;  %v2472_v30 = vrot.slane %v2471_v9, 2  ;;  %v2512_v42 = vadd.f32 %v2511_v38, %v2491_v35 }
 0x20e   :  { %v13601_v35 = vsub.s32 %v2557_v24, %v2559_v25  ;;  %v13639_v18 = vsub.s32 7, %v2559_v25 }
 0x20f   :  { %v2468_v43 = vrot.slane %v2467_v40, 1  ;;  %v2508_v44 = vadd.f32 %v2507_v41, %v2506_v37  ;;  %v2473_v45 = vadd.f32 %v2472_v30, %v2471_v9  ;;  %v2513_v46 = vrot.slane %v2512_v42, 2 }
 0x210   :  { %v2561_v9 = vrot.slane %v2553_v60, %v13601_v35  ;;  %v13610_v30 = vsub.s32 2, %v2559_v25 }
 0x211   :  { %v2469_v36 = vadd.f32 %v2468_v43, %v2467_v40  ;;  %v2509_v49 = vrot.slane %v2508_v44, 1  ;;  %v2474_v50 = vrot.slane %v2473_v45, 1  ;;  %v2514_v51 = vadd.f32 %v2513_v46, %v2512_v42 }
 0x212   :  { %v13608_v40 = vsub.s32 0, %v2559_v25  ;;  %v13612_v42 = vsub.s32 4, %v2559_v25  ;;  %v13614_v43 = vsub.s32 6, %v2559_v25 }
 0x213   :  { %v2485_v52 = vmul.f32 0.125, %v2469_v36  ;;  %v2510_v53 = vadd.f32 %v2509_v49, %v2508_v44  ;;  %v2475_v54 = vadd.f32 %v2474_v50, %v2473_v45  ;;  %v2515_v55 = vrot.slane %v2514_v51, 1 }
 0x215   :  { %v2525_v56 = vmul.f32 0.125, %v2510_v53  ;;  %v2530_v10 = vmul.f32 %v2485_v52, %v2485_v52  ;;  %v2486_v57 = vmul.f32 0.125, %v2475_v54  ;;  %v2516_v61 = vadd.f32 %v2515_v55, %v2514_v51 }
 0x217   :  { %v2535_v62 = vsub.f32 %v2525_v56, %v2530_v10  ;;  %v2526_v63 = vmul.f32 0.125, %v2516_v61  ;;  %v2531_v12 = vmul.f32 %v2486_v57, %v2486_v57 }
 0x219   :  { %v2540_v13 = vadd.f32 1e-05, %v2535_v62  ;;  %v2536_v14 = vsub.f32 %v2526_v63, %v2531_v12  ;;  %v13633_v12 = vsub.s32 1, %v2559_v25 }
 0x21b   :  { %v2541_v17 = vadd.f32 1e-05, %v2536_v14  ;;  %11967 = vrsqrt.f32 %v2540_v13  ;;  %v13635_v14 = vsub.s32 3, %v2559_v25 }
 0x21d   :  { %11969 = vrsqrt.f32 %v2541_v17  ;;  %v13637_v17 = vsub.s32 5, %v2559_v25 }
 0x221   :  { %v11338_v16 = vpop.f32.mrf.mxu0 }
 0x222   :  { %v11360_v22 = vpop.f32.mrf.mxu1 }
 0x223   :  { %v11339_v11 = vpop.f32.mrf.mxu0 }
 0x224   :  { %v11361_v23 = vpop.f32.mrf.mxu1  ;;  %v11340_v20 = vadd.f32 %v11339_v11, %v11338_v16 }
 0x225   :  { %v11341_v27 = vpop.f32.mrf.mxu0  ;;  %v11362_v24 = vadd.f32 %v11361_v23, %v11360_v22 }
 0x226   :  { %v11363_v28 = vpop.f32.mrf.mxu1 }
 0x227   :  { %v11342_v32 = vpop.f32.mrf.mxu0 }
 0x228   :  { %v11364_v33 = vpop.f32.mrf.mxu1  ;;  %v11968_v34 = vpop.eup %11967 }
 0x22a   :  { %v11970_v8 = vpop.eup %11969 }
 0x22b   :  { %v2554_v37 = vcombine.low %v11968_v34, %v11970_v8 }
 0x22d   :  { %v2568_v38 = vrot.slane %v2554_v37, %v13601_v35 }
 0x22f   :  { %v2569_v41 = vcombine.low %v2561_v9, %v2568_v38 }
 0x231   :  { %v2579_v44 = vmul.f32 %v2569_v41, %v13445_v0 }
 0x233   :  { %v2586_v45 = vrot.slane %v2579_v44, %v13608_v40  ;;  %v2590_v46 = vrot.slane %v2579_v44, %v13610_v30  ;;  %v2594_v58 = vrot.slane %v2579_v44, %v13612_v42  ;;  %v2598_v59 = vrot.slane %v2579_v44, %v13614_v43 }
 0x234   :  { %v2367_v44 = vadd.f32 %v11362_v24, %v11340_v20 }
 0x235   :  { %v2608_v60 = vmul.f32 %v2586_v45, %v13575_v31  ;;  %v2609_v36 = vmul.f32 %v2590_v46, %v13579_v47  ;;  %v2610_v49 = vmul.f32 %v2594_v58, %v2485_v52  ;;  %v2611_v50 = vmul.f32 %v2598_v59, %v2486_v57 }
 0x236   :  { %v2651_v51 = vrot.slane %v2586_v45, %v13608_v40  ;;  %v2655_v53 = vrot.slane %v2590_v46, %v13608_v40  ;;  %v2659_v54 = vrot.slane %v2594_v58, %v13608_v40  ;;  %v2663_v55 = vrot.slane %v2598_v59, %v13608_v40 }
 0x237   :  { %v2618_v56 = vcombine.low %v2608_v60, %v2609_v36  ;;  %v2619_v10 = vcombine.low %v2610_v49, %v2611_v50 }
 0x238   :  { %v2668_v61 = vmul.f32 %v2651_v51, %v13563_v15  ;;  %v2669_v62 = vmul.f32 %v2655_v53, %v13568_v48  ;;  %v2670_v31 = vmul.f32 %v2659_v54, %v13589_v21  ;;  %v2671_v47 = vmul.f32 %v2663_v55, %v13594_v26 }
 0x239   :  { %v2626_v52 = vrot.slane %v2618_v56, %v13601_v35  ;;  %v2633_v57 = vrot.slane %v2619_v10, %v13601_v35 }
 0x23b   :  { %v2634_v63 = vcombine.low %v2626_v52, %v2633_v57 }
 0x23d   :  { %v2642_v13 = vrot.slane %v2634_v63, 7 }
 0x23f   :  { %v2646_v15 = vsub.f32 %v13445_v0, %v2642_v13 }
 0x241   :  { %v2678_v48 = vrot.slane %v2646_v15, %v13633_v12  ;;  %v2682_v21 = vrot.slane %v2646_v15, %v13635_v14  ;;  %v2686_v26 = vrot.slane %v2646_v15, %v13637_v17  ;;  %v2690_v19 = vrot.slane %v2646_v15, %v13639_v18  ;;  %v11382_v27 = vpop.f32.mrf.mxu0 }
 0x242   :  { %v2446_v28 = vpop.f32.mrf.mxu1 }
 0x243   :  { %v2703_v32 = vrot.slane %v2678_v48, %v13633_v12  ;;  %v2707_v33 = vrot.slane %v2682_v21, %v13633_v12  ;;  %v2711_v25 = vrot.slane %v2686_v26, %v13633_v12  ;;  %v2715_v0 = vrot.slane %v2690_v19, %v13633_v12  ;;  %v11383_v34 = vpop.f32.mrf.mxu0 }
 0x244   :  { %v11534_v8 = vpop.f32.mrf.mxu1  ;;  %v11384_v45 = vadd.f32 %v11383_v34, %v11382_v27 }
 0x245   :  { %v2720_v37 = vadd.f32 %v2703_v32, %v2668_v61  ;;  %v2721_v9 = vadd.f32 %v2707_v33, %v2669_v62  ;;  %v2722_v38 = vadd.f32 %v2711_v25, %v2670_v31  ;;  %v2723_v41 = vadd.f32 %v2715_v0, %v2671_v47  ;;  %v11385_v16 = vpop.f32.mrf.mxu0 }
 0x246   :  { %v2449_v22 = vpop.f32.mrf.mxu1  ;;  %v2407_v58 = vadd.f32 %v11384_v45, %v2367_v44 }
 0x247   :  { %vm2725_vm1 = vcmp.ge.f32.partialorder %v2720_v37, 0.0  ;;  %vm2726_vm2 = vcmp.ge.f32.partialorder %v2721_v9, 0.0  ;;  %vm2727_vm3 = vcmp.ge.f32.partialorder %v2722_v38, 0.0  ;;  %vm2728_vm4 = vcmp.ge.f32.partialorder %v2723_v41, 0.0  ;;  %v11386_v59 = vpop.f32.mrf.mxu0 }
 0x248   :  { %v2730_v11 = vmul.f32 0.01, %v2720_v37  ;;  %v2731_v23 = vmul.f32 0.01, %v2721_v9  ;;  %v2732_v46 = vmul.f32 0.01, %v2722_v38  ;;  %v11535_v60 = vpop.f32.mrf.mxu1  ;;  %v2447_v53 = vadd.f32 %v2446_v28, %v2407_v58 }
 0x249   :  { %v2733_v36 = vmul.f32 0.01, %v2723_v41 }
 0x24a   :  { %v2735_v49 = vsel %vm2725_vm1, %v2720_v37, %v2730_v11  ;;  %v2736_v50 = vsel %vm2726_vm2, %v2721_v9, %v2731_v23  ;;  %v2737_v51 = vsel %vm2727_vm3, %v2722_v38, %v2732_v46  ;;  %v2476_v62 = vrot.slane %v2447_v53, 4 }
 0x24b   :  { %v2738_v54 = vsel %vm2728_vm4, %v2723_v41, %v2733_v36  ;;  %v13650_v55 = vpack.c.bf16 %v2735_v49, %v2735_v49  ;;  %v13652_v56 = vpack.c.bf16 %v2736_v50, %v2736_v50  ;;  %v13654_v10 = vpack.c.bf16 %v2737_v51, %v2737_v51 }
 0x24c   :  { %v13656_v61 = vpack.c.bf16 %v2738_v54, %v2738_v54  ;;  %v2492_v31 = vmul.f32 %v2447_v53, %v2447_v53  ;;  %v2477_v47 = vadd.f32 %v2476_v62, %v2447_v53 }
 0x24e   :  { %v2517_v52 = vrot.slane %v2492_v31, 4  ;;  %v2478_v57 = vrot.slane %v2477_v47, 2 }
 0x250   :  { %v2518_v63 = vadd.f32 %v2517_v52, %v2492_v31  ;;  %v2479_v13 = vadd.f32 %v2478_v57, %v2477_v47 }
 0x252   :  { %v2519_v15 = vrot.slane %v2518_v63, 2  ;;  %v2480_v48 = vrot.slane %v2479_v13, 1 }
 0x254   :  { %v2520_v21 = vadd.f32 %v2519_v15, %v2518_v63  ;;  %v2481_v26 = vadd.f32 %v2480_v48, %v2479_v13 }
 0x256   :  { %v2521_v19 = vrot.slane %v2520_v21, 1  ;;  %v2487_v20 = vmul.f32 0.125, %v2481_v26 }
 0x258   :  { %v2522_v24 = vadd.f32 %v2521_v19, %v2520_v21  ;;  %v2532_v28 = vmul.f32 %v2487_v20, %v2487_v20 }
 0x25a   :  { %v2527_v27 = vmul.f32 0.125, %v2522_v24 }
 0x25c   :  { %v2537_v32 = vsub.f32 %v2527_v27, %v2532_v28 }
 0x25e   :  { %v2542_v33 = vadd.f32 1e-05, %v2537_v32 }
 0x260   :  { %11971 = vrsqrt.f32 %v2542_v33 }
 0x26d   :  { %v11972_v25 = vpop.eup %11971 }
 0x26e   :  { %v2576_v0 = vrot.slane %v11972_v25, %v13601_v35 }
 0x270   :  { %v2580_v34 = vmul.f32 %v2576_v0, %v13447_v1 }
 0x272   :  { %v2602_v8 = vrot.slane %v2580_v34, %v13608_v40 }
 0x274   :  { %v2612_v37 = vmul.f32 %v2602_v8, %v2487_v20  ;;  %v2667_v44 = vrot.slane %v2602_v8, %v13608_v40 }
 0x276   :  { %v2641_v9 = vrot.slane %v2612_v37, %v13601_v35  ;;  %v2672_v16 = vmul.f32 %v2667_v44, %v2447_v53 }
 0x278   :  { %v2643_v38 = vrot.slane %v2641_v9, 7 }
 0x27a   :  { %v2647_v41 = vsub.f32 %v13447_v1, %v2643_v38 }
 0x27c   :  { %v2694_v45 = vrot.slane %v2647_v41, %v13633_v12 }
 0x27e   :  { %v2719_v22 = vrot.slane %v2694_v45, %v13633_v12 }
 0x280   :  { %v2724_v11 = vadd.f32 %v2719_v22, %v2672_v16 }
 0x282   :  { %vm2729_vm5 = vcmp.ge.f32.partialorder %v2724_v11, 0.0  ;;  %v2734_v23 = vmul.f32 0.01, %v2724_v11 }
 0x284   :  { %v2739_v46 = vsel %vm2729_vm5, %v2724_v11, %v2734_v23 }
 0x285   :  { %v13666_v58 = vpack.c.bf16 %v2739_v46, %v2739_v46 }
 0x286   :  { %13343 = dma.done.wait [#allocation10 + $0x1], 20480 }
 0x287   :  { %13344 = vsyncadd [#allocation10 + $0x1], 4294946816  ;;  %3741 = vmatprep.mubr.bf16.mxu0 %v13652_v56  ;;  %3782 = vmatprep.mubr.bf16.mxu1 %v13656_v61  ;;  %v11973_v59 = vld [vmem:[#allocation3 + $0xe4] ss:$16 sps:$4 sm:$0xff]   ;;  %v11977_v36 = vld [vmem:[#allocation3 + $0xe0] ss:$16 sps:$4 sm:$0xff]  }
 0x288   :  { %v11975_v60 = vld [vmem:[#allocation3 + $0x2e4] ss:$16 sps:$4 sm:$0xff]   ;;  %3709 = vmatprep.subr.bf16.mxu0 %v11973_v59  ;;  %v11978_v49 = vld [vmem:[#allocation3 + $0x2e0] ss:$16 sps:$4 sm:$0xff]   ;;  %vm4035_vm6 = vcmask 1045504  }
 0x289   :  { %3750 = vmatprep.subr.bf16.mxu1 %v11975_v60  ;;  %v11979_v50 = vld [vmem:[#allocation3 + $0xc4] ss:$16 sps:$4 sm:$0xff]   ;;  %3710 = vmatpush1.bf16.msra.mxu0 %v11977_v36  ;;  %v11983_v53 = vld [vmem:[#allocation3 + $0xc0] ss:$16 sps:$4 sm:$0xff]  }
 0x28a   :  { %3751 = vmatpush1.bf16.msra.mxu1 %v11978_v49  ;;  %v11981_v51 = vld [vmem:[#allocation3 + $0x2c4] ss:$16 sps:$4 sm:$0xff]   ;;  %3711 = vmatprep.subr.bf16.mxu0 %v11979_v50  ;;  %v11984_v54 = vld [vmem:[#allocation3 + $0x2c0] ss:$16 sps:$4 sm:$0xff]  }
 0x28b   :  { %3752 = vmatprep.subr.bf16.mxu1 %v11981_v51  ;;  %v11985_v62 = vld [vmem:[#allocation3 + $0xa4] ss:$16 sps:$4 sm:$0xff]   ;;  %v11989_v47 = vld [vmem:[#allocation3 + $0xa0] ss:$16 sps:$4 sm:$0xff]  }
 0x28c   :  { %v11987_v31 = vld [vmem:[#allocation3 + $0x2a4] ss:$16 sps:$4 sm:$0xff]   ;;  %v11990_v52 = vld [vmem:[#allocation3 + $0x2a0] ss:$16 sps:$4 sm:$0xff]  }
 0x28d   :  { %3712 = vmatpush1.bf16.msra.mxu0 %v11983_v53  ;;  %v11991_v57 = vld [vmem:[#allocation3 + $0x84] ss:$16 sps:$4 sm:$0xff]   ;;  %v11995_v13 = vld [vmem:[#allocation3 + $0x80] ss:$16 sps:$4 sm:$0xff]  }
 0x28e   :  { %3753 = vmatpush1.bf16.msra.mxu1 %v11984_v54  ;;  %3713 = vmatprep.subr.bf16.mxu0 %v11985_v62  ;;  %v11993_v63 = vld [vmem:[#allocation3 + $0x284] ss:$16 sps:$4 sm:$0xff]   ;;  %v11996_v15 = vld [vmem:[#allocation3 + $0x280] ss:$16 sps:$4 sm:$0xff]  }
 0x28f   :  { %3754 = vmatprep.subr.bf16.mxu1 %v11987_v31  ;;  %v11997_v48 = vld [vmem:[#allocation3 + $0x64] ss:$16 sps:$4 sm:$0xff]   ;;  %v12001_v26 = vld [vmem:[#allocation3 + $0x60] ss:$16 sps:$4 sm:$0xff]  }
 0x290   :  { %v11999_v21 = vld [vmem:[#allocation3 + $0x264] ss:$16 sps:$4 sm:$0xff]   ;;  %v12002_v19 = vld [vmem:[#allocation3 + $0x260] ss:$16 sps:$4 sm:$0xff]  }
 0x291   :  { %3714 = vmatpush1.bf16.msra.mxu0 %v11989_v47  ;;  %v12003_v20 = vld [vmem:[#allocation3 + $0x44] ss:$16 sps:$4 sm:$0xff]   ;;  %v12007_v27 = vld [vmem:[#allocation3 + $0x40] ss:$16 sps:$4 sm:$0xff]  }
 0x292   :  { %3755 = vmatpush1.bf16.msra.mxu1 %v11990_v52  ;;  %3715 = vmatprep.subr.bf16.mxu0 %v11991_v57  ;;  %v12005_v24 = vld [vmem:[#allocation3 + $0x244] ss:$16 sps:$4 sm:$0xff]   ;;  %v12008_v28 = vld [vmem:[#allocation3 + $0x240] ss:$16 sps:$4 sm:$0xff]  }
 0x293   :  { %3756 = vmatprep.subr.bf16.mxu1 %v11993_v63  ;;  %v12009_v32 = vld [vmem:[#allocation3 + $0x24] ss:$16 sps:$4 sm:$0xff]   ;;  %v12013_v25 = vld [vmem:[#allocation3 + $0x20] ss:$16 sps:$4 sm:$0xff]  }
 0x294   :  { %v12011_v33 = vld [vmem:[#allocation3 + $0x224] ss:$16 sps:$4 sm:$0xff]   ;;  %v12014_v0 = vld [vmem:[#allocation3 + $0x220] ss:$16 sps:$4 sm:$0xff]  }
 0x295   :  { %3716 = vmatpush1.bf16.msra.mxu0 %v11995_v13  ;;  %v12015_v34 = vld [vmem:[#allocation3 + $0x4] ss:$16 sps:$4 sm:$0xff]   ;;  %v12019_v37 = vld [vmem:[#allocation3] ss:$16 sps:$4 sm:$0xff]  }
 0x296   :  { %3757 = vmatpush1.bf16.msra.mxu1 %v11996_v15  ;;  %3717 = vmatprep.subr.bf16.mxu0 %v11997_v48  ;;  %v12017_v8 = vld [vmem:[#allocation3 + $0x204] ss:$16 sps:$4 sm:$0xff]   ;;  %v12020_v9 = vld [vmem:[#allocation3 + $0x200] ss:$16 sps:$4 sm:$0xff]  }
 0x297   :  { %3758 = vmatprep.subr.bf16.mxu1 %v11999_v21  ;;  %v12021_v38 = vld [vmem:[#allocation3 + $0x1e4] ss:$16 sps:$4 sm:$0xff]   ;;  %v12025_v44 = vld [vmem:[#allocation3 + $0x1e0] ss:$16 sps:$4 sm:$0xff]  }
 0x298   :  { %v12023_v41 = vld [vmem:[#allocation3 + $0x3e4] ss:$16 sps:$4 sm:$0xff]   ;;  %v12026_v45 = vld [vmem:[#allocation3 + $0x3e0] ss:$16 sps:$4 sm:$0xff]  }
 0x299   :  { %3718 = vmatpush1.bf16.msra.mxu0 %v12001_v26  ;;  %v12027_v16 = vld [vmem:[#allocation3 + $0x1c4] ss:$16 sps:$4 sm:$0xff]   ;;  %v12031_v11 = vld [vmem:[#allocation3 + $0x1c0] ss:$16 sps:$4 sm:$0xff]  }
 0x29a   :  { %3759 = vmatpush1.bf16.msra.mxu1 %v12002_v19  ;;  %3719 = vmatprep.subr.bf16.mxu0 %v12003_v20  ;;  %v12029_v22 = vld [vmem:[#allocation3 + $0x3c4] ss:$16 sps:$4 sm:$0xff]   ;;  %v12032_v23 = vld [vmem:[#allocation3 + $0x3c0] ss:$16 sps:$4 sm:$0xff]  }
 0x29b   :  { %3760 = vmatprep.subr.bf16.mxu1 %v12005_v24  ;;  %v12033_v46 = vld [vmem:[#allocation3 + $0x1a4] ss:$16 sps:$4 sm:$0xff]   ;;  %v12037_v60 = vld [vmem:[#allocation3 + $0x1a0] ss:$16 sps:$4 sm:$0xff]  }
 0x29c   :  { %v12035_v59 = vld [vmem:[#allocation3 + $0x3a4] ss:$16 sps:$4 sm:$0xff]   ;;  %v12038_v36 = vld [vmem:[#allocation3 + $0x3a0] ss:$16 sps:$4 sm:$0xff]  }
 0x29d   :  { %3720 = vmatpush1.bf16.msra.mxu0 %v12007_v27  ;;  %v12039_v49 = vld [vmem:[#allocation3 + $0x184] ss:$16 sps:$4 sm:$0xff]   ;;  %v12043_v51 = vld [vmem:[#allocation3 + $0x180] ss:$16 sps:$4 sm:$0xff]  }
 0x29e   :  { %3761 = vmatpush1.bf16.msra.mxu1 %v12008_v28  ;;  %3721 = vmatprep.subr.bf16.mxu0 %v12009_v32  ;;  %v12041_v50 = vld [vmem:[#allocation3 + $0x384] ss:$16 sps:$4 sm:$0xff]   ;;  %v12044_v53 = vld [vmem:[#allocation3 + $0x380] ss:$16 sps:$4 sm:$0xff]   ;;  %v12074_v32 = vld [vmem:[#allocation3 + $0xec] ss:$16 sps:$4 sm:$0xff]  }
 0x29f   :  { %3762 = vmatprep.subr.bf16.mxu1 %v12011_v33  ;;  %v12045_v54 = vld [vmem:[#allocation3 + $0x164] ss:$16 sps:$4 sm:$0xff]   ;;  %v12049_v31 = vld [vmem:[#allocation3 + $0x160] ss:$16 sps:$4 sm:$0xff]  }
 0x2a0   :  { %v12047_v62 = vld [vmem:[#allocation3 + $0x364] ss:$16 sps:$4 sm:$0xff]   ;;  %v12050_v47 = vld [vmem:[#allocation3 + $0x360] ss:$16 sps:$4 sm:$0xff]  }
 0x2a1   :  { %3722 = vmatpush1.bf16.msra.mxu0 %v12013_v25  ;;  %v12051_v52 = vld [vmem:[#allocation3 + $0x144] ss:$16 sps:$4 sm:$0xff]   ;;  %v12055_v63 = vld [vmem:[#allocation3 + $0x140] ss:$16 sps:$4 sm:$0xff]   ;;  %v12072_v25 = vld [vmem:[#allocation3 + $0xe8] ss:$16 sps:$4 sm:$0xff]  }
 0x2a2   :  { %3763 = vmatpush1.bf16.msra.mxu1 %v12014_v0  ;;  %3723 = vmatprep.subr.bf16.mxu0 %v12015_v34  ;;  %v12053_v57 = vld [vmem:[#allocation3 + $0x344] ss:$16 sps:$4 sm:$0xff]   ;;  %v12056_v13 = vld [vmem:[#allocation3 + $0x340] ss:$16 sps:$4 sm:$0xff]   ;;  %v12080_v34 = vld [vmem:[#allocation3 + $0xcc] ss:$16 sps:$4 sm:$0xff]  }
 0x2a3   :  { %3764 = vmatprep.subr.bf16.mxu1 %v12017_v8  ;;  %v12057_v15 = vld [vmem:[#allocation3 + $0x124] ss:$16 sps:$4 sm:$0xff]   ;;  %v12061_v21 = vld [vmem:[#allocation3 + $0x120] ss:$16 sps:$4 sm:$0xff]  }
 0x2a4   :  { %v12059_v48 = vld [vmem:[#allocation3 + $0x324] ss:$16 sps:$4 sm:$0xff]   ;;  %v12062_v26 = vld [vmem:[#allocation3 + $0x320] ss:$16 sps:$4 sm:$0xff]  }
 0x2a5   :  { %3724 = vmatpush1.bf16.msra.mxu0 %v12019_v37  ;;  %v12063_v19 = vld [vmem:[#allocation3 + $0x104] ss:$16 sps:$4 sm:$0xff]   ;;  %v12067_v24 = vld [vmem:[#allocation3 + $0x100] ss:$16 sps:$4 sm:$0xff]   ;;  %v12078_v37 = vld [vmem:[#allocation3 + $0xc8] ss:$16 sps:$4 sm:$0xff]  }
 0x2a6   :  { %3765 = vmatpush1.bf16.msra.mxu1 %v12020_v9  ;;  %3725 = vmatprep.subr.bf16.mxu0 %v12021_v38  ;;  %v12065_v20 = vld [vmem:[#allocation3 + $0x304] ss:$16 sps:$4 sm:$0xff]   ;;  %v12068_v27 = vld [vmem:[#allocation3 + $0x300] ss:$16 sps:$4 sm:$0xff]   ;;  %v12086_v38 = vld [vmem:[#allocation3 + $0xac] ss:$16 sps:$4 sm:$0xff]  }
 0x2a7   :  { %3766 = vmatprep.subr.bf16.mxu1 %v12023_v41  ;;  %v12071_v28 = vld [vmem:[#allocation3 + $0x4e4] ss:$16 sps:$4 sm:$0xff]   ;;  %v12069_v33 = vld [vmem:[#allocation3 + $0x4e0] ss:$16 sps:$4 sm:$0xff]  }
 0x2a8   :  { %v12077_v0 = vld [vmem:[#allocation3 + $0x4c4] ss:$16 sps:$4 sm:$0xff]   ;;  %v12075_v8 = vld [vmem:[#allocation3 + $0x4c0] ss:$16 sps:$4 sm:$0xff]  }
 0x2a9   :  { %3726 = vmatpush2.bf16.msra.mxu0 %v12025_v44  ;;  %v12083_v9 = vld [vmem:[#allocation3 + $0x4a4] ss:$16 sps:$4 sm:$0xff]   ;;  %v12081_v41 = vld [vmem:[#allocation3 + $0x4a0] ss:$16 sps:$4 sm:$0xff]   ;;  %v12084_v44 = vld [vmem:[#allocation3 + $0xa8] ss:$16 sps:$4 sm:$0xff]  }
 0x2aa   :  { %3767 = vmatpush2.bf16.msra.mxu1 %v12026_v45  ;;  %3727 = vmatprep.subr.bf16.mxu0 %v12027_v16  ;;  %v12089_v45 = vld [vmem:[#allocation3 + $0x484] ss:$16 sps:$4 sm:$0xff]   ;;  %v12092_v16 = vld [vmem:[#allocation3 + $0x8c] ss:$16 sps:$4 sm:$0xff]  }
 0x2ab   :  { %3768 = vmatprep.subr.bf16.mxu1 %v12029_v22  ;;  %v12087_v22 = vld [vmem:[#allocation3 + $0x480] ss:$16 sps:$4 sm:$0xff]  }
 0x2ad   :  { %3728 = vmatpush2.bf16.msra.mxu0 %v12031_v11  ;;  %v12090_v11 = vld [vmem:[#allocation3 + $0x88] ss:$16 sps:$4 sm:$0xff]  }
 0x2ae   :  { %3769 = vmatpush2.bf16.msra.mxu1 %v12032_v23  ;;  %3729 = vmatprep.subr.bf16.mxu0 %v12033_v46  ;;  %v12095_v23 = vld [vmem:[#allocation3 + $0x464] ss:$16 sps:$4 sm:$0xff]   ;;  %v12098_v46 = vld [vmem:[#allocation3 + $0x6c] ss:$16 sps:$4 sm:$0xff]  }
 0x2af   :  { %3770 = vmatprep.subr.bf16.mxu1 %v12035_v59  ;;  %v12093_v59 = vld [vmem:[#allocation3 + $0x460] ss:$16 sps:$4 sm:$0xff]  }
 0x2b1   :  { %3730 = vmatpush2.bf16.msra.mxu0 %v12037_v60  ;;  %v12096_v60 = vld [vmem:[#allocation3 + $0x68] ss:$16 sps:$4 sm:$0xff]  }
 0x2b2   :  { %3771 = vmatpush2.bf16.msra.mxu1 %v12038_v36  ;;  %3731 = vmatprep.subr.bf16.mxu0 %v12039_v49  ;;  %v12104_v36 = vld [vmem:[#allocation3 + $0x4c] ss:$16 sps:$4 sm:$0xff]   ;;  %v12099_v49 = vld [vmem:[#allocation3 + $0x440] ss:$16 sps:$4 sm:$0xff]  }
 0x2b3   :  { %3772 = vmatprep.subr.bf16.mxu1 %v12041_v50  ;;  %v12102_v50 = vld [vmem:[#allocation3 + $0x48] ss:$16 sps:$4 sm:$0xff]  }
 0x2b5   :  { %3732 = vmatpush2.bf16.msra.mxu0 %v12043_v51  ;;  %v12107_v51 = vld [vmem:[#allocation3 + $0x424] ss:$16 sps:$4 sm:$0xff]  }
 0x2b6   :  { %3773 = vmatpush2.bf16.msra.mxu1 %v12044_v53  ;;  %3733 = vmatprep.subr.bf16.mxu0 %v12045_v54  ;;  %v12110_v53 = vld [vmem:[#allocation3 + $0x2c] ss:$16 sps:$4 sm:$0xff]   ;;  %v12105_v54 = vld [vmem:[#allocation3 + $0x420] ss:$16 sps:$4 sm:$0xff]  }
 0x2b7   :  { %3774 = vmatprep.subr.bf16.mxu1 %v12047_v62  ;;  %v12108_v62 = vld [vmem:[#allocation3 + $0x28] ss:$16 sps:$4 sm:$0xff]  }
 0x2b9   :  { %3734 = vmatpush2.bf16.msra.mxu0 %v12049_v31  ;;  %v12113_v31 = vld [vmem:[#allocation3 + $0x404] ss:$16 sps:$4 sm:$0xff]  }
 0x2ba   :  { %3775 = vmatpush2.bf16.msra.mxu1 %v12050_v47  ;;  %3735 = vmatprep.subr.bf16.mxu0 %v12051_v52  ;;  %v12116_v47 = vld [vmem:[#allocation3 + $0xc] ss:$16 sps:$4 sm:$0xff]   ;;  %v12111_v52 = vld [vmem:[#allocation3 + $0x400] ss:$16 sps:$4 sm:$0xff]  }
 0x2bb   :  { %3776 = vmatprep.subr.bf16.mxu1 %v12053_v57  ;;  %v12114_v57 = vld [vmem:[#allocation3 + $0x8] ss:$16 sps:$4 sm:$0xff]  }
 0x2bd   :  { %3736 = vmatpush2.bf16.msra.mxu0 %v12055_v63  ;;  %v12119_v63 = vld [vmem:[#allocation3 + $0x1ec] ss:$16 sps:$4 sm:$0xff]  }
 0x2be   :  { %3777 = vmatpush2.bf16.msra.mxu1 %v12056_v13  ;;  %3737 = vmatprep.subr.bf16.mxu0 %v12057_v15  ;;  %v12122_v13 = vld [vmem:[#allocation3 + $0x2ec] ss:$16 sps:$4 sm:$0xff]   ;;  %v12117_v15 = vld [vmem:[#allocation3 + $0x1e8] ss:$16 sps:$4 sm:$0xff]  }
 0x2bf   :  { %3778 = vmatprep.subr.bf16.mxu1 %v12059_v48  ;;  %v12120_v48 = vld [vmem:[#allocation3 + $0x2e8] ss:$16 sps:$4 sm:$0xff]  }
 0x2c1   :  { %3738 = vmatpush2.bf16.msra.mxu0 %v12061_v21  ;;  %v12125_v21 = vld [vmem:[#allocation3 + $0x1cc] ss:$16 sps:$4 sm:$0xff]  }
 0x2c2   :  { %3779 = vmatpush2.bf16.msra.mxu1 %v12062_v26  ;;  %3739 = vmatprep.subr.bf16.mxu0 %v12063_v19  ;;  %v12128_v26 = vld [vmem:[#allocation3 + $0x2cc] ss:$16 sps:$4 sm:$0xff]   ;;  %v12123_v19 = vld [vmem:[#allocation3 + $0x1c8] ss:$16 sps:$4 sm:$0xff]  }
 0x2c3   :  { %3780 = vmatprep.subr.bf16.mxu1 %v12065_v20  ;;  %v12126_v20 = vld [vmem:[#allocation3 + $0x2c8] ss:$16 sps:$4 sm:$0xff]  }
 0x2c5   :  { %3740 = vmatpush2.bf16.msra.mxu0 %v12067_v24  ;;  %v12131_v24 = vld [vmem:[#allocation3 + $0x1ac] ss:$16 sps:$4 sm:$0xff]  }
 0x2c6   :  { %3781 = vmatpush2.bf16.msra.mxu1 %v12068_v27  ;;  %3791 = vmatprep.subr.bf16.mxu0 %v12071_v28  ;;  %v12134_v27 = vld [vmem:[#allocation3 + $0x2ac] ss:$16 sps:$4 sm:$0xff]   ;;  %v12129_v28 = vld [vmem:[#allocation3 + $0x1a8] ss:$16 sps:$4 sm:$0xff]  }
 0x2c7   :  { %3832 = vmatprep.subr.bf16.mxu1 %v12074_v32  ;;  %v12132_v32 = vld [vmem:[#allocation3 + $0x2a8] ss:$16 sps:$4 sm:$0xff]  }
 0x2c8   :  { %3742 = vmatmul.mubr.bf16.vlgmr.msra.gmra.mxu0 %v13650_v55 }
 0x2c9   :  { %3783 = vmatmul.mubr.bf16.vlgmr.msra.gmra.mxu1 %v13654_v10  ;;  %3792 = vmatpush1.bf16.msra.mxu0 %v12069_v33  ;;  %v12137_v33 = vld [vmem:[#allocation3 + $0x18c] ss:$16 sps:$4 sm:$0xff]  }
 0x2ca   :  { %3833 = vmatpush1.bf16.msra.mxu1 %v12072_v25  ;;  %3793 = vmatprep.subr.bf16.mxu0 %v12077_v0  ;;  %v12140_v25 = vld [vmem:[#allocation3 + $0x28c] ss:$16 sps:$4 sm:$0xff]   ;;  %v12135_v0 = vld [vmem:[#allocation3 + $0x188] ss:$16 sps:$4 sm:$0xff]  }
 0x2cb   :  { %3834 = vmatprep.subr.bf16.mxu1 %v12080_v34  ;;  %3823 = vmatprep.mubr.bf16.mxu0 %v13370_v39  ;;  %v12138_v34 = vld [vmem:[#allocation3 + $0x288] ss:$16 sps:$4 sm:$0xff]  }
 0x2cc   :  { %3864 = vmatprep.mubr.bf16.mxu1 %v13652_v56  ;;  %v12101_v56 = vld [vmem:[#allocation3 + $0x444] ss:$16 sps:$4 sm:$0xff]  }
 0x2cd   :  { %3794 = vmatpush1.bf16.msra.mxu0 %v12075_v8  ;;  %v12143_v8 = vld [vmem:[#allocation3 + $0x16c] ss:$16 sps:$4 sm:$0xff]  }
 0x2ce   :  { %3835 = vmatpush1.bf16.msra.mxu1 %v12078_v37  ;;  %3795 = vmatprep.subr.bf16.mxu0 %v12083_v9  ;;  %v12146_v37 = vld [vmem:[#allocation3 + $0x26c] ss:$16 sps:$4 sm:$0xff]   ;;  %v12141_v9 = vld [vmem:[#allocation3 + $0x168] ss:$16 sps:$4 sm:$0xff]  }
 0x2cf   :  { %3836 = vmatprep.subr.bf16.mxu1 %v12086_v38  ;;  %v12149_v38 = vld [vmem:[#allocation3 + $0x14c] ss:$16 sps:$4 sm:$0xff]  }
 0x2d1   :  { %3796 = vmatpush1.bf16.msra.mxu0 %v12081_v41  ;;  %v12152_v41 = vld [vmem:[#allocation3 + $0x24c] ss:$16 sps:$4 sm:$0xff]  }
 0x2d2   :  { %3837 = vmatpush1.bf16.msra.mxu1 %v12084_v44  ;;  %3797 = vmatprep.subr.bf16.mxu0 %v12089_v45  ;;  %v12147_v44 = vld [vmem:[#allocation3 + $0x148] ss:$16 sps:$4 sm:$0xff]  }
 0x2d3   :  { %3838 = vmatprep.subr.bf16.mxu1 %v12092_v16  ;;  %v12150_v45 = vld [vmem:[#allocation3 + $0x248] ss:$16 sps:$4 sm:$0xff]   ;;  %v12155_v16 = vld [vmem:[#allocation3 + $0x12c] ss:$16 sps:$4 sm:$0xff]  }
 0x2d5   :  { %3798 = vmatpush1.bf16.msra.mxu0 %v12087_v22  ;;  %v12158_v22 = vld [vmem:[#allocation3 + $0x22c] ss:$16 sps:$4 sm:$0xff]  }
 0x2d6   :  { %3839 = vmatpush1.bf16.msra.mxu1 %v12090_v11  ;;  %3799 = vmatprep.subr.bf16.mxu0 %v12095_v23  ;;  %v12153_v11 = vld [vmem:[#allocation3 + $0x128] ss:$16 sps:$4 sm:$0xff]  }
 0x2d7   :  { %3840 = vmatprep.subr.bf16.mxu1 %v12098_v46  ;;  %v12156_v23 = vld [vmem:[#allocation3 + $0x228] ss:$16 sps:$4 sm:$0xff]   ;;  %v12161_v46 = vld [vmem:[#allocation3 + $0x10c] ss:$16 sps:$4 sm:$0xff]  }
 0x2d9   :  { %3800 = vmatpush1.bf16.msra.mxu0 %v12093_v59  ;;  %v12164_v59 = vld [vmem:[#allocation3 + $0x20c] ss:$16 sps:$4 sm:$0xff]  }
 0x2da   :  { %3841 = vmatpush1.bf16.msra.mxu1 %v12096_v60  ;;  %3801 = vmatprep.subr.bf16.mxu0 %v12101_v56  ;;  %v12159_v60 = vld [vmem:[#allocation3 + $0x108] ss:$16 sps:$4 sm:$0xff]  }
 0x2db   :  { %3842 = vmatprep.subr.bf16.mxu1 %v12104_v36  ;;  %v12162_v56 = vld [vmem:[#allocation3 + $0x208] ss:$16 sps:$4 sm:$0xff]   ;;  %v12167_v36 = vld [vmem:[#allocation3 + $0x3ec] ss:$16 sps:$4 sm:$0xff]  }
 0x2dd   :  { %3802 = vmatpush1.bf16.msra.mxu0 %v12099_v49  ;;  %v12170_v49 = vld [vmem:[#allocation3 + $0x4ec] ss:$16 sps:$4 sm:$0xff]  }
 0x2de   :  { %3843 = vmatpush1.bf16.msra.mxu1 %v12102_v50  ;;  %3803 = vmatprep.subr.bf16.mxu0 %v12107_v51  ;;  %v12165_v50 = vld [vmem:[#allocation3 + $0x3e8] ss:$16 sps:$4 sm:$0xff]  }
 0x2df   :  { %3844 = vmatprep.subr.bf16.mxu1 %v12110_v53  ;;  %v12168_v51 = vld [vmem:[#allocation3 + $0x4e8] ss:$16 sps:$4 sm:$0xff]   ;;  %v12173_v53 = vld [vmem:[#allocation3 + $0x3cc] ss:$16 sps:$4 sm:$0xff]  }
 0x2e1   :  { %3804 = vmatpush1.bf16.msra.mxu0 %v12105_v54  ;;  %v12176_v54 = vld [vmem:[#allocation3 + $0x4cc] ss:$16 sps:$4 sm:$0xff]  }
 0x2e2   :  { %3845 = vmatpush1.bf16.msra.mxu1 %v12108_v62  ;;  %3805 = vmatprep.subr.bf16.mxu0 %v12113_v31  ;;  %v12171_v62 = vld [vmem:[#allocation3 + $0x3c8] ss:$16 sps:$4 sm:$0xff]  }
 0x2e3   :  { %3846 = vmatprep.subr.bf16.mxu1 %v12116_v47  ;;  %v12174_v31 = vld [vmem:[#allocation3 + $0x4c8] ss:$16 sps:$4 sm:$0xff]   ;;  %v12179_v47 = vld [vmem:[#allocation3 + $0x3ac] ss:$16 sps:$4 sm:$0xff]  }
 0x2e5   :  { %3806 = vmatpush1.bf16.msra.mxu0 %v12111_v52  ;;  %v12182_v52 = vld [vmem:[#allocation3 + $0x4ac] ss:$16 sps:$4 sm:$0xff]  }
 0x2e6   :  { %3847 = vmatpush1.bf16.msra.mxu1 %v12114_v57  ;;  %3873 = vmatprep.subr.bf16.mxu0 %v12122_v13  ;;  %v12177_v57 = vld [vmem:[#allocation3 + $0x3a8] ss:$16 sps:$4 sm:$0xff]   ;;  %v12185_v13 = vld [vmem:[#allocation3 + $0x38c] ss:$16 sps:$4 sm:$0xff]  }
 0x2e7   :  { %3848 = vmatprep.subr.bf16.mxu1 %v12119_v63  ;;  %v12180_v63 = vld [vmem:[#allocation3 + $0x4a8] ss:$16 sps:$4 sm:$0xff]  }
 0x2e8   :  { %3824 = vmatmul.mubr.bf16.vlgmr.msra.gmra.mxu0 %v13666_v58 }
 0x2e9   :  { %3874 = vmatpush1.bf16.msra.mxu0 %v12120_v48  ;;  %3905 = vmatprep.mubr.bf16.mxu0 %v13656_v61  ;;  %v12144_v61 = vld [vmem:[#allocation3 + $0x268] ss:$16 sps:$4 sm:$0xff]  }
 0x2ea   :  { %3849 = vmatpush2.bf16.msra.mxu1 %v12117_v15  ;;  %3875 = vmatprep.subr.bf16.mxu0 %v12128_v26  ;;  %v12188_v15 = vld [vmem:[#allocation3 + $0x48c] ss:$16 sps:$4 sm:$0xff]   ;;  %v12186_v48 = vld [vmem:[#allocation3 + $0x488] ss:$16 sps:$4 sm:$0xff]  }
 0x2eb   :  { %3850 = vmatprep.subr.bf16.mxu1 %v12125_v21  ;;  %v12191_v21 = vld [vmem:[#allocation3 + $0x36c] ss:$16 sps:$4 sm:$0xff]  }
 0x2ec   :  { %v12194_v26 = vld [vmem:[#allocation3 + $0x46c] ss:$16 sps:$4 sm:$0xff]  }
 0x2ed   :  { %3876 = vmatpush1.bf16.msra.mxu0 %v12126_v20  ;;  %v12192_v20 = vld [vmem:[#allocation3 + $0x468] ss:$16 sps:$4 sm:$0xff]  }
 0x2ee   :  { %3851 = vmatpush2.bf16.msra.mxu1 %v12123_v19  ;;  %3877 = vmatprep.subr.bf16.mxu0 %v12134_v27  ;;  %v12189_v19 = vld [vmem:[#allocation3 + $0x368] ss:$16 sps:$4 sm:$0xff]   ;;  %v12200_v27 = vld [vmem:[#allocation3 + $0x44c] ss:$16 sps:$4 sm:$0xff]  }
 0x2ef   :  { %3852 = vmatprep.subr.bf16.mxu1 %v12131_v24  ;;  %v12197_v24 = vld [vmem:[#allocation3 + $0x34c] ss:$16 sps:$4 sm:$0xff]  }
 0x2f1   :  { %3878 = vmatpush1.bf16.msra.mxu0 %v12132_v32  ;;  %v12198_v32 = vld [vmem:[#allocation3 + $0x448] ss:$16 sps:$4 sm:$0xff]  }
 0x2f2   :  { %3853 = vmatpush2.bf16.msra.mxu1 %v12129_v28  ;;  %3879 = vmatprep.subr.bf16.mxu0 %v12140_v25  ;;  %v12195_v28 = vld [vmem:[#allocation3 + $0x348] ss:$16 sps:$4 sm:$0xff]   ;;  %v12206_v25 = vld [vmem:[#allocation3 + $0x42c] ss:$16 sps:$4 sm:$0xff]  }
 0x2f3   :  { %3854 = vmatprep.subr.bf16.mxu1 %v12137_v33  ;;  %v12203_v33 = vld [vmem:[#allocation3 + $0x32c] ss:$16 sps:$4 sm:$0xff]  }
 0x2f5   :  { %3880 = vmatpush1.bf16.msra.mxu0 %v12138_v34  ;;  %v12204_v34 = vld [vmem:[#allocation3 + $0x428] ss:$16 sps:$4 sm:$0xff]  }
 0x2f6   :  { %3855 = vmatpush2.bf16.msra.mxu1 %v12135_v0  ;;  %3881 = vmatprep.subr.bf16.mxu0 %v12146_v37  ;;  %v12201_v0 = vld [vmem:[#allocation3 + $0x328] ss:$16 sps:$4 sm:$0xff]   ;;  %v12212_v37 = vld [vmem:[#allocation3 + $0x40c] ss:$16 sps:$4 sm:$0xff]  }
 0x2f7   :  { %3856 = vmatprep.subr.bf16.mxu1 %v12143_v8  ;;  %v12209_v8 = vld [vmem:[#allocation3 + $0x30c] ss:$16 sps:$4 sm:$0xff]  }
 0x2f9   :  { %3882 = vmatpush1.bf16.msra.mxu0 %v12144_v61  ;;  %v12210_v61 = vld [vmem:[#allocation3 + $0x408] ss:$16 sps:$4 sm:$0xff]  }
 0x2fa   :  { %3857 = vmatpush2.bf16.msra.mxu1 %v12141_v9  ;;  %3883 = vmatprep.subr.bf16.mxu0 %v12152_v41  ;;  %v12207_v9 = vld [vmem:[#allocation3 + $0x308] ss:$16 sps:$4 sm:$0xff]  }
 0x2fb   :  { %3858 = vmatprep.subr.bf16.mxu1 %v12149_v38 }
 0x2fd   :  { %3884 = vmatpush1.bf16.msra.mxu0 %v12150_v45 }
 0x2fe   :  { %3859 = vmatpush2.bf16.msra.mxu1 %v12147_v44  ;;  %3885 = vmatprep.subr.bf16.mxu0 %v12158_v22 }
 0x2ff   :  { %3860 = vmatprep.subr.bf16.mxu1 %v12155_v16 }
 0x301   :  { %3886 = vmatpush1.bf16.msra.mxu0 %v12156_v23 }
 0x302   :  { %3861 = vmatpush2.bf16.msra.mxu1 %v12153_v11  ;;  %3887 = vmatprep.subr.bf16.mxu0 %v12164_v59 }
 0x303   :  { %3862 = vmatprep.subr.bf16.mxu1 %v12161_v46 }
 0x305   :  { %3888 = vmatpush1.bf16.msra.mxu0 %v12162_v56 }
 0x306   :  { %3863 = vmatpush2.bf16.msra.mxu1 %v12159_v60  ;;  %3889 = vmatprep.subr.bf16.mxu0 %v12167_v36 }
 0x307   :  { %3914 = vmatprep.subr.bf16.mxu1 %v12170_v49 }
 0x309   :  { %3865 = vmatmul.mubr.bf16.vlgmr.msra.gmra.mxu1 %v13650_v55  ;;  %3890 = vmatpush2.bf16.msra.mxu0 %v12165_v50  ;;  %v12183_v55 = vld [vmem:[#allocation3 + $0x388] ss:$16 sps:$4 sm:$0xff]  }
 0x30a   :  { %3915 = vmatpush1.bf16.msra.mxu1 %v12168_v51  ;;  %3891 = vmatprep.subr.bf16.mxu0 %v12173_v53 }
 0x30b   :  { %3916 = vmatprep.subr.bf16.mxu1 %v12176_v54  ;;  %3946 = vmatprep.mubr.bf16.mxu1 %v13370_v39 }
 0x30d   :  { %3892 = vmatpush2.bf16.msra.mxu0 %v12171_v62 }
 0x30e   :  { %3917 = vmatpush1.bf16.msra.mxu1 %v12174_v31  ;;  %3893 = vmatprep.subr.bf16.mxu0 %v12179_v47 }
 0x30f   :  { %3918 = vmatprep.subr.bf16.mxu1 %v12182_v52 }
 0x311   :  { %3894 = vmatpush2.bf16.msra.mxu0 %v12177_v57 }
 0x312   :  { %3919 = vmatpush1.bf16.msra.mxu1 %v12180_v63  ;;  %3895 = vmatprep.subr.bf16.mxu0 %v12185_v13 }
 0x313   :  { %3920 = vmatprep.subr.bf16.mxu1 %v12188_v15 }
 0x315   :  { %3896 = vmatpush2.bf16.msra.mxu0 %v12183_v55 }
 0x316   :  { %3921 = vmatpush1.bf16.msra.mxu1 %v12186_v48  ;;  %3897 = vmatprep.subr.bf16.mxu0 %v12191_v21 }
 0x317   :  { %3922 = vmatprep.subr.bf16.mxu1 %v12194_v26 }
 0x319   :  { %3898 = vmatpush2.bf16.msra.mxu0 %v12189_v19 }
 0x31a   :  { %3923 = vmatpush1.bf16.msra.mxu1 %v12192_v20  ;;  %3899 = vmatprep.subr.bf16.mxu0 %v12197_v24 }
 0x31b   :  { %3924 = vmatprep.subr.bf16.mxu1 %v12200_v27 }
 0x31d   :  { %3900 = vmatpush2.bf16.msra.mxu0 %v12195_v28 }
 0x31e   :  { %3925 = vmatpush1.bf16.msra.mxu1 %v12198_v32  ;;  %3901 = vmatprep.subr.bf16.mxu0 %v12203_v33 }
 0x31f   :  { %3926 = vmatprep.subr.bf16.mxu1 %v12206_v25 }
 0x321   :  { %3902 = vmatpush2.bf16.msra.mxu0 %v12201_v0 }
 0x322   :  { %3927 = vmatpush1.bf16.msra.mxu1 %v12204_v34  ;;  %3903 = vmatprep.subr.bf16.mxu0 %v12209_v8 }
 0x323   :  { %3928 = vmatprep.subr.bf16.mxu1 %v12212_v37 }
 0x325   :  { %3904 = vmatpush2.bf16.msra.mxu0 %v12207_v9 }
 0x326   :  { %3929 = vmatpush1.bf16.msra.mxu1 %v12210_v61 }
 0x328   :  { %3906 = vmatmul.mubr.bf16.vlgmr.msra.gmra.mxu0 %v13654_v10 }
 0x329   :  { %3947 = vmatmul.mubr.bf16.vlgmr.msra.gmra.mxu1 %v13666_v58 }
 0x388   :  { %v3743_v38 = vpop.f32.mrf.mxu0 }
 0x389   :  { %v3784_v41 = vpop.f32.mrf.mxu1 }
 0x38a   :  { %v3785_v44 = vadd.f32 %v3784_v41, %v3743_v38  ;;  %v3745_v45 = vpop.f32.mrf.mxu0 }
 0x38b   :  { %v3786_v16 = vpop.f32.mrf.mxu1 }
 0x38c   :  { %v3787_v22 = vadd.f32 %v3786_v16, %v3745_v45  ;;  %v3747_v11 = vpop.f32.mrf.mxu0 }
 0x38d   :  { %v3788_v23 = vpop.f32.mrf.mxu1 }
 0x38e   :  { %v3748_v46 = vpop.f32.mrf.mxu0 }
 0x38f   :  { %v3789_v59 = vpop.f32.mrf.mxu1 }
 0x3a8   :  { %v3825_v60 = vpop.f32.mrf.mxu0 }
 0x3a9   :  { %v13680_v56 = vadd.f32 %v3825_v60, %v3785_v44 }
 0x3aa   :  { %v3827_v36 = vpop.f32.mrf.mxu0 }
 0x3ab   :  { %v3955_v49 = vrot.slane %v13680_v56, 4  ;;  %v3983_v10 = vmul.f32 %v13680_v56, %v13680_v56  ;;  %v13685_v58 = vadd.f32 %v3827_v36, %v3787_v22 }
 0x3ac   :  { %v3829_v50 = vpop.f32.mrf.mxu0 }
 0x3ad   :  { %v3956_v51 = vadd.f32 %v3955_v49, %v13680_v56  ;;  %v3987_v53 = vrot.slane %v3983_v10, 4  ;;  %v3961_v54 = vrot.slane %v13685_v58, 4  ;;  %v3984_v62 = vmul.f32 %v13685_v58, %v13685_v58 }
 0x3ae   :  { %v3830_v31 = vpop.f32.mrf.mxu0 }
 0x3af   :  { %v3957_v47 = vrot.slane %v3956_v51, 2  ;;  %v3988_v52 = vadd.f32 %v3987_v53, %v3983_v10  ;;  %v3962_v57 = vadd.f32 %v3961_v54, %v13685_v58  ;;  %v3993_v63 = vrot.slane %v3984_v62, 4 }
 0x3b1   :  { %v3958_v13 = vadd.f32 %v3957_v47, %v3956_v51  ;;  %v3989_v15 = vrot.slane %v3988_v52, 2  ;;  %v3963_v55 = vrot.slane %v3962_v57, 2  ;;  %v3994_v48 = vadd.f32 %v3993_v63, %v3984_v62 }
 0x3b3   :  { %v3959_v21 = vrot.slane %v3958_v13, 1  ;;  %v3990_v26 = vadd.f32 %v3989_v15, %v3988_v52  ;;  %v3964_v19 = vadd.f32 %v3963_v55, %v3962_v57  ;;  %v3995_v20 = vrot.slane %v3994_v48, 2 }
 0x3b5   :  { %v3960_v24 = vadd.f32 %v3959_v21, %v3958_v13  ;;  %v3991_v27 = vrot.slane %v3990_v26, 1  ;;  %v3965_v28 = vrot.slane %v3964_v19, 1  ;;  %v3996_v32 = vadd.f32 %v3995_v20, %v3994_v48 }
 0x3b7   :  { %v13692_v33 = vmul.f32 0.125, %v3960_v24  ;;  %v3992_v25 = vadd.f32 %v3991_v27, %v3990_v26  ;;  %v3966_v0 = vadd.f32 %v3965_v28, %v3964_v19  ;;  %v3997_v34 = vrot.slane %v3996_v32, 1 }
 0x3b9   :  { %v4011_v8 = vmul.f32 0.125, %v3992_v25  ;;  %v4015_v37 = vmul.f32 %v13692_v33, %v13692_v33  ;;  %v13696_v9 = vmul.f32 0.125, %v3966_v0  ;;  %v3998_v61 = vadd.f32 %v3997_v34, %v3996_v32 }
 0x3bb   :  { %v4019_v38 = vsub.f32 %v4011_v8, %v4015_v37  ;;  %v4012_v41 = vmul.f32 0.125, %v3998_v61  ;;  %v4016_v44 = vmul.f32 %v13696_v9, %v13696_v9 }
 0x3bd   :  { %v4023_v45 = vadd.f32 1e-05, %v4019_v38  ;;  %v4020_v16 = vsub.f32 %v4012_v41, %v4016_v44 }
 0x3bf   :  { %v4024_v22 = vadd.f32 1e-05, %v4020_v16  ;;  %12213 = vrsqrt.f32 %v4023_v45 }
 0x3c1   :  { %12215 = vrsqrt.f32 %v4024_v22 }
 0x3c9   :  { %v3866_v11 = vpop.f32.mrf.mxu1 }
 0x3cb   :  { %v3868_v23 = vpop.f32.mrf.mxu1 }
 0x3cc   :  { %v12214_v59 = vpop.eup %12213 }
 0x3cd   :  { %v3870_v46 = vpop.f32.mrf.mxu1 }
 0x3ce   :  { %v12216_v60 = vpop.eup %12215 }
 0x3cf   :  { %v3871_v36 = vpop.f32.mrf.mxu1  ;;  %v4042_v49 = vcombine.low %v12214_v59, %v12216_v60 }
 0x3e8   :  { %v3907_v10 = vpop.f32.mrf.mxu0 }
 0x3e9   :  { %v3948_v50 = vpop.f32.mrf.mxu1  ;;  %v3908_v51 = vadd.f32 %v3907_v10, %v3866_v11 }
 0x3ea   :  { %v3909_v53 = vpop.f32.mrf.mxu0 }
 0x3eb   :  { %v3950_v54 = vpop.f32.mrf.mxu1  ;;  %v13700_v62 = vadd.f32 %v3948_v50, %v3908_v51  ;;  %v3910_v31 = vadd.f32 %v3909_v53, %v3868_v23 }
 0x3ec   :  { %v3911_v47 = vpop.f32.mrf.mxu0 }
 0x3ed   :  { %v3952_v52 = vpop.f32.mrf.mxu1  ;;  %v3967_v57 = vrot.slane %v13700_v62, 4  ;;  %v3985_v63 = vmul.f32 %v13700_v62, %v13700_v62  ;;  %v13705_v13 = vadd.f32 %v3950_v54, %v3910_v31 }
 0x3ee   :  { %v3912_v15 = vpop.f32.mrf.mxu0 }
 0x3ef   :  { %v3953_v55 = vpop.f32.mrf.mxu1  ;;  %v3968_v48 = vadd.f32 %v3967_v57, %v13700_v62  ;;  %v3999_v21 = vrot.slane %v3985_v63, 4  ;;  %v3973_v26 = vrot.slane %v13705_v13, 4  ;;  %v3986_v19 = vmul.f32 %v13705_v13, %v13705_v13 }
 0x3f0   :  { %v13714_v15 = vrot.slane %v13449_v2, 2 }
 0x3f1   :  { %v3969_v20 = vrot.slane %v3968_v48, 2  ;;  %v4000_v24 = vadd.f32 %v3999_v21, %v3985_v63  ;;  %v3974_v27 = vadd.f32 %v3973_v26, %v13705_v13  ;;  %v4005_v28 = vrot.slane %v3986_v19, 4 }
 0x3f2   :  { %v4033_v63 = vrot.slane %v13447_v1, 2 }
 0x3f3   :  { %v3970_v32 = vadd.f32 %v3969_v20, %v3968_v48  ;;  %v4001_v25 = vrot.slane %v4000_v24, 2  ;;  %v3975_v0 = vrot.slane %v3974_v27, 2  ;;  %v4006_v34 = vadd.f32 %v4005_v28, %v3986_v19 }
 0x3f4   :  { %v4050_v48 = vrot.slane %v4042_v49, %v13601_v35  ;;  %v4036_v26 = vsel %vm4035_vm6, %v4033_v63, %v13714_v15 }
 0x3f5   :  { %v3971_v8 = vrot.slane %v3970_v32, 1  ;;  %v4002_v37 = vadd.f32 %v4001_v25, %v4000_v24  ;;  %v3976_v61 = vadd.f32 %v3975_v0, %v3974_v27  ;;  %v4007_v38 = vrot.slane %v4006_v34, 2 }
 0x3f7   :  { %v3972_v41 = vadd.f32 %v3971_v8, %v3970_v32  ;;  %v4003_v44 = vrot.slane %v4002_v37, 1  ;;  %v3977_v45 = vrot.slane %v3976_v61, 1  ;;  %v4008_v16 = vadd.f32 %v4007_v38, %v4006_v34 }
 0x3f9   :  { %v3981_v22 = vmul.f32 0.125, %v3972_v41  ;;  %v4004_v11 = vadd.f32 %v4003_v44, %v4002_v37  ;;  %v3978_v23 = vadd.f32 %v3977_v45, %v3976_v61  ;;  %v4009_v46 = vrot.slane %v4008_v16, 1 }
 0x3fb   :  { %v4013_v59 = vmul.f32 0.125, %v4004_v11  ;;  %v4017_v60 = vmul.f32 %v3981_v22, %v3981_v22  ;;  %v3982_v36 = vmul.f32 0.125, %v3978_v23  ;;  %v4010_v10 = vadd.f32 %v4009_v46, %v4008_v16 }
 0x3fd   :  { %v4021_v50 = vsub.f32 %v4013_v59, %v4017_v60  ;;  %v4014_v51 = vmul.f32 0.125, %v4010_v10  ;;  %v4018_v53 = vmul.f32 %v3982_v36, %v3982_v36 }
 0x3ff   :  { %v4025_v54 = vadd.f32 1e-05, %v4021_v50  ;;  %v4022_v31 = vsub.f32 %v4014_v51, %v4018_v53 }
 0x401   :  { %v4026_v47 = vadd.f32 1e-05, %v4022_v31  ;;  %12217 = vrsqrt.f32 %v4025_v54 }
 0x403   :  { %12219 = vrsqrt.f32 %v4026_v47 }
 0x40e   :  { %v12218_v52 = vpop.eup %12217 }
 0x410   :  { %v12220_v57 = vpop.eup %12219 }
 0x411   :  { %v4043_v55 = vcombine.low %v12218_v52, %v12220_v57 }
 0x413   :  { %v4057_v21 = vrot.slane %v4043_v55, %v13601_v35 }
 0x415   :  { %v4058_v19 = vcombine.low %v4050_v48, %v4057_v21 }
 0x417   :  { %v4060_v20 = vmul.f32 %v4058_v19, %v4036_v26 }
 0x419   :  { %v4065_v24 = vrot.slane %v4060_v20, %v13608_v40  ;;  %v4069_v27 = vrot.slane %v4060_v20, %v13610_v30  ;;  %v4073_v28 = vrot.slane %v4060_v20, %v13612_v42  ;;  %v4077_v1 = vrot.slane %v4060_v20, %v13614_v43 }
 0x41b   :  { %v4082_v32 = vmul.f32 %v4065_v24, %v13692_v33  ;;  %v4083_v25 = vmul.f32 %v4069_v27, %v13696_v9  ;;  %v4084_v0 = vmul.f32 %v4073_v28, %v3981_v22  ;;  %v4085_v49 = vmul.f32 %v4077_v1, %v3982_v36 }
 0x41c   :  { %v4113_v34 = vrot.slane %v4065_v24, %v13608_v40  ;;  %v4117_v8 = vrot.slane %v4069_v27, %v13608_v40  ;;  %v4121_v9 = vrot.slane %v4073_v28, %v13608_v40  ;;  %v4125_v22 = vrot.slane %v4077_v1, %v13608_v40 }
 0x41d   :  { %v4090_v37 = vcombine.low %v4082_v32, %v4083_v25  ;;  %v4091_v61 = vcombine.low %v4084_v0, %v4085_v49 }
 0x41e   :  { %v4126_v38 = vmul.f32 %v4113_v34, %v13680_v56  ;;  %v4127_v41 = vmul.f32 %v4117_v8, %v13685_v58  ;;  %v4128_v58 = vmul.f32 %v4121_v9, %v13700_v62  ;;  %v4129_v60 = vmul.f32 %v4125_v22, %v13705_v13 }
 0x41f   :  { %v4098_v44 = vrot.slane %v4090_v37, %v13601_v35  ;;  %v4105_v45 = vrot.slane %v4091_v61, %v13601_v35 }
 0x421   :  { %v4106_v16 = vcombine.low %v4098_v44, %v4105_v45 }
 0x423   :  { %v4107_v33 = vrot.slane %v4106_v16, 7 }
 0x425   :  { %v4109_v11 = vsub.f32 %v4036_v26, %v4107_v33 }
 0x427   :  { %v4134_v23 = vrot.slane %v4109_v11, %v13633_v12  ;;  %v4138_v46 = vrot.slane %v4109_v11, %v13635_v14  ;;  %v4142_v59 = vrot.slane %v4109_v11, %v13637_v17  ;;  %v4146_v56 = vrot.slane %v4109_v11, %v13639_v18 }
 0x429   :  { %v4154_v36 = vrot.slane %v4134_v23, %v13633_v12  ;;  %v4158_v10 = vrot.slane %v4138_v46, %v13633_v12  ;;  %v4162_v50 = vrot.slane %v4142_v59, %v13633_v12  ;;  %v4166_v51 = vrot.slane %v4146_v56, %v13633_v12 }
 0x42b   :  { %v4167_v53 = vadd.f32 %v4154_v36, %v4126_v38  ;;  %v4168_v54 = vadd.f32 %v4158_v10, %v4127_v41  ;;  %v4169_v31 = vadd.f32 %v4162_v50, %v4128_v58  ;;  %v4170_v47 = vadd.f32 %v4166_v51, %v4129_v60 }
 0x42d   :  { %vm4171_vm7 = vcmp.ge.f32.partialorder %v4167_v53, 0.0  ;;  %vm4172_vm8 = vcmp.ge.f32.partialorder %v4168_v54, 0.0  ;;  %vm4173_vm9 = vcmp.ge.f32.partialorder %v4169_v31, 0.0  ;;  %vm4174_vm10 = vcmp.ge.f32.partialorder %v4170_v47, 0.0 }
 0x42e   :  { %v4175_v52 = vmul.f32 0.01, %v4167_v53  ;;  %v4176_v62 = vmul.f32 0.01, %v4168_v54  ;;  %v4177_v57 = vmul.f32 0.01, %v4169_v31 }
 0x42f   :  { %v4178_v13 = vmul.f32 0.01, %v4170_v47 }
 0x430   :  { %v13743_v63 = vsel %vm4171_vm7, %v4167_v53, %v4175_v52  ;;  %v4180_v55 = vsel %vm4172_vm8, %v4168_v54, %v4176_v62  ;;  %v13745_v48 = vsel %vm4173_vm9, %v4169_v31, %v4177_v57 }
 0x431   :  { %v4182_v21 = vsel %vm4174_vm10, %v4170_v47, %v4178_v13  ;;  %v4183_v26 = vpack.c.bf16 %v13743_v63, %v13743_v63  ;;  %v4184_v19 = vpack.c.bf16 %v4180_v55, %v4180_v55  ;;  %v4185_v20 = vpack.c.bf16 %v13745_v48, %v13745_v48 }
 0x432   :  { %v4186_v24 = vpack.c.bf16 %v4182_v21, %v4182_v21 }
 0x433   :  { %13345 = dma.done.wait [#allocation10 + $0x2], 8192 }
 0x434   :  { %13346 = vsyncadd [#allocation10 + $0x2], 4294959104  ;;  %4607 = vmatprep.mubr.bf16.mxu0 %v4184_v19  ;;  %4648 = vmatprep.mubr.bf16.mxu1 %v4186_v24  ;;  %v12221_v27 = vld [vmem:[#allocation4 + $0x74] ss:$8 sps:$4 sm:$0xff]   ;;  %v12225_v1 = vld [vmem:[#allocation4 + $0x70] ss:$8 sps:$4 sm:$0xff]  }
 0x435   :  { %v12223_v28 = vld [vmem:[#allocation4 + $0x174] ss:$8 sps:$4 sm:$0xff]   ;;  %4575 = vmatprep.subr.bf16.mxu0 %v12221_v27  ;;  %v12226_v32 = vld [vmem:[#allocation4 + $0x170] ss:$8 sps:$4 sm:$0xff]   ;;  %v12227_v25 = vld [vmem:[#allocation4 + $0x64] ss:$8 sps:$4 sm:$0xff]  }
 0x436   :  { %4616 = vmatprep.subr.bf16.mxu1 %v12223_v28  ;;  %4576 = vmatpush1.bf16.msra.mxu0 %v12225_v1  ;;  %v12229_v0 = vld [vmem:[#allocation4 + $0x164] ss:$8 sps:$4 sm:$0xff]   ;;  %v12231_v49 = vld [vmem:[#allocation4 + $0x60] ss:$8 sps:$4 sm:$0xff]   ;;  %v12233_v8 = vld [vmem:[#allocation4 + $0x54] ss:$8 sps:$4 sm:$0xff]  }
 0x437   :  { %4617 = vmatpush1.bf16.msra.mxu1 %v12226_v32  ;;  %4577 = vmatprep.subr.bf16.mxu0 %v12227_v25  ;;  %v12232_v34 = vld [vmem:[#allocation4 + $0x160] ss:$8 sps:$4 sm:$0xff]   ;;  %v12235_v37 = vld [vmem:[#allocation4 + $0x154] ss:$8 sps:$4 sm:$0xff]   ;;  %v12237_v61 = vld [vmem:[#allocation4 + $0x50] ss:$8 sps:$4 sm:$0xff]  }
 0x438   :  { %4618 = vmatprep.subr.bf16.mxu1 %v12229_v0  ;;  %v12238_v38 = vld [vmem:[#allocation4 + $0x150] ss:$8 sps:$4 sm:$0xff]   ;;  %v12239_v41 = vld [vmem:[#allocation4 + $0x44] ss:$8 sps:$4 sm:$0xff]   ;;  %v12243_v45 = vld [vmem:[#allocation4 + $0x40] ss:$8 sps:$4 sm:$0xff]  }
 0x439   :  { %v12241_v44 = vld [vmem:[#allocation4 + $0x144] ss:$8 sps:$4 sm:$0xff]   ;;  %v12244_v16 = vld [vmem:[#allocation4 + $0x140] ss:$8 sps:$4 sm:$0xff]   ;;  %v12245_v33 = vld [vmem:[#allocation4 + $0x34] ss:$8 sps:$4 sm:$0xff]  }
 0x43a   :  { %4578 = vmatpush1.bf16.msra.mxu0 %v12231_v49  ;;  %v12247_v9 = vld [vmem:[#allocation4 + $0x134] ss:$8 sps:$4 sm:$0xff]   ;;  %v12249_v22 = vld [vmem:[#allocation4 + $0x30] ss:$8 sps:$4 sm:$0xff]   ;;  %v12251_v23 = vld [vmem:[#allocation4 + $0x24] ss:$8 sps:$4 sm:$0xff]  }
 0x43b   :  { %4619 = vmatpush1.bf16.msra.mxu1 %v12232_v34  ;;  %4579 = vmatprep.subr.bf16.mxu0 %v12233_v8  ;;  %v12250_v11 = vld [vmem:[#allocation4 + $0x130] ss:$8 sps:$4 sm:$0xff]   ;;  %v12253_v46 = vld [vmem:[#allocation4 + $0x124] ss:$8 sps:$4 sm:$0xff]   ;;  %v12255_v59 = vld [vmem:[#allocation4 + $0x20] ss:$8 sps:$4 sm:$0xff]  }
 0x43c   :  { %4620 = vmatprep.subr.bf16.mxu1 %v12235_v37  ;;  %v12256_v56 = vld [vmem:[#allocation4 + $0x120] ss:$8 sps:$4 sm:$0xff]   ;;  %v12257_v58 = vld [vmem:[#allocation4 + $0x14] ss:$8 sps:$4 sm:$0xff]   ;;  %v12261_v36 = vld [vmem:[#allocation4 + $0x10] ss:$8 sps:$4 sm:$0xff]  }
 0x43d   :  { %v12259_v60 = vld [vmem:[#allocation4 + $0x114] ss:$8 sps:$4 sm:$0xff]   ;;  %v12262_v10 = vld [vmem:[#allocation4 + $0x110] ss:$8 sps:$4 sm:$0xff]   ;;  %v12263_v50 = vld [vmem:[#allocation4 + $0x4] ss:$8 sps:$4 sm:$0xff]  }
 0x43e   :  { %4580 = vmatpush1.bf16.msra.mxu0 %v12237_v61  ;;  %v12265_v51 = vld [vmem:[#allocation4 + $0x104] ss:$8 sps:$4 sm:$0xff]   ;;  %v12267_v53 = vld [vmem:[#allocation4] ss:$8 sps:$4 sm:$0xff]   ;;  %v12269_v31 = vld [vmem:[#allocation4 + $0xf4] ss:$8 sps:$4 sm:$0xff]  }
 0x43f   :  { %4621 = vmatpush1.bf16.msra.mxu1 %v12238_v38  ;;  %4581 = vmatprep.subr.bf16.mxu0 %v12239_v41  ;;  %v12268_v54 = vld [vmem:[#allocation4 + $0x100] ss:$8 sps:$4 sm:$0xff]   ;;  %v12271_v47 = vld [vmem:[#allocation4 + $0x1f4] ss:$8 sps:$4 sm:$0xff]   ;;  %v12273_v52 = vld [vmem:[#allocation4 + $0xf0] ss:$8 sps:$4 sm:$0xff]  }
 0x440   :  { %4622 = vmatprep.subr.bf16.mxu1 %v12241_v44  ;;  %v12274_v62 = vld [vmem:[#allocation4 + $0x1f0] ss:$8 sps:$4 sm:$0xff]   ;;  %v12275_v57 = vld [vmem:[#allocation4 + $0xe4] ss:$8 sps:$4 sm:$0xff]   ;;  %v12279_v55 = vld [vmem:[#allocation4 + $0xe0] ss:$8 sps:$4 sm:$0xff]  }
 0x441   :  { %v12277_v13 = vld [vmem:[#allocation4 + $0x1e4] ss:$8 sps:$4 sm:$0xff]   ;;  %v12280_v21 = vld [vmem:[#allocation4 + $0x1e0] ss:$8 sps:$4 sm:$0xff]   ;;  %v12281_v19 = vld [vmem:[#allocation4 + $0xd4] ss:$8 sps:$4 sm:$0xff]  }
 0x442   :  { %4582 = vmatpush1.bf16.msra.mxu0 %v12243_v45  ;;  %v12283_v24 = vld [vmem:[#allocation4 + $0x1d4] ss:$8 sps:$4 sm:$0xff]   ;;  %v12285_v27 = vld [vmem:[#allocation4 + $0xd0] ss:$8 sps:$4 sm:$0xff]   ;;  %v12287_v1 = vld [vmem:[#allocation4 + $0xc4] ss:$8 sps:$4 sm:$0xff]  }
 0x443   :  { %4623 = vmatpush1.bf16.msra.mxu1 %v12244_v16  ;;  %4583 = vmatprep.subr.bf16.mxu0 %v12245_v33  ;;  %v12286_v28 = vld [vmem:[#allocation4 + $0x1d0] ss:$8 sps:$4 sm:$0xff]   ;;  %v12289_v32 = vld [vmem:[#allocation4 + $0x1c4] ss:$8 sps:$4 sm:$0xff]   ;;  %v12291_v25 = vld [vmem:[#allocation4 + $0xc0] ss:$8 sps:$4 sm:$0xff]  }
 0x444   :  { %4624 = vmatprep.subr.bf16.mxu1 %v12247_v9  ;;  %v12292_v0 = vld [vmem:[#allocation4 + $0x1c0] ss:$8 sps:$4 sm:$0xff]   ;;  %v12293_v49 = vld [vmem:[#allocation4 + $0xb4] ss:$8 sps:$4 sm:$0xff]   ;;  %v12297_v8 = vld [vmem:[#allocation4 + $0xb0] ss:$8 sps:$4 sm:$0xff]  }
 0x445   :  { %v12295_v34 = vld [vmem:[#allocation4 + $0x1b4] ss:$8 sps:$4 sm:$0xff]   ;;  %v12298_v37 = vld [vmem:[#allocation4 + $0x1b0] ss:$8 sps:$4 sm:$0xff]   ;;  %v12299_v61 = vld [vmem:[#allocation4 + $0xa4] ss:$8 sps:$4 sm:$0xff]  }
 0x446   :  { %4584 = vmatpush1.bf16.msra.mxu0 %v12249_v22  ;;  %v12301_v38 = vld [vmem:[#allocation4 + $0x1a4] ss:$8 sps:$4 sm:$0xff]   ;;  %v12303_v41 = vld [vmem:[#allocation4 + $0xa0] ss:$8 sps:$4 sm:$0xff]   ;;  %v12305_v45 = vld [vmem:[#allocation4 + $0x94] ss:$8 sps:$4 sm:$0xff]  }
 0x447   :  { %4625 = vmatpush1.bf16.msra.mxu1 %v12250_v11  ;;  %4585 = vmatprep.subr.bf16.mxu0 %v12251_v23  ;;  %v12304_v44 = vld [vmem:[#allocation4 + $0x1a0] ss:$8 sps:$4 sm:$0xff]   ;;  %v12307_v16 = vld [vmem:[#allocation4 + $0x194] ss:$8 sps:$4 sm:$0xff]   ;;  %v12309_v33 = vld [vmem:[#allocation4 + $0x90] ss:$8 sps:$4 sm:$0xff]  }
 0x448   :  { %4626 = vmatprep.subr.bf16.mxu1 %v12253_v46  ;;  %v12310_v9 = vld [vmem:[#allocation4 + $0x190] ss:$8 sps:$4 sm:$0xff]   ;;  %v12311_v22 = vld [vmem:[#allocation4 + $0x84] ss:$8 sps:$4 sm:$0xff]   ;;  %v12315_v23 = vld [vmem:[#allocation4 + $0x80] ss:$8 sps:$4 sm:$0xff]  }
 0x449   :  { %v12313_v11 = vld [vmem:[#allocation4 + $0x184] ss:$8 sps:$4 sm:$0xff]   ;;  %v12316_v46 = vld [vmem:[#allocation4 + $0x180] ss:$8 sps:$4 sm:$0xff]  }
 0x44a   :  { %4586 = vmatpush1.bf16.msra.mxu0 %v12255_v59 }
 0x44b   :  { %4627 = vmatpush1.bf16.msra.mxu1 %v12256_v56  ;;  %4587 = vmatprep.subr.bf16.mxu0 %v12257_v58 }
 0x44c   :  { %4628 = vmatprep.subr.bf16.mxu1 %v12259_v60 }
 0x44e   :  { %4588 = vmatpush1.bf16.msra.mxu0 %v12261_v36 }
 0x44f   :  { %4629 = vmatpush1.bf16.msra.mxu1 %v12262_v10  ;;  %4589 = vmatprep.subr.bf16.mxu0 %v12263_v50 }
 0x450   :  { %4630 = vmatprep.subr.bf16.mxu1 %v12265_v51 }
 0x452   :  { %4590 = vmatpush1.bf16.msra.mxu0 %v12267_v53 }
 0x453   :  { %4631 = vmatpush1.bf16.msra.mxu1 %v12268_v54  ;;  %4591 = vmatprep.subr.bf16.mxu0 %v12269_v31 }
 0x454   :  { %4632 = vmatprep.subr.bf16.mxu1 %v12271_v47 }
 0x456   :  { %4592 = vmatpush2.bf16.msra.mxu0 %v12273_v52 }
 0x457   :  { %4633 = vmatpush2.bf16.msra.mxu1 %v12274_v62  ;;  %4593 = vmatprep.subr.bf16.mxu0 %v12275_v57 }
 0x458   :  { %4634 = vmatprep.subr.bf16.mxu1 %v12277_v13 }
 0x45a   :  { %4594 = vmatpush2.bf16.msra.mxu0 %v12279_v55 }
 0x45b   :  { %4635 = vmatpush2.bf16.msra.mxu1 %v12280_v21  ;;  %4595 = vmatprep.subr.bf16.mxu0 %v12281_v19 }
 0x45c   :  { %4636 = vmatprep.subr.bf16.mxu1 %v12283_v24 }
 0x45e   :  { %4596 = vmatpush2.bf16.msra.mxu0 %v12285_v27 }
 0x45f   :  { %4637 = vmatpush2.bf16.msra.mxu1 %v12286_v28  ;;  %4597 = vmatprep.subr.bf16.mxu0 %v12287_v1 }
 0x460   :  { %4638 = vmatprep.subr.bf16.mxu1 %v12289_v32 }
 0x462   :  { %4598 = vmatpush2.bf16.msra.mxu0 %v12291_v25 }
 0x463   :  { %4639 = vmatpush2.bf16.msra.mxu1 %v12292_v0  ;;  %4599 = vmatprep.subr.bf16.mxu0 %v12293_v49 }
 0x464   :  { %4640 = vmatprep.subr.bf16.mxu1 %v12295_v34 }
 0x466   :  { %4600 = vmatpush2.bf16.msra.mxu0 %v12297_v8 }
 0x467   :  { %4641 = vmatpush2.bf16.msra.mxu1 %v12298_v37  ;;  %4601 = vmatprep.subr.bf16.mxu0 %v12299_v61 }
 0x468   :  { %4642 = vmatprep.subr.bf16.mxu1 %v12301_v38 }
 0x46a   :  { %4602 = vmatpush2.bf16.msra.mxu0 %v12303_v41 }
 0x46b   :  { %4643 = vmatpush2.bf16.msra.mxu1 %v12304_v44  ;;  %4603 = vmatprep.subr.bf16.mxu0 %v12305_v45 }
 0x46c   :  { %4644 = vmatprep.subr.bf16.mxu1 %v12307_v16 }
 0x46e   :  { %4604 = vmatpush2.bf16.msra.mxu0 %v12309_v33 }
 0x46f   :  { %4645 = vmatpush2.bf16.msra.mxu1 %v12310_v9  ;;  %4605 = vmatprep.subr.bf16.mxu0 %v12311_v22 }
 0x470   :  { %4646 = vmatprep.subr.bf16.mxu1 %v12313_v11 }
 0x472   :  { %4606 = vmatpush2.bf16.msra.mxu0 %v12315_v23 }
 0x473   :  { %4647 = vmatpush2.bf16.msra.mxu1 %v12316_v46 }
 0x475   :  { %4608 = vmatmul.mubr.bf16.vlgmr.msra.gmra.mxu0 %v4183_v26 }
 0x476   :  { %4649 = vmatmul.mubr.bf16.vlgmr.msra.gmra.mxu1 %v4185_v20 }
 0x535   :  { %v4609_v59 = vpop.f32.mrf.mxu0 }
 0x536   :  { %v4650_v56 = vpop.f32.mrf.mxu1 }
 0x537   :  { %v13757_v58 = vadd.f32 %v4650_v56, %v4609_v59  ;;  %v4611_v60 = vpop.f32.mrf.mxu0 }
 0x538   :  { %v4652_v36 = vpop.f32.mrf.mxu1 }
 0x539   :  { %v4657_v10 = vrot.slane %v13757_v58, 4  ;;  %v4671_v50 = vmul.f32 %v13757_v58, %v13757_v58  ;;  %v4653_v51 = vadd.f32 %v4652_v36, %v4611_v60  ;;  %v4613_v53 = vpop.f32.mrf.mxu0 }
 0x53a   :  { %v4654_v54 = vpop.f32.mrf.mxu1 }
 0x53b   :  { %v4658_v63 = vadd.f32 %v4657_v10, %v13757_v58  ;;  %v4673_v26 = vrot.slane %v4671_v50, 4  ;;  %v4663_v31 = vrot.slane %v4653_v51, 4  ;;  %v4672_v48 = vmul.f32 %v4653_v51, %v4653_v51  ;;  %v4614_v20 = vpop.f32.mrf.mxu0 }
 0x53c   :  { %v4655_v47 = vpop.f32.mrf.mxu1 }
 0x53d   :  { %v4659_v52 = vrot.slane %v4658_v63, 2  ;;  %v4674_v62 = vadd.f32 %v4673_v26, %v4671_v50  ;;  %v4664_v57 = vadd.f32 %v4663_v31, %v4653_v51  ;;  %v4679_v13 = vrot.slane %v4672_v48, 4 }
 0x53f   :  { %v4660_v55 = vadd.f32 %v4659_v52, %v4658_v63  ;;  %v4675_v21 = vrot.slane %v4674_v62, 2  ;;  %v4665_v19 = vrot.slane %v4664_v57, 2  ;;  %v4680_v24 = vadd.f32 %v4679_v13, %v4672_v48 }
 0x541   :  { %v4661_v27 = vrot.slane %v4660_v55, 1  ;;  %v4676_v28 = vadd.f32 %v4675_v21, %v4674_v62  ;;  %v4666_v1 = vadd.f32 %v4665_v19, %v4664_v57  ;;  %v4681_v32 = vrot.slane %v4680_v24, 2 }
 0x543   :  { %v4662_v25 = vadd.f32 %v4661_v27, %v4660_v55  ;;  %v4677_v0 = vrot.slane %v4676_v28, 1  ;;  %v4667_v49 = vrot.slane %v4666_v1, 1  ;;  %v4682_v34 = vadd.f32 %v4681_v32, %v4680_v24 }
 0x545   :  { %v4669_v8 = vmul.f32 0.125, %v4662_v25  ;;  %v4678_v37 = vadd.f32 %v4677_v0, %v4676_v28  ;;  %v4668_v61 = vadd.f32 %v4667_v49, %v4666_v1  ;;  %v4683_v38 = vrot.slane %v4682_v34, 1 }
 0x547   :  { %v4685_v41 = vmul.f32 0.125, %v4678_v37  ;;  %v4687_v44 = vmul.f32 %v4669_v8, %v4669_v8  ;;  %v4670_v45 = vmul.f32 0.125, %v4668_v61  ;;  %v4684_v16 = vadd.f32 %v4683_v38, %v4682_v34 }
 0x549   :  { %v4689_v33 = vsub.f32 %v4685_v41, %v4687_v44  ;;  %v4686_v9 = vmul.f32 0.125, %v4684_v16  ;;  %v4688_v22 = vmul.f32 %v4670_v45, %v4670_v45 }
 0x54b   :  { %v4691_v11 = vadd.f32 1e-05, %v4689_v33  ;;  %v4690_v23 = vsub.f32 %v4686_v9, %v4688_v22 }
 0x54d   :  { %v4692_v46 = vadd.f32 1e-05, %v4690_v23  ;;  %12317 = vrsqrt.f32 %v4691_v11 }
 0x54f   :  { %12319 = vrsqrt.f32 %v4692_v46 }
 0x55a   :  { %v12318_v59 = vpop.eup %12317 }
 0x55c   :  { %v12320_v56 = vpop.eup %12319 }
 0x55d   :  { %v4698_v60 = vcombine.low %v12318_v59, %v12320_v56 }
 0x55f   :  { %v4705_v36 = vrot.slane %v4698_v60, %v13601_v35 }
 0x561   :  { %v4707_v10 = vmul.f32 %v4705_v36, %v13714_v15 }
 0x563   :  { %v4712_v50 = vrot.slane %v4707_v10, %v13608_v40  ;;  %v4716_v53 = vrot.slane %v4707_v10, %v13610_v30 }
 0x565   :  { %v4719_v54 = vmul.f32 %v4712_v50, %v4669_v8  ;;  %v4720_v63 = vmul.f32 %v4716_v53, %v4670_v45  ;;  %v4737_v47 = vrot.slane %v4712_v50, %v13608_v40  ;;  %v4741_v52 = vrot.slane %v4716_v53, %v13608_v40 }
 0x567   :  { %v4723_v26 = vcombine.low %v4719_v54, %v4720_v63  ;;  %v4742_v13 = vmul.f32 %v4737_v47, %v13757_v58  ;;  %v4743_v55 = vmul.f32 %v4741_v52, %v4653_v51 }
 0x569   :  { %v4730_v31 = vrot.slane %v4723_v26, %v13601_v35 }
 0x56b   :  { %v4731_v48 = vrot.slane %v4730_v31, 7 }
 0x56d   :  { %v4733_v20 = vsub.f32 %v13714_v15, %v4731_v48 }
 0x56f   :  { %v4748_v62 = vrot.slane %v4733_v20, %v13633_v12  ;;  %v4752_v57 = vrot.slane %v4733_v20, %v13635_v14 }
 0x571   :  { %v4758_v21 = vrot.slane %v4748_v62, %v13633_v12  ;;  %v4762_v19 = vrot.slane %v4752_v57, %v13633_v12 }
 0x573   :  { %v4763_v24 = vadd.f32 %v4758_v21, %v4742_v13  ;;  %v4764_v27 = vadd.f32 %v4762_v19, %v4743_v55 }
 0x575   :  { %vm4765_vm11 = vcmp.ge.f32.partialorder %v4763_v24, 0.0  ;;  %vm4766_vm12 = vcmp.ge.f32.partialorder %v4764_v27, 0.0  ;;  %v4767_v15 = vmul.f32 0.01, %v4763_v24  ;;  %v4768_v28 = vmul.f32 0.01, %v4764_v27 }
 0x577   :  { %v4769_v1 = vsel %vm4765_vm11, %v4763_v24, %v4767_v15  ;;  %v4770_v32 = vsel %vm4766_vm12, %v4764_v27, %v4768_v28 }
 0x578   :  { %v4771_v25 = vpack.c.bf16 %v4769_v1, %v4769_v1  ;;  %v4772_v0 = vpack.c.bf16 %v4770_v32, %v4770_v32 }
 0x579   :  { %13347 = dma.done.wait [#allocation10 + $0x3], 2048 }
 0x57a   :  { %13348 = vsyncadd [#allocation10 + $0x3], 4294965248  ;;  %4937 = vmatprep.mubr.bf16.mxu0 %v4772_v0  ;;  %v12321_v49 = vld [vmem:[#allocation5 + $0x78] sm:$0xff]   ;;  %v12323_v51 = vld [vmem:[#allocation5 + $0x70] sm:$0xff]   ;;  %v4964_v24 = vrot.slane %v13449_v2, 6 }
 0x57b   :  { %v12322_v58 = vld [vmem:[#allocation5 + $0x38] sm:$0xff]   ;;  %11397 = vmatprep.subr.bf16.mxu0 %v12321_v49  ;;  %v12324_v34 = vld [vmem:[#allocation5 + $0x30] sm:$0xff]   ;;  %v12325_v8 = vld [vmem:[#allocation5 + $0x68] sm:$0xff]  }
 0x57c   :  { %11398 = vmatpush3.bf16.msra.mxu0 %v12322_v58  ;;  %v12326_v37 = vld [vmem:[#allocation5 + $0x28] sm:$0xff]   ;;  %v12327_v61 = vld [vmem:[#allocation5 + $0x60] sm:$0xff]   ;;  %v12329_v41 = vld [vmem:[#allocation5 + $0x58] sm:$0xff]  }
 0x57d   :  { %11399 = vmatprep.subr.bf16.mxu0 %v12323_v51  ;;  %v12328_v38 = vld [vmem:[#allocation5 + $0x20] sm:$0xff]   ;;  %v12330_v44 = vld [vmem:[#allocation5 + $0x18] sm:$0xff]   ;;  %v12331_v45 = vld [vmem:[#allocation5 + $0x50] sm:$0xff]  }
 0x57e   :  { %v12332_v16 = vld [vmem:[#allocation5 + $0x10] sm:$0xff]   ;;  %v12333_v33 = vld [vmem:[#allocation5 + $0x48] sm:$0xff]   ;;  %v12335_v22 = vld [vmem:[#allocation5 + $0x40] sm:$0xff]  }
 0x57f   :  { %v12334_v9 = vld [vmem:[#allocation5 + $0x8] sm:$0xff]   ;;  %v12336_v11 = vld [vmem:[#allocation5] sm:$0xff]  }
 0x580   :  { %11400 = vmatpush3.bf16.msra.mxu0 %v12324_v34 }
 0x581   :  { %11401 = vmatprep.subr.bf16.mxu0 %v12325_v8 }
 0x584   :  { %11402 = vmatpush3.bf16.msra.mxu0 %v12326_v37 }
 0x585   :  { %11403 = vmatprep.subr.bf16.mxu0 %v12327_v61 }
 0x588   :  { %11404 = vmatpush3.bf16.msra.mxu0 %v12328_v38 }
 0x589   :  { %11405 = vmatprep.subr.bf16.mxu0 %v12329_v41 }
 0x58c   :  { %11406 = vmatpush3.bf16.msra.mxu0 %v12330_v44 }
 0x58d   :  { %11407 = vmatprep.subr.bf16.mxu0 %v12331_v45 }
 0x590   :  { %11408 = vmatpush3.bf16.msra.mxu0 %v12332_v16 }
 0x591   :  { %11409 = vmatprep.subr.bf16.mxu0 %v12333_v33 }
 0x594   :  { %11410 = vmatpush3.bf16.msra.mxu0 %v12334_v9 }
 0x595   :  { %11411 = vmatprep.subr.bf16.mxu0 %v12335_v22 }
 0x598   :  { %11412 = vmatpush3.bf16.msra.mxu0 %v12336_v11 }
 0x59b   :  { %4938 = vmatmul.mubr.bf16.vlgmr.msra.gmra.mxu0 %v4771_v25 }
 0x65b   :  { %v11413_v23 = vpop.f32.mrf.mxu0 }
 0x65d   :  { %v11414_v46 = vpop.f32.mrf.mxu0 }
 0x65e   :  { %v11415_v59 = vadd.f32 %v11414_v46, %v11413_v23 }
 0x65f   :  { %v11416_v56 = vpop.f32.mrf.mxu0 }
 0x660   :  { %v4945_v60 = vrot.slane %v11415_v59, 4  ;;  %v4952_v36 = vmul.f32 %v11415_v59, %v11415_v59 }
 0x661   :  { %v11417_v10 = vpop.f32.mrf.mxu0 }
 0x662   :  { %v4946_v50 = vadd.f32 %v11415_v59, %v4945_v60  ;;  %v4953_v53 = vrot.slane %v4952_v36, 4 }
 0x664   :  { %v4947_v54 = vrot.slane %v4946_v50, 2  ;;  %v4954_v63 = vadd.f32 %v4953_v53, %v4952_v36 }
 0x666   :  { %v4948_v26 = vadd.f32 %v4947_v54, %v4946_v50  ;;  %v4955_v31 = vrot.slane %v4954_v63, 2 }
 0x668   :  { %v4949_v48 = vrot.slane %v4948_v26, 1  ;;  %v4956_v20 = vadd.f32 %v4955_v31, %v4954_v63 }
 0x66a   :  { %v4950_v47 = vadd.f32 %v4949_v48, %v4948_v26  ;;  %v4957_v52 = vrot.slane %v4956_v20, 1 }
 0x66c   :  { %v4951_v62 = vmul.f32 0.125, %v4950_v47  ;;  %v4958_v57 = vadd.f32 %v4957_v52, %v4956_v20 }
 0x66e   :  { %v4959_v13 = vmul.f32 0.125, %v4958_v57  ;;  %v4960_v55 = vmul.f32 %v4951_v62, %v4951_v62 }
 0x670   :  { %v4961_v21 = vsub.f32 %v4959_v13, %v4960_v55 }
 0x672   :  { %v4962_v19 = vadd.f32 1e-05, %v4961_v21 }
 0x674   :  { %12337 = vrsqrt.f32 %v4962_v19 }
 0x681   :  { %v12338_v27 = vpop.eup %12337 }
 0x682   :  { %v4966_v15 = vmul.f32 %v12338_v27, %v4964_v24 }
 0x684   :  { %v4967_v28 = vmul.f32 %v4966_v15, %v4951_v62  ;;  %v4982_v25 = vrot.slane %v4966_v15, %v13608_v40 }
 0x686   :  { %v4975_v1 = vrot.slane %v4967_v28, %v13601_v35  ;;  %v4983_v49 = vmul.f32 %v11415_v59, %v4982_v25 }
 0x688   :  { %v4976_v32 = vrot.slane %v4975_v1, 7 }
 0x68a   :  { %v4978_v0 = vsub.f32 %v4964_v24, %v4976_v32 }
 0x68c   :  { %v4987_v58 = vrot.slane %v4978_v0, %v13633_v12 }
 0x68e   :  { %v4988_v51 = vadd.f32 %v4987_v58, %v4983_v49 }
 0x690   :  { %vm4989_vm13 = vcmp.ge.f32.partialorder %v4988_v51, 0.0  ;;  %v4990_v34 = vmul.f32 0.01, %v4988_v51 }
 0x692   :  { %v4991_v8 = vsel %vm4989_vm13, %v4988_v51, %v4990_v34 }
 0x693   :  { %4992 = vst [vmem:[#allocation15] sm:$0xff] %v4991_v8  ;;  %v4993_v37 = vpack.c.bf16 %v4991_v8, %v4991_v8 }
 0x694   :  { %13349 = dma.done.wait [#allocation10 + $0x4], 2048 }
 0x695   :  { %13350 = vsyncadd [#allocation10 + $0x4], 4294965248  ;;  %5126 = vmatprep.mubr.bf16.mxu1 %v13370_v39  ;;  %v12339_v2 = vld [vmem:[#allocation6 + $0x74] ss:$8 sps:$4 sm:$0xff]   ;;  %v12341_v61 = vld [vmem:[#allocation6 + $0x70] ss:$8 sps:$4 sm:$0xff]  }
 0x696   :  { %5094 = vmatprep.subr.bf16.mxu1 %v12339_v2  ;;  %v12342_v38 = vld [vmem:[#allocation6 + $0x64] ss:$8 sps:$4 sm:$0xff]   ;;  %v12344_v41 = vld [vmem:[#allocation6 + $0x60] ss:$8 sps:$4 sm:$0xff]   ;;  %v12345_v44 = vld [vmem:[#allocation6 + $0x54] ss:$8 sps:$4 sm:$0xff]  }
 0x697   :  { %5095 = vmatpush1.bf16.msra.mxu1 %v12341_v61  ;;  %v12347_v45 = vld [vmem:[#allocation6 + $0x50] ss:$8 sps:$4 sm:$0xff]   ;;  %v12348_v16 = vld [vmem:[#allocation6 + $0x44] ss:$8 sps:$4 sm:$0xff]   ;;  %v12350_v33 = vld [vmem:[#allocation6 + $0x40] ss:$8 sps:$4 sm:$0xff]  }
 0x698   :  { %5096 = vmatprep.subr.bf16.mxu1 %v12342_v38  ;;  %v12351_v9 = vld [vmem:[#allocation6 + $0x34] ss:$8 sps:$4 sm:$0xff]   ;;  %v12353_v22 = vld [vmem:[#allocation6 + $0x30] ss:$8 sps:$4 sm:$0xff]   ;;  %v12354_v11 = vld [vmem:[#allocation6 + $0x24] ss:$8 sps:$4 sm:$0xff]  }
 0x699   :  { %v12356_v23 = vld [vmem:[#allocation6 + $0x20] ss:$8 sps:$4 sm:$0xff]   ;;  %v12357_v46 = vld [vmem:[#allocation6 + $0x14] ss:$8 sps:$4 sm:$0xff]   ;;  %v12359_v59 = vld [vmem:[#allocation6 + $0x10] ss:$8 sps:$4 sm:$0xff]  }
 0x69a   :  { %v12360_v56 = vld [vmem:[#allocation6 + $0x4] ss:$8 sps:$4 sm:$0xff]   ;;  %v12362_v60 = vld [vmem:[#allocation6] ss:$8 sps:$4 sm:$0xff]  }
 0x69b   :  { %5097 = vmatpush1.bf16.msra.mxu1 %v12344_v41 }
 0x69c   :  { %5098 = vmatprep.subr.bf16.mxu1 %v12345_v44 }
 0x69f   :  { %5099 = vmatpush1.bf16.msra.mxu1 %v12347_v45 }
 0x6a0   :  { %5100 = vmatprep.subr.bf16.mxu1 %v12348_v16 }
 0x6a3   :  { %5101 = vmatpush1.bf16.msra.mxu1 %v12350_v33 }
 0x6a4   :  { %5102 = vmatprep.subr.bf16.mxu1 %v12351_v9 }
 0x6a7   :  { %5103 = vmatpush1.bf16.msra.mxu1 %v12353_v22 }
 0x6a8   :  { %5104 = vmatprep.subr.bf16.mxu1 %v12354_v11 }
 0x6ab   :  { %5105 = vmatpush1.bf16.msra.mxu1 %v12356_v23 }
 0x6ac   :  { %5106 = vmatprep.subr.bf16.mxu1 %v12357_v46 }
 0x6af   :  { %5107 = vmatpush1.bf16.msra.mxu1 %v12359_v59 }
 0x6b0   :  { %5108 = vmatprep.subr.bf16.mxu1 %v12360_v56 }
 0x6b3   :  { %5109 = vmatpush1.bf16.msra.mxu1 %v12362_v60 }
 0x6b6   :  { %5127 = vmatmul.mubr.bf16.vlgmr.msra.gmra.mxu1 %v4993_v37 }
 0x776   :  { %v5128_v36 = vpop.f32.mrf.mxu1 }
 0x777   :  { %v5135_v10 = vrot.slane %v5128_v36, 4  ;;  %v5149_v50 = vmul.f32 %v5128_v36, %v5128_v36 }
 0x778   :  { %v5130_v53 = vpop.f32.mrf.mxu1 }
 0x779   :  { %v5136_v54 = vadd.f32 %v5135_v10, %v5128_v36  ;;  %v5151_v63 = vrot.slane %v5149_v50, 4  ;;  %v5141_v26 = vrot.slane %v5130_v53, 4  ;;  %v5150_v31 = vmul.f32 %v5130_v53, %v5130_v53 }
 0x77a   :  { %v5132_v48 = vpop.f32.mrf.mxu1 }
 0x77b   :  { %v5137_v20 = vrot.slane %v5136_v54, 2  ;;  %v5152_v47 = vadd.f32 %v5151_v63, %v5149_v50  ;;  %v5142_v52 = vadd.f32 %v5141_v26, %v5130_v53  ;;  %v5157_v62 = vrot.slane %v5150_v31, 4 }
 0x77c   :  { %v5133_v57 = vpop.f32.mrf.mxu1 }
 0x77d   :  { %v5138_v13 = vadd.f32 %v5137_v20, %v5136_v54  ;;  %v5153_v55 = vrot.slane %v5152_v47, 2  ;;  %v5143_v21 = vrot.slane %v5142_v52, 2  ;;  %v5158_v19 = vadd.f32 %v5157_v62, %v5150_v31 }
 0x77f   :  { %v5139_v24 = vrot.slane %v5138_v13, 1  ;;  %v5154_v27 = vadd.f32 %v5153_v55, %v5152_v47  ;;  %v5144_v15 = vadd.f32 %v5143_v21, %v5142_v52  ;;  %v5159_v28 = vrot.slane %v5158_v19, 2 }
 0x781   :  { %v5140_v1 = vadd.f32 %v5139_v24, %v5138_v13  ;;  %v5155_v32 = vrot.slane %v5154_v27, 1  ;;  %v5145_v25 = vrot.slane %v5144_v15, 1  ;;  %v5160_v0 = vadd.f32 %v5159_v28, %v5158_v19 }
 0x783   :  { %v5147_v49 = vmul.f32 0.125, %v5140_v1  ;;  %v5156_v58 = vadd.f32 %v5155_v32, %v5154_v27  ;;  %v5146_v51 = vadd.f32 %v5145_v25, %v5144_v15  ;;  %v5161_v34 = vrot.slane %v5160_v0, 1 }
 0x785   :  { %v5163_v8 = vmul.f32 0.125, %v5156_v58  ;;  %v5165_v37 = vmul.f32 %v5147_v49, %v5147_v49  ;;  %v5148_v2 = vmul.f32 0.125, %v5146_v51  ;;  %v5162_v61 = vadd.f32 %v5161_v34, %v5160_v0 }
 0x787   :  { %v5167_v38 = vsub.f32 %v5163_v8, %v5165_v37  ;;  %v5164_v41 = vmul.f32 0.125, %v5162_v61  ;;  %v5166_v44 = vmul.f32 %v5148_v2, %v5148_v2 }
 0x789   :  { %v5169_v45 = vadd.f32 1e-05, %v5167_v38  ;;  %v5168_v16 = vsub.f32 %v5164_v41, %v5166_v44 }
 0x78b   :  { %v5170_v33 = vadd.f32 1e-05, %v5168_v16  ;;  %12363 = vrsqrt.f32 %v5169_v45 }
 0x78d   :  { %12365 = vrsqrt.f32 %v5170_v33 }
 0x798   :  { %v12364_v9 = vpop.eup %12363 }
 0x79a   :  { %v12366_v22 = vpop.eup %12365 }
 0x79b   :  { %v5175_v11 = vcombine.low %v12364_v9, %v12366_v22 }
 0x79d   :  { %v5182_v23 = vrot.slane %v5175_v11, %v13601_v35 }
 0x79f   :  { %v5184_v46 = vmul.f32 %v5182_v23, %v13451_v3 }
 0x7a1   :  { %v5189_v59 = vrot.slane %v5184_v46, %v13608_v40  ;;  %v5193_v56 = vrot.slane %v5184_v46, %v13610_v30 }
 0x7a3   :  { %v5196_v60 = vmul.f32 %v5189_v59, %v5147_v49  ;;  %v5197_v10 = vmul.f32 %v5193_v56, %v5148_v2  ;;  %v5214_v31 = vrot.slane %v5189_v59, %v13608_v40  ;;  %v5218_v48 = vrot.slane %v5193_v56, %v13608_v40 }
 0x7a5   :  { %v5200_v50 = vcombine.low %v5196_v60, %v5197_v10  ;;  %v5219_v52 = vmul.f32 %v5214_v31, %v5128_v36  ;;  %v5220_v62 = vmul.f32 %v5218_v48, %v5130_v53 }
 0x7a7   :  { %v5207_v54 = vrot.slane %v5200_v50, %v13601_v35 }
 0x7a9   :  { %v5208_v63 = vrot.slane %v5207_v54, 7 }
 0x7ab   :  { %v5210_v26 = vsub.f32 %v13451_v3, %v5208_v63 }
 0x7ad   :  { %v5225_v20 = vrot.slane %v5210_v26, %v13633_v12  ;;  %v5229_v47 = vrot.slane %v5210_v26, %v13635_v14 }
 0x7af   :  { %v5235_v57 = vrot.slane %v5225_v20, %v13633_v12  ;;  %v5239_v13 = vrot.slane %v5229_v47, %v13633_v12 }
 0x7b1   :  { %v5240_v55 = vadd.f32 %v5235_v57, %v5219_v52  ;;  %v5241_v21 = vadd.f32 %v5239_v13, %v5220_v62 }
 0x7b3   :  { %vm5242_vm14 = vcmp.ge.f32.partialorder %v5240_v55, 0.0  ;;  %vm5243_vm15 = vcmp.ge.f32.partialorder %v5241_v21, 0.0  ;;  %v5244_v19 = vmul.f32 0.01, %v5240_v55  ;;  %v5245_v24 = vmul.f32 0.01, %v5241_v21 }
 0x7b5   :  { %v5246_v27 = vsel %vm5242_vm14, %v5240_v55, %v5244_v19  ;;  %v5247_v15 = vsel %vm5243_vm15, %v5241_v21, %v5245_v24 }
 0x7b6   :  { %v13793_v28 = vpack.c.bf16 %v5246_v27, %v5246_v27  ;;  %v5249_v1 = vpack.c.bf16 %v5247_v15, %v5247_v15 }
 0x7b7   :  { %13351 = dma.done.wait [#allocation10 + $0x5], 8192 }
 0x7b8   :  { %13352 = vsyncadd [#allocation10 + $0x5], 4294959104  ;;  %5669 = vmatprep.mubr.bf16.mxu0 %v5249_v1  ;;  %5710 = vmatprep.mubr.bf16.mxu1 %v5249_v1  ;;  %v12367_v36 = vld [vmem:[#allocation7 + $0xe4] ss:$16 sps:$4 sm:$0xff]   ;;  %v12369_v53 = vld [vmem:[#allocation7 + $0xec] ss:$16 sps:$4 sm:$0xff]  }
 0x7b9   :  { %5637 = vmatprep.subr.bf16.mxu0 %v12367_v36  ;;  %v12371_v32 = vld [vmem:[#allocation7 + $0xe0] ss:$16 sps:$4 sm:$0xff]   ;;  %v12372_v25 = vld [vmem:[#allocation7 + $0xe8] ss:$16 sps:$4 sm:$0xff]   ;;  %5678 = vmatprep.subr.bf16.mxu1 %v12369_v53  ;;  %v12373_v0 = vld [vmem:[#allocation7 + $0xc4] ss:$16 sps:$4 sm:$0xff]  }
 0x7ba   :  { %5638 = vmatpush1.bf16.msra.mxu0 %v12371_v32  ;;  %5679 = vmatpush1.bf16.msra.mxu1 %v12372_v25  ;;  %v12375_v49 = vld [vmem:[#allocation7 + $0xcc] ss:$16 sps:$4 sm:$0xff]   ;;  %v12377_v58 = vld [vmem:[#allocation7 + $0xc0] ss:$16 sps:$4 sm:$0xff]   ;;  %v12378_v51 = vld [vmem:[#allocation7 + $0xc8] ss:$16 sps:$4 sm:$0xff]  }
 0x7bb   :  { %5639 = vmatprep.subr.bf16.mxu0 %v12373_v0  ;;  %5680 = vmatprep.subr.bf16.mxu1 %v12375_v49  ;;  %v12379_v34 = vld [vmem:[#allocation7 + $0xa4] ss:$16 sps:$4 sm:$0xff]   ;;  %v12381_v8 = vld [vmem:[#allocation7 + $0xac] ss:$16 sps:$4 sm:$0xff]   ;;  %v12383_v37 = vld [vmem:[#allocation7 + $0xa0] ss:$16 sps:$4 sm:$0xff]  }
 0x7bc   :  { %v12384_v2 = vld [vmem:[#allocation7 + $0xa8] ss:$16 sps:$4 sm:$0xff]   ;;  %v12385_v61 = vld [vmem:[#allocation7 + $0x84] ss:$16 sps:$4 sm:$0xff]   ;;  %v12387_v38 = vld [vmem:[#allocation7 + $0x8c] ss:$16 sps:$4 sm:$0xff]  }
 0x7bd   :  { %v12389_v41 = vld [vmem:[#allocation7 + $0x80] ss:$16 sps:$4 sm:$0xff]   ;;  %v12390_v44 = vld [vmem:[#allocation7 + $0x88] ss:$16 sps:$4 sm:$0xff]   ;;  %v12391_v45 = vld [vmem:[#allocation7 + $0x64] ss:$16 sps:$4 sm:$0xff]  }
 0x7be   :  { %5640 = vmatpush1.bf16.msra.mxu0 %v12377_v58  ;;  %5681 = vmatpush1.bf16.msra.mxu1 %v12378_v51  ;;  %v12393_v16 = vld [vmem:[#allocation7 + $0x6c] ss:$16 sps:$4 sm:$0xff]   ;;  %v12395_v33 = vld [vmem:[#allocation7 + $0x60] ss:$16 sps:$4 sm:$0xff]   ;;  %v12396_v9 = vld [vmem:[#allocation7 + $0x68] ss:$16 sps:$4 sm:$0xff]  }
 0x7bf   :  { %5641 = vmatprep.subr.bf16.mxu0 %v12379_v34  ;;  %5682 = vmatprep.subr.bf16.mxu1 %v12381_v8  ;;  %v12397_v22 = vld [vmem:[#allocation7 + $0x44] ss:$16 sps:$4 sm:$0xff]   ;;  %v12399_v11 = vld [vmem:[#allocation7 + $0x4c] ss:$16 sps:$4 sm:$0xff]   ;;  %v12401_v23 = vld [vmem:[#allocation7 + $0x40] ss:$16 sps:$4 sm:$0xff]  }
 0x7c0   :  { %v12402_v46 = vld [vmem:[#allocation7 + $0x48] ss:$16 sps:$4 sm:$0xff]   ;;  %v12403_v59 = vld [vmem:[#allocation7 + $0x24] ss:$16 sps:$4 sm:$0xff]   ;;  %v12405_v56 = vld [vmem:[#allocation7 + $0x2c] ss:$16 sps:$4 sm:$0xff]  }
 0x7c1   :  { %v12407_v60 = vld [vmem:[#allocation7 + $0x20] ss:$16 sps:$4 sm:$0xff]   ;;  %v12408_v10 = vld [vmem:[#allocation7 + $0x28] ss:$16 sps:$4 sm:$0xff]   ;;  %v12409_v50 = vld [vmem:[#allocation7 + $0x4] ss:$16 sps:$4 sm:$0xff]  }
 0x7c2   :  { %5642 = vmatpush1.bf16.msra.mxu0 %v12383_v37  ;;  %5683 = vmatpush1.bf16.msra.mxu1 %v12384_v2  ;;  %v12411_v54 = vld [vmem:[#allocation7 + $0xc] ss:$16 sps:$4 sm:$0xff]   ;;  %v12413_v63 = vld [vmem:[#allocation7] ss:$16 sps:$4 sm:$0xff]   ;;  %v12414_v26 = vld [vmem:[#allocation7 + $0x8] ss:$16 sps:$4 sm:$0xff]  }
 0x7c3   :  { %5643 = vmatprep.subr.bf16.mxu0 %v12385_v61  ;;  %5684 = vmatprep.subr.bf16.mxu1 %v12387_v38  ;;  %v12415_v31 = vld [vmem:[#allocation7 + $0x1e4] ss:$16 sps:$4 sm:$0xff]   ;;  %v12417_v48 = vld [vmem:[#allocation7 + $0x1ec] ss:$16 sps:$4 sm:$0xff]   ;;  %v12419_v20 = vld [vmem:[#allocation7 + $0x1e0] ss:$16 sps:$4 sm:$0xff]  }
 0x7c4   :  { %v12420_v47 = vld [vmem:[#allocation7 + $0x1e8] ss:$16 sps:$4 sm:$0xff]   ;;  %v12421_v52 = vld [vmem:[#allocation7 + $0x1c4] ss:$16 sps:$4 sm:$0xff]   ;;  %v12423_v62 = vld [vmem:[#allocation7 + $0x1cc] ss:$16 sps:$4 sm:$0xff]  }
 0x7c5   :  { %v12425_v57 = vld [vmem:[#allocation7 + $0x1c0] ss:$16 sps:$4 sm:$0xff]   ;;  %v12426_v13 = vld [vmem:[#allocation7 + $0x1c8] ss:$16 sps:$4 sm:$0xff]   ;;  %v12427_v55 = vld [vmem:[#allocation7 + $0x1a4] ss:$16 sps:$4 sm:$0xff]  }
 0x7c6   :  { %5644 = vmatpush1.bf16.msra.mxu0 %v12389_v41  ;;  %5685 = vmatpush1.bf16.msra.mxu1 %v12390_v44  ;;  %v12429_v21 = vld [vmem:[#allocation7 + $0x1ac] ss:$16 sps:$4 sm:$0xff]   ;;  %v12431_v19 = vld [vmem:[#allocation7 + $0x1a0] ss:$16 sps:$4 sm:$0xff]   ;;  %v12432_v24 = vld [vmem:[#allocation7 + $0x1a8] ss:$16 sps:$4 sm:$0xff]  }
 0x7c7   :  { %5645 = vmatprep.subr.bf16.mxu0 %v12391_v45  ;;  %5686 = vmatprep.subr.bf16.mxu1 %v12393_v16  ;;  %v12433_v27 = vld [vmem:[#allocation7 + $0x184] ss:$16 sps:$4 sm:$0xff]   ;;  %v12435_v15 = vld [vmem:[#allocation7 + $0x18c] ss:$16 sps:$4 sm:$0xff]   ;;  %v12437_v1 = vld [vmem:[#allocation7 + $0x180] ss:$16 sps:$4 sm:$0xff]  }
 0x7c8   :  { %v12438_v36 = vld [vmem:[#allocation7 + $0x188] ss:$16 sps:$4 sm:$0xff]   ;;  %v12439_v53 = vld [vmem:[#allocation7 + $0x164] ss:$16 sps:$4 sm:$0xff]   ;;  %v12441_v32 = vld [vmem:[#allocation7 + $0x16c] ss:$16 sps:$4 sm:$0xff]  }
 0x7c9   :  { %v12443_v25 = vld [vmem:[#allocation7 + $0x160] ss:$16 sps:$4 sm:$0xff]   ;;  %v12444_v0 = vld [vmem:[#allocation7 + $0x168] ss:$16 sps:$4 sm:$0xff]   ;;  %v12445_v49 = vld [vmem:[#allocation7 + $0x144] ss:$16 sps:$4 sm:$0xff]  }
 0x7ca   :  { %5646 = vmatpush1.bf16.msra.mxu0 %v12395_v33  ;;  %5687 = vmatpush1.bf16.msra.mxu1 %v12396_v9  ;;  %v12447_v58 = vld [vmem:[#allocation7 + $0x14c] ss:$16 sps:$4 sm:$0xff]   ;;  %v12449_v51 = vld [vmem:[#allocation7 + $0x140] ss:$16 sps:$4 sm:$0xff]   ;;  %v12450_v34 = vld [vmem:[#allocation7 + $0x148] ss:$16 sps:$4 sm:$0xff]  }
 0x7cb   :  { %5647 = vmatprep.subr.bf16.mxu0 %v12397_v22  ;;  %5688 = vmatprep.subr.bf16.mxu1 %v12399_v11  ;;  %v12451_v8 = vld [vmem:[#allocation7 + $0x124] ss:$16 sps:$4 sm:$0xff]   ;;  %v12453_v37 = vld [vmem:[#allocation7 + $0x12c] ss:$16 sps:$4 sm:$0xff]   ;;  %v12455_v2 = vld [vmem:[#allocation7 + $0x120] ss:$16 sps:$4 sm:$0xff]  }
 0x7cc   :  { %v12456_v61 = vld [vmem:[#allocation7 + $0x128] ss:$16 sps:$4 sm:$0xff]   ;;  %v12457_v38 = vld [vmem:[#allocation7 + $0x104] ss:$16 sps:$4 sm:$0xff]   ;;  %v12459_v41 = vld [vmem:[#allocation7 + $0x10c] ss:$16 sps:$4 sm:$0xff]  }
 0x7cd   :  { %v12461_v44 = vld [vmem:[#allocation7 + $0x100] ss:$16 sps:$4 sm:$0xff]   ;;  %v12462_v45 = vld [vmem:[#allocation7 + $0x108] ss:$16 sps:$4 sm:$0xff]   ;;  %vm5799_vm1 = vcmask 1043456  }
 0x7ce   :  { %5648 = vmatpush1.bf16.msra.mxu0 %v12401_v23  ;;  %5689 = vmatpush1.bf16.msra.mxu1 %v12402_v46 }
 0x7cf   :  { %5649 = vmatprep.subr.bf16.mxu0 %v12403_v59  ;;  %5690 = vmatprep.subr.bf16.mxu1 %v12405_v56 }
 0x7d2   :  { %5650 = vmatpush1.bf16.msra.mxu0 %v12407_v60  ;;  %5691 = vmatpush1.bf16.msra.mxu1 %v12408_v10 }
 0x7d3   :  { %5651 = vmatprep.subr.bf16.mxu0 %v12409_v50  ;;  %5692 = vmatprep.subr.bf16.mxu1 %v12411_v54 }
 0x7d6   :  { %5652 = vmatpush1.bf16.msra.mxu0 %v12413_v63  ;;  %5693 = vmatpush1.bf16.msra.mxu1 %v12414_v26 }
 0x7d7   :  { %5653 = vmatprep.subr.bf16.mxu0 %v12415_v31  ;;  %5694 = vmatprep.subr.bf16.mxu1 %v12417_v48 }
 0x7da   :  { %5654 = vmatpush2.bf16.msra.mxu0 %v12419_v20  ;;  %5695 = vmatpush2.bf16.msra.mxu1 %v12420_v47 }
 0x7db   :  { %5655 = vmatprep.subr.bf16.mxu0 %v12421_v52  ;;  %5696 = vmatprep.subr.bf16.mxu1 %v12423_v62 }
 0x7de   :  { %5656 = vmatpush2.bf16.msra.mxu0 %v12425_v57  ;;  %5697 = vmatpush2.bf16.msra.mxu1 %v12426_v13 }
 0x7df   :  { %5657 = vmatprep.subr.bf16.mxu0 %v12427_v55  ;;  %5698 = vmatprep.subr.bf16.mxu1 %v12429_v21 }
 0x7e2   :  { %5658 = vmatpush2.bf16.msra.mxu0 %v12431_v19  ;;  %5699 = vmatpush2.bf16.msra.mxu1 %v12432_v24 }
 0x7e3   :  { %5659 = vmatprep.subr.bf16.mxu0 %v12433_v27  ;;  %5700 = vmatprep.subr.bf16.mxu1 %v12435_v15 }
 0x7e6   :  { %5660 = vmatpush2.bf16.msra.mxu0 %v12437_v1  ;;  %5701 = vmatpush2.bf16.msra.mxu1 %v12438_v36 }
 0x7e7   :  { %5661 = vmatprep.subr.bf16.mxu0 %v12439_v53  ;;  %5702 = vmatprep.subr.bf16.mxu1 %v12441_v32 }
 0x7ea   :  { %5662 = vmatpush2.bf16.msra.mxu0 %v12443_v25  ;;  %5703 = vmatpush2.bf16.msra.mxu1 %v12444_v0 }
 0x7eb   :  { %5663 = vmatprep.subr.bf16.mxu0 %v12445_v49  ;;  %5704 = vmatprep.subr.bf16.mxu1 %v12447_v58 }
 0x7ee   :  { %5664 = vmatpush2.bf16.msra.mxu0 %v12449_v51  ;;  %5705 = vmatpush2.bf16.msra.mxu1 %v12450_v34 }
 0x7ef   :  { %5665 = vmatprep.subr.bf16.mxu0 %v12451_v8  ;;  %5706 = vmatprep.subr.bf16.mxu1 %v12453_v37 }
 0x7f2   :  { %5666 = vmatpush2.bf16.msra.mxu0 %v12455_v2  ;;  %5707 = vmatpush2.bf16.msra.mxu1 %v12456_v61 }
 0x7f3   :  { %5667 = vmatprep.subr.bf16.mxu0 %v12457_v38  ;;  %5708 = vmatprep.subr.bf16.mxu1 %v12459_v41 }
 0x7f6   :  { %5668 = vmatpush2.bf16.msra.mxu0 %v12461_v44  ;;  %5709 = vmatpush2.bf16.msra.mxu1 %v12462_v45 }
 0x7f9   :  { %5670 = vmatmul.mubr.bf16.vlgmr.msra.gmra.mxu0 %v13793_v28  ;;  %5711 = vmatmul.mubr.bf16.vlgmr.msra.gmra.mxu1 %v13793_v28 }
 0x8b9   :  { %v13797_v16 = vpop.f32.mrf.mxu0  ;;  %v13799_v33 = vpop.f32.mrf.mxu1 }
 0x8ba   :  { %v5719_v9 = vrot.slane %v13797_v16, 4  ;;  %v5747_v22 = vmul.f32 %v13797_v16, %v13797_v16  ;;  %v5731_v11 = vrot.slane %v13799_v33, 4  ;;  %v5749_v23 = vmul.f32 %v13799_v33, %v13799_v33 }
 0x8bb   :  { %v13807_v46 = vpop.f32.mrf.mxu0  ;;  %v13809_v59 = vpop.f32.mrf.mxu1 }
 0x8bc   :  { %v5720_v28 = vadd.f32 %v5719_v9, %v13797_v16  ;;  %v5751_v56 = vrot.slane %v5747_v22, 4  ;;  %v5732_v60 = vadd.f32 %v5731_v11, %v13799_v33  ;;  %v5763_v10 = vrot.slane %v5749_v23, 4 }
 0x8bd   :  { %v5725_v50 = vrot.slane %v13807_v46, 4  ;;  %v5748_v54 = vmul.f32 %v13807_v46, %v13807_v46  ;;  %v5737_v63 = vrot.slane %v13809_v59, 4  ;;  %v5750_v26 = vmul.f32 %v13809_v59, %v13809_v59  ;;  %v5675_v31 = vpop.f32.mrf.mxu0  ;;  %v5716_v48 = vpop.f32.mrf.mxu1 }
 0x8be   :  { %v5721_v20 = vrot.slane %v5720_v28, 2  ;;  %v5752_v47 = vadd.f32 %v5751_v56, %v5747_v22  ;;  %v5733_v52 = vrot.slane %v5732_v60, 2  ;;  %v5764_v62 = vadd.f32 %v5763_v10, %v5749_v23 }
 0x8bf   :  { %v5726_v57 = vadd.f32 %v5725_v50, %v13807_v46  ;;  %v5757_v13 = vrot.slane %v5748_v54, 4  ;;  %v5738_v55 = vadd.f32 %v5737_v63, %v13809_v59  ;;  %v5769_v21 = vrot.slane %v5750_v26, 4  ;;  %v5676_v19 = vpop.f32.mrf.mxu0  ;;  %v5717_v24 = vpop.f32.mrf.mxu1 }
 0x8c0   :  { %v5722_v27 = vadd.f32 %v5721_v20, %v5720_v28  ;;  %v5753_v15 = vrot.slane %v5752_v47, 2  ;;  %v5734_v1 = vadd.f32 %v5733_v52, %v5732_v60  ;;  %v5765_v36 = vrot.slane %v5764_v62, 2 }
 0x8c1   :  { %v5727_v53 = vrot.slane %v5726_v57, 2  ;;  %v5758_v32 = vadd.f32 %v5757_v13, %v5748_v54  ;;  %v5739_v25 = vrot.slane %v5738_v55, 2  ;;  %v5770_v0 = vadd.f32 %v5769_v21, %v5750_v26 }
 0x8c2   :  { %v5723_v49 = vrot.slane %v5722_v27, 1  ;;  %v5754_v58 = vadd.f32 %v5753_v15, %v5752_v47  ;;  %v5735_v51 = vrot.slane %v5734_v1, 1  ;;  %v5766_v34 = vadd.f32 %v5765_v36, %v5764_v62 }
 0x8c3   :  { %v5728_v8 = vadd.f32 %v5727_v53, %v5726_v57  ;;  %v5759_v37 = vrot.slane %v5758_v32, 2  ;;  %v5740_v2 = vadd.f32 %v5739_v25, %v5738_v55  ;;  %v5771_v61 = vrot.slane %v5770_v0, 2 }
 0x8c4   :  { %v5724_v38 = vadd.f32 %v5723_v49, %v5722_v27  ;;  %v5755_v41 = vrot.slane %v5754_v58, 1  ;;  %v5736_v44 = vadd.f32 %v5735_v51, %v5734_v1  ;;  %v5767_v45 = vrot.slane %v5766_v34, 1 }
 0x8c5   :  { %v5729_v9 = vrot.slane %v5728_v8, 1  ;;  %v5760_v22 = vadd.f32 %v5759_v37, %v5758_v32  ;;  %v5741_v11 = vrot.slane %v5740_v2, 1  ;;  %v5772_v23 = vadd.f32 %v5771_v61, %v5770_v0 }
 0x8c6   :  { %v5743_v28 = vmul.f32 0.125, %v5724_v38  ;;  %v5756_v56 = vadd.f32 %v5755_v41, %v5754_v58  ;;  %v5745_v60 = vmul.f32 0.125, %v5736_v44  ;;  %v5768_v10 = vadd.f32 %v5767_v45, %v5766_v34 }
 0x8c7   :  { %v5730_v50 = vadd.f32 %v5729_v9, %v5728_v8  ;;  %v5761_v54 = vrot.slane %v5760_v22, 1  ;;  %v5742_v63 = vadd.f32 %v5741_v11, %v5740_v2  ;;  %v5773_v26 = vrot.slane %v5772_v23, 1 }
 0x8c8   :  { %v5775_v31 = vmul.f32 0.125, %v5756_v56  ;;  %v5779_v48 = vmul.f32 %v5743_v28, %v5743_v28  ;;  %v5777_v20 = vmul.f32 0.125, %v5768_v10  ;;  %v5781_v47 = vmul.f32 %v5745_v60, %v5745_v60 }
 0x8c9   :  { %v5744_v52 = vmul.f32 0.125, %v5730_v50  ;;  %v5762_v62 = vadd.f32 %v5761_v54, %v5760_v22  ;;  %v5746_v57 = vmul.f32 0.125, %v5742_v63  ;;  %v5774_v13 = vadd.f32 %v5773_v26, %v5772_v23 }
 0x8ca   :  { %v5783_v55 = vsub.f32 %v5775_v31, %v5779_v48  ;;  %v5785_v21 = vsub.f32 %v5777_v20, %v5781_v47  ;;  %v5797_v8 = vrot.slane %v13451_v3, 4  ;;  %v5798_v37 = vrot.slane %v13453_v4, 4 }
 0x8cb   :  { %v5776_v19 = vmul.f32 0.125, %v5762_v62  ;;  %v5780_v24 = vmul.f32 %v5744_v52, %v5744_v52  ;;  %v5778_v27 = vmul.f32 0.125, %v5774_v13  ;;  %v5782_v15 = vmul.f32 %v5746_v57, %v5746_v57 }
 0x8cc   :  { %v5787_v1 = vadd.f32 1e-05, %v5783_v55  ;;  %v5789_v36 = vadd.f32 1e-05, %v5785_v21  ;;  %v5800_v44 = vsel %vm5799_vm1, %v5797_v8, %v5798_v37 }
 0x8cd   :  { %v5784_v53 = vsub.f32 %v5776_v19, %v5780_v24  ;;  %v5786_v32 = vsub.f32 %v5778_v27, %v5782_v15 }
 0x8ce   :  { %12463 = vrsqrt.f32 %v5787_v1 }
 0x8cf   :  { %v5788_v25 = vadd.f32 1e-05, %v5784_v53  ;;  %v5790_v0 = vadd.f32 1e-05, %v5786_v32  ;;  %12465 = vrsqrt.f32 %v5789_v36 }
 0x8d1   :  { %12467 = vrsqrt.f32 %v5788_v25 }
 0x8d2   :  { %12469 = vrsqrt.f32 %v5790_v0 }
 0x8db   :  { %v12464_v49 = vpop.eup %12463 }
 0x8dc   :  { %v12466_v58 = vpop.eup %12465 }
 0x8de   :  { %v12468_v51 = vpop.eup %12467 }
 0x8df   :  { %v12470_v34 = vpop.eup %12469  ;;  %v5806_v2 = vcombine.low %v12464_v49, %v12468_v51 }
 0x8e0   :  { %v5807_v61 = vcombine.low %v12466_v58, %v12470_v34 }
 0x8e1   :  { %v5814_v38 = vrot.slane %v5806_v2, %v13601_v35 }
 0x8e2   :  { %v5821_v41 = vrot.slane %v5807_v61, %v13601_v35 }
 0x8e4   :  { %v5822_v45 = vcombine.low %v5814_v38, %v5821_v41 }
 0x8e6   :  { %v5824_v9 = vmul.f32 %v5822_v45, %v5800_v44 }
 0x8e8   :  { %v5829_v22 = vrot.slane %v5824_v9, %v13608_v40  ;;  %v5833_v11 = vrot.slane %v5824_v9, %v13610_v30  ;;  %v5837_v3 = vrot.slane %v5824_v9, %v13612_v42  ;;  %v5841_v23 = vrot.slane %v5824_v9, %v13614_v43 }
 0x8ea   :  { %v5846_v56 = vmul.f32 %v5829_v22, %v5743_v28  ;;  %v5847_v10 = vmul.f32 %v5833_v11, %v5744_v52  ;;  %v5848_v50 = vmul.f32 %v5837_v3, %v5745_v60  ;;  %v5849_v54 = vmul.f32 %v5841_v23, %v5746_v57 }
 0x8eb   :  { %v5877_v62 = vrot.slane %v5829_v22, %v13608_v40  ;;  %v5881_v13 = vrot.slane %v5833_v11, %v13608_v40  ;;  %v5885_v55 = vrot.slane %v5837_v3, %v13608_v40  ;;  %v5889_v21 = vrot.slane %v5841_v23, %v13608_v40 }
 0x8ec   :  { %v5854_v63 = vcombine.low %v5846_v56, %v5847_v10  ;;  %v5855_v26 = vcombine.low %v5848_v50, %v5849_v54 }
 0x8ed   :  { %v5890_v24 = vmul.f32 %v5877_v62, %v13797_v16  ;;  %v5891_v27 = vmul.f32 %v5881_v13, %v13807_v46  ;;  %v5892_v15 = vmul.f32 %v5885_v55, %v13799_v33  ;;  %v5893_v1 = vmul.f32 %v5889_v21, %v13809_v59 }
 0x8ee   :  { %v5862_v31 = vrot.slane %v5854_v63, %v13601_v35  ;;  %v5869_v48 = vrot.slane %v5855_v26, %v13601_v35 }
 0x8f0   :  { %v5870_v20 = vcombine.low %v5862_v31, %v5869_v48 }
 0x8f2   :  { %v5871_v47 = vrot.slane %v5870_v20, 7 }
 0x8f4   :  { %v5873_v28 = vsub.f32 %v5800_v44, %v5871_v47 }
 0x8f6   :  { %v5898_v60 = vrot.slane %v5873_v28, %v13633_v12  ;;  %v5902_v52 = vrot.slane %v5873_v28, %v13635_v14  ;;  %v5906_v57 = vrot.slane %v5873_v28, %v13637_v17  ;;  %v5910_v19 = vrot.slane %v5873_v28, %v13639_v18 }
 0x8f8   :  { %v5918_v36 = vrot.slane %v5898_v60, %v13633_v12  ;;  %v5922_v53 = vrot.slane %v5902_v52, %v13633_v12  ;;  %v5926_v32 = vrot.slane %v5906_v57, %v13633_v12  ;;  %v5930_v25 = vrot.slane %v5910_v19, %v13633_v12 }
 0x8fa   :  { %v5931_v0 = vadd.f32 %v5918_v36, %v5890_v24  ;;  %v5932_v49 = vadd.f32 %v5922_v53, %v5891_v27  ;;  %v5933_v58 = vadd.f32 %v5926_v32, %v5892_v15  ;;  %v5934_v51 = vadd.f32 %v5930_v25, %v5893_v1 }
 0x8fc   :  { %vm5935_vm2 = vcmp.ge.f32.partialorder %v5931_v0, 0.0  ;;  %vm5936_vm3 = vcmp.ge.f32.partialorder %v5932_v49, 0.0  ;;  %vm5937_vm4 = vcmp.ge.f32.partialorder %v5933_v58, 0.0  ;;  %vm5938_vm5 = vcmp.ge.f32.partialorder %v5934_v51, 0.0 }
 0x8fd   :  { %v5939_v16 = vmul.f32 0.01, %v5931_v0  ;;  %v5940_v33 = vmul.f32 0.01, %v5932_v49  ;;  %v5941_v46 = vmul.f32 0.01, %v5933_v58 }
 0x8fe   :  { %v5942_v59 = vmul.f32 0.01, %v5934_v51 }
 0x8ff   :  { %v5943_v34 = vsel %vm5935_vm2, %v5931_v0, %v5939_v16  ;;  %v5944_v8 = vsel %vm5936_vm3, %v5932_v49, %v5940_v33  ;;  %v5945_v2 = vsel %vm5937_vm4, %v5933_v58, %v5941_v46 }
 0x900   :  { %v5946_v61 = vsel %vm5938_vm5, %v5934_v51, %v5942_v59  ;;  %v13850_v38 = vpack.c.bf16 %v5943_v34, %v5943_v34  ;;  %v13852_v41 = vpack.c.bf16 %v5944_v8, %v5944_v8  ;;  %v13854_v44 = vpack.c.bf16 %v5945_v2, %v5945_v2 }
 0x901   :  { %v13856_v45 = vpack.c.bf16 %v5946_v61, %v5946_v61 }
 0x902   :  { %13353 = dma.done.wait [#allocation10 + $0x6], 20480 }
 0x903   :  { %13354 = vsyncadd [#allocation10 + $0x6], 4294946816  ;;  %7010 = vmatprep.mubr.bf16.mxu0 %v13852_v41  ;;  %7051 = vmatprep.mubr.bf16.mxu1 %v13856_v45  ;;  %v12471_v9 = vld [vmem:[#allocation8 + $0x11c] ss:$20 sps:$4 sm:$0xff]   ;;  %v12475_v11 = vld [vmem:[#allocation8 + $0x118] ss:$20 sps:$4 sm:$0xff]  }
 0x904   :  { %v12473_v22 = vld [vmem:[#allocation8 + $0x39c] ss:$20 sps:$4 sm:$0xff]   ;;  %6978 = vmatprep.subr.bf16.mxu0 %v12471_v9  ;;  %v12476_v3 = vld [vmem:[#allocation8 + $0x398] ss:$20 sps:$4 sm:$0xff]   ;;  %v12477_v23 = vld [vmem:[#allocation8 + $0xf4] ss:$20 sps:$4 sm:$0xff]  }
 0x905   :  { %7019 = vmatprep.subr.bf16.mxu1 %v12473_v22  ;;  %6979 = vmatpush1.bf16.msra.mxu0 %v12475_v11  ;;  %v12479_v56 = vld [vmem:[#allocation8 + $0x374] ss:$20 sps:$4 sm:$0xff]   ;;  %v12481_v10 = vld [vmem:[#allocation8 + $0xf0] ss:$20 sps:$4 sm:$0xff]   ;;  %v12483_v54 = vld [vmem:[#allocation8 + $0xcc] ss:$20 sps:$4 sm:$0xff]  }
 0x906   :  { %7020 = vmatpush1.bf16.msra.mxu1 %v12476_v3  ;;  %6980 = vmatprep.subr.bf16.mxu0 %v12477_v23  ;;  %v12482_v50 = vld [vmem:[#allocation8 + $0x370] ss:$20 sps:$4 sm:$0xff]   ;;  %v12485_v63 = vld [vmem:[#allocation8 + $0x34c] ss:$20 sps:$4 sm:$0xff]   ;;  %v12487_v26 = vld [vmem:[#allocation8 + $0xc8] ss:$20 sps:$4 sm:$0xff]  }
 0x907   :  { %7021 = vmatprep.subr.bf16.mxu1 %v12479_v56  ;;  %v12488_v31 = vld [vmem:[#allocation8 + $0x348] ss:$20 sps:$4 sm:$0xff]   ;;  %v12489_v48 = vld [vmem:[#allocation8 + $0xa4] ss:$20 sps:$4 sm:$0xff]   ;;  %v12493_v47 = vld [vmem:[#allocation8 + $0xa0] ss:$20 sps:$4 sm:$0xff]  }
 0x908   :  { %v12491_v20 = vld [vmem:[#allocation8 + $0x324] ss:$20 sps:$4 sm:$0xff]   ;;  %v12494_v62 = vld [vmem:[#allocation8 + $0x320] ss:$20 sps:$4 sm:$0xff]   ;;  %v12495_v13 = vld [vmem:[#allocation8 + $0x7c] ss:$20 sps:$4 sm:$0xff]  }
 0x909   :  { %6981 = vmatpush1.bf16.msra.mxu0 %v12481_v10  ;;  %v12497_v55 = vld [vmem:[#allocation8 + $0x2fc] ss:$20 sps:$4 sm:$0xff]   ;;  %v12499_v21 = vld [vmem:[#allocation8 + $0x78] ss:$20 sps:$4 sm:$0xff]   ;;  %v12501_v60 = vld [vmem:[#allocation8 + $0x54] ss:$20 sps:$4 sm:$0xff]  }
 0x90a   :  { %7022 = vmatpush1.bf16.msra.mxu1 %v12482_v50  ;;  %6982 = vmatprep.subr.bf16.mxu0 %v12483_v54  ;;  %v12500_v28 = vld [vmem:[#allocation8 + $0x2f8] ss:$20 sps:$4 sm:$0xff]   ;;  %v12503_v52 = vld [vmem:[#allocation8 + $0x2d4] ss:$20 sps:$4 sm:$0xff]   ;;  %v12505_v57 = vld [vmem:[#allocation8 + $0x50] ss:$20 sps:$4 sm:$0xff]  }
 0x90b   :  { %7023 = vmatprep.subr.bf16.mxu1 %v12485_v63  ;;  %v12506_v19 = vld [vmem:[#allocation8 + $0x2d0] ss:$20 sps:$4 sm:$0xff]   ;;  %v12507_v24 = vld [vmem:[#allocation8 + $0x2c] ss:$20 sps:$4 sm:$0xff]   ;;  %v12511_v15 = vld [vmem:[#allocation8 + $0x28] ss:$20 sps:$4 sm:$0xff]  }
 0x90c   :  { %v12509_v27 = vld [vmem:[#allocation8 + $0x2ac] ss:$20 sps:$4 sm:$0xff]   ;;  %v12512_v1 = vld [vmem:[#allocation8 + $0x2a8] ss:$20 sps:$4 sm:$0xff]   ;;  %v12513_v36 = vld [vmem:[#allocation8 + $0x4] ss:$20 sps:$4 sm:$0xff]  }
 0x90d   :  { %6983 = vmatpush1.bf16.msra.mxu0 %v12487_v26  ;;  %v12515_v53 = vld [vmem:[#allocation8 + $0x284] ss:$20 sps:$4 sm:$0xff]   ;;  %v12517_v32 = vld [vmem:[#allocation8] ss:$20 sps:$4 sm:$0xff]   ;;  %v12519_v0 = vld [vmem:[#allocation8 + $0x25c] ss:$20 sps:$4 sm:$0xff]  }
 0x90e   :  { %7024 = vmatpush1.bf16.msra.mxu1 %v12488_v31  ;;  %6984 = vmatprep.subr.bf16.mxu0 %v12489_v48  ;;  %v12518_v25 = vld [vmem:[#allocation8 + $0x280] ss:$20 sps:$4 sm:$0xff]   ;;  %v12521_v49 = vld [vmem:[#allocation8 + $0x4dc] ss:$20 sps:$4 sm:$0xff]   ;;  %v12523_v58 = vld [vmem:[#allocation8 + $0x258] ss:$20 sps:$4 sm:$0xff]  }
 0x90f   :  { %7025 = vmatprep.subr.bf16.mxu1 %v12491_v20  ;;  %v12524_v51 = vld [vmem:[#allocation8 + $0x4d8] ss:$20 sps:$4 sm:$0xff]   ;;  %v12525_v16 = vld [vmem:[#allocation8 + $0x234] ss:$20 sps:$4 sm:$0xff]   ;;  %v12529_v46 = vld [vmem:[#allocation8 + $0x230] ss:$20 sps:$4 sm:$0xff]  }
 0x910   :  { %v12527_v33 = vld [vmem:[#allocation8 + $0x4b4] ss:$20 sps:$4 sm:$0xff]   ;;  %v12530_v59 = vld [vmem:[#allocation8 + $0x4b0] ss:$20 sps:$4 sm:$0xff]   ;;  %v12531_v34 = vld [vmem:[#allocation8 + $0x20c] ss:$20 sps:$4 sm:$0xff]  }
 0x911   :  { %6985 = vmatpush1.bf16.msra.mxu0 %v12493_v47  ;;  %v12533_v8 = vld [vmem:[#allocation8 + $0x48c] ss:$20 sps:$4 sm:$0xff]   ;;  %v12535_v2 = vld [vmem:[#allocation8 + $0x208] ss:$20 sps:$4 sm:$0xff]   ;;  %v12537_v9 = vld [vmem:[#allocation8 + $0x1e4] ss:$20 sps:$4 sm:$0xff]  }
 0x912   :  { %7026 = vmatpush1.bf16.msra.mxu1 %v12494_v62  ;;  %6986 = vmatprep.subr.bf16.mxu0 %v12495_v13  ;;  %v12536_v61 = vld [vmem:[#allocation8 + $0x488] ss:$20 sps:$4 sm:$0xff]   ;;  %v12539_v22 = vld [vmem:[#allocation8 + $0x464] ss:$20 sps:$4 sm:$0xff]   ;;  %v12541_v11 = vld [vmem:[#allocation8 + $0x1e0] ss:$20 sps:$4 sm:$0xff]  }
 0x913   :  { %7027 = vmatprep.subr.bf16.mxu1 %v12497_v55  ;;  %v12542_v3 = vld [vmem:[#allocation8 + $0x460] ss:$20 sps:$4 sm:$0xff]   ;;  %v12543_v23 = vld [vmem:[#allocation8 + $0x1bc] ss:$20 sps:$4 sm:$0xff]   ;;  %v12547_v10 = vld [vmem:[#allocation8 + $0x1b8] ss:$20 sps:$4 sm:$0xff]  }
 0x914   :  { %v12545_v56 = vld [vmem:[#allocation8 + $0x43c] ss:$20 sps:$4 sm:$0xff]   ;;  %v12548_v50 = vld [vmem:[#allocation8 + $0x438] ss:$20 sps:$4 sm:$0xff]   ;;  %v12549_v54 = vld [vmem:[#allocation8 + $0x194] ss:$20 sps:$4 sm:$0xff]  }
 0x915   :  { %6987 = vmatpush1.bf16.msra.mxu0 %v12499_v21  ;;  %v12551_v63 = vld [vmem:[#allocation8 + $0x414] ss:$20 sps:$4 sm:$0xff]   ;;  %v12553_v26 = vld [vmem:[#allocation8 + $0x190] ss:$20 sps:$4 sm:$0xff]   ;;  %v12555_v48 = vld [vmem:[#allocation8 + $0x16c] ss:$20 sps:$4 sm:$0xff]  }
 0x916   :  { %7028 = vmatpush1.bf16.msra.mxu1 %v12500_v28  ;;  %6988 = vmatprep.subr.bf16.mxu0 %v12501_v60  ;;  %v12554_v31 = vld [vmem:[#allocation8 + $0x410] ss:$20 sps:$4 sm:$0xff]   ;;  %v12557_v20 = vld [vmem:[#allocation8 + $0x3ec] ss:$20 sps:$4 sm:$0xff]   ;;  %v12559_v47 = vld [vmem:[#allocation8 + $0x168] ss:$20 sps:$4 sm:$0xff]  }
 0x917   :  { %7029 = vmatprep.subr.bf16.mxu1 %v12503_v52  ;;  %v12560_v62 = vld [vmem:[#allocation8 + $0x3e8] ss:$20 sps:$4 sm:$0xff]   ;;  %v12561_v13 = vld [vmem:[#allocation8 + $0x144] ss:$20 sps:$4 sm:$0xff]   ;;  %v12565_v21 = vld [vmem:[#allocation8 + $0x140] ss:$20 sps:$4 sm:$0xff]  }
 0x918   :  { %v12563_v55 = vld [vmem:[#allocation8 + $0x3c4] ss:$20 sps:$4 sm:$0xff]   ;;  %v12566_v28 = vld [vmem:[#allocation8 + $0x3c0] ss:$20 sps:$4 sm:$0xff]  }
 0x919   :  { %6989 = vmatpush1.bf16.msra.mxu0 %v12505_v57  ;;  %v12569_v60 = vld [vmem:[#allocation8 + $0x124] ss:$20 sps:$4 sm:$0xff]   ;;  %v12567_v57 = vld [vmem:[#allocation8 + $0x120] ss:$20 sps:$4 sm:$0xff]  }
 0x91a   :  { %7030 = vmatpush1.bf16.msra.mxu1 %v12506_v19  ;;  %6990 = vmatprep.subr.bf16.mxu0 %v12507_v24  ;;  %v12572_v52 = vld [vmem:[#allocation8 + $0x3a4] ss:$20 sps:$4 sm:$0xff]   ;;  %v12570_v19 = vld [vmem:[#allocation8 + $0x3a0] ss:$20 sps:$4 sm:$0xff]   ;;  %v12575_v24 = vld [vmem:[#allocation8 + $0xfc] ss:$20 sps:$4 sm:$0xff]  }
 0x91b   :  { %7031 = vmatprep.subr.bf16.mxu1 %v12509_v27  ;;  %v12578_v27 = vld [vmem:[#allocation8 + $0x37c] ss:$20 sps:$4 sm:$0xff]  }
 0x91d   :  { %6991 = vmatpush1.bf16.msra.mxu0 %v12511_v15  ;;  %v12573_v15 = vld [vmem:[#allocation8 + $0xf8] ss:$20 sps:$4 sm:$0xff]  }
 0x91e   :  { %7032 = vmatpush1.bf16.msra.mxu1 %v12512_v1  ;;  %6992 = vmatprep.subr.bf16.mxu0 %v12513_v36  ;;  %v12576_v1 = vld [vmem:[#allocation8 + $0x378] ss:$20 sps:$4 sm:$0xff]   ;;  %v12581_v36 = vld [vmem:[#allocation8 + $0xd4] ss:$20 sps:$4 sm:$0xff]  }
 0x91f   :  { %7033 = vmatprep.subr.bf16.mxu1 %v12515_v53  ;;  %v12584_v53 = vld [vmem:[#allocation8 + $0x354] ss:$20 sps:$4 sm:$0xff]  }
 0x921   :  { %6993 = vmatpush1.bf16.msra.mxu0 %v12517_v32  ;;  %v12579_v32 = vld [vmem:[#allocation8 + $0xd0] ss:$20 sps:$4 sm:$0xff]  }
 0x922   :  { %7034 = vmatpush1.bf16.msra.mxu1 %v12518_v25  ;;  %6994 = vmatprep.subr.bf16.mxu0 %v12519_v0  ;;  %v12582_v25 = vld [vmem:[#allocation8 + $0x350] ss:$20 sps:$4 sm:$0xff]   ;;  %v12587_v0 = vld [vmem:[#allocation8 + $0xac] ss:$20 sps:$4 sm:$0xff]  }
 0x923   :  { %7035 = vmatprep.subr.bf16.mxu1 %v12521_v49  ;;  %v12590_v49 = vld [vmem:[#allocation8 + $0x32c] ss:$20 sps:$4 sm:$0xff]  }
 0x925   :  { %6995 = vmatpush2.bf16.msra.mxu0 %v12523_v58  ;;  %v12585_v58 = vld [vmem:[#allocation8 + $0xa8] ss:$20 sps:$4 sm:$0xff]  }
 0x926   :  { %7036 = vmatpush2.bf16.msra.mxu1 %v12524_v51  ;;  %6996 = vmatprep.subr.bf16.mxu0 %v12525_v16  ;;  %v12588_v51 = vld [vmem:[#allocation8 + $0x328] ss:$20 sps:$4 sm:$0xff]   ;;  %v12593_v16 = vld [vmem:[#allocation8 + $0x84] ss:$20 sps:$4 sm:$0xff]  }
 0x927   :  { %7037 = vmatprep.subr.bf16.mxu1 %v12527_v33  ;;  %v12596_v33 = vld [vmem:[#allocation8 + $0x304] ss:$20 sps:$4 sm:$0xff]  }
 0x929   :  { %6997 = vmatpush2.bf16.msra.mxu0 %v12529_v46  ;;  %v12591_v46 = vld [vmem:[#allocation8 + $0x80] ss:$20 sps:$4 sm:$0xff]  }
 0x92a   :  { %7038 = vmatpush2.bf16.msra.mxu1 %v12530_v59  ;;  %6998 = vmatprep.subr.bf16.mxu0 %v12531_v34  ;;  %v12594_v59 = vld [vmem:[#allocation8 + $0x300] ss:$20 sps:$4 sm:$0xff]   ;;  %v12599_v34 = vld [vmem:[#allocation8 + $0x5c] ss:$20 sps:$4 sm:$0xff]  }
 0x92b   :  { %7039 = vmatprep.subr.bf16.mxu1 %v12533_v8  ;;  %v12602_v8 = vld [vmem:[#allocation8 + $0x2dc] ss:$20 sps:$4 sm:$0xff]  }
 0x92d   :  { %6999 = vmatpush2.bf16.msra.mxu0 %v12535_v2  ;;  %v12597_v2 = vld [vmem:[#allocation8 + $0x58] ss:$20 sps:$4 sm:$0xff]  }
 0x92e   :  { %7040 = vmatpush2.bf16.msra.mxu1 %v12536_v61  ;;  %7000 = vmatprep.subr.bf16.mxu0 %v12537_v9  ;;  %v12600_v61 = vld [vmem:[#allocation8 + $0x2d8] ss:$20 sps:$4 sm:$0xff]   ;;  %v12605_v9 = vld [vmem:[#allocation8 + $0x34] ss:$20 sps:$4 sm:$0xff]  }
 0x92f   :  { %7041 = vmatprep.subr.bf16.mxu1 %v12539_v22  ;;  %v12608_v22 = vld [vmem:[#allocation8 + $0x2b4] ss:$20 sps:$4 sm:$0xff]  }
 0x931   :  { %7001 = vmatpush2.bf16.msra.mxu0 %v12541_v11  ;;  %v12603_v11 = vld [vmem:[#allocation8 + $0x30] ss:$20 sps:$4 sm:$0xff]  }
 0x932   :  { %7042 = vmatpush2.bf16.msra.mxu1 %v12542_v3  ;;  %7002 = vmatprep.subr.bf16.mxu0 %v12543_v23  ;;  %v12606_v3 = vld [vmem:[#allocation8 + $0x2b0] ss:$20 sps:$4 sm:$0xff]   ;;  %v12611_v23 = vld [vmem:[#allocation8 + $0xc] ss:$20 sps:$4 sm:$0xff]  }
 0x933   :  { %7043 = vmatprep.subr.bf16.mxu1 %v12545_v56  ;;  %v12614_v56 = vld [vmem:[#allocation8 + $0x28c] ss:$20 sps:$4 sm:$0xff]  }
 0x935   :  { %7003 = vmatpush2.bf16.msra.mxu0 %v12547_v10  ;;  %v12609_v10 = vld [vmem:[#allocation8 + $0x8] ss:$20 sps:$4 sm:$0xff]  }
 0x936   :  { %7044 = vmatpush2.bf16.msra.mxu1 %v12548_v50  ;;  %7004 = vmatprep.subr.bf16.mxu0 %v12549_v54  ;;  %v12612_v50 = vld [vmem:[#allocation8 + $0x288] ss:$20 sps:$4 sm:$0xff]   ;;  %v12617_v54 = vld [vmem:[#allocation8 + $0x264] ss:$20 sps:$4 sm:$0xff]  }
 0x937   :  { %7045 = vmatprep.subr.bf16.mxu1 %v12551_v63  ;;  %v12620_v63 = vld [vmem:[#allocation8 + $0x4e4] ss:$20 sps:$4 sm:$0xff]  }
 0x939   :  { %7005 = vmatpush2.bf16.msra.mxu0 %v12553_v26  ;;  %v12615_v26 = vld [vmem:[#allocation8 + $0x260] ss:$20 sps:$4 sm:$0xff]  }
 0x93a   :  { %7046 = vmatpush2.bf16.msra.mxu1 %v12554_v31  ;;  %7006 = vmatprep.subr.bf16.mxu0 %v12555_v48  ;;  %v12618_v31 = vld [vmem:[#allocation8 + $0x4e0] ss:$20 sps:$4 sm:$0xff]   ;;  %v12623_v48 = vld [vmem:[#allocation8 + $0x23c] ss:$20 sps:$4 sm:$0xff]  }
 0x93b   :  { %7047 = vmatprep.subr.bf16.mxu1 %v12557_v20  ;;  %v12626_v20 = vld [vmem:[#allocation8 + $0x4bc] ss:$20 sps:$4 sm:$0xff]  }
 0x93d   :  { %7007 = vmatpush2.bf16.msra.mxu0 %v12559_v47  ;;  %v12621_v47 = vld [vmem:[#allocation8 + $0x238] ss:$20 sps:$4 sm:$0xff]  }
 0x93e   :  { %7048 = vmatpush2.bf16.msra.mxu1 %v12560_v62  ;;  %7008 = vmatprep.subr.bf16.mxu0 %v12561_v13  ;;  %v12624_v62 = vld [vmem:[#allocation8 + $0x4b8] ss:$20 sps:$4 sm:$0xff]   ;;  %v12629_v13 = vld [vmem:[#allocation8 + $0x214] ss:$20 sps:$4 sm:$0xff]  }
 0x93f   :  { %7049 = vmatprep.subr.bf16.mxu1 %v12563_v55  ;;  %v12632_v55 = vld [vmem:[#allocation8 + $0x494] ss:$20 sps:$4 sm:$0xff]  }
 0x941   :  { %7009 = vmatpush2.bf16.msra.mxu0 %v12565_v21  ;;  %v12627_v21 = vld [vmem:[#allocation8 + $0x210] ss:$20 sps:$4 sm:$0xff]  }
 0x942   :  { %7050 = vmatpush2.bf16.msra.mxu1 %v12566_v28  ;;  %7060 = vmatprep.subr.bf16.mxu0 %v12569_v60  ;;  %v12630_v28 = vld [vmem:[#allocation8 + $0x490] ss:$20 sps:$4 sm:$0xff]   ;;  %v12635_v60 = vld [vmem:[#allocation8 + $0x1ec] ss:$20 sps:$4 sm:$0xff]  }
 0x943   :  { %7101 = vmatprep.subr.bf16.mxu1 %v12572_v52  ;;  %v12638_v52 = vld [vmem:[#allocation8 + $0x46c] ss:$20 sps:$4 sm:$0xff]  }
 0x944   :  { %7011 = vmatmul.mubr.bf16.vlgmr.msra.gmra.mxu0 %v13850_v38 }
 0x945   :  { %7052 = vmatmul.mubr.bf16.vlgmr.msra.gmra.mxu1 %v13854_v44  ;;  %7061 = vmatpush1.bf16.msra.mxu0 %v12567_v57  ;;  %v12633_v57 = vld [vmem:[#allocation8 + $0x1e8] ss:$20 sps:$4 sm:$0xff]  }
 0x946   :  { %7102 = vmatpush1.bf16.msra.mxu1 %v12570_v19  ;;  %7062 = vmatprep.subr.bf16.mxu0 %v12575_v24  ;;  %v12636_v19 = vld [vmem:[#allocation8 + $0x468] ss:$20 sps:$4 sm:$0xff]   ;;  %v12641_v24 = vld [vmem:[#allocation8 + $0x1c4] ss:$20 sps:$4 sm:$0xff]  }
 0x947   :  { %7103 = vmatprep.subr.bf16.mxu1 %v12578_v27  ;;  %7092 = vmatprep.mubr.bf16.mxu0 %v13852_v41  ;;  %v12644_v27 = vld [vmem:[#allocation8 + $0x444] ss:$20 sps:$4 sm:$0xff]  }
 0x948   :  { %7133 = vmatprep.mubr.bf16.mxu1 %v13856_v45 }
 0x949   :  { %7063 = vmatpush1.bf16.msra.mxu0 %v12573_v15  ;;  %v12639_v15 = vld [vmem:[#allocation8 + $0x1c0] ss:$20 sps:$4 sm:$0xff]  }
 0x94a   :  { %7104 = vmatpush1.bf16.msra.mxu1 %v12576_v1  ;;  %7064 = vmatprep.subr.bf16.mxu0 %v12581_v36  ;;  %v12642_v1 = vld [vmem:[#allocation8 + $0x440] ss:$20 sps:$4 sm:$0xff]   ;;  %v12647_v36 = vld [vmem:[#allocation8 + $0x19c] ss:$20 sps:$4 sm:$0xff]  }
 0x94b   :  { %7105 = vmatprep.subr.bf16.mxu1 %v12584_v53  ;;  %v12650_v53 = vld [vmem:[#allocation8 + $0x41c] ss:$20 sps:$4 sm:$0xff]  }
 0x94d   :  { %7065 = vmatpush1.bf16.msra.mxu0 %v12579_v32  ;;  %v12645_v32 = vld [vmem:[#allocation8 + $0x198] ss:$20 sps:$4 sm:$0xff]  }
 0x94e   :  { %7106 = vmatpush1.bf16.msra.mxu1 %v12582_v25  ;;  %7066 = vmatprep.subr.bf16.mxu0 %v12587_v0  ;;  %v12648_v25 = vld [vmem:[#allocation8 + $0x418] ss:$20 sps:$4 sm:$0xff]   ;;  %v12653_v0 = vld [vmem:[#allocation8 + $0x174] ss:$20 sps:$4 sm:$0xff]  }
 0x94f   :  { %7107 = vmatprep.subr.bf16.mxu1 %v12590_v49  ;;  %v12656_v49 = vld [vmem:[#allocation8 + $0x3f4] ss:$20 sps:$4 sm:$0xff]  }
 0x951   :  { %7067 = vmatpush1.bf16.msra.mxu0 %v12585_v58  ;;  %v12651_v58 = vld [vmem:[#allocation8 + $0x170] ss:$20 sps:$4 sm:$0xff]  }
 0x952   :  { %7108 = vmatpush1.bf16.msra.mxu1 %v12588_v51  ;;  %7068 = vmatprep.subr.bf16.mxu0 %v12593_v16  ;;  %v12654_v51 = vld [vmem:[#allocation8 + $0x3f0] ss:$20 sps:$4 sm:$0xff]   ;;  %v12659_v16 = vld [vmem:[#allocation8 + $0x14c] ss:$20 sps:$4 sm:$0xff]  }
 0x953   :  { %7109 = vmatprep.subr.bf16.mxu1 %v12596_v33  ;;  %v12662_v33 = vld [vmem:[#allocation8 + $0x3cc] ss:$20 sps:$4 sm:$0xff]  }
 0x955   :  { %7069 = vmatpush1.bf16.msra.mxu0 %v12591_v46  ;;  %v12657_v46 = vld [vmem:[#allocation8 + $0x148] ss:$20 sps:$4 sm:$0xff]  }
 0x956   :  { %7110 = vmatpush1.bf16.msra.mxu1 %v12594_v59  ;;  %7070 = vmatprep.subr.bf16.mxu0 %v12599_v34  ;;  %v12660_v59 = vld [vmem:[#allocation8 + $0x3c8] ss:$20 sps:$4 sm:$0xff]  }
 0x957   :  { %7111 = vmatprep.subr.bf16.mxu1 %v12602_v8  ;;  %v12663_v34 = vld [vmem:[#allocation8 + $0x268] ss:$20 sps:$4 sm:$0xff]  }
 0x958   :  { %v12664_v8 = vld [vmem:[#allocation8 + $0x4e8] ss:$20 sps:$4 sm:$0xff]  }
 0x959   :  { %7071 = vmatpush1.bf16.msra.mxu0 %v12597_v2  ;;  %v12665_v2 = vld [vmem:[#allocation8 + $0x128] ss:$20 sps:$4 sm:$0xff]  }
 0x95a   :  { %7112 = vmatpush1.bf16.msra.mxu1 %v12600_v61  ;;  %7072 = vmatprep.subr.bf16.mxu0 %v12605_v9  ;;  %v12666_v61 = vld [vmem:[#allocation8 + $0x3a8] ss:$20 sps:$4 sm:$0xff]   ;;  %v12667_v9 = vld [vmem:[#allocation8 + $0x240] ss:$20 sps:$4 sm:$0xff]  }
 0x95b   :  { %7113 = vmatprep.subr.bf16.mxu1 %v12608_v22  ;;  %v12668_v22 = vld [vmem:[#allocation8 + $0x4c0] ss:$20 sps:$4 sm:$0xff]  }
 0x95d   :  { %7073 = vmatpush1.bf16.msra.mxu0 %v12603_v11  ;;  %v12669_v11 = vld [vmem:[#allocation8 + $0x100] ss:$20 sps:$4 sm:$0xff]  }
 0x95e   :  { %7114 = vmatpush1.bf16.msra.mxu1 %v12606_v3  ;;  %7074 = vmatprep.subr.bf16.mxu0 %v12611_v23  ;;  %v12670_v3 = vld [vmem:[#allocation8 + $0x380] ss:$20 sps:$4 sm:$0xff]   ;;  %v12671_v23 = vld [vmem:[#allocation8 + $0x218] ss:$20 sps:$4 sm:$0xff]  }
 0x95f   :  { %7115 = vmatprep.subr.bf16.mxu1 %v12614_v56  ;;  %v12672_v56 = vld [vmem:[#allocation8 + $0x498] ss:$20 sps:$4 sm:$0xff]  }
 0x961   :  { %7075 = vmatpush1.bf16.msra.mxu0 %v12609_v10  ;;  %v12673_v10 = vld [vmem:[#allocation8 + $0xd8] ss:$20 sps:$4 sm:$0xff]  }
 0x962   :  { %7116 = vmatpush1.bf16.msra.mxu1 %v12612_v50  ;;  %7076 = vmatprep.subr.bf16.mxu0 %v12617_v54  ;;  %v12674_v50 = vld [vmem:[#allocation8 + $0x358] ss:$20 sps:$4 sm:$0xff]   ;;  %v12675_v54 = vld [vmem:[#allocation8 + $0x1f0] ss:$20 sps:$4 sm:$0xff]  }
 0x963   :  { %7117 = vmatprep.subr.bf16.mxu1 %v12620_v63  ;;  %v12676_v63 = vld [vmem:[#allocation8 + $0x470] ss:$20 sps:$4 sm:$0xff]  }
 0x965   :  { %7077 = vmatpush2.bf16.msra.mxu0 %v12615_v26  ;;  %v12677_v26 = vld [vmem:[#allocation8 + $0xb0] ss:$20 sps:$4 sm:$0xff]  }
 0x966   :  { %7118 = vmatpush2.bf16.msra.mxu1 %v12618_v31  ;;  %7078 = vmatprep.subr.bf16.mxu0 %v12623_v48  ;;  %v12678_v31 = vld [vmem:[#allocation8 + $0x330] ss:$20 sps:$4 sm:$0xff]   ;;  %v12679_v48 = vld [vmem:[#allocation8 + $0x1c8] ss:$20 sps:$4 sm:$0xff]  }
 0x967   :  { %7119 = vmatprep.subr.bf16.mxu1 %v12626_v20  ;;  %v12680_v20 = vld [vmem:[#allocation8 + $0x448] ss:$20 sps:$4 sm:$0xff]  }
 0x969   :  { %7079 = vmatpush2.bf16.msra.mxu0 %v12621_v47  ;;  %v12683_v47 = vld [vmem:[#allocation8 + $0x1a0] ss:$20 sps:$4 sm:$0xff]  }
 0x96a   :  { %7120 = vmatpush2.bf16.msra.mxu1 %v12624_v62  ;;  %7080 = vmatprep.subr.bf16.mxu0 %v12629_v13  ;;  %v12684_v62 = vld [vmem:[#allocation8 + $0x420] ss:$20 sps:$4 sm:$0xff]  }
 0x96b   :  { %7121 = vmatprep.subr.bf16.mxu1 %v12632_v55  ;;  %v12685_v13 = vld [vmem:[#allocation8 + $0x60] ss:$20 sps:$4 sm:$0xff]  }
 0x96c   :  { %v12686_v55 = vld [vmem:[#allocation8 + $0x2e0] ss:$20 sps:$4 sm:$0xff]  }
 0x96d   :  { %7081 = vmatpush2.bf16.msra.mxu0 %v12627_v21  ;;  %v12687_v21 = vld [vmem:[#allocation8 + $0x178] ss:$20 sps:$4 sm:$0xff]  }
 0x96e   :  { %7122 = vmatpush2.bf16.msra.mxu1 %v12630_v28  ;;  %7082 = vmatprep.subr.bf16.mxu0 %v12635_v60  ;;  %v12688_v28 = vld [vmem:[#allocation8 + $0x3f8] ss:$20 sps:$4 sm:$0xff]  }
 0x96f   :  { %7123 = vmatprep.subr.bf16.mxu1 %v12638_v52  ;;  %v12689_v60 = vld [vmem:[#allocation8 + $0x38] ss:$20 sps:$4 sm:$0xff]  }
 0x970   :  { %v12690_v52 = vld [vmem:[#allocation8 + $0x2b8] ss:$20 sps:$4 sm:$0xff]  }
 0x971   :  { %7083 = vmatpush2.bf16.msra.mxu0 %v12633_v57  ;;  %v12691_v57 = vld [vmem:[#allocation8 + $0x150] ss:$20 sps:$4 sm:$0xff]  }
 0x972   :  { %7124 = vmatpush2.bf16.msra.mxu1 %v12636_v19  ;;  %7084 = vmatprep.subr.bf16.mxu0 %v12641_v24  ;;  %v12692_v19 = vld [vmem:[#allocation8 + $0x3d0] ss:$20 sps:$4 sm:$0xff]  }
 0x973   :  { %7125 = vmatprep.subr.bf16.mxu1 %v12644_v27  ;;  %v12693_v24 = vld [vmem:[#allocation8 + $0x10] ss:$20 sps:$4 sm:$0xff]  }
 0x974   :  { %v12694_v27 = vld [vmem:[#allocation8 + $0x290] ss:$20 sps:$4 sm:$0xff]  }
 0x975   :  { %7085 = vmatpush2.bf16.msra.mxu0 %v12639_v15 }
 0x976   :  { %7126 = vmatpush2.bf16.msra.mxu1 %v12642_v1  ;;  %7086 = vmatprep.subr.bf16.mxu0 %v12647_v36 }
 0x977   :  { %7127 = vmatprep.subr.bf16.mxu1 %v12650_v53 }
 0x979   :  { %7087 = vmatpush2.bf16.msra.mxu0 %v12645_v32 }
 0x97a   :  { %7128 = vmatpush2.bf16.msra.mxu1 %v12648_v25  ;;  %7088 = vmatprep.subr.bf16.mxu0 %v12653_v0 }
 0x97b   :  { %7129 = vmatprep.subr.bf16.mxu1 %v12656_v49 }
 0x97d   :  { %7089 = vmatpush2.bf16.msra.mxu0 %v12651_v58 }
 0x97e   :  { %7130 = vmatpush2.bf16.msra.mxu1 %v12654_v51  ;;  %7090 = vmatprep.subr.bf16.mxu0 %v12659_v16 }
 0x97f   :  { %7131 = vmatprep.subr.bf16.mxu1 %v12662_v33 }
 0x981   :  { %7091 = vmatpush2.bf16.msra.mxu0 %v12657_v46 }
 0x982   :  { %7132 = vmatpush2.bf16.msra.mxu1 %v12660_v59  ;;  %11419 = vmatprep.subr.bf16.mxu0 %v12663_v34 }
 0x983   :  { %11441 = vmatprep.subr.bf16.mxu1 %v12664_v8 }
 0x984   :  { %7093 = vmatmul.mubr.bf16.vlgmr.msra.gmra.mxu0 %v13850_v38 }
 0x985   :  { %7134 = vmatmul.mubr.bf16.vlgmr.msra.gmra.mxu1 %v13854_v44  ;;  %11420 = vmatpush3.bf16.msra.mxu0 %v12665_v2 }
 0x986   :  { %11442 = vmatpush3.bf16.msra.mxu1 %v12666_v61  ;;  %11421 = vmatprep.subr.bf16.mxu0 %v12667_v9 }
 0x987   :  { %11443 = vmatprep.subr.bf16.mxu1 %v12668_v22  ;;  %7174 = vmatprep.mubr.bf16.mxu0 %v13852_v41  ;;  %v12681_v41 = vld [vmem:[#allocation8 + $0x88] ss:$20 sps:$4 sm:$0xff]  }
 0x988   :  { %7214 = vmatprep.mubr.bf16.mxu1 %v13856_v45  ;;  %v12682_v45 = vld [vmem:[#allocation8 + $0x308] ss:$20 sps:$4 sm:$0xff]  }
 0x989   :  { %11422 = vmatpush3.bf16.msra.mxu0 %v12669_v11 }
 0x98a   :  { %11444 = vmatpush3.bf16.msra.mxu1 %v12670_v3  ;;  %11423 = vmatprep.subr.bf16.mxu0 %v12671_v23 }
 0x98b   :  { %11445 = vmatprep.subr.bf16.mxu1 %v12672_v56 }
 0x98d   :  { %11424 = vmatpush3.bf16.msra.mxu0 %v12673_v10 }
 0x98e   :  { %11446 = vmatpush3.bf16.msra.mxu1 %v12674_v50  ;;  %11425 = vmatprep.subr.bf16.mxu0 %v12675_v54 }
 0x98f   :  { %11447 = vmatprep.subr.bf16.mxu1 %v12676_v63 }
 0x991   :  { %11426 = vmatpush3.bf16.msra.mxu0 %v12677_v26 }
 0x992   :  { %11448 = vmatpush3.bf16.msra.mxu1 %v12678_v31  ;;  %11427 = vmatprep.subr.bf16.mxu0 %v12679_v48 }
 0x993   :  { %11449 = vmatprep.subr.bf16.mxu1 %v12680_v20 }
 0x995   :  { %11428 = vmatpush3.bf16.msra.mxu0 %v12681_v41 }
 0x996   :  { %11450 = vmatpush3.bf16.msra.mxu1 %v12682_v45  ;;  %11429 = vmatprep.subr.bf16.mxu0 %v12683_v47 }
 0x997   :  { %11451 = vmatprep.subr.bf16.mxu1 %v12684_v62 }
 0x999   :  { %11430 = vmatpush3.bf16.msra.mxu0 %v12685_v13 }
 0x99a   :  { %11452 = vmatpush3.bf16.msra.mxu1 %v12686_v55  ;;  %11431 = vmatprep.subr.bf16.mxu0 %v12687_v21 }
 0x99b   :  { %11453 = vmatprep.subr.bf16.mxu1 %v12688_v28 }
 0x99d   :  { %11432 = vmatpush3.bf16.msra.mxu0 %v12689_v60 }
 0x99e   :  { %11454 = vmatpush3.bf16.msra.mxu1 %v12690_v52  ;;  %11433 = vmatprep.subr.bf16.mxu0 %v12691_v57 }
 0x99f   :  { %11455 = vmatprep.subr.bf16.mxu1 %v12692_v19 }
 0x9a1   :  { %11434 = vmatpush3.bf16.msra.mxu0 %v12693_v24 }
 0x9a2   :  { %11456 = vmatpush3.bf16.msra.mxu1 %v12694_v27 }
 0x9a4   :  { %7175 = vmatmul.mubr.bf16.vlgmr.msra.gmra.mxu0 %v13850_v38 }
 0x9a5   :  { %7215 = vmatmul.mubr.bf16.vlgmr.msra.gmra.mxu1 %v13854_v44 }
 0xa04   :  { %v7012_v15 = vpop.f32.mrf.mxu0 }
 0xa05   :  { %v7053_v1 = vpop.f32.mrf.mxu1 }
 0xa06   :  { %v13870_v36 = vadd.f32 %v7053_v1, %v7012_v15  ;;  %v7014_v53 = vpop.f32.mrf.mxu0 }
 0xa07   :  { %v7055_v32 = vpop.f32.mrf.mxu1 }
 0xa08   :  { %v7222_v25 = vrot.slane %v13870_v36, 4  ;;  %v7257_v0 = vmul.f32 %v13870_v36, %v13870_v36  ;;  %v13875_v49 = vadd.f32 %v7055_v32, %v7014_v53  ;;  %v7016_v58 = vpop.f32.mrf.mxu0 }
 0xa09   :  { %v7057_v51 = vpop.f32.mrf.mxu1 }
 0xa0a   :  { %v7223_v16 = vadd.f32 %v7222_v25, %v13870_v36  ;;  %v7262_v38 = vrot.slane %v7257_v0, 4  ;;  %v7228_v44 = vrot.slane %v13875_v49, 4  ;;  %v7258_v33 = vmul.f32 %v13875_v49, %v13875_v49  ;;  %v7017_v46 = vpop.f32.mrf.mxu0 }
 0xa0b   :  { %v7058_v59 = vpop.f32.mrf.mxu1 }
 0xa0c   :  { %v7224_v34 = vrot.slane %v7223_v16, 2  ;;  %v7263_v8 = vadd.f32 %v7262_v38, %v7257_v0  ;;  %v7229_v2 = vadd.f32 %v7228_v44, %v13875_v49  ;;  %v7268_v61 = vrot.slane %v7258_v33, 4 }
 0xa0e   :  { %v7225_v9 = vadd.f32 %v7224_v34, %v7223_v16  ;;  %v7264_v22 = vrot.slane %v7263_v8, 2  ;;  %v7230_v11 = vrot.slane %v7229_v2, 2  ;;  %v7269_v3 = vadd.f32 %v7268_v61, %v7258_v33 }
 0xa10   :  { %v7226_v23 = vrot.slane %v7225_v9, 1  ;;  %v7265_v56 = vadd.f32 %v7264_v22, %v7263_v8  ;;  %v7231_v10 = vadd.f32 %v7230_v11, %v7229_v2  ;;  %v7270_v50 = vrot.slane %v7269_v3, 2 }
 0xa12   :  { %v7227_v54 = vadd.f32 %v7226_v23, %v7225_v9  ;;  %v7266_v63 = vrot.slane %v7265_v56, 1  ;;  %v7232_v26 = vrot.slane %v7231_v10, 1  ;;  %v7271_v31 = vadd.f32 %v7270_v50, %v7269_v3 }
 0xa14   :  { %v13882_v48 = vmul.f32 0.125, %v7227_v54  ;;  %v7267_v20 = vadd.f32 %v7266_v63, %v7265_v56  ;;  %v7233_v41 = vadd.f32 %v7232_v26, %v7231_v10  ;;  %v7272_v45 = vrot.slane %v7271_v31, 1 }
 0xa16   :  { %v7292_v47 = vmul.f32 0.125, %v7267_v20  ;;  %v7297_v62 = vmul.f32 %v13882_v48, %v13882_v48  ;;  %v13886_v13 = vmul.f32 0.125, %v7233_v41  ;;  %v7273_v55 = vadd.f32 %v7272_v45, %v7271_v31 }
 0xa18   :  { %v7302_v21 = vsub.f32 %v7292_v47, %v7297_v62  ;;  %v7293_v28 = vmul.f32 0.125, %v7273_v55  ;;  %v7298_v60 = vmul.f32 %v13886_v13, %v13886_v13 }
 0xa1a   :  { %v7307_v52 = vadd.f32 1e-05, %v7302_v21  ;;  %v7303_v57 = vsub.f32 %v7293_v28, %v7298_v60 }
 0xa1c   :  { %v7308_v19 = vadd.f32 1e-05, %v7303_v57  ;;  %12695 = vrsqrt.f32 %v7307_v52 }
 0xa1e   :  { %12697 = vrsqrt.f32 %v7308_v19 }
 0xa29   :  { %v13890_v24 = vpop.eup %12695 }
 0xa2b   :  { %v13892_v27 = vpop.eup %12697 }
 0xa2c   :  { %v7327_v15 = vcombine.low %v13890_v24, %v13892_v27 }
 0xa44   :  { %v7094_v1 = vpop.f32.mrf.mxu0 }
 0xa45   :  { %v7135_v53 = vpop.f32.mrf.mxu1 }
 0xa46   :  { %v13896_v32 = vadd.f32 %v7135_v53, %v7094_v1  ;;  %v7096_v25 = vpop.f32.mrf.mxu0 }
 0xa47   :  { %v7137_v0 = vpop.f32.mrf.mxu1 }
 0xa48   :  { %v7234_v58 = vrot.slane %v13896_v32, 4  ;;  %v7259_v51 = vmul.f32 %v13896_v32, %v13896_v32  ;;  %v13901_v16 = vadd.f32 %v7137_v0, %v7096_v25  ;;  %v7098_v38 = vpop.f32.mrf.mxu0 }
 0xa49   :  { %v7139_v44 = vpop.f32.mrf.mxu1 }
 0xa4a   :  { %v7235_v33 = vadd.f32 %v7234_v58, %v13896_v32  ;;  %v7274_v46 = vrot.slane %v7259_v51, 4  ;;  %v7240_v59 = vrot.slane %v13901_v16, 4  ;;  %v7260_v34 = vmul.f32 %v13901_v16, %v13901_v16  ;;  %v7099_v8 = vpop.f32.mrf.mxu0 }
 0xa4b   :  { %v7140_v2 = vpop.f32.mrf.mxu1 }
 0xa4c   :  { %v7236_v61 = vrot.slane %v7235_v33, 2  ;;  %v7275_v9 = vadd.f32 %v7274_v46, %v7259_v51  ;;  %v7241_v22 = vadd.f32 %v7240_v59, %v13901_v16  ;;  %v7280_v11 = vrot.slane %v7260_v34, 4 }
 0xa4e   :  { %v7237_v3 = vadd.f32 %v7236_v61, %v7235_v33  ;;  %v7276_v23 = vrot.slane %v7275_v9, 2  ;;  %v7242_v56 = vrot.slane %v7241_v22, 2  ;;  %v7281_v10 = vadd.f32 %v7280_v11, %v7260_v34 }
 0xa50   :  { %v7238_v50 = vrot.slane %v7237_v3, 1  ;;  %v7277_v54 = vadd.f32 %v7276_v23, %v7275_v9  ;;  %v7243_v63 = vadd.f32 %v7242_v56, %v7241_v22  ;;  %v7282_v26 = vrot.slane %v7281_v10, 2 }
 0xa51   :  { %v13911_v22 = vrot.slane %v13455_v5, 4 }
 0xa52   :  { %v7239_v31 = vadd.f32 %v7238_v50, %v7237_v3  ;;  %v7278_v20 = vrot.slane %v7277_v54, 1  ;;  %v7244_v41 = vrot.slane %v7243_v63, 1  ;;  %v7283_v45 = vadd.f32 %v7282_v26, %v7281_v10 }
 0xa53   :  { %v7335_v50 = vrot.slane %v7327_v15, %v13601_v35 }
 0xa54   :  { %v7254_v47 = vmul.f32 0.125, %v7239_v31  ;;  %v7279_v62 = vadd.f32 %v7278_v20, %v7277_v54  ;;  %v7245_v55 = vadd.f32 %v7244_v41, %v7243_v63  ;;  %v7284_v21 = vrot.slane %v7283_v45, 1 }
 0xa55   :  { %v7319_v31 = vsel %vm5799_vm1, %v5798_v37, %v13911_v22 }
 0xa56   :  { %v7294_v28 = vmul.f32 0.125, %v7279_v62  ;;  %v7299_v60 = vmul.f32 %v7254_v47, %v7254_v47  ;;  %v7255_v52 = vmul.f32 0.125, %v7245_v55  ;;  %v7285_v57 = vadd.f32 %v7284_v21, %v7283_v45 }
 0xa58   :  { %v7304_v19 = vsub.f32 %v7294_v28, %v7299_v60  ;;  %v7295_v1 = vmul.f32 0.125, %v7285_v57  ;;  %v7300_v53 = vmul.f32 %v7255_v52, %v7255_v52 }
 0xa5a   :  { %v7309_v25 = vadd.f32 1e-05, %v7304_v19  ;;  %v7305_v0 = vsub.f32 %v7295_v1, %v7300_v53 }
 0xa5c   :  { %v7310_v58 = vadd.f32 1e-05, %v7305_v0  ;;  %12699 = vrsqrt.f32 %v7309_v25 }
 0xa5e   :  { %12701 = vrsqrt.f32 %v7310_v58 }
 0xa64   :  { %v11435_v51 = vpop.f32.mrf.mxu0 }
 0xa65   :  { %v11457_v38 = vpop.f32.mrf.mxu1 }
 0xa66   :  { %v11436_v44 = vpop.f32.mrf.mxu0 }
 0xa67   :  { %v11458_v33 = vpop.f32.mrf.mxu1  ;;  %v11437_v46 = vadd.f32 %v11436_v44, %v11435_v51 }
 0xa68   :  { %v11459_v59 = vadd.f32 %v11458_v33, %v11457_v38  ;;  %v11438_v34 = vpop.f32.mrf.mxu0 }
 0xa69   :  { %v11460_v8 = vpop.f32.mrf.mxu1  ;;  %v12700_v2 = vpop.eup %12699 }
 0xa6a   :  { %v13908_v61 = vadd.f32 %v11459_v59, %v11437_v46  ;;  %v11439_v11 = vpop.f32.mrf.mxu0 }
 0xa6b   :  { %v12702_v9 = vpop.eup %12701  ;;  %v11461_v3 = vpop.f32.mrf.mxu1 }
 0xa6c   :  { %v7328_v23 = vcombine.low %v12700_v2, %v12702_v9  ;;  %v7246_v56 = vrot.slane %v13908_v61, 4  ;;  %v7261_v10 = vmul.f32 %v13908_v61, %v13908_v61 }
 0xa6e   :  { %v7342_v54 = vrot.slane %v7328_v23, %v13601_v35  ;;  %v7247_v63 = vadd.f32 %v7246_v56, %v13908_v61  ;;  %v7286_v26 = vrot.slane %v7261_v10, 4 }
 0xa70   :  { %v7343_v20 = vcombine.low %v7335_v50, %v7342_v54  ;;  %v7248_v41 = vrot.slane %v7247_v63, 2  ;;  %v7287_v45 = vadd.f32 %v7286_v26, %v7261_v10 }
 0xa72   :  { %v7353_v62 = vmul.f32 %v7343_v20, %v7319_v31  ;;  %v7249_v55 = vadd.f32 %v7248_v41, %v7247_v63  ;;  %v7288_v21 = vrot.slane %v7287_v45, 2 }
 0xa74   :  { %v7360_v28 = vrot.slane %v7353_v62, %v13608_v40  ;;  %v7364_v24 = vrot.slane %v7353_v62, %v13610_v30  ;;  %v7368_v27 = vrot.slane %v7353_v62, %v13612_v42  ;;  %v7372_v15 = vrot.slane %v7353_v62, %v13614_v43 }
 0xa75   :  { %v7250_v60 = vrot.slane %v7249_v55, 1  ;;  %v7289_v57 = vadd.f32 %v7288_v21, %v7287_v45 }
 0xa76   :  { %v7382_v4 = vmul.f32 %v7360_v28, %v13882_v48  ;;  %v7383_v37 = vmul.f32 %v7364_v24, %v13886_v13  ;;  %v7384_v19 = vmul.f32 %v7368_v27, %v7254_v47  ;;  %v7385_v1 = vmul.f32 %v7372_v15, %v7255_v52 }
 0xa77   :  { %v7425_v53 = vrot.slane %v7360_v28, %v13608_v40  ;;  %v7429_v25 = vrot.slane %v7364_v24, %v13608_v40  ;;  %v7251_v51 = vadd.f32 %v7250_v60, %v7249_v55  ;;  %v7290_v38 = vrot.slane %v7289_v57, 1 }
 0xa78   :  { %v7392_v0 = vcombine.low %v7382_v4, %v7383_v37  ;;  %v7393_v58 = vcombine.low %v7384_v19, %v7385_v1  ;;  %v7433_v9 = vrot.slane %v7368_v27, %v13608_v40  ;;  %v7437_v11 = vrot.slane %v7372_v15, %v13608_v40 }
 0xa79   :  { %v7442_v44 = vmul.f32 %v7425_v53, %v13870_v36  ;;  %v7443_v33 = vmul.f32 %v7429_v25, %v13875_v49  ;;  %v7256_v59 = vmul.f32 0.125, %v7251_v51  ;;  %v7291_v13 = vadd.f32 %v7290_v38, %v7289_v57 }
 0xa7a   :  { %v7400_v46 = vrot.slane %v7392_v0, %v13601_v35  ;;  %v7407_v48 = vrot.slane %v7393_v58, %v13601_v35  ;;  %v7444_v50 = vmul.f32 %v7433_v9, %v13896_v32  ;;  %v7445_v54 = vmul.f32 %v7437_v11, %v13901_v16 }
 0xa7b   :  { %v7296_v52 = vmul.f32 0.125, %v7291_v13  ;;  %v7301_v34 = vmul.f32 %v7256_v59, %v7256_v59 }
 0xa7c   :  { %v7408_v47 = vcombine.low %v7400_v46, %v7407_v48 }
 0xa7d   :  { %v7306_v2 = vsub.f32 %v7296_v52, %v7301_v34 }
 0xa7e   :  { %v7416_v8 = vrot.slane %v7408_v47, 7 }
 0xa7f   :  { %v7311_v23 = vadd.f32 1e-05, %v7306_v2 }
 0xa80   :  { %v7420_v3 = vsub.f32 %v7319_v31, %v7416_v8 }
 0xa81   :  { %12703 = vrsqrt.f32 %v7311_v23 }
 0xa82   :  { %v7452_v36 = vrot.slane %v7420_v3, %v13633_v12  ;;  %v7456_v49 = vrot.slane %v7420_v3, %v13635_v14  ;;  %v7460_v56 = vrot.slane %v7420_v3, %v13637_v17  ;;  %v7464_v10 = vrot.slane %v7420_v3, %v13639_v18 }
 0xa84   :  { %v7477_v63 = vrot.slane %v7452_v36, %v13633_v12  ;;  %v7481_v26 = vrot.slane %v7456_v49, %v13633_v12  ;;  %v7485_v31 = vrot.slane %v7460_v56, %v13633_v12  ;;  %v7489_v20 = vrot.slane %v7464_v10, %v13633_v12 }
 0xa86   :  { %v7494_v41 = vadd.f32 %v7477_v63, %v7442_v44  ;;  %v7495_v45 = vadd.f32 %v7481_v26, %v7443_v33  ;;  %v7496_v62 = vadd.f32 %v7485_v31, %v7444_v50  ;;  %v7497_v55 = vadd.f32 %v7489_v20, %v7445_v54 }
 0xa88   :  { %vm7499_vm6 = vcmp.ge.f32.partialorder %v7494_v41, 0.0  ;;  %vm7500_vm7 = vcmp.ge.f32.partialorder %v7495_v45, 0.0  ;;  %vm7501_vm8 = vcmp.ge.f32.partialorder %v7496_v62, 0.0  ;;  %vm7502_vm9 = vcmp.ge.f32.partialorder %v7497_v55, 0.0 }
 0xa89   :  { %v7504_v32 = vmul.f32 0.01, %v7494_v41  ;;  %v7505_v21 = vmul.f32 0.01, %v7495_v45  ;;  %v7506_v16 = vmul.f32 0.01, %v7496_v62 }
 0xa8a   :  { %v7507_v28 = vmul.f32 0.01, %v7497_v55 }
 0xa8b   :  { %v7509_v24 = vsel %vm7499_vm6, %v7494_v41, %v7504_v32  ;;  %v7510_v27 = vsel %vm7500_vm7, %v7495_v45, %v7505_v21  ;;  %v7511_v15 = vsel %vm7501_vm8, %v7496_v62, %v7506_v16 }
 0xa8c   :  { %v7512_v60 = vsel %vm7502_vm9, %v7497_v55, %v7507_v28  ;;  %v13950_v57 = vpack.c.bf16 %v7509_v24, %v7509_v24  ;;  %v13952_v4 = vpack.c.bf16 %v7510_v27, %v7510_v27  ;;  %v13954_v37 = vpack.c.bf16 %v7511_v15, %v7511_v15 }
 0xa8d   :  { %v13956_v19 = vpack.c.bf16 %v7512_v60, %v7512_v60 }
 0xa8e   :  { %v12704_v1 = vpop.eup %12703 }
 0xa8f   :  { %v7350_v53 = vrot.slane %v12704_v1, %v13601_v35 }
 0xa91   :  { %v7354_v25 = vmul.f32 %v7350_v53, %v13911_v22 }
 0xa93   :  { %v7376_v0 = vrot.slane %v7354_v25, %v13608_v40 }
 0xa95   :  { %v7386_v58 = vmul.f32 %v7376_v0, %v7256_v59  ;;  %v7441_v33 = vrot.slane %v7376_v0, %v13608_v40 }
 0xa97   :  { %v7415_v51 = vrot.slane %v7386_v58, %v13601_v35  ;;  %v7446_v48 = vmul.f32 %v7441_v33, %v13908_v61 }
 0xa99   :  { %v7417_v38 = vrot.slane %v7415_v51, 7 }
 0xa9b   :  { %v7421_v44 = vsub.f32 %v13911_v22, %v7417_v38 }
 0xa9d   :  { %v7468_v46 = vrot.slane %v7421_v44, %v13633_v12 }
 0xa9f   :  { %v7493_v13 = vrot.slane %v7468_v46, %v13633_v12 }
 0xaa1   :  { %v7498_v47 = vadd.f32 %v7493_v13, %v7446_v48 }
 0xaa3   :  { %vm7503_vm10 = vcmp.ge.f32.partialorder %v7498_v47, 0.0  ;;  %v7508_v52 = vmul.f32 0.01, %v7498_v47 }
 0xaa5   :  { %v7513_v34 = vsel %vm7503_vm10, %v7498_v47, %v7508_v52 }
 0xaa6   :  { %v13967_v8 = vpack.c.bf16 %v7513_v34, %v7513_v34 }
 0xaa7   :  { %13355 = dma.done.wait [#allocation10 + $0x7], 35840 }
 0xaa8   :  { %13356 = vsyncadd [#allocation10 + $0x7], 4294931456  ;;  %9314 = vmatprep.mubr.bf16.mxu0 %v13952_v4  ;;  %9355 = vmatprep.mubr.bf16.mxu1 %v13956_v19  ;;  %v12705_v22 = vld [vmem:[#allocation9 + $0x18c] ss:$28 sps:$4 sm:$0xff]   ;;  %v12711_v61 = vld [vmem:[#allocation9 + $0x154] ss:$28 sps:$4 sm:$0xff]  }
 0xaa9   :  { %v12707_v59 = vld [vmem:[#allocation9 + $0x50c] ss:$28 sps:$4 sm:$0xff]   ;;  %9282 = vmatprep.subr.bf16.mxu0 %v12705_v22  ;;  %v12713_v11 = vld [vmem:[#allocation9 + $0x4d4] ss:$28 sps:$4 sm:$0xff]   ;;  %v12717_v36 = vld [vmem:[#allocation9 + $0x11c] ss:$28 sps:$4 sm:$0xff]  }
 0xaaa   :  { %v12709_v2 = vld [vmem:[#allocation9 + $0x188] ss:$28 sps:$4 sm:$0xff]   ;;  %9323 = vmatprep.subr.bf16.mxu1 %v12707_v59  ;;  %v12715_v3 = vld [vmem:[#allocation9 + $0x150] ss:$28 sps:$4 sm:$0xff]   ;;  %v12719_v49 = vld [vmem:[#allocation9 + $0x49c] ss:$28 sps:$4 sm:$0xff]  }
 0xaab   :  { %v12710_v9 = vld [vmem:[#allocation9 + $0x508] ss:$28 sps:$4 sm:$0xff]   ;;  %9283 = vmatpush1.bf16.msra.mxu0 %v12709_v2  ;;  %v12716_v23 = vld [vmem:[#allocation9 + $0x4d0] ss:$28 sps:$4 sm:$0xff]   ;;  %v12721_v56 = vld [vmem:[#allocation9 + $0x118] ss:$28 sps:$4 sm:$0xff]  }
 0xaac   :  { %9324 = vmatpush1.bf16.msra.mxu1 %v12710_v9  ;;  %9284 = vmatprep.subr.bf16.mxu0 %v12711_v61  ;;  %v12722_v10 = vld [vmem:[#allocation9 + $0x498] ss:$28 sps:$4 sm:$0xff]   ;;  %v12723_v50 = vld [vmem:[#allocation9 + $0xe4] ss:$28 sps:$4 sm:$0xff]   ;;  %v12729_v31 = vld [vmem:[#allocation9 + $0xac] ss:$28 sps:$4 sm:$0xff]  }
 0xaad   :  { %9325 = vmatprep.subr.bf16.mxu1 %v12713_v11  ;;  %v12725_v54 = vld [vmem:[#allocation9 + $0x464] ss:$28 sps:$4 sm:$0xff]   ;;  %v12731_v20 = vld [vmem:[#allocation9 + $0x42c] ss:$28 sps:$4 sm:$0xff]   ;;  %v12735_v62 = vld [vmem:[#allocation9 + $0x74] ss:$28 sps:$4 sm:$0xff]  }
 0xaae   :  { %v12727_v63 = vld [vmem:[#allocation9 + $0xe0] ss:$28 sps:$4 sm:$0xff]   ;;  %v12733_v41 = vld [vmem:[#allocation9 + $0xa8] ss:$28 sps:$4 sm:$0xff]   ;;  %v12737_v55 = vld [vmem:[#allocation9 + $0x3f4] ss:$28 sps:$4 sm:$0xff]  }
 0xaaf   :  { %9285 = vmatpush1.bf16.msra.mxu0 %v12715_v3  ;;  %v12728_v26 = vld [vmem:[#allocation9 + $0x460] ss:$28 sps:$4 sm:$0xff]   ;;  %v12734_v45 = vld [vmem:[#allocation9 + $0x428] ss:$28 sps:$4 sm:$0xff]   ;;  %v12739_v32 = vld [vmem:[#allocation9 + $0x70] ss:$28 sps:$4 sm:$0xff]  }
 0xab0   :  { %9326 = vmatpush1.bf16.msra.mxu1 %v12716_v23  ;;  %9286 = vmatprep.subr.bf16.mxu0 %v12717_v36  ;;  %v12740_v21 = vld [vmem:[#allocation9 + $0x3f0] ss:$28 sps:$4 sm:$0xff]   ;;  %v12741_v16 = vld [vmem:[#allocation9 + $0x3c] ss:$28 sps:$4 sm:$0xff]   ;;  %v12747_v15 = vld [vmem:[#allocation9 + $0x4] ss:$28 sps:$4 sm:$0xff]  }
 0xab1   :  { %9327 = vmatprep.subr.bf16.mxu1 %v12719_v49  ;;  %v12743_v28 = vld [vmem:[#allocation9 + $0x3bc] ss:$28 sps:$4 sm:$0xff]   ;;  %v12749_v60 = vld [vmem:[#allocation9 + $0x384] ss:$28 sps:$4 sm:$0xff]   ;;  %v12753_v25 = vld [vmem:[#allocation9 + $0x34c] ss:$28 sps:$4 sm:$0xff]  }
 0xab2   :  { %v12745_v24 = vld [vmem:[#allocation9 + $0x38] ss:$28 sps:$4 sm:$0xff]   ;;  %v12751_v1 = vld [vmem:[#allocation9] ss:$28 sps:$4 sm:$0xff]   ;;  %v12755_v0 = vld [vmem:[#allocation9 + $0x6cc] ss:$28 sps:$4 sm:$0xff]  }
 0xab3   :  { %9287 = vmatpush1.bf16.msra.mxu0 %v12721_v56  ;;  %v12746_v27 = vld [vmem:[#allocation9 + $0x3b8] ss:$28 sps:$4 sm:$0xff]   ;;  %v12752_v53 = vld [vmem:[#allocation9 + $0x380] ss:$28 sps:$4 sm:$0xff]   ;;  %v12757_v58 = vld [vmem:[#allocation9 + $0x348] ss:$28 sps:$4 sm:$0xff]  }
 0xab4   :  { %9328 = vmatpush1.bf16.msra.mxu1 %v12722_v10  ;;  %9288 = vmatprep.subr.bf16.mxu0 %v12723_v50  ;;  %v12758_v51 = vld [vmem:[#allocation9 + $0x6c8] ss:$28 sps:$4 sm:$0xff]   ;;  %v12759_v38 = vld [vmem:[#allocation9 + $0x314] ss:$28 sps:$4 sm:$0xff]   ;;  %v12765_v48 = vld [vmem:[#allocation9 + $0x2dc] ss:$28 sps:$4 sm:$0xff]  }
 0xab5   :  { %9329 = vmatprep.subr.bf16.mxu1 %v12725_v54  ;;  %v12761_v44 = vld [vmem:[#allocation9 + $0x694] ss:$28 sps:$4 sm:$0xff]   ;;  %v12767_v13 = vld [vmem:[#allocation9 + $0x65c] ss:$28 sps:$4 sm:$0xff]   ;;  %v12771_v34 = vld [vmem:[#allocation9 + $0x2a4] ss:$28 sps:$4 sm:$0xff]  }
 0xab6   :  { %v12763_v33 = vld [vmem:[#allocation9 + $0x310] ss:$28 sps:$4 sm:$0xff]   ;;  %v12769_v47 = vld [vmem:[#allocation9 + $0x2d8] ss:$28 sps:$4 sm:$0xff]   ;;  %v12773_v22 = vld [vmem:[#allocation9 + $0x624] ss:$28 sps:$4 sm:$0xff]  }
 0xab7   :  { %9289 = vmatpush1.bf16.msra.mxu0 %v12727_v63  ;;  %v12764_v46 = vld [vmem:[#allocation9 + $0x690] ss:$28 sps:$4 sm:$0xff]   ;;  %v12770_v52 = vld [vmem:[#allocation9 + $0x658] ss:$28 sps:$4 sm:$0xff]   ;;  %v12775_v59 = vld [vmem:[#allocation9 + $0x2a0] ss:$28 sps:$4 sm:$0xff]  }
 0xab8   :  { %9330 = vmatpush1.bf16.msra.mxu1 %v12728_v26  ;;  %9290 = vmatprep.subr.bf16.mxu0 %v12729_v31  ;;  %v12776_v2 = vld [vmem:[#allocation9 + $0x620] ss:$28 sps:$4 sm:$0xff]   ;;  %v12777_v9 = vld [vmem:[#allocation9 + $0x26c] ss:$28 sps:$4 sm:$0xff]   ;;  %v12783_v23 = vld [vmem:[#allocation9 + $0x234] ss:$28 sps:$4 sm:$0xff]  }
 0xab9   :  { %9331 = vmatprep.subr.bf16.mxu1 %v12731_v20  ;;  %v12779_v61 = vld [vmem:[#allocation9 + $0x5ec] ss:$28 sps:$4 sm:$0xff]   ;;  %v12785_v36 = vld [vmem:[#allocation9 + $0x5b4] ss:$28 sps:$4 sm:$0xff]   ;;  %v12789_v10 = vld [vmem:[#allocation9 + $0x1fc] ss:$28 sps:$4 sm:$0xff]  }
 0xaba   :  { %v12781_v11 = vld [vmem:[#allocation9 + $0x268] ss:$28 sps:$4 sm:$0xff]   ;;  %v12787_v49 = vld [vmem:[#allocation9 + $0x230] ss:$28 sps:$4 sm:$0xff]   ;;  %v12791_v50 = vld [vmem:[#allocation9 + $0x57c] ss:$28 sps:$4 sm:$0xff]  }
 0xabb   :  { %9291 = vmatpush1.bf16.msra.mxu0 %v12733_v41  ;;  %v12782_v3 = vld [vmem:[#allocation9 + $0x5e8] ss:$28 sps:$4 sm:$0xff]   ;;  %v12788_v56 = vld [vmem:[#allocation9 + $0x5b0] ss:$28 sps:$4 sm:$0xff]   ;;  %v12793_v54 = vld [vmem:[#allocation9 + $0x1f8] ss:$28 sps:$4 sm:$0xff]  }
 0xabc   :  { %9332 = vmatpush1.bf16.msra.mxu1 %v12734_v45  ;;  %9292 = vmatprep.subr.bf16.mxu0 %v12735_v62  ;;  %v12794_v63 = vld [vmem:[#allocation9 + $0x578] ss:$28 sps:$4 sm:$0xff]   ;;  %v12795_v26 = vld [vmem:[#allocation9 + $0x1c4] ss:$28 sps:$4 sm:$0xff]   ;;  %v12803_v45 = vld [vmem:[#allocation9 + $0x88c] ss:$28 sps:$4 sm:$0xff]  }
 0xabd   :  { %9333 = vmatprep.subr.bf16.mxu1 %v12737_v55  ;;  %v12797_v31 = vld [vmem:[#allocation9 + $0x544] ss:$28 sps:$4 sm:$0xff]   ;;  %v12806_v62 = vld [vmem:[#allocation9 + $0x194] ss:$28 sps:$4 sm:$0xff]   ;;  %s13374_s8 = smov [#allocation15]  }
 0xabe   :  { %v12799_v20 = vld [vmem:[#allocation9 + $0x1c0] ss:$28 sps:$4 sm:$0xff]   ;;  %v12801_v55 = vld [vmem:[#allocation9 + $0x888] ss:$28 sps:$4 sm:$0xff]   ;;  %s10199_s9 = sshll.u32 %s13374_s8, 4  ;;  %s10200_s9 = int_to_ptr.vmem [resolvable:$true] %s10199_s9 }
 0xabf   :  { %9293 = vmatpush1.bf16.msra.mxu0 %v12739_v32  ;;  %v12800_v41 = vld [vmem:[#allocation9 + $0x540] ss:$28 sps:$4 sm:$0xff]   ;;  %v12804_v32 = vld [vmem:[#allocation9 + $0x190] ss:$28 sps:$4 sm:$0xff]   ;;  %s13299_s21 = scalar_lea.vmem %s10200_s9, 128  ;;  %p13304_p4 = scmp.lt.s32.totalorder %s10200_s9, %s10200_s9 }
 0xac0   :  { %9334 = vmatpush1.bf16.msra.mxu1 %v12740_v21  ;;  %9294 = vmatprep.subr.bf16.mxu0 %v12741_v16  ;;  %v12809_v21 = vld [vmem:[#allocation9 + $0x854] ss:$28 sps:$4 sm:$0xff]   ;;  %v12812_v16 = vld [vmem:[#allocation9 + $0x15c] ss:$28 sps:$4 sm:$0xff]   ;;  %p13300_p3 = scmp.ne.s32.totalorder %s10200_s9, %s13299_s21  ;;  %p13305_p5 = scmp.lt.s32.totalorder %s13299_s21, %s13299_s21 }
 0xac1   :  { %9335 = vmatprep.subr.bf16.mxu1 %v12743_v28  ;;  %v12807_v28 = vld [vmem:[#allocation9 + $0x850] ss:$28 sps:$4 sm:$0xff]  }
 0xac2   :  { %p13306_p6 = por %p13305_p5, %p13304_p4 }
 0xac3   :  { %9295 = vmatpush1.bf16.msra.mxu0 %v12745_v24  ;;  %v12810_v24 = vld [vmem:[#allocation9 + $0x158] ss:$28 sps:$4 sm:$0xff]  }
 0xac4   :  { %9336 = vmatpush1.bf16.msra.mxu1 %v12746_v27  ;;  %9296 = vmatprep.subr.bf16.mxu0 %v12747_v15  ;;  %v12815_v27 = vld [vmem:[#allocation9 + $0x81c] ss:$28 sps:$4 sm:$0xff]   ;;  %v12818_v15 = vld [vmem:[#allocation9 + $0x124] ss:$28 sps:$4 sm:$0xff]   ;;  %p13307_p7 = pnand %p13306_p6, %p13300_p3 }
 0xac5   :  { %9337 = vmatprep.subr.bf16.mxu1 %v12749_v60  ;;  %v12813_v60 = vld [vmem:[#allocation9 + $0x818] ss:$28 sps:$4 sm:$0xff]  }
 0xac7   :  { %9297 = vmatpush1.bf16.msra.mxu0 %v12751_v1  ;;  %v12816_v1 = vld [vmem:[#allocation9 + $0x120] ss:$28 sps:$4 sm:$0xff]  }
 0xac8   :  { %9338 = vmatpush1.bf16.msra.mxu1 %v12752_v53  ;;  %9298 = vmatprep.subr.bf16.mxu0 %v12753_v25  ;;  %v12821_v53 = vld [vmem:[#allocation9 + $0x7e4] ss:$28 sps:$4 sm:$0xff]   ;;  %v12824_v25 = vld [vmem:[#allocation9 + $0xec] ss:$28 sps:$4 sm:$0xff]  }
 0xac9   :  { %9339 = vmatprep.subr.bf16.mxu1 %v12755_v0  ;;  %v12819_v0 = vld [vmem:[#allocation9 + $0x7e0] ss:$28 sps:$4 sm:$0xff]  }
 0xacb   :  { %9299 = vmatpush2.bf16.msra.mxu0 %v12757_v58  ;;  %v12822_v58 = vld [vmem:[#allocation9 + $0xe8] ss:$28 sps:$4 sm:$0xff]  }
 0xacc   :  { %9340 = vmatpush2.bf16.msra.mxu1 %v12758_v51  ;;  %9300 = vmatprep.subr.bf16.mxu0 %v12759_v38  ;;  %v12827_v51 = vld [vmem:[#allocation9 + $0x7ac] ss:$28 sps:$4 sm:$0xff]   ;;  %v12830_v38 = vld [vmem:[#allocation9 + $0xb4] ss:$28 sps:$4 sm:$0xff]  }
 0xacd   :  { %9341 = vmatprep.subr.bf16.mxu1 %v12761_v44  ;;  %v12825_v44 = vld [vmem:[#allocation9 + $0x7a8] ss:$28 sps:$4 sm:$0xff]  }
 0xacf   :  { %9301 = vmatpush2.bf16.msra.mxu0 %v12763_v33  ;;  %v12828_v33 = vld [vmem:[#allocation9 + $0xb0] ss:$28 sps:$4 sm:$0xff]  }
 0xad0   :  { %9342 = vmatpush2.bf16.msra.mxu1 %v12764_v46  ;;  %9302 = vmatprep.subr.bf16.mxu0 %v12765_v48  ;;  %v12833_v46 = vld [vmem:[#allocation9 + $0x774] ss:$28 sps:$4 sm:$0xff]   ;;  %v12836_v48 = vld [vmem:[#allocation9 + $0x7c] ss:$28 sps:$4 sm:$0xff]  }
 0xad1   :  { %9343 = vmatprep.subr.bf16.mxu1 %v12767_v13  ;;  %v12831_v13 = vld [vmem:[#allocation9 + $0x770] ss:$28 sps:$4 sm:$0xff]  }
 0xad3   :  { %9303 = vmatpush2.bf16.msra.mxu0 %v12769_v47  ;;  %v12834_v47 = vld [vmem:[#allocation9 + $0x78] ss:$28 sps:$4 sm:$0xff]  }
 0xad4   :  { %9344 = vmatpush2.bf16.msra.mxu1 %v12770_v52  ;;  %9304 = vmatprep.subr.bf16.mxu0 %v12771_v34  ;;  %v12839_v52 = vld [vmem:[#allocation9 + $0x73c] ss:$28 sps:$4 sm:$0xff]   ;;  %v12842_v34 = vld [vmem:[#allocation9 + $0x44] ss:$28 sps:$4 sm:$0xff]  }
 0xad5   :  { %9345 = vmatprep.subr.bf16.mxu1 %v12773_v22  ;;  %v12837_v22 = vld [vmem:[#allocation9 + $0x738] ss:$28 sps:$4 sm:$0xff]  }
 0xad7   :  { %9305 = vmatpush2.bf16.msra.mxu0 %v12775_v59  ;;  %v12840_v59 = vld [vmem:[#allocation9 + $0x40] ss:$28 sps:$4 sm:$0xff]  }
 0xad8   :  { %9346 = vmatpush2.bf16.msra.mxu1 %v12776_v2  ;;  %9306 = vmatprep.subr.bf16.mxu0 %v12777_v9  ;;  %v12845_v2 = vld [vmem:[#allocation9 + $0x704] ss:$28 sps:$4 sm:$0xff]   ;;  %v12848_v9 = vld [vmem:[#allocation9 + $0xc] ss:$28 sps:$4 sm:$0xff]  }
 0xad9   :  { %9347 = vmatprep.subr.bf16.mxu1 %v12779_v61  ;;  %v12843_v61 = vld [vmem:[#allocation9 + $0x700] ss:$28 sps:$4 sm:$0xff]  }
 0xadb   :  { %9307 = vmatpush2.bf16.msra.mxu0 %v12781_v11  ;;  %v12846_v11 = vld [vmem:[#allocation9 + $0x8] ss:$28 sps:$4 sm:$0xff]  }
 0xadc   :  { %9348 = vmatpush2.bf16.msra.mxu1 %v12782_v3  ;;  %9308 = vmatprep.subr.bf16.mxu0 %v12783_v23  ;;  %v12851_v3 = vld [vmem:[#allocation9 + $0x354] ss:$28 sps:$4 sm:$0xff]  }
 0xadd   :  { %9349 = vmatprep.subr.bf16.mxu1 %v12785_v36  ;;  %v12854_v23 = vld [vmem:[#allocation9 + $0x514] ss:$28 sps:$4 sm:$0xff]  }
 0xade   :  { %v12849_v36 = vld [vmem:[#allocation9 + $0x350] ss:$28 sps:$4 sm:$0xff]  }
 0xadf   :  { %9309 = vmatpush2.bf16.msra.mxu0 %v12787_v49  ;;  %v12852_v49 = vld [vmem:[#allocation9 + $0x510] ss:$28 sps:$4 sm:$0xff]  }
 0xae0   :  { %9350 = vmatpush2.bf16.msra.mxu1 %v12788_v56  ;;  %9310 = vmatprep.subr.bf16.mxu0 %v12789_v10  ;;  %v12857_v56 = vld [vmem:[#allocation9 + $0x31c] ss:$28 sps:$4 sm:$0xff]  }
 0xae1   :  { %9351 = vmatprep.subr.bf16.mxu1 %v12791_v50  ;;  %v12860_v10 = vld [vmem:[#allocation9 + $0x4dc] ss:$28 sps:$4 sm:$0xff]  }
 0xae2   :  { %v12855_v50 = vld [vmem:[#allocation9 + $0x318] ss:$28 sps:$4 sm:$0xff]  }
 0xae3   :  { %9311 = vmatpush2.bf16.msra.mxu0 %v12793_v54  ;;  %v12858_v54 = vld [vmem:[#allocation9 + $0x4d8] ss:$28 sps:$4 sm:$0xff]  }
 0xae4   :  { %9352 = vmatpush2.bf16.msra.mxu1 %v12794_v63  ;;  %9312 = vmatprep.subr.bf16.mxu0 %v12795_v26  ;;  %v12863_v63 = vld [vmem:[#allocation9 + $0x2e4] ss:$28 sps:$4 sm:$0xff]  }
 0xae5   :  { %9353 = vmatprep.subr.bf16.mxu1 %v12797_v31  ;;  %v12866_v26 = vld [vmem:[#allocation9 + $0x4a4] ss:$28 sps:$4 sm:$0xff]  }
 0xae6   :  { %v12861_v31 = vld [vmem:[#allocation9 + $0x2e0] ss:$28 sps:$4 sm:$0xff]  }
 0xae7   :  { %9313 = vmatpush2.bf16.msra.mxu0 %v12799_v20  ;;  %v12864_v20 = vld [vmem:[#allocation9 + $0x4a0] ss:$28 sps:$4 sm:$0xff]  }
 0xae8   :  { %9354 = vmatpush2.bf16.msra.mxu1 %v12800_v41  ;;  %9364 = vmatprep.subr.bf16.mxu0 %v12803_v45  ;;  %v12869_v41 = vld [vmem:[#allocation9 + $0x2ac] ss:$28 sps:$4 sm:$0xff]  }
 0xae9   :  { %9405 = vmatprep.subr.bf16.mxu1 %v12806_v62  ;;  %v12872_v45 = vld [vmem:[#allocation9 + $0x46c] ss:$28 sps:$4 sm:$0xff]  }
 0xaea   :  { %9315 = vmatmul.mubr.bf16.vlgmr.msra.gmra.mxu0 %v13950_v57  ;;  %v12867_v62 = vld [vmem:[#allocation9 + $0x2a8] ss:$28 sps:$4 sm:$0xff]  }
 0xaeb   :  { %9356 = vmatmul.mubr.bf16.vlgmr.msra.gmra.mxu1 %v13954_v37  ;;  %9365 = vmatpush1.bf16.msra.mxu0 %v12801_v55  ;;  %v12870_v55 = vld [vmem:[#allocation9 + $0x468] ss:$28 sps:$4 sm:$0xff]  }
 0xaec   :  { %9406 = vmatpush1.bf16.msra.mxu1 %v12804_v32  ;;  %9366 = vmatprep.subr.bf16.mxu0 %v12809_v21  ;;  %v12875_v32 = vld [vmem:[#allocation9 + $0x274] ss:$28 sps:$4 sm:$0xff]  }
 0xaed   :  { %9407 = vmatprep.subr.bf16.mxu1 %v12812_v16  ;;  %9396 = vmatprep.mubr.bf16.mxu0 %v13370_v39  ;;  %v12878_v21 = vld [vmem:[#allocation9 + $0x434] ss:$28 sps:$4 sm:$0xff]  }
 0xaee   :  { %9437 = vmatprep.mubr.bf16.mxu1 %v13952_v4  ;;  %v12873_v16 = vld [vmem:[#allocation9 + $0x270] ss:$28 sps:$4 sm:$0xff]  }
 0xaef   :  { %9367 = vmatpush1.bf16.msra.mxu0 %v12807_v28  ;;  %v12876_v28 = vld [vmem:[#allocation9 + $0x430] ss:$28 sps:$4 sm:$0xff]  }
 0xaf0   :  { %9408 = vmatpush1.bf16.msra.mxu1 %v12810_v24  ;;  %9368 = vmatprep.subr.bf16.mxu0 %v12815_v27  ;;  %v12881_v24 = vld [vmem:[#allocation9 + $0x23c] ss:$28 sps:$4 sm:$0xff]  }
 0xaf1   :  { %9409 = vmatprep.subr.bf16.mxu1 %v12818_v15  ;;  %v12884_v27 = vld [vmem:[#allocation9 + $0x3fc] ss:$28 sps:$4 sm:$0xff]  }
 0xaf2   :  { %v12879_v15 = vld [vmem:[#allocation9 + $0x238] ss:$28 sps:$4 sm:$0xff]  }
 0xaf3   :  { %9369 = vmatpush1.bf16.msra.mxu0 %v12813_v60  ;;  %v12882_v60 = vld [vmem:[#allocation9 + $0x3f8] ss:$28 sps:$4 sm:$0xff]  }
 0xaf4   :  { %9410 = vmatpush1.bf16.msra.mxu1 %v12816_v1  ;;  %9370 = vmatprep.subr.bf16.mxu0 %v12821_v53  ;;  %v12887_v1 = vld [vmem:[#allocation9 + $0x204] ss:$28 sps:$4 sm:$0xff]  }
 0xaf5   :  { %9411 = vmatprep.subr.bf16.mxu1 %v12824_v25  ;;  %v12890_v53 = vld [vmem:[#allocation9 + $0x3c4] ss:$28 sps:$4 sm:$0xff]  }
 0xaf6   :  { %v12885_v25 = vld [vmem:[#allocation9 + $0x200] ss:$28 sps:$4 sm:$0xff]  }
 0xaf7   :  { %9371 = vmatpush1.bf16.msra.mxu0 %v12819_v0  ;;  %v12888_v0 = vld [vmem:[#allocation9 + $0x3c0] ss:$28 sps:$4 sm:$0xff]  }
 0xaf8   :  { %9412 = vmatpush1.bf16.msra.mxu1 %v12822_v58  ;;  %9372 = vmatprep.subr.bf16.mxu0 %v12827_v51  ;;  %v12893_v58 = vld [vmem:[#allocation9 + $0x1cc] ss:$28 sps:$4 sm:$0xff]  }
 0xaf9   :  { %9413 = vmatprep.subr.bf16.mxu1 %v12830_v38  ;;  %v12896_v51 = vld [vmem:[#allocation9 + $0x38c] ss:$28 sps:$4 sm:$0xff]  }
 0xafa   :  { %v12891_v38 = vld [vmem:[#allocation9 + $0x1c8] ss:$28 sps:$4 sm:$0xff]  }
 0xafb   :  { %9373 = vmatpush1.bf16.msra.mxu0 %v12825_v44  ;;  %v12894_v44 = vld [vmem:[#allocation9 + $0x388] ss:$28 sps:$4 sm:$0xff]  }
 0xafc   :  { %9414 = vmatpush1.bf16.msra.mxu1 %v12828_v33  ;;  %9374 = vmatprep.subr.bf16.mxu0 %v12833_v46  ;;  %v12899_v33 = vld [vmem:[#allocation9 + $0x6d4] ss:$28 sps:$4 sm:$0xff]  }
 0xafd   :  { %9415 = vmatprep.subr.bf16.mxu1 %v12836_v48  ;;  %v12902_v46 = vld [vmem:[#allocation9 + $0x894] ss:$28 sps:$4 sm:$0xff]  }
 0xafe   :  { %v12897_v48 = vld [vmem:[#allocation9 + $0x6d0] ss:$28 sps:$4 sm:$0xff]  }
 0xaff   :  { %9375 = vmatpush1.bf16.msra.mxu0 %v12831_v13  ;;  %v12900_v13 = vld [vmem:[#allocation9 + $0x890] ss:$28 sps:$4 sm:$0xff]  }
 0xb00   :  { %9416 = vmatpush1.bf16.msra.mxu1 %v12834_v47  ;;  %9376 = vmatprep.subr.bf16.mxu0 %v12839_v52  ;;  %v12905_v47 = vld [vmem:[#allocation9 + $0x69c] ss:$28 sps:$4 sm:$0xff]  }
 0xb01   :  { %9417 = vmatprep.subr.bf16.mxu1 %v12842_v34  ;;  %v12908_v52 = vld [vmem:[#allocation9 + $0x85c] ss:$28 sps:$4 sm:$0xff]  }
 0xb02   :  { %v12903_v34 = vld [vmem:[#allocation9 + $0x698] ss:$28 sps:$4 sm:$0xff]  }
 0xb03   :  { %9377 = vmatpush1.bf16.msra.mxu0 %v12837_v22  ;;  %v12906_v22 = vld [vmem:[#allocation9 + $0x858] ss:$28 sps:$4 sm:$0xff]  }
 0xb04   :  { %9418 = vmatpush1.bf16.msra.mxu1 %v12840_v59  ;;  %9378 = vmatprep.subr.bf16.mxu0 %v12845_v2  ;;  %v12911_v59 = vld [vmem:[#allocation9 + $0x664] ss:$28 sps:$4 sm:$0xff]  }
 0xb05   :  { %9419 = vmatprep.subr.bf16.mxu1 %v12848_v9  ;;  %v12914_v2 = vld [vmem:[#allocation9 + $0x824] ss:$28 sps:$4 sm:$0xff]  }
 0xb06   :  { %v12909_v9 = vld [vmem:[#allocation9 + $0x660] ss:$28 sps:$4 sm:$0xff]  }
 0xb07   :  { %9379 = vmatpush1.bf16.msra.mxu0 %v12843_v61  ;;  %v12912_v61 = vld [vmem:[#allocation9 + $0x820] ss:$28 sps:$4 sm:$0xff]  }
 0xb08   :  { %9420 = vmatpush1.bf16.msra.mxu1 %v12846_v11  ;;  %9446 = vmatprep.subr.bf16.mxu0 %v12854_v23  ;;  %v12917_v11 = vld [vmem:[#allocation9 + $0x62c] ss:$28 sps:$4 sm:$0xff]  }
 0xb09   :  { %9421 = vmatprep.subr.bf16.mxu1 %v12851_v3  ;;  %v12920_v3 = vld [vmem:[#allocation9 + $0x7ec] ss:$28 sps:$4 sm:$0xff]  }
 0xb0a   :  { %9397 = vmatmul.mubr.bf16.vlgmr.msra.gmra.mxu0 %v13967_v8  ;;  %v12915_v23 = vld [vmem:[#allocation9 + $0x628] ss:$28 sps:$4 sm:$0xff]  }
 0xb0b   :  { %9447 = vmatpush1.bf16.msra.mxu0 %v12852_v49  ;;  %9478 = vmatprep.mubr.bf16.mxu0 %v13956_v19  ;;  %v12923_v49 = vld [vmem:[#allocation9 + $0x5f4] ss:$28 sps:$4 sm:$0xff]  }
 0xb0c   :  { %9422 = vmatpush2.bf16.msra.mxu1 %v12849_v36  ;;  %9448 = vmatprep.subr.bf16.mxu0 %v12860_v10  ;;  %v12918_v36 = vld [vmem:[#allocation9 + $0x7e8] ss:$28 sps:$4 sm:$0xff]   ;;  %v12921_v10 = vld [vmem:[#allocation9 + $0x5f0] ss:$28 sps:$4 sm:$0xff]  }
 0xb0d   :  { %9423 = vmatprep.subr.bf16.mxu1 %v12857_v56  ;;  %v12926_v56 = vld [vmem:[#allocation9 + $0x7b4] ss:$28 sps:$4 sm:$0xff]  }
 0xb0f   :  { %9449 = vmatpush1.bf16.msra.mxu0 %v12858_v54  ;;  %v12929_v54 = vld [vmem:[#allocation9 + $0x5bc] ss:$28 sps:$4 sm:$0xff]  }
 0xb10   :  { %9424 = vmatpush2.bf16.msra.mxu1 %v12855_v50  ;;  %9450 = vmatprep.subr.bf16.mxu0 %v12866_v26  ;;  %v12924_v50 = vld [vmem:[#allocation9 + $0x7b0] ss:$28 sps:$4 sm:$0xff]   ;;  %v12927_v26 = vld [vmem:[#allocation9 + $0x5b8] ss:$28 sps:$4 sm:$0xff]  }
 0xb11   :  { %9425 = vmatprep.subr.bf16.mxu1 %v12863_v63  ;;  %v12932_v63 = vld [vmem:[#allocation9 + $0x77c] ss:$28 sps:$4 sm:$0xff]  }
 0xb13   :  { %9451 = vmatpush1.bf16.msra.mxu0 %v12864_v20  ;;  %v12935_v20 = vld [vmem:[#allocation9 + $0x584] ss:$28 sps:$4 sm:$0xff]  }
 0xb14   :  { %9426 = vmatpush2.bf16.msra.mxu1 %v12861_v31  ;;  %9452 = vmatprep.subr.bf16.mxu0 %v12872_v45  ;;  %v12930_v31 = vld [vmem:[#allocation9 + $0x778] ss:$28 sps:$4 sm:$0xff]   ;;  %v12933_v45 = vld [vmem:[#allocation9 + $0x580] ss:$28 sps:$4 sm:$0xff]  }
 0xb15   :  { %9427 = vmatprep.subr.bf16.mxu1 %v12869_v41  ;;  %v12938_v41 = vld [vmem:[#allocation9 + $0x744] ss:$28 sps:$4 sm:$0xff]  }
 0xb17   :  { %9453 = vmatpush1.bf16.msra.mxu0 %v12870_v55  ;;  %v12941_v55 = vld [vmem:[#allocation9 + $0x54c] ss:$28 sps:$4 sm:$0xff]  }
 0xb18   :  { %9428 = vmatpush2.bf16.msra.mxu1 %v12867_v62  ;;  %9454 = vmatprep.subr.bf16.mxu0 %v12878_v21  ;;  %v12936_v62 = vld [vmem:[#allocation9 + $0x740] ss:$28 sps:$4 sm:$0xff]   ;;  %v12939_v21 = vld [vmem:[#allocation9 + $0x548] ss:$28 sps:$4 sm:$0xff]  }
 0xb19   :  { %9429 = vmatprep.subr.bf16.mxu1 %v12875_v32  ;;  %v12944_v32 = vld [vmem:[#allocation9 + $0x70c] ss:$28 sps:$4 sm:$0xff]  }
 0xb1b   :  { %9455 = vmatpush1.bf16.msra.mxu0 %v12876_v28  ;;  %v12947_v28 = vld [vmem:[#allocation9 + $0x19c] ss:$28 sps:$4 sm:$0xff]  }
 0xb1c   :  { %9430 = vmatpush2.bf16.msra.mxu1 %v12873_v16  ;;  %9456 = vmatprep.subr.bf16.mxu0 %v12884_v27  ;;  %v12942_v16 = vld [vmem:[#allocation9 + $0x708] ss:$28 sps:$4 sm:$0xff]   ;;  %v12945_v27 = vld [vmem:[#allocation9 + $0x198] ss:$28 sps:$4 sm:$0xff]  }
 0xb1d   :  { %9431 = vmatprep.subr.bf16.mxu1 %v12881_v24  ;;  %v12950_v24 = vld [vmem:[#allocation9 + $0x51c] ss:$28 sps:$4 sm:$0xff]  }
 0xb1f   :  { %9457 = vmatpush1.bf16.msra.mxu0 %v12882_v60  ;;  %v12953_v60 = vld [vmem:[#allocation9 + $0x164] ss:$28 sps:$4 sm:$0xff]  }
 0xb20   :  { %9432 = vmatpush2.bf16.msra.mxu1 %v12879_v15  ;;  %9458 = vmatprep.subr.bf16.mxu0 %v12890_v53  ;;  %v12948_v15 = vld [vmem:[#allocation9 + $0x518] ss:$28 sps:$4 sm:$0xff]   ;;  %v12951_v53 = vld [vmem:[#allocation9 + $0x160] ss:$28 sps:$4 sm:$0xff]  }
 0xb21   :  { %9433 = vmatprep.subr.bf16.mxu1 %v12887_v1  ;;  %v12956_v1 = vld [vmem:[#allocation9 + $0x4e4] ss:$28 sps:$4 sm:$0xff]  }
 0xb23   :  { %9459 = vmatpush1.bf16.msra.mxu0 %v12888_v0  ;;  %v12959_v0 = vld [vmem:[#allocation9 + $0x12c] ss:$28 sps:$4 sm:$0xff]  }
 0xb24   :  { %9434 = vmatpush2.bf16.msra.mxu1 %v12885_v25  ;;  %9460 = vmatprep.subr.bf16.mxu0 %v12896_v51  ;;  %v12954_v25 = vld [vmem:[#allocation9 + $0x4e0] ss:$28 sps:$4 sm:$0xff]   ;;  %v12957_v51 = vld [vmem:[#allocation9 + $0x128] ss:$28 sps:$4 sm:$0xff]  }
 0xb25   :  { %9435 = vmatprep.subr.bf16.mxu1 %v12893_v58  ;;  %v12962_v58 = vld [vmem:[#allocation9 + $0x4ac] ss:$28 sps:$4 sm:$0xff]  }
 0xb27   :  { %9461 = vmatpush1.bf16.msra.mxu0 %v12894_v44  ;;  %v12965_v44 = vld [vmem:[#allocation9 + $0xf4] ss:$28 sps:$4 sm:$0xff]  }
 0xb28   :  { %9436 = vmatpush2.bf16.msra.mxu1 %v12891_v38  ;;  %9462 = vmatprep.subr.bf16.mxu0 %v12899_v33  ;;  %v12960_v38 = vld [vmem:[#allocation9 + $0x4a8] ss:$28 sps:$4 sm:$0xff]   ;;  %v12968_v33 = vld [vmem:[#allocation9 + $0x474] ss:$28 sps:$4 sm:$0xff]  }
 0xb29   :  { %9487 = vmatprep.subr.bf16.mxu1 %v12902_v46  ;;  %v12963_v46 = vld [vmem:[#allocation9 + $0xf0] ss:$28 sps:$4 sm:$0xff]  }
 0xb2b   :  { %9438 = vmatmul.mubr.bf16.vlgmr.msra.gmra.mxu1 %v13950_v57  ;;  %9463 = vmatpush2.bf16.msra.mxu0 %v12897_v48  ;;  %v12966_v48 = vld [vmem:[#allocation9 + $0x470] ss:$28 sps:$4 sm:$0xff]  }
 0xb2c   :  { %9488 = vmatpush1.bf16.msra.mxu1 %v12900_v13  ;;  %9464 = vmatprep.subr.bf16.mxu0 %v12905_v47  ;;  %v12971_v13 = vld [vmem:[#allocation9 + $0xbc] ss:$28 sps:$4 sm:$0xff]  }
 0xb2d   :  { %9489 = vmatprep.subr.bf16.mxu1 %v12908_v52  ;;  %9519 = vmatprep.mubr.bf16.mxu1 %v13370_v39  ;;  %v12974_v47 = vld [vmem:[#allocation9 + $0x43c] ss:$28 sps:$4 sm:$0xff]  }
 0xb2e   :  { %v12969_v52 = vld [vmem:[#allocation9 + $0xb8] ss:$28 sps:$4 sm:$0xff]  }
 0xb2f   :  { %9465 = vmatpush2.bf16.msra.mxu0 %v12903_v34  ;;  %v12972_v34 = vld [vmem:[#allocation9 + $0x438] ss:$28 sps:$4 sm:$0xff]  }
 0xb30   :  { %9490 = vmatpush1.bf16.msra.mxu1 %v12906_v22  ;;  %9466 = vmatprep.subr.bf16.mxu0 %v12911_v59  ;;  %v12977_v22 = vld [vmem:[#allocation9 + $0x84] ss:$28 sps:$4 sm:$0xff]  }
 0xb31   :  { %9491 = vmatprep.subr.bf16.mxu1 %v12914_v2  ;;  %v12980_v59 = vld [vmem:[#allocation9 + $0x404] ss:$28 sps:$4 sm:$0xff]  }
 0xb32   :  { %v12975_v2 = vld [vmem:[#allocation9 + $0x80] ss:$28 sps:$4 sm:$0xff]  }
 0xb33   :  { %9467 = vmatpush2.bf16.msra.mxu0 %v12909_v9  ;;  %v12978_v9 = vld [vmem:[#allocation9 + $0x400] ss:$28 sps:$4 sm:$0xff]  }
 0xb34   :  { %9492 = vmatpush1.bf16.msra.mxu1 %v12912_v61  ;;  %9468 = vmatprep.subr.bf16.mxu0 %v12917_v11  ;;  %v12983_v61 = vld [vmem:[#allocation9 + $0x4c] ss:$28 sps:$4 sm:$0xff]  }
 0xb35   :  { %9493 = vmatprep.subr.bf16.mxu1 %v12920_v3  ;;  %v12986_v11 = vld [vmem:[#allocation9 + $0x3cc] ss:$28 sps:$4 sm:$0xff]  }
 0xb36   :  { %v12981_v3 = vld [vmem:[#allocation9 + $0x48] ss:$28 sps:$4 sm:$0xff]  }
 0xb37   :  { %9469 = vmatpush2.bf16.msra.mxu0 %v12915_v23  ;;  %v12984_v23 = vld [vmem:[#allocation9 + $0x3c8] ss:$28 sps:$4 sm:$0xff]  }
 0xb38   :  { %9494 = vmatpush1.bf16.msra.mxu1 %v12918_v36  ;;  %9470 = vmatprep.subr.bf16.mxu0 %v12923_v49  ;;  %v12989_v36 = vld [vmem:[#allocation9 + $0x14] ss:$28 sps:$4 sm:$0xff]  }
 0xb39   :  { %9495 = vmatprep.subr.bf16.mxu1 %v12926_v56  ;;  %v12992_v49 = vld [vmem:[#allocation9 + $0x394] ss:$28 sps:$4 sm:$0xff]  }
 0xb3a   :  { %v12987_v56 = vld [vmem:[#allocation9 + $0x10] ss:$28 sps:$4 sm:$0xff]  }
 0xb3b   :  { %9471 = vmatpush2.bf16.msra.mxu0 %v12921_v10  ;;  %v12990_v10 = vld [vmem:[#allocation9 + $0x390] ss:$28 sps:$4 sm:$0xff]  }
 0xb3c   :  { %9496 = vmatpush1.bf16.msra.mxu1 %v12924_v50  ;;  %9472 = vmatprep.subr.bf16.mxu0 %v12929_v54  ;;  %v12995_v50 = vld [vmem:[#allocation9 + $0x35c] ss:$28 sps:$4 sm:$0xff]  }
 0xb3d   :  { %9497 = vmatprep.subr.bf16.mxu1 %v12932_v63  ;;  %v12998_v54 = vld [vmem:[#allocation9 + $0x6dc] ss:$28 sps:$4 sm:$0xff]  }
 0xb3e   :  { %v12993_v63 = vld [vmem:[#allocation9 + $0x358] ss:$28 sps:$4 sm:$0xff]  }
 0xb3f   :  { %9473 = vmatpush2.bf16.msra.mxu0 %v12927_v26  ;;  %v12996_v26 = vld [vmem:[#allocation9 + $0x6d8] ss:$28 sps:$4 sm:$0xff]  }
 0xb40   :  { %9498 = vmatpush1.bf16.msra.mxu1 %v12930_v31  ;;  %9474 = vmatprep.subr.bf16.mxu0 %v12935_v20  ;;  %v13001_v31 = vld [vmem:[#allocation9 + $0x324] ss:$28 sps:$4 sm:$0xff]  }
 0xb41   :  { %9499 = vmatprep.subr.bf16.mxu1 %v12938_v41  ;;  %v13004_v20 = vld [vmem:[#allocation9 + $0x6a4] ss:$28 sps:$4 sm:$0xff]  }
 0xb42   :  { %v12999_v41 = vld [vmem:[#allocation9 + $0x320] ss:$28 sps:$4 sm:$0xff]  }
 0xb43   :  { %9475 = vmatpush2.bf16.msra.mxu0 %v12933_v45  ;;  %v13002_v45 = vld [vmem:[#allocation9 + $0x6a0] ss:$28 sps:$4 sm:$0xff]  }
 0xb44   :  { %9500 = vmatpush1.bf16.msra.mxu1 %v12936_v62  ;;  %9476 = vmatprep.subr.bf16.mxu0 %v12941_v55  ;;  %v13007_v62 = vld [vmem:[#allocation9 + $0x2ec] ss:$28 sps:$4 sm:$0xff]  }
 0xb45   :  { %9501 = vmatprep.subr.bf16.mxu1 %v12944_v32  ;;  %v13010_v55 = vld [vmem:[#allocation9 + $0x66c] ss:$28 sps:$4 sm:$0xff]  }
 0xb46   :  { %v13005_v32 = vld [vmem:[#allocation9 + $0x2e8] ss:$28 sps:$4 sm:$0xff]  }
 0xb47   :  { %9477 = vmatpush2.bf16.msra.mxu0 %v12939_v21  ;;  %v13008_v21 = vld [vmem:[#allocation9 + $0x668] ss:$28 sps:$4 sm:$0xff]  }
 0xb48   :  { %9502 = vmatpush1.bf16.msra.mxu1 %v12942_v16  ;;  %9528 = vmatprep.subr.bf16.mxu0 %v12947_v28  ;;  %v13013_v16 = vld [vmem:[#allocation9 + $0x2b4] ss:$28 sps:$4 sm:$0xff]  }
 0xb49   :  { %9569 = vmatprep.subr.bf16.mxu1 %v12950_v24  ;;  %v13016_v28 = vld [vmem:[#allocation9 + $0x634] ss:$28 sps:$4 sm:$0xff]  }
 0xb4a   :  { %9479 = vmatmul.mubr.bf16.vlgmr.msra.gmra.mxu0 %v13954_v37  ;;  %v13011_v24 = vld [vmem:[#allocation9 + $0x2b0] ss:$28 sps:$4 sm:$0xff]  }
 0xb4b   :  { %9520 = vmatmul.mubr.bf16.vlgmr.msra.gmra.mxu1 %v13967_v8  ;;  %9529 = vmatpush1.bf16.msra.mxu0 %v12945_v27  ;;  %v13014_v27 = vld [vmem:[#allocation9 + $0x630] ss:$28 sps:$4 sm:$0xff]  }
 0xb4c   :  { %9570 = vmatpush1.bf16.msra.mxu1 %v12948_v15  ;;  %9530 = vmatprep.subr.bf16.mxu0 %v12953_v60  ;;  %v13019_v15 = vld [vmem:[#allocation9 + $0x27c] ss:$28 sps:$4 sm:$0xff]  }
 0xb4d   :  { %9571 = vmatprep.subr.bf16.mxu1 %v12956_v1  ;;  %9560 = vmatprep.mubr.bf16.mxu0 %v13952_v4  ;;  %v13022_v60 = vld [vmem:[#allocation9 + $0x5fc] ss:$28 sps:$4 sm:$0xff]  }
 0xb4e   :  { %9601 = vmatprep.mubr.bf16.mxu1 %v13956_v19  ;;  %v13017_v1 = vld [vmem:[#allocation9 + $0x278] ss:$28 sps:$4 sm:$0xff]  }
 0xb4f   :  { %9531 = vmatpush1.bf16.msra.mxu0 %v12951_v53  ;;  %v13020_v53 = vld [vmem:[#allocation9 + $0x5f8] ss:$28 sps:$4 sm:$0xff]  }
 0xb50   :  { %9572 = vmatpush1.bf16.msra.mxu1 %v12954_v25  ;;  %9532 = vmatprep.subr.bf16.mxu0 %v12959_v0  ;;  %v13025_v25 = vld [vmem:[#allocation9 + $0x244] ss:$28 sps:$4 sm:$0xff]  }
 0xb51   :  { %9573 = vmatprep.subr.bf16.mxu1 %v12962_v58  ;;  %v13028_v0 = vld [vmem:[#allocation9 + $0x5c4] ss:$28 sps:$4 sm:$0xff]  }
 0xb52   :  { %v13023_v58 = vld [vmem:[#allocation9 + $0x240] ss:$28 sps:$4 sm:$0xff]  }
 0xb53   :  { %9533 = vmatpush1.bf16.msra.mxu0 %v12957_v51  ;;  %v13026_v51 = vld [vmem:[#allocation9 + $0x5c0] ss:$28 sps:$4 sm:$0xff]  }
 0xb54   :  { %9574 = vmatpush1.bf16.msra.mxu1 %v12960_v38  ;;  %9534 = vmatprep.subr.bf16.mxu0 %v12965_v44  ;;  %v13031_v38 = vld [vmem:[#allocation9 + $0x20c] ss:$28 sps:$4 sm:$0xff]  }
 0xb55   :  { %9575 = vmatprep.subr.bf16.mxu1 %v12968_v33  ;;  %v13034_v44 = vld [vmem:[#allocation9 + $0x58c] ss:$28 sps:$4 sm:$0xff]  }
 0xb56   :  { %v13029_v33 = vld [vmem:[#allocation9 + $0x208] ss:$28 sps:$4 sm:$0xff]  }
 0xb57   :  { %9535 = vmatpush1.bf16.msra.mxu0 %v12963_v46  ;;  %v13032_v46 = vld [vmem:[#allocation9 + $0x588] ss:$28 sps:$4 sm:$0xff]  }
 0xb58   :  { %9576 = vmatpush1.bf16.msra.mxu1 %v12966_v48  ;;  %9536 = vmatprep.subr.bf16.mxu0 %v12971_v13  ;;  %v13037_v48 = vld [vmem:[#allocation9 + $0x1d4] ss:$28 sps:$4 sm:$0xff]  }
 0xb59   :  { %9577 = vmatprep.subr.bf16.mxu1 %v12974_v47  ;;  %v13040_v13 = vld [vmem:[#allocation9 + $0x554] ss:$28 sps:$4 sm:$0xff]  }
 0xb5a   :  { %v13035_v47 = vld [vmem:[#allocation9 + $0x1d0] ss:$28 sps:$4 sm:$0xff]  }
 0xb5b   :  { %9537 = vmatpush1.bf16.msra.mxu0 %v12969_v52  ;;  %v13038_v52 = vld [vmem:[#allocation9 + $0x550] ss:$28 sps:$4 sm:$0xff]  }
 0xb5c   :  { %9578 = vmatpush1.bf16.msra.mxu1 %v12972_v34  ;;  %9538 = vmatprep.subr.bf16.mxu0 %v12977_v22  ;;  %v13043_v34 = vld [vmem:[#allocation9 + $0x89c] ss:$28 sps:$4 sm:$0xff]  }
 0xb5d   :  { %9579 = vmatprep.subr.bf16.mxu1 %v12980_v59  ;;  %v13044_v22 = vld [vmem:[#allocation9 + $0x360] ss:$28 sps:$4 sm:$0xff]   ;;  %v13041_v59 = vld [vmem:[#allocation9 + $0x898] ss:$28 sps:$4 sm:$0xff]  }
 0xb5f   :  { %9539 = vmatpush1.bf16.msra.mxu0 %v12975_v2  ;;  %v13045_v2 = vld [vmem:[#allocation9 + $0x1a0] ss:$28 sps:$4 sm:$0xff]  }
 0xb60   :  { %9580 = vmatpush1.bf16.msra.mxu1 %v12978_v9  ;;  %9540 = vmatprep.subr.bf16.mxu0 %v12983_v61  ;;  %v13048_v9 = vld [vmem:[#allocation9 + $0x864] ss:$28 sps:$4 sm:$0xff]  }
 0xb61   :  { %9581 = vmatprep.subr.bf16.mxu1 %v12986_v11  ;;  %v13049_v61 = vld [vmem:[#allocation9 + $0x328] ss:$28 sps:$4 sm:$0xff]   ;;  %v13046_v11 = vld [vmem:[#allocation9 + $0x860] ss:$28 sps:$4 sm:$0xff]  }
 0xb63   :  { %9541 = vmatpush1.bf16.msra.mxu0 %v12981_v3  ;;  %v13050_v3 = vld [vmem:[#allocation9 + $0x168] ss:$28 sps:$4 sm:$0xff]  }
 0xb64   :  { %9582 = vmatpush1.bf16.msra.mxu1 %v12984_v23  ;;  %9542 = vmatprep.subr.bf16.mxu0 %v12989_v36  ;;  %v13053_v23 = vld [vmem:[#allocation9 + $0x82c] ss:$28 sps:$4 sm:$0xff]  }
 0xb65   :  { %9583 = vmatprep.subr.bf16.mxu1 %v12992_v49  ;;  %v13054_v36 = vld [vmem:[#allocation9 + $0x2f0] ss:$28 sps:$4 sm:$0xff]   ;;  %v13051_v49 = vld [vmem:[#allocation9 + $0x828] ss:$28 sps:$4 sm:$0xff]  }
 0xb67   :  { %9543 = vmatpush1.bf16.msra.mxu0 %v12987_v56  ;;  %v13055_v56 = vld [vmem:[#allocation9 + $0x130] ss:$28 sps:$4 sm:$0xff]  }
 0xb68   :  { %9584 = vmatpush1.bf16.msra.mxu1 %v12990_v10  ;;  %9544 = vmatprep.subr.bf16.mxu0 %v12995_v50  ;;  %v13058_v10 = vld [vmem:[#allocation9 + $0x7f4] ss:$28 sps:$4 sm:$0xff]  }
 0xb69   :  { %9585 = vmatprep.subr.bf16.mxu1 %v12998_v54  ;;  %v13059_v50 = vld [vmem:[#allocation9 + $0x2b8] ss:$28 sps:$4 sm:$0xff]   ;;  %v13056_v54 = vld [vmem:[#allocation9 + $0x7f0] ss:$28 sps:$4 sm:$0xff]  }
 0xb6b   :  { %9545 = vmatpush2.bf16.msra.mxu0 %v12993_v63  ;;  %v13060_v63 = vld [vmem:[#allocation9 + $0xf8] ss:$28 sps:$4 sm:$0xff]  }
 0xb6c   :  { %9586 = vmatpush2.bf16.msra.mxu1 %v12996_v26  ;;  %9546 = vmatprep.subr.bf16.mxu0 %v13001_v31  ;;  %v13063_v26 = vld [vmem:[#allocation9 + $0x7bc] ss:$28 sps:$4 sm:$0xff]  }
 0xb6d   :  { %9587 = vmatprep.subr.bf16.mxu1 %v13004_v20  ;;  %v13064_v31 = vld [vmem:[#allocation9 + $0x280] ss:$28 sps:$4 sm:$0xff]  }
 0xb6e   :  { %v13068_v20 = vld [vmem:[#allocation9 + $0x784] ss:$28 sps:$4 sm:$0xff]  }
 0xb6f   :  { %9547 = vmatpush2.bf16.msra.mxu0 %v12999_v41  ;;  %v13069_v41 = vld [vmem:[#allocation9 + $0x248] ss:$28 sps:$4 sm:$0xff]  }
 0xb70   :  { %9588 = vmatpush2.bf16.msra.mxu1 %v13002_v45  ;;  %9548 = vmatprep.subr.bf16.mxu0 %v13007_v62  ;;  %v13066_v45 = vld [vmem:[#allocation9 + $0x780] ss:$28 sps:$4 sm:$0xff]   ;;  %v13070_v62 = vld [vmem:[#allocation9 + $0x88] ss:$28 sps:$4 sm:$0xff]  }
 0xb71   :  { %9589 = vmatprep.subr.bf16.mxu1 %v13010_v55  ;;  %v13073_v55 = vld [vmem:[#allocation9 + $0x74c] ss:$28 sps:$4 sm:$0xff]  }
 0xb73   :  { %9549 = vmatpush2.bf16.msra.mxu0 %v13005_v32  ;;  %v13074_v32 = vld [vmem:[#allocation9 + $0x210] ss:$28 sps:$4 sm:$0xff]  }
 0xb74   :  { %9590 = vmatpush2.bf16.msra.mxu1 %v13008_v21  ;;  %9550 = vmatprep.subr.bf16.mxu0 %v13013_v16  ;;  %v13071_v21 = vld [vmem:[#allocation9 + $0x748] ss:$28 sps:$4 sm:$0xff]   ;;  %v13075_v16 = vld [vmem:[#allocation9 + $0x50] ss:$28 sps:$4 sm:$0xff]  }
 0xb75   :  { %9591 = vmatprep.subr.bf16.mxu1 %v13016_v28  ;;  %v13078_v28 = vld [vmem:[#allocation9 + $0x714] ss:$28 sps:$4 sm:$0xff]  }
 0xb77   :  { %9551 = vmatpush2.bf16.msra.mxu0 %v13011_v24  ;;  %v13079_v24 = vld [vmem:[#allocation9 + $0x1d8] ss:$28 sps:$4 sm:$0xff]  }
 0xb78   :  { %9592 = vmatpush2.bf16.msra.mxu1 %v13014_v27  ;;  %9552 = vmatprep.subr.bf16.mxu0 %v13019_v15  ;;  %v13076_v27 = vld [vmem:[#allocation9 + $0x710] ss:$28 sps:$4 sm:$0xff]   ;;  %v13080_v15 = vld [vmem:[#allocation9 + $0x18] ss:$28 sps:$4 sm:$0xff]  }
 0xb79   :  { %9593 = vmatprep.subr.bf16.mxu1 %v13022_v60  ;;  %v13081_v60 = vld [vmem:[#allocation9 + $0x6e0] ss:$28 sps:$4 sm:$0xff]  }
 0xb7b   :  { %9553 = vmatpush2.bf16.msra.mxu0 %v13017_v1  ;;  %v13082_v1 = vld [vmem:[#allocation9 + $0x520] ss:$28 sps:$4 sm:$0xff]  }
 0xb7c   :  { %9594 = vmatpush2.bf16.msra.mxu1 %v13020_v53  ;;  %9554 = vmatprep.subr.bf16.mxu0 %v13025_v25  ;;  %v13083_v53 = vld [vmem:[#allocation9 + $0x8a0] ss:$28 sps:$4 sm:$0xff]   ;;  %v13084_v25 = vld [vmem:[#allocation9 + $0x6a8] ss:$28 sps:$4 sm:$0xff]  }
 0xb7d   :  { %9595 = vmatprep.subr.bf16.mxu1 %v13028_v0 }
 0xb7f   :  { %9555 = vmatpush2.bf16.msra.mxu0 %v13023_v58 }
 0xb80   :  { %9596 = vmatpush2.bf16.msra.mxu1 %v13026_v51  ;;  %9556 = vmatprep.subr.bf16.mxu0 %v13031_v38  ;;  %v13085_v38 = vld [vmem:[#allocation9 + $0x4e8] ss:$28 sps:$4 sm:$0xff]  }
 0xb81   :  { %9597 = vmatprep.subr.bf16.mxu1 %v13034_v44  ;;  %v13086_v44 = vld [vmem:[#allocation9 + $0x868] ss:$28 sps:$4 sm:$0xff]  }
 0xb83   :  { %9557 = vmatpush2.bf16.msra.mxu0 %v13029_v33 }
 0xb84   :  { %9598 = vmatpush2.bf16.msra.mxu1 %v13032_v46  ;;  %9558 = vmatprep.subr.bf16.mxu0 %v13037_v48  ;;  %v13087_v48 = vld [vmem:[#allocation9 + $0x670] ss:$28 sps:$4 sm:$0xff]  }
 0xb85   :  { %9599 = vmatprep.subr.bf16.mxu1 %v13040_v13 }
 0xb87   :  { %9559 = vmatpush2.bf16.msra.mxu0 %v13035_v47 }
 0xb88   :  { %9600 = vmatpush2.bf16.msra.mxu1 %v13038_v52  ;;  %9610 = vmatprep.subr.bf16.mxu0 %v13043_v34  ;;  %v13088_v52 = vld [vmem:[#allocation9 + $0x4b0] ss:$28 sps:$4 sm:$0xff]  }
 0xb89   :  { %11463 = vmatprep.subr.bf16.mxu1 %v13044_v22  ;;  %v13089_v34 = vld [vmem:[#allocation9 + $0x830] ss:$28 sps:$4 sm:$0xff]  }
 0xb8a   :  { %9561 = vmatmul.mubr.bf16.vlgmr.msra.gmra.mxu0 %v13950_v57 }
 0xb8b   :  { %9602 = vmatmul.mubr.bf16.vlgmr.msra.gmra.mxu1 %v13954_v37  ;;  %9611 = vmatpush1.bf16.msra.mxu0 %v13041_v59 }
 0xb8c   :  { %11464 = vmatpush3.bf16.msra.mxu1 %v13045_v2  ;;  %9612 = vmatprep.subr.bf16.mxu0 %v13048_v9  ;;  %v13090_v2 = vld [vmem:[#allocation9 + $0x638] ss:$28 sps:$4 sm:$0xff]  }
 0xb8d   :  { %11465 = vmatprep.subr.bf16.mxu1 %v13049_v61  ;;  %9642 = vmatprep.mubr.bf16.mxu0 %v13370_v39  ;;  %v13061_v39 = vld [vmem:[#allocation9 + $0x7b8] ss:$28 sps:$4 sm:$0xff]  }
 0xb8e   :  { %9683 = vmatprep.mubr.bf16.mxu1 %v13952_v4  ;;  %v13065_v4 = vld [vmem:[#allocation9 + $0xc0] ss:$28 sps:$4 sm:$0xff]   ;;  %v13091_v9 = vld [vmem:[#allocation9 + $0x478] ss:$28 sps:$4 sm:$0xff]  }
 0xb8f   :  { %9613 = vmatpush1.bf16.msra.mxu0 %v13046_v11  ;;  %v13092_v61 = vld [vmem:[#allocation9 + $0x7f8] ss:$28 sps:$4 sm:$0xff]   ;;  %v13094_v11 = vld [vmem:[#allocation9 + $0x440] ss:$28 sps:$4 sm:$0xff]  }
 0xb90   :  { %11466 = vmatpush3.bf16.msra.mxu1 %v13050_v3  ;;  %9614 = vmatprep.subr.bf16.mxu0 %v13053_v23  ;;  %v13095_v3 = vld [vmem:[#allocation9 + $0x7c0] ss:$28 sps:$4 sm:$0xff]   ;;  %v13096_v23 = vld [vmem:[#allocation9 + $0x5c8] ss:$28 sps:$4 sm:$0xff]  }
 0xb91   :  { %11467 = vmatprep.subr.bf16.mxu1 %v13054_v36  ;;  %v13097_v36 = vld [vmem:[#allocation9 + $0x408] ss:$28 sps:$4 sm:$0xff]  }
 0xb93   :  { %9615 = vmatpush1.bf16.msra.mxu0 %v13051_v49  ;;  %v13098_v49 = vld [vmem:[#allocation9 + $0x788] ss:$28 sps:$4 sm:$0xff]  }
 0xb94   :  { %11468 = vmatpush3.bf16.msra.mxu1 %v13055_v56  ;;  %9616 = vmatprep.subr.bf16.mxu0 %v13058_v10  ;;  %v13099_v56 = vld [vmem:[#allocation9 + $0x590] ss:$28 sps:$4 sm:$0xff]  }
 0xb95   :  { %11469 = vmatprep.subr.bf16.mxu1 %v13059_v50  ;;  %v13100_v10 = vld [vmem:[#allocation9 + $0x3d0] ss:$28 sps:$4 sm:$0xff]  }
 0xb96   :  { %v13101_v50 = vld [vmem:[#allocation9 + $0x750] ss:$28 sps:$4 sm:$0xff]  }
 0xb97   :  { %9617 = vmatpush1.bf16.msra.mxu0 %v13056_v54  ;;  %v13102_v54 = vld [vmem:[#allocation9 + $0x558] ss:$28 sps:$4 sm:$0xff]  }
 0xb98   :  { %11470 = vmatpush3.bf16.msra.mxu1 %v13060_v63  ;;  %9618 = vmatprep.subr.bf16.mxu0 %v13063_v26  ;;  %v13103_v63 = vld [vmem:[#allocation9 + $0x398] ss:$28 sps:$4 sm:$0xff]  }
 0xb99   :  { %11471 = vmatprep.subr.bf16.mxu1 %v13064_v31  ;;  %v13104_v26 = vld [vmem:[#allocation9 + $0x718] ss:$28 sps:$4 sm:$0xff]  }
 0xb9b   :  { %9619 = vmatpush1.bf16.msra.mxu0 %v13061_v39 }
 0xb9c   :  { %11472 = vmatpush3.bf16.msra.mxu1 %v13065_v4  ;;  %9620 = vmatprep.subr.bf16.mxu0 %v13068_v20 }
 0xb9d   :  { %11473 = vmatprep.subr.bf16.mxu1 %v13069_v41 }
 0xb9f   :  { %9621 = vmatpush1.bf16.msra.mxu0 %v13066_v45 }
 0xba0   :  { %11474 = vmatpush3.bf16.msra.mxu1 %v13070_v62  ;;  %9622 = vmatprep.subr.bf16.mxu0 %v13073_v55 }
 0xba1   :  { %11475 = vmatprep.subr.bf16.mxu1 %v13074_v32 }
 0xba3   :  { %9623 = vmatpush1.bf16.msra.mxu0 %v13071_v21 }
 0xba4   :  { %11476 = vmatpush3.bf16.msra.mxu1 %v13075_v16  ;;  %9624 = vmatprep.subr.bf16.mxu0 %v13078_v28 }
 0xba5   :  { %11477 = vmatprep.subr.bf16.mxu1 %v13079_v24 }
 0xba7   :  { %9625 = vmatpush1.bf16.msra.mxu0 %v13076_v27 }
 0xba8   :  { %11478 = vmatpush3.bf16.msra.mxu1 %v13080_v15  ;;  %11485 = vmatprep.subr.bf16.mxu0 %v13081_v60 }
 0xba9   :  { %11536 = vmatprep.subr.bf16.mxu1 %v13371_v29 }
 0xbaa   :  { %v9316_v0 = vpop.f32.mrf.mxu0  ;;  %9643 = vmatmul.mubr.bf16.vlgmr.msra.gmra.mxu0 %v13967_v8 }
 0xbab   :  { %v9357_v58 = vpop.f32.mrf.mxu1  ;;  %9684 = vmatmul.mubr.bf16.vlgmr.msra.gmra.mxu1 %v13950_v57  ;;  %11486 = vmatpush3.bf16.msra.mxu0 %v13082_v1 }
 0xbac   :  { %v13990_v51 = vadd.f32 %v9357_v58, %v9316_v0  ;;  %11537 = vmatpush3.bf16.msra.mxu1 %v13083_v53  ;;  %v9318_v33 = vpop.f32.mrf.mxu0  ;;  %11487 = vmatprep.subr.bf16.mxu0 %v13084_v25 }
 0xbad   :  { %v9359_v46 = vpop.f32.mrf.mxu1  ;;  %11538 = vmatprep.subr.bf16.mxu1 %v13371_v29  ;;  %9723 = vmatprep.mubr.bf16.mxu0 %v13956_v19  ;;  %v13093_v19 = vld [vmem:[#allocation9 + $0x600] ss:$28 sps:$4 sm:$0xff]  }
 0xbae   :  { %v9360_v13 = vadd.f32 %v9359_v46, %v9318_v33  ;;  %11552 = vmatprep.mubr.msk.bf16.mxu1 %vm13372_vm0, %v13371_v29  ;;  %v9320_v47 = vpop.f32.mrf.mxu0  ;;  %vm9909_vm0 = vcmask 1041408  }
 0xbaf   :  { %v9361_v57 = vpop.f32.mrf.mxu1  ;;  %11488 = vmatpush3.bf16.msra.mxu0 %v13085_v38 }
 0xbb0   :  { %11539 = vmatpush3.bf16.msra.mxu1 %v13086_v44  ;;  %v9321_v22 = vpop.f32.mrf.mxu0  ;;  %11489 = vmatprep.subr.bf16.mxu0 %v13087_v48 }
 0xbb1   :  { %v9362_v59 = vpop.f32.mrf.mxu1  ;;  %11540 = vmatprep.subr.bf16.mxu1 %v13371_v29 }
 0xbb3   :  { %11490 = vmatpush3.bf16.msra.mxu0 %v13088_v52 }
 0xbb4   :  { %11541 = vmatpush3.bf16.msra.mxu1 %v13089_v34  ;;  %11491 = vmatprep.subr.bf16.mxu0 %v13090_v2 }
 0xbb5   :  { %11542 = vmatprep.subr.bf16.mxu1 %v13371_v29 }
 0xbb7   :  { %11492 = vmatpush3.bf16.msra.mxu0 %v13091_v9 }
 0xbb8   :  { %11543 = vmatpush3.bf16.msra.mxu1 %v13092_v61  ;;  %11493 = vmatprep.subr.bf16.mxu0 %v13093_v19 }
 0xbb9   :  { %11544 = vmatprep.subr.bf16.mxu1 %v13371_v29 }
 0xbbb   :  { %11494 = vmatpush3.bf16.msra.mxu0 %v13094_v11 }
 0xbbc   :  { %11545 = vmatpush3.bf16.msra.mxu1 %v13095_v3  ;;  %11495 = vmatprep.subr.bf16.mxu0 %v13096_v23 }
 0xbbd   :  { %11546 = vmatprep.subr.bf16.mxu1 %v13371_v29 }
 0xbbf   :  { %11496 = vmatpush3.bf16.msra.mxu0 %v13097_v36 }
 0xbc0   :  { %11547 = vmatpush3.bf16.msra.mxu1 %v13098_v49  ;;  %11497 = vmatprep.subr.bf16.mxu0 %v13099_v56 }
 0xbc1   :  { %11548 = vmatprep.subr.bf16.mxu1 %v13371_v29 }
 0xbc3   :  { %11498 = vmatpush3.bf16.msra.mxu0 %v13100_v10 }
 0xbc4   :  { %11549 = vmatpush3.bf16.msra.mxu1 %v13101_v50  ;;  %11499 = vmatprep.subr.bf16.mxu0 %v13102_v54 }
 0xbc5   :  { %11550 = vmatprep.subr.bf16.mxu1 %v13371_v29 }
 0xbc7   :  { %11500 = vmatpush3.bf16.msra.mxu0 %v13103_v63 }
 0xbc8   :  { %11551 = vmatpush3.bf16.msra.mxu1 %v13104_v26 }
 0xbca   :  { %v9398_v31 = vpop.f32.mrf.mxu0  ;;  %9724 = vmatmul.mubr.bf16.vlgmr.msra.gmra.mxu0 %v13954_v37 }
 0xbcb   :  { %11553 = vmatmul.mubr.bf16.vlgmr.msra.gmra.mxu1 %v13967_v8  ;;  %v14005_v39 = vadd.f32 %v9398_v31, %v13990_v51 }
 0xbcc   :  { %v9400_v4 = vpop.f32.mrf.mxu0 }
 0xbcd   :  { %v9771_v20 = vrot.slane %v14005_v39, 4  ;;  %v9820_v41 = vmul.f32 %v14005_v39, %v14005_v39  ;;  %v14010_v45 = vadd.f32 %v9400_v4, %v9360_v13 }
 0xbce   :  { %v9402_v62 = vpop.f32.mrf.mxu0 }
 0xbcf   :  { %v9772_v29 = vadd.f32 %v9771_v20, %v14005_v39  ;;  %v9827_v55 = vrot.slane %v9820_v41, 4  ;;  %v9777_v32 = vrot.slane %v14010_v45, 4  ;;  %v9821_v37 = vmul.f32 %v14010_v45, %v14010_v45 }
 0xbd0   :  { %v9403_v8 = vpop.f32.mrf.mxu0 }
 0xbd1   :  { %v9773_v21 = vrot.slane %v9772_v29, 2  ;;  %v9828_v16 = vadd.f32 %v9827_v55, %v9820_v41  ;;  %v9778_v28 = vadd.f32 %v9777_v32, %v14010_v45  ;;  %v9833_v24 = vrot.slane %v9821_v37, 4 }
 0xbd3   :  { %v9774_v27 = vadd.f32 %v9773_v21, %v9772_v29  ;;  %v9829_v15 = vrot.slane %v9828_v16, 2  ;;  %v9779_v60 = vrot.slane %v9778_v28, 2  ;;  %v9834_v1 = vadd.f32 %v9833_v24, %v9821_v37 }
 0xbd5   :  { %v9775_v53 = vrot.slane %v9774_v27, 1  ;;  %v9830_v25 = vadd.f32 %v9829_v15, %v9828_v16  ;;  %v9780_v0 = vadd.f32 %v9779_v60, %v9778_v28  ;;  %v9835_v58 = vrot.slane %v9834_v1, 2 }
 0xbd7   :  { %v9776_v51 = vadd.f32 %v9775_v53, %v9774_v27  ;;  %v9831_v38 = vrot.slane %v9830_v25, 1  ;;  %v9781_v44 = vrot.slane %v9780_v0, 1  ;;  %v9836_v33 = vadd.f32 %v9835_v58, %v9834_v1 }
 0xbd9   :  { %v14017_v46 = vmul.f32 0.125, %v9776_v51  ;;  %v9832_v48 = vadd.f32 %v9831_v38, %v9830_v25  ;;  %v9782_v13 = vadd.f32 %v9781_v44, %v9780_v0  ;;  %v9837_v47 = vrot.slane %v9836_v33, 1 }
 0xbdb   :  { %v9869_v57 = vmul.f32 0.125, %v9832_v48  ;;  %v9876_v52 = vmul.f32 %v14017_v46, %v14017_v46  ;;  %v14021_v34 = vmul.f32 0.125, %v9782_v13  ;;  %v9838_v22 = vadd.f32 %v9837_v47, %v9836_v33 }
 0xbdd   :  { %v9883_v59 = vsub.f32 %v9869_v57, %v9876_v52  ;;  %v9870_v2 = vmul.f32 0.125, %v9838_v22  ;;  %v9877_v9 = vmul.f32 %v14021_v34, %v14021_v34 }
 0xbdf   :  { %v9890_v61 = vadd.f32 1e-05, %v9883_v59  ;;  %v9884_v19 = vsub.f32 %v9870_v2, %v9877_v9 }
 0xbe1   :  { %v9891_v11 = vadd.f32 1e-05, %v9884_v19  ;;  %13105 = vrsqrt.f32 %v9890_v61 }
 0xbe3   :  { %13107 = vrsqrt.f32 %v9891_v11 }
 0xbeb   :  { %v9439_v3 = vpop.f32.mrf.mxu1 }
 0xbed   :  { %v9441_v23 = vpop.f32.mrf.mxu1 }
 0xbee   :  { %v13106_v49 = vpop.eup %13105 }
 0xbef   :  { %v9443_v36 = vpop.f32.mrf.mxu1 }
 0xbf0   :  { %v13108_v56 = vpop.eup %13107 }
 0xbf1   :  { %v9444_v10 = vpop.f32.mrf.mxu1  ;;  %v9921_v50 = vcombine.low %v13106_v49, %v13108_v56 }
 0xc0a   :  { %v9480_v54 = vpop.f32.mrf.mxu0 }
 0xc0b   :  { %v9521_v63 = vpop.f32.mrf.mxu1  ;;  %v9481_v26 = vadd.f32 %v9480_v54, %v9439_v3 }
 0xc0c   :  { %v9482_v31 = vpop.f32.mrf.mxu0 }
 0xc0d   :  { %v9523_v4 = vpop.f32.mrf.mxu1  ;;  %v14025_v20 = vadd.f32 %v9521_v63, %v9481_v26  ;;  %v9483_v41 = vadd.f32 %v9482_v31, %v9441_v23  ;;  %v9906_v31 = vrot.slane %v13455_v5, 6 }
 0xc0e   :  { %v9484_v62 = vpop.f32.mrf.mxu0 }
 0xc0f   :  { %v9525_v29 = vpop.f32.mrf.mxu1  ;;  %v9783_v55 = vrot.slane %v14025_v20, 4  ;;  %v9822_v32 = vmul.f32 %v14025_v20, %v14025_v20  ;;  %v14030_v37 = vadd.f32 %v9523_v4, %v9483_v41  ;;  %v9907_v4 = vrot.slane %v13460_v6, 6 }
 0xc10   :  { %v9485_v8 = vpop.f32.mrf.mxu0  ;;  %v9929_v62 = vrot.slane %v9921_v50, %v13601_v35 }
 0xc11   :  { %v9526_v21 = vpop.f32.mrf.mxu1  ;;  %v9784_v16 = vadd.f32 %v9783_v55, %v14025_v20  ;;  %v9839_v28 = vrot.slane %v9822_v32, 4  ;;  %v9789_v24 = vrot.slane %v14030_v37, 4  ;;  %v9823_v27 = vmul.f32 %v14030_v37, %v14030_v37 }
 0xc12   :  { %v9910_v55 = vsel %vm9909_vm0, %v9906_v31, %v9907_v4 }
 0xc13   :  { %v9785_v15 = vrot.slane %v9784_v16, 2  ;;  %v9840_v60 = vadd.f32 %v9839_v28, %v9822_v32  ;;  %v9790_v1 = vadd.f32 %v9789_v24, %v14030_v37  ;;  %v9845_v53 = vrot.slane %v9823_v27, 4 }
 0xc15   :  { %v9786_v25 = vadd.f32 %v9785_v15, %v9784_v16  ;;  %v9841_v0 = vrot.slane %v9840_v60, 2  ;;  %v9791_v58 = vrot.slane %v9790_v1, 2  ;;  %v9846_v51 = vadd.f32 %v9845_v53, %v9823_v27 }
 0xc17   :  { %v9787_v38 = vrot.slane %v9786_v25, 1  ;;  %v9842_v44 = vadd.f32 %v9841_v0, %v9840_v60  ;;  %v9792_v33 = vadd.f32 %v9791_v58, %v9790_v1  ;;  %v9847_v48 = vrot.slane %v9846_v51, 2 }
 0xc19   :  { %v9788_v13 = vadd.f32 %v9787_v38, %v9786_v25  ;;  %v9843_v47 = vrot.slane %v9842_v44, 1  ;;  %v9793_v57 = vrot.slane %v9792_v33, 1  ;;  %v9848_v52 = vadd.f32 %v9847_v48, %v9846_v51 }
 0xc1b   :  { %v9815_v22 = vmul.f32 0.125, %v9788_v13  ;;  %v9844_v59 = vadd.f32 %v9843_v47, %v9842_v44  ;;  %v9794_v2 = vadd.f32 %v9793_v57, %v9792_v33  ;;  %v9849_v9 = vrot.slane %v9848_v52, 1 }
 0xc1d   :  { %v9871_v61 = vmul.f32 0.125, %v9844_v59  ;;  %v9878_v19 = vmul.f32 %v9815_v22, %v9815_v22  ;;  %v9816_v11 = vmul.f32 0.125, %v9794_v2  ;;  %v9850_v3 = vadd.f32 %v9849_v9, %v9848_v52 }
 0xc1f   :  { %v9885_v23 = vsub.f32 %v9871_v61, %v9878_v19  ;;  %v9872_v36 = vmul.f32 0.125, %v9850_v3  ;;  %v9879_v49 = vmul.f32 %v9816_v11, %v9816_v11 }
 0xc21   :  { %v9892_v56 = vadd.f32 1e-05, %v9885_v23  ;;  %v9886_v10 = vsub.f32 %v9872_v36, %v9879_v49 }
 0xc23   :  { %v9893_v54 = vadd.f32 1e-05, %v9886_v10  ;;  %13109 = vrsqrt.f32 %v9892_v56 }
 0xc25   :  { %13111 = vrsqrt.f32 %v9893_v54 }
 0xc30   :  { %v13110_v63 = vpop.eup %13109 }
 0xc32   :  { %v13112_v26 = vpop.eup %13111 }
 0xc33   :  { %v9922_v41 = vcombine.low %v13110_v63, %v13112_v26 }
 0xc35   :  { %v9936_v29 = vrot.slane %v9922_v41, %v13601_v35 }
 0xc37   :  { %v9937_v32 = vcombine.low %v9929_v62, %v9936_v29 }
 0xc39   :  { %v9956_v8 = vmul.f32 %v9937_v32, %v9910_v55 }
 0xc3b   :  { %v9963_v21 = vrot.slane %v9956_v8, %v13608_v40  ;;  %v9967_v16 = vrot.slane %v9956_v8, %v13610_v30  ;;  %v9971_v5 = vrot.slane %v9956_v8, %v13612_v42  ;;  %v9975_v28 = vrot.slane %v9956_v8, %v13614_v43 }
 0xc3d   :  { %v9995_v24 = vmul.f32 %v9963_v21, %v14017_v46  ;;  %v9996_v50 = vmul.f32 %v9967_v16, %v14021_v34  ;;  %v9997_v27 = vmul.f32 %v9971_v5, %v9815_v22  ;;  %v9998_v15 = vmul.f32 %v9975_v28, %v9816_v11 }
 0xc3e   :  { %v10051_v60 = vrot.slane %v9963_v21, %v13608_v40  ;;  %v10055_v1 = vrot.slane %v9967_v16, %v13608_v40  ;;  %v10063_v34 = vrot.slane %v9975_v28, %v13608_v40  ;;  %v10059_v33 = vrot.slane %v9971_v5, %v13608_v40 }
 0xc3f   :  { %v10009_v53 = vcombine.low %v9995_v24, %v9996_v50  ;;  %v10010_v25 = vcombine.low %v9997_v27, %v9998_v15 }
 0xc40   :  { %v10076_v0 = vmul.f32 %v10051_v60, %v14005_v39  ;;  %v10077_v58 = vmul.f32 %v10055_v1, %v14010_v45  ;;  %v10079_v45 = vmul.f32 %v10063_v34, %v14030_v37  ;;  %v10078_v61 = vmul.f32 %v10059_v33, %v14025_v20 }
 0xc41   :  { %v10017_v51 = vrot.slane %v10009_v53, %v13601_v35  ;;  %v10024_v43 = vrot.slane %v10010_v25, %v13601_v35 }
 0xc43   :  { %v10025_v38 = vcombine.low %v10017_v51, %v10024_v43 }
 0xc45   :  { %v10042_v46 = vrot.slane %v10025_v38, 7 }
 0xc47   :  { %v10046_v44 = vsub.f32 %v9910_v55, %v10042_v46 }
 0xc49   :  { %v10100_v48 = vrot.slane %v10046_v44, %v13639_v18  ;;  %v10088_v13 = vrot.slane %v10046_v44, %v13633_v12  ;;  %v10092_v47 = vrot.slane %v10046_v44, %v13635_v14  ;;  %v10096_v39 = vrot.slane %v10046_v44, %v13637_v17 }
 0xc4a   :  { %v9562_v57 = vpop.f32.mrf.mxu0 }
 0xc4b   :  { %v9603_v52 = vpop.f32.mrf.mxu1  ;;  %v10135_v22 = vrot.slane %v10100_v48, %v13633_v12  ;;  %v10123_v2 = vrot.slane %v10088_v13, %v13633_v12  ;;  %v10127_v9 = vrot.slane %v10092_v47, %v13633_v12  ;;  %v10131_v11 = vrot.slane %v10096_v39, %v13633_v12 }
 0xc4c   :  { %v9604_v59 = vadd.f32 %v9603_v52, %v9562_v57  ;;  %v9564_v18 = vpop.f32.mrf.mxu0 }
 0xc4d   :  { %v9605_v19 = vpop.f32.mrf.mxu1  ;;  %v10151_v3 = vadd.f32 %v10135_v22, %v10079_v45  ;;  %v10148_v36 = vadd.f32 %v10123_v2, %v10076_v0  ;;  %v10149_v49 = vadd.f32 %v10127_v9, %v10077_v58  ;;  %v10150_v10 = vadd.f32 %v10131_v11, %v10078_v61 }
 0xc4e   :  { %v9606_v23 = vadd.f32 %v9605_v19, %v9564_v18  ;;  %v9566_v37 = vpop.f32.mrf.mxu0 }
 0xc4f   :  { %v9607_v56 = vpop.f32.mrf.mxu1  ;;  %vm10158_vm11 = vcmp.ge.f32.partialorder %v10151_v3, 0.0  ;;  %v10165_v54 = vmul.f32 0.01, %v10151_v3  ;;  %vm10155_vm12 = vcmp.ge.f32.partialorder %v10148_v36, 0.0  ;;  %vm10156_vm13 = vcmp.ge.f32.partialorder %v10149_v49, 0.0 }
 0xc50   :  { %v9567_v63 = vpop.f32.mrf.mxu0  ;;  %vm10157_vm14 = vcmp.ge.f32.partialorder %v10150_v10, 0.0  ;;  %v10162_v31 = vmul.f32 0.01, %v10148_v36  ;;  %v10163_v20 = vmul.f32 0.01, %v10149_v49 }
 0xc51   :  { %v9608_v26 = vpop.f32.mrf.mxu1  ;;  %v10172_v41 = vsel %vm10158_vm11, %v10151_v3, %v10165_v54  ;;  %v10164_v62 = vmul.f32 0.01, %v10150_v10 }
 0xc52   :  { %10179 = vst [vmem:[#allocation14 + $0x18] sm:$0xff] %v10172_v41  ;;  %v10169_v29 = vsel %vm10155_vm12, %v10148_v36, %v10162_v31  ;;  %v10170_v55 = vsel %vm10156_vm13, %v10149_v49, %v10163_v20 }
 0xc53   :  { %v10171_v32 = vsel %vm10157_vm14, %v10150_v10, %v10164_v62  ;;  %10176 = vst [vmem:[#allocation14] sm:$0xff] %v10169_v29  ;;  %10177 = vst [vmem:[#allocation14 + $0x8] sm:$0xff] %v10170_v55 }
 0xc54   :  { %10178 = vst [vmem:[#allocation14 + $0x10] sm:$0xff] %v10171_v32 }
 0xc55   :  { %13310 = shalt.err (!%p13307_p7)
}
 0xc56   :  { %10202 = dma.vmem_to_hbm [thread:$0]  %s10200_s9, 128, %s14119_s11, [#allocation16]  }
 0xc57   :  { %s13375_s11 = smov [#allocation14]  }
 0xc58   :  { %s10189_s23 = sshll.u32 %s13375_s11, 4  ;;  %s10190_s23 = int_to_ptr.vmem [resolvable:$true] %s10189_s23 }
 0xc59   :  { %s13319_s24 = scalar_lea.vmem %s10190_s23, 896  ;;  %p13324_p9 = scmp.lt.s32.totalorder %s10190_s23, %s10190_s23 }
 0xc5a   :  { %p13320_p8 = scmp.ne.s32.totalorder %s10190_s23, %s13319_s24  ;;  %p13325_p10 = scmp.lt.s32.totalorder %s13319_s24, %s13319_s24 }
 0xc5c   :  { %p13326_p11 = por %p13325_p10, %p13324_p9 }
 0xc5e   :  { %p13327_p12 = pnand %p13326_p11, %p13320_p8 }
 0xc6a   :  { %v9644_v8 = vpop.f32.mrf.mxu0 }
 0xc6b   :  { %v11479_v21 = vpop.f32.mrf.mxu1  ;;  %v14071_v16 = vadd.f32 %v9644_v8, %v9604_v59 }
 0xc6c   :  { %v9646_v5 = vpop.f32.mrf.mxu0 }
 0xc6d   :  { %v11480_v28 = vpop.f32.mrf.mxu1  ;;  %v9795_v24 = vrot.slane %v14071_v16, 4  ;;  %v9824_v50 = vmul.f32 %v14071_v16, %v14071_v16  ;;  %v14076_v27 = vadd.f32 %v9646_v5, %v9606_v23 }
 0xc6e   :  { %v9648_v15 = vpop.f32.mrf.mxu0  ;;  %v11481_v62 = vadd.f32 %v11480_v28, %v11479_v21 }
 0xc6f   :  { %v11482_v60 = vpop.f32.mrf.mxu1  ;;  %v9796_v1 = vadd.f32 %v9795_v24, %v14071_v16  ;;  %v9851_v53 = vrot.slane %v9824_v50, 4  ;;  %v9801_v25 = vrot.slane %v14076_v27, 4  ;;  %v9825_v0 = vmul.f32 %v14076_v27, %v14076_v27 }
 0xc70   :  { %v9649_v58 = vpop.f32.mrf.mxu0 }
 0xc71   :  { %v11483_v51 = vpop.f32.mrf.mxu1  ;;  %v9797_v43 = vrot.slane %v9796_v1, 2  ;;  %v9852_v38 = vadd.f32 %v9851_v53, %v9824_v50  ;;  %v9802_v46 = vadd.f32 %v9801_v25, %v14076_v27  ;;  %v9857_v34 = vrot.slane %v9825_v0, 4 }
 0xc73   :  { %v9798_v44 = vadd.f32 %v9797_v43, %v9796_v1  ;;  %v9853_v33 = vrot.slane %v9852_v38, 2  ;;  %v9803_v48 = vrot.slane %v9802_v46, 2  ;;  %v9858_v13 = vadd.f32 %v9857_v34, %v9825_v0 }
 0xc75   :  { %v9799_v47 = vrot.slane %v9798_v44, 1  ;;  %v9854_v39 = vadd.f32 %v9853_v33, %v9852_v38  ;;  %v9804_v45 = vadd.f32 %v9803_v48, %v9802_v46  ;;  %v9859_v57 = vrot.slane %v9858_v13, 2 }
 0xc77   :  { %v9800_v52 = vadd.f32 %v9799_v47, %v9798_v44  ;;  %v9855_v22 = vrot.slane %v9854_v39, 1  ;;  %v9805_v59 = vrot.slane %v9804_v45, 1  ;;  %v9860_v2 = vadd.f32 %v9859_v57, %v9858_v13 }
 0xc78   :  { %v9908_v57 = vrot.slane %v13462_v7, 6 }
 0xc79   :  { %v9817_v9 = vmul.f32 0.125, %v9800_v52  ;;  %v9856_v61 = vadd.f32 %v9855_v22, %v9854_v39  ;;  %v9806_v18 = vadd.f32 %v9805_v59, %v9804_v45  ;;  %v9861_v19 = vrot.slane %v9860_v2, 1 }
 0xc7b   :  { %v9873_v11 = vmul.f32 0.125, %v9856_v61  ;;  %v9880_v3 = vmul.f32 %v9817_v9, %v9817_v9  ;;  %v9818_v23 = vmul.f32 0.125, %v9806_v18  ;;  %v9862_v36 = vadd.f32 %v9861_v19, %v9860_v2 }
 0xc7c   :  { %v9911_v2 = vsel %vm9909_vm0, %v9907_v4, %v9908_v57 }
 0xc7d   :  { %v9887_v49 = vsub.f32 %v9873_v11, %v9880_v3  ;;  %v9874_v37 = vmul.f32 0.125, %v9862_v36  ;;  %v9881_v56 = vmul.f32 %v9818_v23, %v9818_v23 }
 0xc7f   :  { %v9894_v10 = vadd.f32 1e-05, %v9887_v49  ;;  %v9888_v54 = vsub.f32 %v9874_v37, %v9881_v56 }
 0xc81   :  { %v9895_v63 = vadd.f32 1e-05, %v9888_v54  ;;  %13113 = vrsqrt.f32 %v9894_v10 }
 0xc83   :  { %13115 = vrsqrt.f32 %v9895_v63 }
 0xc8a   :  { %v11501_v26 = vpop.f32.mrf.mxu0 }
 0xc8b   :  { %v9765_v31 = vpop.f32.mrf.mxu1 }
 0xc8c   :  { %v11502_v20 = vpop.f32.mrf.mxu0 }
 0xc8d   :  { %v11554_v41 = vpop.f32.mrf.mxu1  ;;  %v11503_v29 = vadd.f32 %v11502_v20, %v11501_v26 }
 0xc8e   :  { %v11504_v55 = vpop.f32.mrf.mxu0  ;;  %v13114_v8 = vpop.eup %13113 }
 0xc8f   :  { %v9768_v32 = vpop.f32.mrf.mxu1  ;;  %v9726_v5 = vadd.f32 %v11503_v29, %v11481_v62 }
 0xc90   :  { %v13116_v24 = vpop.eup %13115  ;;  %v11505_v50 = vpop.f32.mrf.mxu0 }
 0xc91   :  { %v11555_v15 = vpop.f32.mrf.mxu1  ;;  %v9766_v60 = vadd.f32 %v9765_v31, %v9726_v5  ;;  %v9938_v1 = vcombine.low %v13114_v8, %v13116_v24 }
 0xc93   :  { %v9807_v53 = vrot.slane %v9766_v60, 4  ;;  %v9826_v25 = vmul.f32 %v9766_v60, %v9766_v60  ;;  %v9945_v22 = vrot.slane %v9938_v1, %v13601_v35 }
 0xc95   :  { %v9808_v0 = vadd.f32 %v9807_v53, %v9766_v60  ;;  %v9863_v58 = vrot.slane %v9826_v25, 4 }
 0xc97   :  { %v9809_v51 = vrot.slane %v9808_v0, 2  ;;  %v9864_v43 = vadd.f32 %v9863_v58, %v9826_v25 }
 0xc99   :  { %v9810_v38 = vadd.f32 %v9809_v51, %v9808_v0  ;;  %v9865_v46 = vrot.slane %v9864_v43, 2 }
 0xc9b   :  { %v9811_v34 = vrot.slane %v9810_v38, 1  ;;  %v9866_v21 = vadd.f32 %v9865_v46, %v9864_v43 }
 0xc9d   :  { %v9812_v28 = vadd.f32 %v9811_v34, %v9810_v38  ;;  %v9867_v44 = vrot.slane %v9866_v21, 1 }
 0xc9f   :  { %v9819_v33 = vmul.f32 0.125, %v9812_v28  ;;  %v9868_v48 = vadd.f32 %v9867_v44, %v9866_v21 }
 0xca1   :  { %v9875_v13 = vmul.f32 0.125, %v9868_v48  ;;  %v9882_v47 = vmul.f32 %v9819_v33, %v9819_v33 }
 0xca3   :  { %v9889_v39 = vsub.f32 %v9875_v13, %v9882_v47 }
 0xca5   :  { %v9896_v45 = vadd.f32 1e-05, %v9889_v39 }
 0xca7   :  { %13117 = vrsqrt.f32 %v9896_v45 }
 0xcb4   :  { %v13118_v52 = vpop.eup %13117 }
 0xcb5   :  { %v9952_v59 = vrot.slane %v13118_v52, %v13601_v35 }
 0xcb7   :  { %v9953_v61 = vcombine.low %v9945_v22, %v9952_v59 }
 0xcb9   :  { %v9957_v18 = vmul.f32 %v9953_v61, %v9911_v2 }
 0xcbb   :  { %v9979_v19 = vrot.slane %v9957_v18, %v13608_v40  ;;  %v9983_v11 = vrot.slane %v9957_v18, %v13610_v30  ;;  %v9987_v3 = vrot.slane %v9957_v18, %v13612_v42 }
 0xcbd   :  { %v9999_v36 = vmul.f32 %v9979_v19, %v9817_v9  ;;  %v10000_v49 = vmul.f32 %v9983_v11, %v9818_v23  ;;  %v10001_v7 = vmul.f32 %v9987_v3, %v9819_v33  ;;  %v10067_v37 = vrot.slane %v9979_v19, %v13608_v40 }
 0xcbe   :  { %v10071_v56 = vrot.slane %v9983_v11, %v13608_v40  ;;  %v10075_v42 = vrot.slane %v9987_v3, %v13608_v40 }
 0xcbf   :  { %v10026_v10 = vcombine.low %v9999_v36, %v10000_v49  ;;  %v10080_v6 = vmul.f32 %v10067_v37, %v14071_v16  ;;  %v10040_v63 = vrot.slane %v10001_v7, %v13601_v35 }
 0xcc0   :  { %v10081_v4 = vmul.f32 %v10071_v56, %v14076_v27  ;;  %v10082_v41 = vmul.f32 %v10075_v42, %v9766_v60 }
 0xcc1   :  { %v10033_v54 = vrot.slane %v10026_v10, %v13601_v35 }
 0xcc3   :  { %v10041_v26 = vcombine.low %v10033_v54, %v10040_v63 }
 0xcc5   :  { %v10043_v30 = vrot.slane %v10041_v26, 7 }
 0xcc7   :  { %v10047_v31 = vsub.f32 %v9911_v2, %v10043_v30 }
 0xcc9   :  { %v10104_v9 = vrot.slane %v10047_v31, %v13633_v12  ;;  %v10108_v23 = vrot.slane %v10047_v31, %v13635_v14  ;;  %v10112_v20 = vrot.slane %v10047_v31, %v13637_v17 }
 0xccb   :  { %v10139_v16 = vrot.slane %v10104_v9, %v13633_v12  ;;  %v10143_v27 = vrot.slane %v10108_v23, %v13633_v12  ;;  %v10147_v62 = vrot.slane %v10112_v20, %v13633_v12 }
 0xccd   :  { %v10154_v29 = vadd.f32 %v10147_v62, %v10082_v41  ;;  %v10152_v35 = vadd.f32 %v10139_v16, %v10080_v6  ;;  %v10153_v55 = vadd.f32 %v10143_v27, %v10081_v4 }
 0xccf   :  { %vm10161_vm15 = vcmp.ge.f32.partialorder %v10154_v29, 0.0  ;;  %v10168_v40 = vmul.f32 0.01, %v10154_v29  ;;  %vm10159_vm1 = vcmp.ge.f32.partialorder %v10152_v35, 0.0  ;;  %vm10160_vm2 = vcmp.ge.f32.partialorder %v10153_v55, 0.0 }
 0xcd0   :  { %v10166_v32 = vmul.f32 0.01, %v10152_v35  ;;  %v10167_v14 = vmul.f32 0.01, %v10153_v55 }
 0xcd1   :  { %v10175_v8 = vsel %vm10161_vm15, %v10154_v29, %v10168_v40 }
 0xcd2   :  { %10182 = vst [vmem:[#allocation14 + $0x30] sm:$0xff] %v10175_v8  ;;  %v10173_v17 = vsel %vm10159_vm1, %v10152_v35, %v10166_v32  ;;  %v10174_v5 = vsel %vm10160_vm2, %v10153_v55, %v10167_v14 }
 0xcd3   :  { %10180 = vst [vmem:[#allocation14 + $0x20] sm:$0xff] %v10173_v17  ;;  %10181 = vst [vmem:[#allocation14 + $0x28] sm:$0xff] %v10174_v5 }
 0xcd4   :  { %13330 = shalt.err (!%p13327_p12)
}
 0xcd5   :  { %10192 = dma.vmem_to_hbm [thread:$0]  %s10190_s23, 896, %s14118_s10, [#allocation13]  }
 0xcd6   :  { %13357 = dma.done.wait [#allocation13], 896  }
 0xcd7   :  { %13358 = vsyncadd [#allocation13], 4294966400 }
 0xcd8   :  { %13359 = dma.done.wait [#allocation16], 128  }
 0xcd9   :  { %13360 = vsyncadd [#allocation16], 4294967168 }
 0xcda   :  { %10209 = vsyncpa [#allocation12], 1 }
 0xcdb   :  { %10210 = vsyncpa [#allocation13], 1 }
 0xcdc   :  { %10211 = vsyncpa [#allocation16], 1 }
 0xcdd   :  { %10212 = vsyncmov [#allocation10] }
 0xce0   :  { %s10213_s27 = vpop.sfrf %10212 }
 0xce1   :  { %p11314_p13 = scmp.ne.s32.totalorder %s10213_s27, 0 }
 0xce3   :  { %10217 = shalt.err (%p11314_p13)  }
 0xce4   :  { %10219 = vsyncmov [#allocation10 + $0x1] }
 0xce7   :  { %s10220_s28 = vpop.sfrf %10219 }
 0xce8   :  { %p11315_p0 = scmp.ne.s32.totalorder %s10220_s28, 0 }
 0xcea   :  { %10224 = shalt.err (%p11315_p0)  }
 0xceb   :  { %10226 = vsyncmov [#allocation10 + $0x2] }
 0xcee   :  { %s10227_s1 = vpop.sfrf %10226 }
 0xcef   :  { %p11316_p1 = scmp.ne.s32.totalorder %s10227_s1, 0 }
 0xcf1   :  { %10231 = shalt.err (%p11316_p1)  }
 0xcf2   :  { %10233 = vsyncmov [#allocation10 + $0x3] }
 0xcf5   :  { %s10234_s10 = vpop.sfrf %10233 }
 0xcf6   :  { %p11317_p2 = scmp.ne.s32.totalorder %s10234_s10, 0 }
 0xcf8   :  { %10238 = shalt.err (%p11317_p2)  }
 0xcf9   :  { %10240 = vsyncmov [#allocation10 + $0x4] }
 0xcfc   :  { %s10241_s29 = vpop.sfrf %10240 }
 0xcfd   :  { %p11318_p3 = scmp.ne.s32.totalorder %s10241_s29, 0 }
 0xcff   :  { %10245 = shalt.err (%p11318_p3)  }
 0xd00   :  { %10247 = vsyncmov [#allocation10 + $0x5] }
 0xd03   :  { %s10248_s5 = vpop.sfrf %10247 }
 0xd04   :  { %p11319_p4 = scmp.ne.s32.totalorder %s10248_s5, 0 }
 0xd06   :  { %10252 = shalt.err (%p11319_p4)  }
 0xd07   :  { %10254 = vsyncmov [#allocation10 + $0x6] }
 0xd0a   :  { %s10255_s30 = vpop.sfrf %10254 }
 0xd0b   :  { %p11320_p5 = scmp.ne.s32.totalorder %s10255_s30, 0 }
 0xd0d   :  { %10259 = shalt.err (%p11320_p5)  }
 0xd0e   :  { %10261 = vsyncmov [#allocation10 + $0x7] }
 0xd11   :  { %s10262_s12 = vpop.sfrf %10261 }
 0xd12   :  { %p11321_p6 = scmp.ne.s32.totalorder %s10262_s12, 0 }
 0xd14   :  { %10266 = shalt.err (%p11321_p6)  }

</bundles_post_ra>
